<compile_context>
chip_gen: v7x
topology: tpu7x:2x2x1
jax: 0.10.0
libtpu: 0.0.40
codegen_flags: <defaults>
</compile_context>

<pallas_src>
import functools

import jax
import jax.numpy as jnp
from jax.experimental import pallas as pl
from jax.experimental.pallas import tpu as pltpu

_BN_EPS = 1e-5
_LN_EPS = 1e-5
_LEAKY_SLOPE = 0.01
_VMEM_LIMIT = 48 * 1024 * 1024


def _round_up(x, m):
    return (x + m - 1) // m * m


# ---------------------------------------------------------------------------
# Pallas kernels
# ---------------------------------------------------------------------------
def _conv_kernel(x_ref, w_ref, shift_ref, o_ref, *, taps, mrows, res_off, slope):
    """Stride-1 conv as a sum of shifted sub-matmuls + folded-BN shift + LeakyReLU.

    x_ref:     (1, R, Cin)        flattened (row-major) padded image, bf16.
    w_ref:     (ntaps, Cin, Cout) BN-scale-folded weights, bf16 (resident).
    shift_ref: (1, Cout)          folded BN shift, f32.
    o_ref:     (1, mrows, Cout)   output rows on the padded-width grid, bf16.
    """
    xv = x_ref[0]                                    # (R, Cin) in VMEM
    acc = None
    for t, off in enumerate(taps):                   # static unroll: kh*kw taps
        part = jnp.dot(xv[off:off + mrows, :], w_ref[t],
                       preferred_element_type=jnp.float32)
        acc = part if acc is None else acc + part
    y = acc + shift_ref[...]                         # folded BatchNorm (eval)
    y = jnp.where(y > 0, y, slope * y)               # LeakyReLU
    if res_off is not None:                          # residual straight from VMEM tile
        y = y + xv[res_off:res_off + mrows, :].astype(jnp.float32)
    o_ref[0] = y.astype(o_ref.dtype)


def _conv_pallas(x_flat, w3, shift, *, taps, mrows, res_off):
    """x_flat: (N, R, Cin) bf16; w3: (ntaps, Cin, Cout) bf16; shift: (1, Cout) f32."""
    N, R, cin = x_flat.shape
    ntaps, _, cout = w3.shape
    assert max(taps) + mrows <= R
    kernel = functools.partial(_conv_kernel, taps=taps, mrows=mrows,
                               res_off=res_off, slope=_LEAKY_SLOPE)
    return pl.pallas_call(
        kernel,
        out_shape=jax.ShapeDtypeStruct((N, mrows, cout), jnp.bfloat16),
        grid_spec=pltpu.PrefetchScalarGridSpec(
            num_scalar_prefetch=0,
            grid=(N,),
            in_specs=[
                pl.BlockSpec((1, R, cin), lambda n: (n, 0, 0)),         # image tile
                pl.BlockSpec((ntaps, cin, cout), lambda n: (0, 0, 0)),  # resident W
                pl.BlockSpec((1, cout), lambda n: (0, 0)),              # BN shift
            ],
            out_specs=pl.BlockSpec((1, mrows, cout), lambda n: (n, 0, 0)),
        ),
        compiler_params=pltpu.CompilerParams(
            dimension_semantics=("parallel",),
            vmem_limit_bytes=_VMEM_LIMIT,
        ),
    )(x_flat, w3, shift)


def _linear_ln_kernel(x_ref, w_ref, g_ref, b_ref, o_ref, acc_ref, *, eps):
    k = pl.program_id(1)

    @pl.when(k == 0)
    def _():
        acc_ref[...] = jnp.zeros_like(acc_ref)

    acc_ref[...] += jnp.dot(x_ref[...], w_ref[...],
                            preferred_element_type=jnp.float32)

    @pl.when(k == pl.num_programs(1) - 1)
    def _():
        y = acc_ref[...]
        mean = jnp.mean(y, axis=-1, keepdims=True)
        var = jnp.mean(jnp.square(y - mean), axis=-1, keepdims=True)
        yn = (y - mean) * jax.lax.rsqrt(var + eps)
        o_ref[...] = (yn * g_ref[...] + b_ref[...]).astype(o_ref.dtype)


def linear_layernorm_pallas(x, w, gamma, beta):
    """Fused Linear(bias=False) + LayerNorm, tiled over batch rows and K."""
    B, F = x.shape
    D = w.shape[1]
    x = x.astype(jnp.bfloat16)
    w = w.astype(jnp.bfloat16)

    TB = B if B <= 256 else 256
    Bp = _round_up(B, TB)
    TF = F if F <= 4096 else 2048
    Fp = _round_up(F, TF)
    if Bp != B or Fp != F:
        x = jnp.pad(x, ((0, Bp - B), (0, Fp - F)))
    if Fp != F:
        w = jnp.pad(w, ((0, Fp - F), (0, 0)))

    grid = (Bp // TB, Fp // TF)
    out = pl.pallas_call(
        functools.partial(_linear_ln_kernel, eps=_LN_EPS),
        out_shape=jax.ShapeDtypeStruct((Bp, D), jnp.float32),
        grid_spec=pltpu.PrefetchScalarGridSpec(
            num_scalar_prefetch=0,
            grid=grid,
            in_specs=[
                pl.BlockSpec((TB, TF), lambda i, k: (i, k)),
                pl.BlockSpec((TF, D), lambda i, k: (k, 0)),
                pl.BlockSpec((1, D), lambda i, k: (0, 0)),
                pl.BlockSpec((1, D), lambda i, k: (0, 0)),
            ],
            out_specs=pl.BlockSpec((TB, D), lambda i, k: (i, 0)),
            scratch_shapes=[pltpu.VMEM((TB, D), jnp.float32)],
        ),
        compiler_params=pltpu.CompilerParams(
            dimension_semantics=("parallel", "arbitrary"),
            vmem_limit_bytes=_VMEM_LIMIT,
        ),
    )(x, w,
      gamma.reshape(1, -1).astype(jnp.float32),
      beta.reshape(1, -1).astype(jnp.float32))
    return out[:B]


# ---------------------------------------------------------------------------
# JAX wrappers: layout prep (pad / flatten / space-to-depth) + BN folding
# ---------------------------------------------------------------------------
def _fold_bn(bn):
    gamma, beta, mean, var = bn
    scale = gamma * jax.lax.rsqrt(var + _BN_EPS)
    shift = (beta - mean * scale).astype(jnp.float32).reshape(1, -1)
    return scale, shift


def conv3x3_block(x, p, residual):
    """Conv2d(3x3, stride 1, pad 1, bias=False) + BN(eval) + LeakyReLU (+ residual)."""
    N, H, W, Cin = x.shape
    w_t = p["w"]                                   # (Cout, Cin, 3, 3) torch layout
    Cout = w_t.shape[0]
    scale, shift = _fold_bn(p["bn"])
    w = jnp.transpose(w_t, (2, 3, 1, 0)) * scale   # (3,3,Cin,Cout), BN scale folded
    w3 = w.reshape(9, Cin, Cout).astype(jnp.bfloat16)

    pad, kh, kw = 1, 3, 3
    Hp, Wp = H + 2 * pad, W + 2 * pad
    Ho, Wo = H, W
    xp = jnp.pad(x, ((0, 0), (pad, pad), (pad, pad), (0, 0)))
    R = _round_up(Hp * Wp + kw - 1, 8)
    xf = jnp.pad(xp.reshape(N, Hp * Wp, Cin), ((0, 0), (0, R - Hp * Wp), (0, 0)))

    taps = tuple(di * Wp + dj for di in range(kh) for dj in range(kw))
    mrows = Ho * Wp                                # padded-width output rows
    if residual:
        assert Cin == Cout, "residual add requires Cin == Cout"
        res_off = pad * Wp + pad
    else:
        res_off = None

    out = _conv_pallas(xf, w3, shift, taps=taps, mrows=mrows, res_off=res_off)
    return out.reshape(N, Ho, Wp, Cout)[:, :, :Wo, :]


def reduce_conv_block(x, p):
    """Conv2d(4x4, stride 2, pad 1, bias=False) + BN(eval) + LeakyReLU.

    Rewritten exactly as a stride-1 2x2 conv over a space-to-depth transform.
    """
    N, H, W, Cin = x.shape
    assert H % 2 == 0 and W % 2 == 0
    w_t = p["w"]                                   # (Cout, Cin, 4, 4) torch layout
    Cout = w_t.shape[0]
    scale, shift = _fold_bn(p["bn"])
    w = jnp.transpose(w_t, (2, 3, 1, 0)) * scale   # (4,4,Cin,Cout), BN scale folded
    # kernel index (i=2a+r, j=2b+t)  ->  tap (a,b), channel (r,t,cin)
    w = w.reshape(2, 2, 2, 2, Cin, Cout).transpose(0, 2, 1, 3, 4, 5)
    w3 = w.reshape(4, 4 * Cin, Cout).astype(jnp.bfloat16)

    pad = 1
    Hp, Wp = H + 2 * pad, W + 2 * pad              # even
    Hs, Ws = Hp // 2, Wp // 2
    Ho, Wo = Hs - 1, Ws - 1                        # == H//2, W//2
    xp = jnp.pad(x, ((0, 0), (pad, pad), (pad, pad), (0, 0)))
    y = xp.reshape(N, Hs, 2, Ws, 2, Cin).transpose(0, 1, 3, 2, 4, 5)
    y = y.reshape(N, Hs, Ws, 4 * Cin)              # space-to-depth, channels (r,t,c)
    R = _round_up(Hs * Ws + 1, 8)
    yf = jnp.pad(y.reshape(N, Hs * Ws, 4 * Cin), ((0, 0), (0, R - Hs * Ws), (0, 0)))

    taps = tuple(a * Ws + b for a in range(2) for b in range(2))
    mrows = Ho * Ws
    out = _conv_pallas(yf, w3, shift, taps=taps, mrows=mrows, res_off=None)
    return out.reshape(N, Ho, Ws, Cout)[:, :, :Wo, :]


def encoder_forward(params, x_nchw):
    """x_nchw: (N, nc, S, S) -> (N, 2, latent_size), matching the PyTorch Encoder."""
    x = jnp.transpose(x_nchw, (0, 2, 3, 1)).astype(jnp.bfloat16)   # NCHW -> NHWC, bf16
    x = conv3x3_block(x, params["bottleneck"], residual=False)
    for lp in params["layers"]:
        for rp in lp["res"]:
            x = conv3x3_block(x, rp, residual=True)                # x = x + layer(x)
        x = reduce_conv_block(x, lp["reduce"])
    N = x.shape[0]
    flat = jnp.transpose(x, (0, 3, 1, 2)).reshape(N, -1)           # PyTorch C*H*W order
    y = linear_layernorm_pallas(flat, params["final"]["w"],
                                params["final"]["ln_g"], params["final"]["ln_b"])
    latent = y.shape[1] // 2
    return y.reshape(N, 2, latent)                 # Rearrange 'b (a l) -> b a l', a=2


# ---------------------------------------------------------------------------
# Deterministic parameter initialization (synthetic, no checkpoint)
# ---------------------------------------------------------------------------
class _KeyGen:
    def __init__(self, key):
        self.key = key

    def __call__(self):
        self.key, sub = jax.random.split(self.key)
        return sub


def _init_conv(key, cout, cin, k):
    return 0.1 * jax.random.normal(key, (cout, cin, k, k), jnp.float32)


def _init_bn(key, c):
    k1, k2, k3, k4 = jax.random.split(key, 4)
    gamma = 1.0 + 0.1 * jax.random.normal(k1, (c,), jnp.float32)
    beta = 0.1 * jax.random.normal(k2, (c,), jnp.float32)
    mean = 0.1 * jax.random.normal(k3, (c,), jnp.float32)
    var = 1.0 + 0.1 * jnp.abs(jax.random.normal(k4, (c,), jnp.float32))
    return (gamma, beta, mean, var)


def init_encoder_params(key, nc, nfilters, latent_size, nlayers, res_layers, input_size):
    kg = _KeyGen(key)
    scale_factor = 1 << nlayers
    final_nfilters = nfilters * scale_factor
    final_size = input_size // scale_factor

    params = {
        "bottleneck": {"w": _init_conv(kg(), nfilters, nc, 3), "bn": _init_bn(kg(), nfilters)},
        "layers": [],
    }
    for i in range(nlayers):
        f = nfilters * (1 << i)
        layer = {"res": [], "reduce": None}
        for _ in range(res_layers):
            layer["res"].append({"w": _init_conv(kg(), f, f, 3), "bn": _init_bn(kg(), f)})
        layer["reduce"] = {"w": _init_conv(kg(), 2 * f, f, 4), "bn": _init_bn(kg(), 2 * f)}
        params["layers"].append(layer)

    in_features = final_size * final_size * final_nfilters
    w_lin = 0.05 * jax.random.normal(kg(), (latent_size * 2, in_features), jnp.float32)
    params["final"] = {
        "w": jnp.transpose(w_lin),                                           # (F, 2L)
        "ln_g": 1.0 + 0.1 * jax.random.normal(kg(), (latent_size * 2,), jnp.float32),
        "ln_b": 0.1 * jax.random.normal(kg(), (latent_size * 2,), jnp.float32),
    }
    return params


# ---------------------------------------------------------------------------
if __name__ == "__main__":
    # Small config: nc=4, nfilters=8, latent_size=8, nlayers=2, res_layers=1, input=16.
    nc, nfilters, latent_size, nlayers, res_layers, input_size = 4, 8, 8, 2, 1, 16
    batch = 2

    key = jax.random.PRNGKey(0)
    pkey, xkey = jax.random.split(key)
    params = init_encoder_params(pkey, nc, nfilters, latent_size, nlayers, res_layers, input_size)
    x = jax.random.normal(xkey, (batch, nc, input_size, input_size), jnp.float32)

    forward = jax.jit(encoder_forward)
    out = forward(params, x)
    out = jax.block_until_ready(out)

    assert out.shape == (batch, 2, latent_size), out.shape
    assert jnp.all(jnp.isfinite(out))
    print("KERNEL_OK")
</pallas_src>

<mosaic_0001>
module attributes {stable_mosaic.version = 11 : i64} {
  func.func @_conv_kernel(%arg0: i32, %arg1: memref<1x328x4xbf16, #tpu.memory_space<vmem>>, %arg2: memref<9x4x8xbf16, #tpu.memory_space<vmem>>, %arg3: memref<1x8xf32, #tpu.memory_space<vmem>>, %arg4: memref<1x288x8xbf16, #tpu.memory_space<vmem>>) attributes {dimension_semantics = [#tpu.dimension_semantics<parallel>], iteration_bounds = array<i64: 2>, scalar_prefetch = 0 : i64, scratch_operands = 0 : i64, tpu.core_type = #tpu.core_type<tc>, window_params = [{transform_indices = @transform_0, window_bounds = array<i64: 1, 328, 4>}, {pipeline_mode = #tpu.pipeline_mode<synchronous>, transform_indices = @transform_1, window_bounds = array<i64: 9, 4, 8>}, {pipeline_mode = #tpu.pipeline_mode<synchronous>, transform_indices = @transform_2, window_bounds = array<i64: 1, 8>}, {transform_indices = @transform_3, window_bounds = array<i64: 1, 288, 8>}]} {
    %c0 = arith.constant 0 : index
    %c0_0 = arith.constant 0 : index
    %c0_1 = arith.constant 0 : index
    %0 = vector.load %arg1[%c0, %c0_0, %c0_1] : memref<1x328x4xbf16, #tpu.memory_space<vmem>>, vector<1x328x4xbf16>
    %1 = vector.shape_cast %0 : vector<1x328x4xbf16> to vector<328x4xbf16>
    %2 = vector.extract_strided_slice %1 {offsets = [0, 0], sizes = [288, 4], strides = [1, 1]} : vector<328x4xbf16> to vector<288x4xbf16>
    %c0_2 = arith.constant 0 : index
    %c0_3 = arith.constant 0 : index
    %c0_4 = arith.constant 0 : index
    %3 = vector.load %arg2[%c0_2, %c0_3, %c0_4] : memref<9x4x8xbf16, #tpu.memory_space<vmem>>, vector<1x4x8xbf16>
    %4 = vector.shape_cast %3 : vector<1x4x8xbf16> to vector<4x8xbf16>
    %cst = arith.constant dense<0.000000e+00> : vector<288x8xf32>
    %5 = tpu.matmul %2, %4, %cst {dimension_numbers = #tpu.dot_dimension_numbers<[1], [0], [0], [1], [0, 0, 1, 1], [], []>} : vector<288x4xbf16>, vector<4x8xbf16>, vector<288x8xf32> -> vector<288x8xf32>
    %6 = vector.extract_strided_slice %1 {offsets = [1, 0], sizes = [288, 4], strides = [1, 1]} : vector<328x4xbf16> to vector<288x4xbf16>
    %c1 = arith.constant 1 : index
    %c0_5 = arith.constant 0 : index
    %c0_6 = arith.constant 0 : index
    %7 = vector.load %arg2[%c1, %c0_5, %c0_6] : memref<9x4x8xbf16, #tpu.memory_space<vmem>>, vector<1x4x8xbf16>
    %8 = vector.shape_cast %7 : vector<1x4x8xbf16> to vector<4x8xbf16>
    %cst_7 = arith.constant dense<0.000000e+00> : vector<288x8xf32>
    %9 = tpu.matmul %6, %8, %cst_7 {dimension_numbers = #tpu.dot_dimension_numbers<[1], [0], [0], [1], [0, 0, 1, 1], [], []>} : vector<288x4xbf16>, vector<4x8xbf16>, vector<288x8xf32> -> vector<288x8xf32>
    %10 = arith.addf %5, %9 : vector<288x8xf32>
    %11 = vector.extract_strided_slice %1 {offsets = [2, 0], sizes = [288, 4], strides = [1, 1]} : vector<328x4xbf16> to vector<288x4xbf16>
    %c2 = arith.constant 2 : index
    %c0_8 = arith.constant 0 : index
    %c0_9 = arith.constant 0 : index
    %12 = vector.load %arg2[%c2, %c0_8, %c0_9] : memref<9x4x8xbf16, #tpu.memory_space<vmem>>, vector<1x4x8xbf16>
    %13 = vector.shape_cast %12 : vector<1x4x8xbf16> to vector<4x8xbf16>
    %cst_10 = arith.constant dense<0.000000e+00> : vector<288x8xf32>
    %14 = tpu.matmul %11, %13, %cst_10 {dimension_numbers = #tpu.dot_dimension_numbers<[1], [0], [0], [1], [0, 0, 1, 1], [], []>} : vector<288x4xbf16>, vector<4x8xbf16>, vector<288x8xf32> -> vector<288x8xf32>
    %15 = arith.addf %10, %14 : vector<288x8xf32>
    %16 = vector.extract_strided_slice %1 {offsets = [18, 0], sizes = [288, 4], strides = [1, 1]} : vector<328x4xbf16> to vector<288x4xbf16>
    %c3 = arith.constant 3 : index
    %c0_11 = arith.constant 0 : index
    %c0_12 = arith.constant 0 : index
    %17 = vector.load %arg2[%c3, %c0_11, %c0_12] : memref<9x4x8xbf16, #tpu.memory_space<vmem>>, vector<1x4x8xbf16>
    %18 = vector.shape_cast %17 : vector<1x4x8xbf16> to vector<4x8xbf16>
    %cst_13 = arith.constant dense<0.000000e+00> : vector<288x8xf32>
    %19 = tpu.matmul %16, %18, %cst_13 {dimension_numbers = #tpu.dot_dimension_numbers<[1], [0], [0], [1], [0, 0, 1, 1], [], []>} : vector<288x4xbf16>, vector<4x8xbf16>, vector<288x8xf32> -> vector<288x8xf32>
    %20 = arith.addf %15, %19 : vector<288x8xf32>
    %21 = vector.extract_strided_slice %1 {offsets = [19, 0], sizes = [288, 4], strides = [1, 1]} : vector<328x4xbf16> to vector<288x4xbf16>
    %c4 = arith.constant 4 : index
    %c0_14 = arith.constant 0 : index
    %c0_15 = arith.constant 0 : index
    %22 = vector.load %arg2[%c4, %c0_14, %c0_15] : memref<9x4x8xbf16, #tpu.memory_space<vmem>>, vector<1x4x8xbf16>
    %23 = vector.shape_cast %22 : vector<1x4x8xbf16> to vector<4x8xbf16>
    %cst_16 = arith.constant dense<0.000000e+00> : vector<288x8xf32>
    %24 = tpu.matmul %21, %23, %cst_16 {dimension_numbers = #tpu.dot_dimension_numbers<[1], [0], [0], [1], [0, 0, 1, 1], [], []>} : vector<288x4xbf16>, vector<4x8xbf16>, vector<288x8xf32> -> vector<288x8xf32>
    %25 = arith.addf %20, %24 : vector<288x8xf32>
    %26 = vector.extract_strided_slice %1 {offsets = [20, 0], sizes = [288, 4], strides = [1, 1]} : vector<328x4xbf16> to vector<288x4xbf16>
    %c5 = arith.constant 5 : index
    %c0_17 = arith.constant 0 : index
    %c0_18 = arith.constant 0 : index
    %27 = vector.load %arg2[%c5, %c0_17, %c0_18] : memref<9x4x8xbf16, #tpu.memory_space<vmem>>, vector<1x4x8xbf16>
    %28 = vector.shape_cast %27 : vector<1x4x8xbf16> to vector<4x8xbf16>
    %cst_19 = arith.constant dense<0.000000e+00> : vector<288x8xf32>
    %29 = tpu.matmul %26, %28, %cst_19 {dimension_numbers = #tpu.dot_dimension_numbers<[1], [0], [0], [1], [0, 0, 1, 1], [], []>} : vector<288x4xbf16>, vector<4x8xbf16>, vector<288x8xf32> -> vector<288x8xf32>
    %30 = arith.addf %25, %29 : vector<288x8xf32>
    %31 = vector.extract_strided_slice %1 {offsets = [36, 0], sizes = [288, 4], strides = [1, 1]} : vector<328x4xbf16> to vector<288x4xbf16>
    %c6 = arith.constant 6 : index
    %c0_20 = arith.constant 0 : index
    %c0_21 = arith.constant 0 : index
    %32 = vector.load %arg2[%c6, %c0_20, %c0_21] : memref<9x4x8xbf16, #tpu.memory_space<vmem>>, vector<1x4x8xbf16>
    %33 = vector.shape_cast %32 : vector<1x4x8xbf16> to vector<4x8xbf16>
    %cst_22 = arith.constant dense<0.000000e+00> : vector<288x8xf32>
    %34 = tpu.matmul %31, %33, %cst_22 {dimension_numbers = #tpu.dot_dimension_numbers<[1], [0], [0], [1], [0, 0, 1, 1], [], []>} : vector<288x4xbf16>, vector<4x8xbf16>, vector<288x8xf32> -> vector<288x8xf32>
    %35 = arith.addf %30, %34 : vector<288x8xf32>
    %36 = vector.extract_strided_slice %1 {offsets = [37, 0], sizes = [288, 4], strides = [1, 1]} : vector<328x4xbf16> to vector<288x4xbf16>
    %c7 = arith.constant 7 : index
    %c0_23 = arith.constant 0 : index
    %c0_24 = arith.constant 0 : index
    %37 = vector.load %arg2[%c7, %c0_23, %c0_24] : memref<9x4x8xbf16, #tpu.memory_space<vmem>>, vector<1x4x8xbf16>
    %38 = vector.shape_cast %37 : vector<1x4x8xbf16> to vector<4x8xbf16>
    %cst_25 = arith.constant dense<0.000000e+00> : vector<288x8xf32>
    %39 = tpu.matmul %36, %38, %cst_25 {dimension_numbers = #tpu.dot_dimension_numbers<[1], [0], [0], [1], [0, 0, 1, 1], [], []>} : vector<288x4xbf16>, vector<4x8xbf16>, vector<288x8xf32> -> vector<288x8xf32>
    %40 = arith.addf %35, %39 : vector<288x8xf32>
    %41 = vector.extract_strided_slice %1 {offsets = [38, 0], sizes = [288, 4], strides = [1, 1]} : vector<328x4xbf16> to vector<288x4xbf16>
    %c8 = arith.constant 8 : index
    %c0_26 = arith.constant 0 : index
    %c0_27 = arith.constant 0 : index
    %42 = vector.load %arg2[%c8, %c0_26, %c0_27] : memref<9x4x8xbf16, #tpu.memory_space<vmem>>, vector<1x4x8xbf16>
    %43 = vector.shape_cast %42 : vector<1x4x8xbf16> to vector<4x8xbf16>
    %cst_28 = arith.constant dense<0.000000e+00> : vector<288x8xf32>
    %44 = tpu.matmul %41, %43, %cst_28 {dimension_numbers = #tpu.dot_dimension_numbers<[1], [0], [0], [1], [0, 0, 1, 1], [], []>} : vector<288x4xbf16>, vector<4x8xbf16>, vector<288x8xf32> -> vector<288x8xf32>
    %45 = arith.addf %40, %44 : vector<288x8xf32>
    %c0_29 = arith.constant 0 : index
    %c0_30 = arith.constant 0 : index
    %46 = vector.load %arg3[%c0_29, %c0_30] : memref<1x8xf32, #tpu.memory_space<vmem>>, vector<1x8xf32>
    %47 = vector.broadcast %46 : vector<1x8xf32> to vector<288x8xf32>
    %48 = arith.addf %45, %47 : vector<288x8xf32>
    %cst_31 = arith.constant 0.000000e+00 : f32
    %49 = vector.broadcast %cst_31 : f32 to vector<288x8xf32>
    %50 = arith.cmpf ogt, %48, %49 : vector<288x8xf32>
    %cst_32 = arith.constant 0.00999999977 : f32
    %51 = vector.broadcast %cst_32 : f32 to vector<288x8xf32>
    %52 = arith.mulf %51, %48 : vector<288x8xf32>
    %53 = arith.select %50, %48, %52 : vector<288x8xi1>, vector<288x8xf32>
    %54 = arith.truncf %53 : vector<288x8xf32> to vector<288x8xbf16>
    %c0_33 = arith.constant 0 : index
    %c0_34 = arith.constant 0 : index
    %c0_35 = arith.constant 0 : index
    %55 = vector.load %arg4[%c0_33, %c0_34, %c0_35] : memref<1x288x8xbf16, #tpu.memory_space<vmem>>, vector<1x288x8xbf16>
    %56 = vector.shape_cast %55 : vector<1x288x8xbf16> to vector<288x8xbf16>
    %57 = vector.shape_cast %54 : vector<288x8xbf16> to vector<1x288x8xbf16>
    tpu.vector_store %arg4[%c0_33, %c0_34, %c0_35], %57 {strides = array<i32>} : memref<1x288x8xbf16, #tpu.memory_space<vmem>>, vector<1x288x8xbf16>,
    return
  }
  func.func @transform_0(%arg0: i32) -> (i32, i32, i32) {
    %c0_i32 = arith.constant 0 : i32
    %c0_i32_0 = arith.constant 0 : i32
    %c0_i32_1 = arith.constant 0 : i32
    return %arg0, %c0_i32, %c0_i32_0 : i32, i32, i32
  }
  func.func @transform_1(%arg0: i32) -> (i32, i32, i32) {
    %c0_i32 = arith.constant 0 : i32
    %c0_i32_0 = arith.constant 0 : i32
    %c0_i32_1 = arith.constant 0 : i32
    %c0_i32_2 = arith.constant 0 : i32
    return %c0_i32, %c0_i32_0, %c0_i32_1 : i32, i32, i32
  }
  func.func @transform_2(%arg0: i32) -> (i32, i32) {
    %c0_i32 = arith.constant 0 : i32
    %c0_i32_0 = arith.constant 0 : i32
    %c0_i32_1 = arith.constant 0 : i32
    return %c0_i32, %c0_i32_0 : i32, i32
  }
  func.func @transform_3(%arg0: i32) -> (i32, i32, i32) {
    %c0_i32 = arith.constant 0 : i32
    %c0_i32_0 = arith.constant 0 : i32
    %c0_i32_1 = arith.constant 0 : i32
    return %arg0, %c0_i32, %c0_i32_0 : i32, i32, i32
  }
}

module attributes {stable_mosaic.version = 11 : i64} {
  func.func @_conv_kernel(%arg0: i32, %arg1: memref<1x328x8xbf16, #tpu.memory_space<vmem>>, %arg2: memref<9x8x8xbf16, #tpu.memory_space<vmem>>, %arg3: memref<1x8xf32, #tpu.memory_space<vmem>>, %arg4: memref<1x288x8xbf16, #tpu.memory_space<vmem>>) attributes {dimension_semantics = [#tpu.dimension_semantics<parallel>], iteration_bounds = array<i64: 2>, scalar_prefetch = 0 : i64, scratch_operands = 0 : i64, tpu.core_type = #tpu.core_type<tc>, window_params = [{transform_indices = @transform_0, window_bounds = array<i64: 1, 328, 8>}, {pipeline_mode = #tpu.pipeline_mode<synchronous>, transform_indices = @transform_1, window_bounds = array<i64: 9, 8, 8>}, {pipeline_mode = #tpu.pipeline_mode<synchronous>, transform_indices = @transform_2, window_bounds = array<i64: 1, 8>}, {transform_indices = @transform_3, window_bounds = array<i64: 1, 288, 8>}]} {
    %c0 = arith.constant 0 : index
    %c0_0 = arith.constant 0 : index
    %c0_1 = arith.constant 0 : index
    %0 = vector.load %arg1[%c0, %c0_0, %c0_1] : memref<1x328x8xbf16, #tpu.memory_space<vmem>>, vector<1x328x8xbf16>
    %1 = vector.shape_cast %0 : vector<1x328x8xbf16> to vector<328x8xbf16>
    %2 = vector.extract_strided_slice %1 {offsets = [0, 0], sizes = [288, 8], strides = [1, 1]} : vector<328x8xbf16> to vector<288x8xbf16>
    %c0_2 = arith.constant 0 : index
    %c0_3 = arith.constant 0 : index
    %c0_4 = arith.constant 0 : index
    %3 = vector.load %arg2[%c0_2, %c0_3, %c0_4] : memref<9x8x8xbf16, #tpu.memory_space<vmem>>, vector<1x8x8xbf16>
    %4 = vector.shape_cast %3 : vector<1x8x8xbf16> to vector<8x8xbf16>
    %cst = arith.constant dense<0.000000e+00> : vector<288x8xf32>
    %5 = tpu.matmul %2, %4, %cst {dimension_numbers = #tpu.dot_dimension_numbers<[1], [0], [0], [1], [0, 0, 1, 1], [], []>} : vector<288x8xbf16>, vector<8x8xbf16>, vector<288x8xf32> -> vector<288x8xf32>
    %6 = vector.extract_strided_slice %1 {offsets = [1, 0], sizes = [288, 8], strides = [1, 1]} : vector<328x8xbf16> to vector<288x8xbf16>
    %c1 = arith.constant 1 : index
    %c0_5 = arith.constant 0 : index
    %c0_6 = arith.constant 0 : index
    %7 = vector.load %arg2[%c1, %c0_5, %c0_6] : memref<9x8x8xbf16, #tpu.memory_space<vmem>>, vector<1x8x8xbf16>
    %8 = vector.shape_cast %7 : vector<1x8x8xbf16> to vector<8x8xbf16>
    %cst_7 = arith.constant dense<0.000000e+00> : vector<288x8xf32>
    %9 = tpu.matmul %6, %8, %cst_7 {dimension_numbers = #tpu.dot_dimension_numbers<[1], [0], [0], [1], [0, 0, 1, 1], [], []>} : vector<288x8xbf16>, vector<8x8xbf16>, vector<288x8xf32> -> vector<288x8xf32>
    %10 = arith.addf %5, %9 : vector<288x8xf32>
    %11 = vector.extract_strided_slice %1 {offsets = [2, 0], sizes = [288, 8], strides = [1, 1]} : vector<328x8xbf16> to vector<288x8xbf16>
    %c2 = arith.constant 2 : index
    %c0_8 = arith.constant 0 : index
    %c0_9 = arith.constant 0 : index
    %12 = vector.load %arg2[%c2, %c0_8, %c0_9] : memref<9x8x8xbf16, #tpu.memory_space<vmem>>, vector<1x8x8xbf16>
    %13 = vector.shape_cast %12 : vector<1x8x8xbf16> to vector<8x8xbf16>
    %cst_10 = arith.constant dense<0.000000e+00> : vector<288x8xf32>
    %14 = tpu.matmul %11, %13, %cst_10 {dimension_numbers = #tpu.dot_dimension_numbers<[1], [0], [0], [1], [0, 0, 1, 1], [], []>} : vector<288x8xbf16>, vector<8x8xbf16>, vector<288x8xf32> -> vector<288x8xf32>
    %15 = arith.addf %10, %14 : vector<288x8xf32>
    %16 = vector.extract_strided_slice %1 {offsets = [18, 0], sizes = [288, 8], strides = [1, 1]} : vector<328x8xbf16> to vector<288x8xbf16>
    %c3 = arith.constant 3 : index
    %c0_11 = arith.constant 0 : index
    %c0_12 = arith.constant 0 : index
    %17 = vector.load %arg2[%c3, %c0_11, %c0_12] : memref<9x8x8xbf16, #tpu.memory_space<vmem>>, vector<1x8x8xbf16>
    %18 = vector.shape_cast %17 : vector<1x8x8xbf16> to vector<8x8xbf16>
    %cst_13 = arith.constant dense<0.000000e+00> : vector<288x8xf32>
    %19 = tpu.matmul %16, %18, %cst_13 {dimension_numbers = #tpu.dot_dimension_numbers<[1], [0], [0], [1], [0, 0, 1, 1], [], []>} : vector<288x8xbf16>, vector<8x8xbf16>, vector<288x8xf32> -> vector<288x8xf32>
    %20 = arith.addf %15, %19 : vector<288x8xf32>
    %21 = vector.extract_strided_slice %1 {offsets = [19, 0], sizes = [288, 8], strides = [1, 1]} : vector<328x8xbf16> to vector<288x8xbf16>
    %c4 = arith.constant 4 : index
    %c0_14 = arith.constant 0 : index
    %c0_15 = arith.constant 0 : index
    %22 = vector.load %arg2[%c4, %c0_14, %c0_15] : memref<9x8x8xbf16, #tpu.memory_space<vmem>>, vector<1x8x8xbf16>
    %23 = vector.shape_cast %22 : vector<1x8x8xbf16> to vector<8x8xbf16>
    %cst_16 = arith.constant dense<0.000000e+00> : vector<288x8xf32>
    %24 = tpu.matmul %21, %23, %cst_16 {dimension_numbers = #tpu.dot_dimension_numbers<[1], [0], [0], [1], [0, 0, 1, 1], [], []>} : vector<288x8xbf16>, vector<8x8xbf16>, vector<288x8xf32> -> vector<288x8xf32>
    %25 = arith.addf %20, %24 : vector<288x8xf32>
    %26 = vector.extract_strided_slice %1 {offsets = [20, 0], sizes = [288, 8], strides = [1, 1]} : vector<328x8xbf16> to vector<288x8xbf16>
    %c5 = arith.constant 5 : index
    %c0_17 = arith.constant 0 : index
    %c0_18 = arith.constant 0 : index
    %27 = vector.load %arg2[%c5, %c0_17, %c0_18] : memref<9x8x8xbf16, #tpu.memory_space<vmem>>, vector<1x8x8xbf16>
    %28 = vector.shape_cast %27 : vector<1x8x8xbf16> to vector<8x8xbf16>
    %cst_19 = arith.constant dense<0.000000e+00> : vector<288x8xf32>
    %29 = tpu.matmul %26, %28, %cst_19 {dimension_numbers = #tpu.dot_dimension_numbers<[1], [0], [0], [1], [0, 0, 1, 1], [], []>} : vector<288x8xbf16>, vector<8x8xbf16>, vector<288x8xf32> -> vector<288x8xf32>
    %30 = arith.addf %25, %29 : vector<288x8xf32>
    %31 = vector.extract_strided_slice %1 {offsets = [36, 0], sizes = [288, 8], strides = [1, 1]} : vector<328x8xbf16> to vector<288x8xbf16>
    %c6 = arith.constant 6 : index
    %c0_20 = arith.constant 0 : index
    %c0_21 = arith.constant 0 : index
    %32 = vector.load %arg2[%c6, %c0_20, %c0_21] : memref<9x8x8xbf16, #tpu.memory_space<vmem>>, vector<1x8x8xbf16>
    %33 = vector.shape_cast %32 : vector<1x8x8xbf16> to vector<8x8xbf16>
    %cst_22 = arith.constant dense<0.000000e+00> : vector<288x8xf32>
    %34 = tpu.matmul %31, %33, %cst_22 {dimension_numbers = #tpu.dot_dimension_numbers<[1], [0], [0], [1], [0, 0, 1, 1], [], []>} : vector<288x8xbf16>, vector<8x8xbf16>, vector<288x8xf32> -> vector<288x8xf32>
    %35 = arith.addf %30, %34 : vector<288x8xf32>
    %36 = vector.extract_strided_slice %1 {offsets = [37, 0], sizes = [288, 8], strides = [1, 1]} : vector<328x8xbf16> to vector<288x8xbf16>
    %c7 = arith.constant 7 : index
    %c0_23 = arith.constant 0 : index
    %c0_24 = arith.constant 0 : index
    %37 = vector.load %arg2[%c7, %c0_23, %c0_24] : memref<9x8x8xbf16, #tpu.memory_space<vmem>>, vector<1x8x8xbf16>
    %38 = vector.shape_cast %37 : vector<1x8x8xbf16> to vector<8x8xbf16>
    %cst_25 = arith.constant dense<0.000000e+00> : vector<288x8xf32>
    %39 = tpu.matmul %36, %38, %cst_25 {dimension_numbers = #tpu.dot_dimension_numbers<[1], [0], [0], [1], [0, 0, 1, 1], [], []>} : vector<288x8xbf16>, vector<8x8xbf16>, vector<288x8xf32> -> vector<288x8xf32>
    %40 = arith.addf %35, %39 : vector<288x8xf32>
    %41 = vector.extract_strided_slice %1 {offsets = [38, 0], sizes = [288, 8], strides = [1, 1]} : vector<328x8xbf16> to vector<288x8xbf16>
    %c8 = arith.constant 8 : index
    %c0_26 = arith.constant 0 : index
    %c0_27 = arith.constant 0 : index
    %42 = vector.load %arg2[%c8, %c0_26, %c0_27] : memref<9x8x8xbf16, #tpu.memory_space<vmem>>, vector<1x8x8xbf16>
    %43 = vector.shape_cast %42 : vector<1x8x8xbf16> to vector<8x8xbf16>
    %cst_28 = arith.constant dense<0.000000e+00> : vector<288x8xf32>
    %44 = tpu.matmul %41, %43, %cst_28 {dimension_numbers = #tpu.dot_dimension_numbers<[1], [0], [0], [1], [0, 0, 1, 1], [], []>} : vector<288x8xbf16>, vector<8x8xbf16>, vector<288x8xf32> -> vector<288x8xf32>
    %45 = arith.addf %40, %44 : vector<288x8xf32>
    %c0_29 = arith.constant 0 : index
    %c0_30 = arith.constant 0 : index
    %46 = vector.load %arg3[%c0_29, %c0_30] : memref<1x8xf32, #tpu.memory_space<vmem>>, vector<1x8xf32>
    %47 = vector.broadcast %46 : vector<1x8xf32> to vector<288x8xf32>
    %48 = arith.addf %45, %47 : vector<288x8xf32>
    %cst_31 = arith.constant 0.000000e+00 : f32
    %49 = vector.broadcast %cst_31 : f32 to vector<288x8xf32>
    %50 = arith.cmpf ogt, %48, %49 : vector<288x8xf32>
    %cst_32 = arith.constant 0.00999999977 : f32
    %51 = vector.broadcast %cst_32 : f32 to vector<288x8xf32>
    %52 = arith.mulf %51, %48 : vector<288x8xf32>
    %53 = arith.select %50, %48, %52 : vector<288x8xi1>, vector<288x8xf32>
    %54 = vector.extract_strided_slice %1 {offsets = [19, 0], sizes = [288, 8], strides = [1, 1]} : vector<328x8xbf16> to vector<288x8xbf16>
    %55 = arith.extf %54 : vector<288x8xbf16> to vector<288x8xf32>
    %56 = arith.addf %53, %55 : vector<288x8xf32>
    %57 = arith.truncf %56 : vector<288x8xf32> to vector<288x8xbf16>
    %c0_33 = arith.constant 0 : index
    %c0_34 = arith.constant 0 : index
    %c0_35 = arith.constant 0 : index
    %58 = vector.load %arg4[%c0_33, %c0_34, %c0_35] : memref<1x288x8xbf16, #tpu.memory_space<vmem>>, vector<1x288x8xbf16>
    %59 = vector.shape_cast %58 : vector<1x288x8xbf16> to vector<288x8xbf16>
    %60 = vector.shape_cast %57 : vector<288x8xbf16> to vector<1x288x8xbf16>
    tpu.vector_store %arg4[%c0_33, %c0_34, %c0_35], %60 {strides = array<i32>} : memref<1x288x8xbf16, #tpu.memory_space<vmem>>, vector<1x288x8xbf16>,
    return
  }
  func.func @transform_0(%arg0: i32) -> (i32, i32, i32) {
    %c0_i32 = arith.constant 0 : i32
    %c0_i32_0 = arith.constant 0 : i32
    %c0_i32_1 = arith.constant 0 : i32
    return %arg0, %c0_i32, %c0_i32_0 : i32, i32, i32
  }
  func.func @transform_1(%arg0: i32) -> (i32, i32, i32) {
    %c0_i32 = arith.constant 0 : i32
    %c0_i32_0 = arith.constant 0 : i32
    %c0_i32_1 = arith.constant 0 : i32
    %c0_i32_2 = arith.constant 0 : i32
    return %c0_i32, %c0_i32_0, %c0_i32_1 : i32, i32, i32
  }
  func.func @transform_2(%arg0: i32) -> (i32, i32) {
    %c0_i32 = arith.constant 0 : i32
    %c0_i32_0 = arith.constant 0 : i32
    %c0_i32_1 = arith.constant 0 : i32
    return %c0_i32, %c0_i32_0 : i32, i32
  }
  func.func @transform_3(%arg0: i32) -> (i32, i32, i32) {
    %c0_i32 = arith.constant 0 : i32
    %c0_i32_0 = arith.constant 0 : i32
    %c0_i32_1 = arith.constant 0 : i32
    return %arg0, %c0_i32, %c0_i32_0 : i32, i32, i32
  }
}

module attributes {stable_mosaic.version = 11 : i64} {
  func.func @_conv_kernel(%arg0: i32, %arg1: memref<1x88x32xbf16, #tpu.memory_space<vmem>>, %arg2: memref<4x32x16xbf16, #tpu.memory_space<vmem>>, %arg3: memref<1x16xf32, #tpu.memory_space<vmem>>, %arg4: memref<1x72x16xbf16, #tpu.memory_space<vmem>>) attributes {dimension_semantics = [#tpu.dimension_semantics<parallel>], iteration_bounds = array<i64: 2>, scalar_prefetch = 0 : i64, scratch_operands = 0 : i64, tpu.core_type = #tpu.core_type<tc>, window_params = [{transform_indices = @transform_0, window_bounds = array<i64: 1, 88, 32>}, {pipeline_mode = #tpu.pipeline_mode<synchronous>, transform_indices = @transform_1, window_bounds = array<i64: 4, 32, 16>}, {pipeline_mode = #tpu.pipeline_mode<synchronous>, transform_indices = @transform_2, window_bounds = array<i64: 1, 16>}, {transform_indices = @transform_3, window_bounds = array<i64: 1, 72, 16>}]} {
    %c0 = arith.constant 0 : index
    %c0_0 = arith.constant 0 : index
    %c0_1 = arith.constant 0 : index
    %0 = vector.load %arg1[%c0, %c0_0, %c0_1] : memref<1x88x32xbf16, #tpu.memory_space<vmem>>, vector<1x88x32xbf16>
    %1 = vector.shape_cast %0 : vector<1x88x32xbf16> to vector<88x32xbf16>
    %2 = vector.extract_strided_slice %1 {offsets = [0, 0], sizes = [72, 32], strides = [1, 1]} : vector<88x32xbf16> to vector<72x32xbf16>
    %c0_2 = arith.constant 0 : index
    %c0_3 = arith.constant 0 : index
    %c0_4 = arith.constant 0 : index
    %3 = vector.load %arg2[%c0_2, %c0_3, %c0_4] : memref<4x32x16xbf16, #tpu.memory_space<vmem>>, vector<1x32x16xbf16>
    %4 = vector.shape_cast %3 : vector<1x32x16xbf16> to vector<32x16xbf16>
    %cst = arith.constant dense<0.000000e+00> : vector<72x16xf32>
    %5 = tpu.matmul %2, %4, %cst {dimension_numbers = #tpu.dot_dimension_numbers<[1], [0], [0], [1], [0, 0, 1, 1], [], []>} : vector<72x32xbf16>, vector<32x16xbf16>, vector<72x16xf32> -> vector<72x16xf32>
    %6 = vector.extract_strided_slice %1 {offsets = [1, 0], sizes = [72, 32], strides = [1, 1]} : vector<88x32xbf16> to vector<72x32xbf16>
    %c1 = arith.constant 1 : index
    %c0_5 = arith.constant 0 : index
    %c0_6 = arith.constant 0 : index
    %7 = vector.load %arg2[%c1, %c0_5, %c0_6] : memref<4x32x16xbf16, #tpu.memory_space<vmem>>, vector<1x32x16xbf16>
    %8 = vector.shape_cast %7 : vector<1x32x16xbf16> to vector<32x16xbf16>
    %cst_7 = arith.constant dense<0.000000e+00> : vector<72x16xf32>
    %9 = tpu.matmul %6, %8, %cst_7 {dimension_numbers = #tpu.dot_dimension_numbers<[1], [0], [0], [1], [0, 0, 1, 1], [], []>} : vector<72x32xbf16>, vector<32x16xbf16>, vector<72x16xf32> -> vector<72x16xf32>
    %10 = arith.addf %5, %9 : vector<72x16xf32>
    %11 = vector.extract_strided_slice %1 {offsets = [9, 0], sizes = [72, 32], strides = [1, 1]} : vector<88x32xbf16> to vector<72x32xbf16>
    %c2 = arith.constant 2 : index
    %c0_8 = arith.constant 0 : index
    %c0_9 = arith.constant 0 : index
    %12 = vector.load %arg2[%c2, %c0_8, %c0_9] : memref<4x32x16xbf16, #tpu.memory_space<vmem>>, vector<1x32x16xbf16>
    %13 = vector.shape_cast %12 : vector<1x32x16xbf16> to vector<32x16xbf16>
    %cst_10 = arith.constant dense<0.000000e+00> : vector<72x16xf32>
    %14 = tpu.matmul %11, %13, %cst_10 {dimension_numbers = #tpu.dot_dimension_numbers<[1], [0], [0], [1], [0, 0, 1, 1], [], []>} : vector<72x32xbf16>, vector<32x16xbf16>, vector<72x16xf32> -> vector<72x16xf32>
    %15 = arith.addf %10, %14 : vector<72x16xf32>
    %16 = vector.extract_strided_slice %1 {offsets = [10, 0], sizes = [72, 32], strides = [1, 1]} : vector<88x32xbf16> to vector<72x32xbf16>
    %c3 = arith.constant 3 : index
    %c0_11 = arith.constant 0 : index
    %c0_12 = arith.constant 0 : index
    %17 = vector.load %arg2[%c3, %c0_11, %c0_12] : memref<4x32x16xbf16, #tpu.memory_space<vmem>>, vector<1x32x16xbf16>
    %18 = vector.shape_cast %17 : vector<1x32x16xbf16> to vector<32x16xbf16>
    %cst_13 = arith.constant dense<0.000000e+00> : vector<72x16xf32>
    %19 = tpu.matmul %16, %18, %cst_13 {dimension_numbers = #tpu.dot_dimension_numbers<[1], [0], [0], [1], [0, 0, 1, 1], [], []>} : vector<72x32xbf16>, vector<32x16xbf16>, vector<72x16xf32> -> vector<72x16xf32>
    %20 = arith.addf %15, %19 : vector<72x16xf32>
    %c0_14 = arith.constant 0 : index
    %c0_15 = arith.constant 0 : index
    %21 = vector.load %arg3[%c0_14, %c0_15] : memref<1x16xf32, #tpu.memory_space<vmem>>, vector<1x16xf32>
    %22 = vector.broadcast %21 : vector<1x16xf32> to vector<72x16xf32>
    %23 = arith.addf %20, %22 : vector<72x16xf32>
    %cst_16 = arith.constant 0.000000e+00 : f32
    %24 = vector.broadcast %cst_16 : f32 to vector<72x16xf32>
    %25 = arith.cmpf ogt, %23, %24 : vector<72x16xf32>
    %cst_17 = arith.constant 0.00999999977 : f32
    %26 = vector.broadcast %cst_17 : f32 to vector<72x16xf32>
    %27 = arith.mulf %26, %23 : vector<72x16xf32>
    %28 = arith.select %25, %23, %27 : vector<72x16xi1>, vector<72x16xf32>
    %29 = arith.truncf %28 : vector<72x16xf32> to vector<72x16xbf16>
    %c0_18 = arith.constant 0 : index
    %c0_19 = arith.constant 0 : index
    %c0_20 = arith.constant 0 : index
    %30 = vector.load %arg4[%c0_18, %c0_19, %c0_20] : memref<1x72x16xbf16, #tpu.memory_space<vmem>>, vector<1x72x16xbf16>
    %31 = vector.shape_cast %30 : vector<1x72x16xbf16> to vector<72x16xbf16>
    %32 = vector.shape_cast %29 : vector<72x16xbf16> to vector<1x72x16xbf16>
    tpu.vector_store %arg4[%c0_18, %c0_19, %c0_20], %32 {strides = array<i32>} : memref<1x72x16xbf16, #tpu.memory_space<vmem>>, vector<1x72x16xbf16>,
    return
  }
  func.func @transform_0(%arg0: i32) -> (i32, i32, i32) {
    %c0_i32 = arith.constant 0 : i32
    %c0_i32_0 = arith.constant 0 : i32
    %c0_i32_1 = arith.constant 0 : i32
    return %arg0, %c0_i32, %c0_i32_0 : i32, i32, i32
  }
  func.func @transform_1(%arg0: i32) -> (i32, i32, i32) {
    %c0_i32 = arith.constant 0 : i32
    %c0_i32_0 = arith.constant 0 : i32
    %c0_i32_1 = arith.constant 0 : i32
    %c0_i32_2 = arith.constant 0 : i32
    return %c0_i32, %c0_i32_0, %c0_i32_1 : i32, i32, i32
  }
  func.func @transform_2(%arg0: i32) -> (i32, i32) {
    %c0_i32 = arith.constant 0 : i32
    %c0_i32_0 = arith.constant 0 : i32
    %c0_i32_1 = arith.constant 0 : i32
    return %c0_i32, %c0_i32_0 : i32, i32
  }
  func.func @transform_3(%arg0: i32) -> (i32, i32, i32) {
    %c0_i32 = arith.constant 0 : i32
    %c0_i32_0 = arith.constant 0 : i32
    %c0_i32_1 = arith.constant 0 : i32
    return %arg0, %c0_i32, %c0_i32_0 : i32, i32, i32
  }
}

module attributes {stable_mosaic.version = 11 : i64} {
  func.func @_conv_kernel(%arg0: i32, %arg1: memref<1x104x16xbf16, #tpu.memory_space<vmem>>, %arg2: memref<9x16x16xbf16, #tpu.memory_space<vmem>>, %arg3: memref<1x16xf32, #tpu.memory_space<vmem>>, %arg4: memref<1x80x16xbf16, #tpu.memory_space<vmem>>) attributes {dimension_semantics = [#tpu.dimension_semantics<parallel>], iteration_bounds = array<i64: 2>, scalar_prefetch = 0 : i64, scratch_operands = 0 : i64, tpu.core_type = #tpu.core_type<tc>, window_params = [{transform_indices = @transform_0, window_bounds = array<i64: 1, 104, 16>}, {pipeline_mode = #tpu.pipeline_mode<synchronous>, transform_indices = @transform_1, window_bounds = array<i64: 9, 16, 16>}, {pipeline_mode = #tpu.pipeline_mode<synchronous>, transform_indices = @transform_2, window_bounds = array<i64: 1, 16>}, {transform_indices = @transform_3, window_bounds = array<i64: 1, 80, 16>}]} {
    %c0 = arith.constant 0 : index
    %c0_0 = arith.constant 0 : index
    %c0_1 = arith.constant 0 : index
    %0 = vector.load %arg1[%c0, %c0_0, %c0_1] : memref<1x104x16xbf16, #tpu.memory_space<vmem>>, vector<1x104x16xbf16>
    %1 = vector.shape_cast %0 : vector<1x104x16xbf16> to vector<104x16xbf16>
    %2 = vector.extract_strided_slice %1 {offsets = [0, 0], sizes = [80, 16], strides = [1, 1]} : vector<104x16xbf16> to vector<80x16xbf16>
    %c0_2 = arith.constant 0 : index
    %c0_3 = arith.constant 0 : index
    %c0_4 = arith.constant 0 : index
    %3 = vector.load %arg2[%c0_2, %c0_3, %c0_4] : memref<9x16x16xbf16, #tpu.memory_space<vmem>>, vector<1x16x16xbf16>
    %4 = vector.shape_cast %3 : vector<1x16x16xbf16> to vector<16x16xbf16>
    %cst = arith.constant dense<0.000000e+00> : vector<80x16xf32>
    %5 = tpu.matmul %2, %4, %cst {dimension_numbers = #tpu.dot_dimension_numbers<[1], [0], [0], [1], [0, 0, 1, 1], [], []>} : vector<80x16xbf16>, vector<16x16xbf16>, vector<80x16xf32> -> vector<80x16xf32>
    %6 = vector.extract_strided_slice %1 {offsets = [1, 0], sizes = [80, 16], strides = [1, 1]} : vector<104x16xbf16> to vector<80x16xbf16>
    %c1 = arith.constant 1 : index
    %c0_5 = arith.constant 0 : index
    %c0_6 = arith.constant 0 : index
    %7 = vector.load %arg2[%c1, %c0_5, %c0_6] : memref<9x16x16xbf16, #tpu.memory_space<vmem>>, vector<1x16x16xbf16>
    %8 = vector.shape_cast %7 : vector<1x16x16xbf16> to vector<16x16xbf16>
    %cst_7 = arith.constant dense<0.000000e+00> : vector<80x16xf32>
    %9 = tpu.matmul %6, %8, %cst_7 {dimension_numbers = #tpu.dot_dimension_numbers<[1], [0], [0], [1], [0, 0, 1, 1], [], []>} : vector<80x16xbf16>, vector<16x16xbf16>, vector<80x16xf32> -> vector<80x16xf32>
    %10 = arith.addf %5, %9 : vector<80x16xf32>
    %11 = vector.extract_strided_slice %1 {offsets = [2, 0], sizes = [80, 16], strides = [1, 1]} : vector<104x16xbf16> to vector<80x16xbf16>
    %c2 = arith.constant 2 : index
    %c0_8 = arith.constant 0 : index
    %c0_9 = arith.constant 0 : index
    %12 = vector.load %arg2[%c2, %c0_8, %c0_9] : memref<9x16x16xbf16, #tpu.memory_space<vmem>>, vector<1x16x16xbf16>
    %13 = vector.shape_cast %12 : vector<1x16x16xbf16> to vector<16x16xbf16>
    %cst_10 = arith.constant dense<0.000000e+00> : vector<80x16xf32>
    %14 = tpu.matmul %11, %13, %cst_10 {dimension_numbers = #tpu.dot_dimension_numbers<[1], [0], [0], [1], [0, 0, 1, 1], [], []>} : vector<80x16xbf16>, vector<16x16xbf16>, vector<80x16xf32> -> vector<80x16xf32>
    %15 = arith.addf %10, %14 : vector<80x16xf32>
    %16 = vector.extract_strided_slice %1 {offsets = [10, 0], sizes = [80, 16], strides = [1, 1]} : vector<104x16xbf16> to vector<80x16xbf16>
    %c3 = arith.constant 3 : index
    %c0_11 = arith.constant 0 : index
    %c0_12 = arith.constant 0 : index
    %17 = vector.load %arg2[%c3, %c0_11, %c0_12] : memref<9x16x16xbf16, #tpu.memory_space<vmem>>, vector<1x16x16xbf16>
    %18 = vector.shape_cast %17 : vector<1x16x16xbf16> to vector<16x16xbf16>
    %cst_13 = arith.constant dense<0.000000e+00> : vector<80x16xf32>
    %19 = tpu.matmul %16, %18, %cst_13 {dimension_numbers = #tpu.dot_dimension_numbers<[1], [0], [0], [1], [0, 0, 1, 1], [], []>} : vector<80x16xbf16>, vector<16x16xbf16>, vector<80x16xf32> -> vector<80x16xf32>
    %20 = arith.addf %15, %19 : vector<80x16xf32>
    %21 = vector.extract_strided_slice %1 {offsets = [11, 0], sizes = [80, 16], strides = [1, 1]} : vector<104x16xbf16> to vector<80x16xbf16>
    %c4 = arith.constant 4 : index
    %c0_14 = arith.constant 0 : index
    %c0_15 = arith.constant 0 : index
    %22 = vector.load %arg2[%c4, %c0_14, %c0_15] : memref<9x16x16xbf16, #tpu.memory_space<vmem>>, vector<1x16x16xbf16>
    %23 = vector.shape_cast %22 : vector<1x16x16xbf16> to vector<16x16xbf16>
    %cst_16 = arith.constant dense<0.000000e+00> : vector<80x16xf32>
    %24 = tpu.matmul %21, %23, %cst_16 {dimension_numbers = #tpu.dot_dimension_numbers<[1], [0], [0], [1], [0, 0, 1, 1], [], []>} : vector<80x16xbf16>, vector<16x16xbf16>, vector<80x16xf32> -> vector<80x16xf32>
    %25 = arith.addf %20, %24 : vector<80x16xf32>
    %26 = vector.extract_strided_slice %1 {offsets = [12, 0], sizes = [80, 16], strides = [1, 1]} : vector<104x16xbf16> to vector<80x16xbf16>
    %c5 = arith.constant 5 : index
    %c0_17 = arith.constant 0 : index
    %c0_18 = arith.constant 0 : index
    %27 = vector.load %arg2[%c5, %c0_17, %c0_18] : memref<9x16x16xbf16, #tpu.memory_space<vmem>>, vector<1x16x16xbf16>
    %28 = vector.shape_cast %27 : vector<1x16x16xbf16> to vector<16x16xbf16>
    %cst_19 = arith.constant dense<0.000000e+00> : vector<80x16xf32>
    %29 = tpu.matmul %26, %28, %cst_19 {dimension_numbers = #tpu.dot_dimension_numbers<[1], [0], [0], [1], [0, 0, 1, 1], [], []>} : vector<80x16xbf16>, vector<16x16xbf16>, vector<80x16xf32> -> vector<80x16xf32>
    %30 = arith.addf %25, %29 : vector<80x16xf32>
    %31 = vector.extract_strided_slice %1 {offsets = [20, 0], sizes = [80, 16], strides = [1, 1]} : vector<104x16xbf16> to vector<80x16xbf16>
    %c6 = arith.constant 6 : index
    %c0_20 = arith.constant 0 : index
    %c0_21 = arith.constant 0 : index
    %32 = vector.load %arg2[%c6, %c0_20, %c0_21] : memref<9x16x16xbf16, #tpu.memory_space<vmem>>, vector<1x16x16xbf16>
    %33 = vector.shape_cast %32 : vector<1x16x16xbf16> to vector<16x16xbf16>
    %cst_22 = arith.constant dense<0.000000e+00> : vector<80x16xf32>
    %34 = tpu.matmul %31, %33, %cst_22 {dimension_numbers = #tpu.dot_dimension_numbers<[1], [0], [0], [1], [0, 0, 1, 1], [], []>} : vector<80x16xbf16>, vector<16x16xbf16>, vector<80x16xf32> -> vector<80x16xf32>
    %35 = arith.addf %30, %34 : vector<80x16xf32>
    %36 = vector.extract_strided_slice %1 {offsets = [21, 0], sizes = [80, 16], strides = [1, 1]} : vector<104x16xbf16> to vector<80x16xbf16>
    %c7 = arith.constant 7 : index
    %c0_23 = arith.constant 0 : index
    %c0_24 = arith.constant 0 : index
    %37 = vector.load %arg2[%c7, %c0_23, %c0_24] : memref<9x16x16xbf16, #tpu.memory_space<vmem>>, vector<1x16x16xbf16>
    %38 = vector.shape_cast %37 : vector<1x16x16xbf16> to vector<16x16xbf16>
    %cst_25 = arith.constant dense<0.000000e+00> : vector<80x16xf32>
    %39 = tpu.matmul %36, %38, %cst_25 {dimension_numbers = #tpu.dot_dimension_numbers<[1], [0], [0], [1], [0, 0, 1, 1], [], []>} : vector<80x16xbf16>, vector<16x16xbf16>, vector<80x16xf32> -> vector<80x16xf32>
    %40 = arith.addf %35, %39 : vector<80x16xf32>
    %41 = vector.extract_strided_slice %1 {offsets = [22, 0], sizes = [80, 16], strides = [1, 1]} : vector<104x16xbf16> to vector<80x16xbf16>
    %c8 = arith.constant 8 : index
    %c0_26 = arith.constant 0 : index
    %c0_27 = arith.constant 0 : index
    %42 = vector.load %arg2[%c8, %c0_26, %c0_27] : memref<9x16x16xbf16, #tpu.memory_space<vmem>>, vector<1x16x16xbf16>
    %43 = vector.shape_cast %42 : vector<1x16x16xbf16> to vector<16x16xbf16>
    %cst_28 = arith.constant dense<0.000000e+00> : vector<80x16xf32>
    %44 = tpu.matmul %41, %43, %cst_28 {dimension_numbers = #tpu.dot_dimension_numbers<[1], [0], [0], [1], [0, 0, 1, 1], [], []>} : vector<80x16xbf16>, vector<16x16xbf16>, vector<80x16xf32> -> vector<80x16xf32>
    %45 = arith.addf %40, %44 : vector<80x16xf32>
    %c0_29 = arith.constant 0 : index
    %c0_30 = arith.constant 0 : index
    %46 = vector.load %arg3[%c0_29, %c0_30] : memref<1x16xf32, #tpu.memory_space<vmem>>, vector<1x16xf32>
    %47 = vector.broadcast %46 : vector<1x16xf32> to vector<80x16xf32>
    %48 = arith.addf %45, %47 : vector<80x16xf32>
    %cst_31 = arith.constant 0.000000e+00 : f32
    %49 = vector.broadcast %cst_31 : f32 to vector<80x16xf32>
    %50 = arith.cmpf ogt, %48, %49 : vector<80x16xf32>
    %cst_32 = arith.constant 0.00999999977 : f32
    %51 = vector.broadcast %cst_32 : f32 to vector<80x16xf32>
    %52 = arith.mulf %51, %48 : vector<80x16xf32>
    %53 = arith.select %50, %48, %52 : vector<80x16xi1>, vector<80x16xf32>
    %54 = vector.extract_strided_slice %1 {offsets = [11, 0], sizes = [80, 16], strides = [1, 1]} : vector<104x16xbf16> to vector<80x16xbf16>
    %55 = arith.extf %54 : vector<80x16xbf16> to vector<80x16xf32>
    %56 = arith.addf %53, %55 : vector<80x16xf32>
    %57 = arith.truncf %56 : vector<80x16xf32> to vector<80x16xbf16>
    %c0_33 = arith.constant 0 : index
    %c0_34 = arith.constant 0 : index
    %c0_35 = arith.constant 0 : index
    %58 = vector.load %arg4[%c0_33, %c0_34, %c0_35] : memref<1x80x16xbf16, #tpu.memory_space<vmem>>, vector<1x80x16xbf16>
    %59 = vector.shape_cast %58 : vector<1x80x16xbf16> to vector<80x16xbf16>
    %60 = vector.shape_cast %57 : vector<80x16xbf16> to vector<1x80x16xbf16>
    tpu.vector_store %arg4[%c0_33, %c0_34, %c0_35], %60 {strides = array<i32>} : memref<1x80x16xbf16, #tpu.memory_space<vmem>>, vector<1x80x16xbf16>,
    return
  }
  func.func @transform_0(%arg0: i32) -> (i32, i32, i32) {
    %c0_i32 = arith.constant 0 : i32
    %c0_i32_0 = arith.constant 0 : i32
    %c0_i32_1 = arith.constant 0 : i32
    return %arg0, %c0_i32, %c0_i32_0 : i32, i32, i32
  }
  func.func @transform_1(%arg0: i32) -> (i32, i32, i32) {
    %c0_i32 = arith.constant 0 : i32
    %c0_i32_0 = arith.constant 0 : i32
    %c0_i32_1 = arith.constant 0 : i32
    %c0_i32_2 = arith.constant 0 : i32
    return %c0_i32, %c0_i32_0, %c0_i32_1 : i32, i32, i32
  }
  func.func @transform_2(%arg0: i32) -> (i32, i32) {
    %c0_i32 = arith.constant 0 : i32
    %c0_i32_0 = arith.constant 0 : i32
    %c0_i32_1 = arith.constant 0 : i32
    return %c0_i32, %c0_i32_0 : i32, i32
  }
  func.func @transform_3(%arg0: i32) -> (i32, i32, i32) {
    %c0_i32 = arith.constant 0 : i32
    %c0_i32_0 = arith.constant 0 : i32
    %c0_i32_1 = arith.constant 0 : i32
    return %arg0, %c0_i32, %c0_i32_0 : i32, i32, i32
  }
}

module attributes {stable_mosaic.version = 11 : i64} {
  func.func @_conv_kernel(%arg0: i32, %arg1: memref<1x32x64xbf16, #tpu.memory_space<vmem>>, %arg2: memref<4x64x32xbf16, #tpu.memory_space<vmem>>, %arg3: memref<1x32xf32, #tpu.memory_space<vmem>>, %arg4: memref<1x20x32xbf16, #tpu.memory_space<vmem>>) attributes {dimension_semantics = [#tpu.dimension_semantics<parallel>], iteration_bounds = array<i64: 2>, scalar_prefetch = 0 : i64, scratch_operands = 0 : i64, tpu.core_type = #tpu.core_type<tc>, window_params = [{transform_indices = @transform_0, window_bounds = array<i64: 1, 32, 64>}, {pipeline_mode = #tpu.pipeline_mode<synchronous>, transform_indices = @transform_1, window_bounds = array<i64: 4, 64, 32>}, {pipeline_mode = #tpu.pipeline_mode<synchronous>, transform_indices = @transform_2, window_bounds = array<i64: 1, 32>}, {transform_indices = @transform_3, window_bounds = array<i64: 1, 20, 32>}]} {
    %c0 = arith.constant 0 : index
    %c0_0 = arith.constant 0 : index
    %c0_1 = arith.constant 0 : index
    %0 = vector.load %arg1[%c0, %c0_0, %c0_1] : memref<1x32x64xbf16, #tpu.memory_space<vmem>>, vector<1x32x64xbf16>
    %1 = vector.shape_cast %0 : vector<1x32x64xbf16> to vector<32x64xbf16>
    %2 = vector.extract_strided_slice %1 {offsets = [0, 0], sizes = [20, 64], strides = [1, 1]} : vector<32x64xbf16> to vector<20x64xbf16>
    %c0_2 = arith.constant 0 : index
    %c0_3 = arith.constant 0 : index
    %c0_4 = arith.constant 0 : index
    %3 = vector.load %arg2[%c0_2, %c0_3, %c0_4] : memref<4x64x32xbf16, #tpu.memory_space<vmem>>, vector<1x64x32xbf16>
    %4 = vector.shape_cast %3 : vector<1x64x32xbf16> to vector<64x32xbf16>
    %cst = arith.constant dense<0.000000e+00> : vector<20x32xf32>
    %5 = tpu.matmul %2, %4, %cst {dimension_numbers = #tpu.dot_dimension_numbers<[1], [0], [0], [1], [0, 0, 1, 1], [], []>} : vector<20x64xbf16>, vector<64x32xbf16>, vector<20x32xf32> -> vector<20x32xf32>
    %6 = vector.extract_strided_slice %1 {offsets = [1, 0], sizes = [20, 64], strides = [1, 1]} : vector<32x64xbf16> to vector<20x64xbf16>
    %c1 = arith.constant 1 : index
    %c0_5 = arith.constant 0 : index
    %c0_6 = arith.constant 0 : index
    %7 = vector.load %arg2[%c1, %c0_5, %c0_6] : memref<4x64x32xbf16, #tpu.memory_space<vmem>>, vector<1x64x32xbf16>
    %8 = vector.shape_cast %7 : vector<1x64x32xbf16> to vector<64x32xbf16>
    %cst_7 = arith.constant dense<0.000000e+00> : vector<20x32xf32>
    %9 = tpu.matmul %6, %8, %cst_7 {dimension_numbers = #tpu.dot_dimension_numbers<[1], [0], [0], [1], [0, 0, 1, 1], [], []>} : vector<20x64xbf16>, vector<64x32xbf16>, vector<20x32xf32> -> vector<20x32xf32>
    %10 = arith.addf %5, %9 : vector<20x32xf32>
    %11 = vector.extract_strided_slice %1 {offsets = [5, 0], sizes = [20, 64], strides = [1, 1]} : vector<32x64xbf16> to vector<20x64xbf16>
    %c2 = arith.constant 2 : index
    %c0_8 = arith.constant 0 : index
    %c0_9 = arith.constant 0 : index
    %12 = vector.load %arg2[%c2, %c0_8, %c0_9] : memref<4x64x32xbf16, #tpu.memory_space<vmem>>, vector<1x64x32xbf16>
    %13 = vector.shape_cast %12 : vector<1x64x32xbf16> to vector<64x32xbf16>
    %cst_10 = arith.constant dense<0.000000e+00> : vector<20x32xf32>
    %14 = tpu.matmul %11, %13, %cst_10 {dimension_numbers = #tpu.dot_dimension_numbers<[1], [0], [0], [1], [0, 0, 1, 1], [], []>} : vector<20x64xbf16>, vector<64x32xbf16>, vector<20x32xf32> -> vector<20x32xf32>
    %15 = arith.addf %10, %14 : vector<20x32xf32>
    %16 = vector.extract_strided_slice %1 {offsets = [6, 0], sizes = [20, 64], strides = [1, 1]} : vector<32x64xbf16> to vector<20x64xbf16>
    %c3 = arith.constant 3 : index
    %c0_11 = arith.constant 0 : index
    %c0_12 = arith.constant 0 : index
    %17 = vector.load %arg2[%c3, %c0_11, %c0_12] : memref<4x64x32xbf16, #tpu.memory_space<vmem>>, vector<1x64x32xbf16>
    %18 = vector.shape_cast %17 : vector<1x64x32xbf16> to vector<64x32xbf16>
    %cst_13 = arith.constant dense<0.000000e+00> : vector<20x32xf32>
    %19 = tpu.matmul %16, %18, %cst_13 {dimension_numbers = #tpu.dot_dimension_numbers<[1], [0], [0], [1], [0, 0, 1, 1], [], []>} : vector<20x64xbf16>, vector<64x32xbf16>, vector<20x32xf32> -> vector<20x32xf32>
    %20 = arith.addf %15, %19 : vector<20x32xf32>
    %c0_14 = arith.constant 0 : index
    %c0_15 = arith.constant 0 : index
    %21 = vector.load %arg3[%c0_14, %c0_15] : memref<1x32xf32, #tpu.memory_space<vmem>>, vector<1x32xf32>
    %22 = vector.broadcast %21 : vector<1x32xf32> to vector<20x32xf32>
    %23 = arith.addf %20, %22 : vector<20x32xf32>
    %cst_16 = arith.constant 0.000000e+00 : f32
    %24 = vector.broadcast %cst_16 : f32 to vector<20x32xf32>
    %25 = arith.cmpf ogt, %23, %24 : vector<20x32xf32>
    %cst_17 = arith.constant 0.00999999977 : f32
    %26 = vector.broadcast %cst_17 : f32 to vector<20x32xf32>
    %27 = arith.mulf %26, %23 : vector<20x32xf32>
    %28 = arith.select %25, %23, %27 : vector<20x32xi1>, vector<20x32xf32>
    %29 = arith.truncf %28 : vector<20x32xf32> to vector<20x32xbf16>
    %c0_18 = arith.constant 0 : index
    %c0_19 = arith.constant 0 : index
    %c0_20 = arith.constant 0 : index
    %30 = vector.load %arg4[%c0_18, %c0_19, %c0_20] : memref<1x20x32xbf16, #tpu.memory_space<vmem>>, vector<1x20x32xbf16>
    %31 = vector.shape_cast %30 : vector<1x20x32xbf16> to vector<20x32xbf16>
    %32 = vector.shape_cast %29 : vector<20x32xbf16> to vector<1x20x32xbf16>
    tpu.vector_store %arg4[%c0_18, %c0_19, %c0_20], %32 {strides = array<i32>} : memref<1x20x32xbf16, #tpu.memory_space<vmem>>, vector<1x20x32xbf16>,
    return
  }
  func.func @transform_0(%arg0: i32) -> (i32, i32, i32) {
    %c0_i32 = arith.constant 0 : i32
    %c0_i32_0 = arith.constant 0 : i32
    %c0_i32_1 = arith.constant 0 : i32
    return %arg0, %c0_i32, %c0_i32_0 : i32, i32, i32
  }
  func.func @transform_1(%arg0: i32) -> (i32, i32, i32) {
    %c0_i32 = arith.constant 0 : i32
    %c0_i32_0 = arith.constant 0 : i32
    %c0_i32_1 = arith.constant 0 : i32
    %c0_i32_2 = arith.constant 0 : i32
    return %c0_i32, %c0_i32_0, %c0_i32_1 : i32, i32, i32
  }
  func.func @transform_2(%arg0: i32) -> (i32, i32) {
    %c0_i32 = arith.constant 0 : i32
    %c0_i32_0 = arith.constant 0 : i32
    %c0_i32_1 = arith.constant 0 : i32
    return %c0_i32, %c0_i32_0 : i32, i32
  }
  func.func @transform_3(%arg0: i32) -> (i32, i32, i32) {
    %c0_i32 = arith.constant 0 : i32
    %c0_i32_0 = arith.constant 0 : i32
    %c0_i32_1 = arith.constant 0 : i32
    return %arg0, %c0_i32, %c0_i32_0 : i32, i32, i32
  }
}

module attributes {stable_mosaic.version = 11 : i64} {
  func.func @_linear_ln_kernel(%arg0: i32, %arg1: i32, %arg2: memref<2x512xbf16, #tpu.memory_space<vmem>>, %arg3: memref<512x16xbf16, #tpu.memory_space<vmem>>, %arg4: memref<1x16xf32, #tpu.memory_space<vmem>>, %arg5: memref<1x16xf32, #tpu.memory_space<vmem>>, %arg6: memref<2x16xf32, #tpu.memory_space<vmem>>, %arg7: memref<2x16xf32, #tpu.memory_space<vmem>>) attributes {dimension_semantics = [#tpu.dimension_semantics<parallel>, #tpu.dimension_semantics<arbitrary>], iteration_bounds = array<i64: 1, 1>, scalar_prefetch = 0 : i64, scratch_operands = 1 : i64, tpu.core_type = #tpu.core_type<tc>, window_params = [{transform_indices = @transform_0, window_bounds = array<i64: 2, 512>}, {transform_indices = @transform_1, window_bounds = array<i64: 512, 16>}, {pipeline_mode = #tpu.pipeline_mode<synchronous>, transform_indices = @transform_2, window_bounds = array<i64: 1, 16>}, {pipeline_mode = #tpu.pipeline_mode<synchronous>, transform_indices = @transform_3, window_bounds = array<i64: 1, 16>}, {transform_indices = @transform_4, window_bounds = array<i64: 2, 16>}]} {
    %c0_i32 = arith.constant 0 : i32
    %0 = arith.cmpi eq, %arg1, %c0_i32 : i32
    %1 = arith.extui %0 : i1 to i32
    %c0_i32_0 = arith.constant 0 : i32
    %2 = arith.cmpi ne, %1, %c0_i32_0 : i32
    scf.if %2 {
      %cst_10 = arith.constant 0.000000e+00 : f32
      %12 = vector.broadcast %cst_10 : f32 to vector<2x16xf32>
      %c0_11 = arith.constant 0 : index
      %c0_12 = arith.constant 0 : index
      %13 = vector.load %arg7[%c0_11, %c0_12] : memref<2x16xf32, #tpu.memory_space<vmem>>, vector<2x16xf32>
      tpu.vector_store %arg7[%c0_11, %c0_12], %12 {strides = array<i32>} : memref<2x16xf32, #tpu.memory_space<vmem>>, vector<2x16xf32>,
    } else {
    }
    %c0 = arith.constant 0 : index
    %c0_1 = arith.constant 0 : index
    %3 = vector.load %arg7[%c0, %c0_1] : memref<2x16xf32, #tpu.memory_space<vmem>>, vector<2x16xf32>
    %c0_2 = arith.constant 0 : index
    %c0_3 = arith.constant 0 : index
    %4 = vector.load %arg2[%c0_2, %c0_3] : memref<2x512xbf16, #tpu.memory_space<vmem>>, vector<2x512xbf16>
    %c0_4 = arith.constant 0 : index
    %c0_5 = arith.constant 0 : index
    %5 = vector.load %arg3[%c0_4, %c0_5] : memref<512x16xbf16, #tpu.memory_space<vmem>>, vector<512x16xbf16>
    %cst = arith.constant dense<0.000000e+00> : vector<2x16xf32>
    %6 = tpu.matmul %4, %5, %cst {dimension_numbers = #tpu.dot_dimension_numbers<[1], [0], [0], [1], [0, 0, 1, 1], [], []>} : vector<2x512xbf16>, vector<512x16xbf16>, vector<2x16xf32> -> vector<2x16xf32>
    %7 = arith.addf %3, %6 : vector<2x16xf32>
    %c0_6 = arith.constant 0 : index
    %c0_7 = arith.constant 0 : index
    %8 = vector.load %arg7[%c0_6, %c0_7] : memref<2x16xf32, #tpu.memory_space<vmem>>, vector<2x16xf32>
    tpu.vector_store %arg7[%c0_6, %c0_7], %7 {strides = array<i32>} : memref<2x16xf32, #tpu.memory_space<vmem>>, vector<2x16xf32>,
    %c0_i32_8 = arith.constant 0 : i32
    %9 = arith.cmpi eq, %arg1, %c0_i32_8 : i32
    %10 = arith.extui %9 : i1 to i32
    %c0_i32_9 = arith.constant 0 : i32
    %11 = arith.cmpi ne, %10, %c0_i32_9 : i32
    scf.if %11 {
      %c0_10 = arith.constant 0 : index
      %c0_11 = arith.constant 0 : index
      %12 = vector.load %arg7[%c0_10, %c0_11] : memref<2x16xf32, #tpu.memory_space<vmem>>, vector<2x16xf32>
      %cst_12 = arith.constant dense<0.000000e+00> : vector<2xf32>
      %13 = vector.multi_reduction <add>, %12, %cst_12 [1] : vector<2x16xf32> to vector<2xf32>
      %14 = vector.shape_cast %13 : vector<2xf32> to vector<2x1xf32>
      %cst_13 = arith.constant 1.600000e+01 : f32
      %15 = vector.broadcast %cst_13 : f32 to vector<2x1xf32>
      %16 = arith.divf %14, %15 : vector<2x1xf32>
      %17 = vector.broadcast %16 : vector<2x1xf32> to vector<2x16xf32>
      %18 = arith.subf %12, %17 : vector<2x16xf32>
      %19 = arith.mulf %18, %18 : vector<2x16xf32>
      %cst_14 = arith.constant dense<0.000000e+00> : vector<2xf32>
      %20 = vector.multi_reduction <add>, %19, %cst_14 [1] : vector<2x16xf32> to vector<2xf32>
      %21 = vector.shape_cast %20 : vector<2xf32> to vector<2x1xf32>
      %cst_15 = arith.constant 1.600000e+01 : f32
      %22 = vector.broadcast %cst_15 : f32 to vector<2x1xf32>
      %23 = arith.divf %21, %22 : vector<2x1xf32>
      %24 = vector.broadcast %16 : vector<2x1xf32> to vector<2x16xf32>
      %25 = arith.subf %12, %24 : vector<2x16xf32>
      %cst_16 = arith.constant 9.99999974E-6 : f32
      %26 = vector.broadcast %cst_16 : f32 to vector<2x1xf32>
      %27 = arith.addf %23, %26 : vector<2x1xf32>
      %28 = math.rsqrt %27 : vector<2x1xf32>
      %29 = vector.broadcast %28 : vector<2x1xf32> to vector<2x16xf32>
      %30 = arith.mulf %25, %29 : vector<2x16xf32>
      %c0_17 = arith.constant 0 : index
      %c0_18 = arith.constant 0 : index
      %31 = vector.load %arg4[%c0_17, %c0_18] : memref<1x16xf32, #tpu.memory_space<vmem>>, vector<1x16xf32>
      %32 = vector.broadcast %31 : vector<1x16xf32> to vector<2x16xf32>
      %33 = arith.mulf %30, %32 : vector<2x16xf32>
      %c0_19 = arith.constant 0 : index
      %c0_20 = arith.constant 0 : index
      %34 = vector.load %arg5[%c0_19, %c0_20] : memref<1x16xf32, #tpu.memory_space<vmem>>, vector<1x16xf32>
      %35 = vector.broadcast %34 : vector<1x16xf32> to vector<2x16xf32>
      %36 = arith.addf %33, %35 : vector<2x16xf32>
      %c0_21 = arith.constant 0 : index
      %c0_22 = arith.constant 0 : index
      %37 = vector.load %arg6[%c0_21, %c0_22] : memref<2x16xf32, #tpu.memory_space<vmem>>, vector<2x16xf32>
      tpu.vector_store %arg6[%c0_21, %c0_22], %36 {strides = array<i32>} : memref<2x16xf32, #tpu.memory_space<vmem>>, vector<2x16xf32>,
    } else {
    }
    return
  }
  func.func @transform_0(%arg0: i32, %arg1: i32) -> (i32, i32) {
    %c0_i32 = arith.constant 0 : i32
    return %arg0, %arg1 : i32, i32
  }
  func.func @transform_1(%arg0: i32, %arg1: i32) -> (i32, i32) {
    %c0_i32 = arith.constant 0 : i32
    %c0_i32_0 = arith.constant 0 : i32
    return %arg1, %c0_i32 : i32, i32
  }
  func.func @transform_2(%arg0: i32, %arg1: i32) -> (i32, i32) {
    %c0_i32 = arith.constant 0 : i32
    %c0_i32_0 = arith.constant 0 : i32
    %c0_i32_1 = arith.constant 0 : i32
    return %c0_i32, %c0_i32_0 : i32, i32
  }
  func.func @transform_3(%arg0: i32, %arg1: i32) -> (i32, i32) {
    %c0_i32 = arith.constant 0 : i32
    %c0_i32_0 = arith.constant 0 : i32
    %c0_i32_1 = arith.constant 0 : i32
    return %c0_i32, %c0_i32_0 : i32, i32
  }
  func.func @transform_4(%arg0: i32, %arg1: i32) -> (i32, i32) {
    %c0_i32 = arith.constant 0 : i32
    %c0_i32_0 = arith.constant 0 : i32
    return %arg0, %c0_i32 : i32, i32
  }
}

</mosaic_0001>

<bundles_post_ra>
// kernel: encoder_forward.6
= control target key start
LH: loop header
LB: loop body
LE: loop exit
PB: predicated region body
PF: predicated region fallthrough
CT: control target
= control target key end

     0   :  { %s4560_s12 = smov 0   ;;  %s5633_s0 = inlined_call_operand.vmem [shape: bf16[2,328,4], index: 0, kind: input, shape index: {}]   ;;  %s5634_s1 = inlined_call_operand.vmem [shape: bf16[9,4,8], index: 1, kind: input, shape index: {}]   ;;  %s5635_s2 = inlined_call_operand.vmem [shape: f32[1,8], index: 2, kind: input, shape index: {}]   ;;  %s5636_s3 = inlined_call_operand.vmem [shape: bf16[2,288,8], index: 3, kind: output, shape index: {}]  }
   0x1 LB: > { %s3411_s13 = sadd.s32 4294967295, %s4538_s12   ;;  %p3415_p0 = scmp.ge.s32.totalorder %s4538_s12, 1  ;;  %s4538_s12 = sphi %s4560_s12, %s13_s12  }
   0x2   : > { %p137_p1 = scmp.lt.s32.totalorder %s4538_s12, 3 }
   0x4   : > { %p138_p2 = pnand %p3415_p0, %p137_p1 }
   0x6   : > { %141 = sbr.rel (%p138_p2) target bundleno = 575 (0x23f), region = 32 }
   0xd   : > { %vm513_vm0 = vcmask 1041408   ;;  %v4571_v0 = vld [vmem:[%s5634_s1 + $0x8] sm:$0x3]  ;;  %v3418_v1 = vld [vmem:[%s5634_s1 + $0x2] sm:$0x3]  ;;  %p161_p3 = scmp.lt.s32.totalorder %s3411_s13, 1 }
   0xe   : > { %4493 = vmatprep.subr.msk.bf16.mxu0 %vm513_vm0, %v4571_v0  ;;  %4489 = vmatprep.subr.msk.bf16.mxu1 %vm513_vm0, %v3418_v1  ;;  %v4581_v2 = vsel %vm513_vm0, %v4571_v0, 0  ;;  %v515_v3 = vsel %vm513_vm0, %v3418_v1, 0  ;;  %v3533_v4 = vld [vmem:[%s5634_s1 + $0xa] sm:$0x3]  ;;  %v213_v5 = vld [vmem:[%s5634_s1] sm:$0x3] }
   0xf   : > { %5668 = vst [vmem:[#allocation2_spill] sm:$0xff] %v4581_v2  ;;  %4010 = vmatpush3.bf16.msra.mxu0 %v4581_v2  ;;  %3858 = vmatpush3.bf16.msra.mxu1 %v515_v3  ;;  %s5705_s13 = smov (!%p161_p3, %s3411_s13), 1  ;;  %vm309_vm1 = vsmask.f32 7424  ;;  %vm1456_vm2 = vsmask.f32 6400 }
  0x10   : > { %4495 = vmatprep.subr.msk.bf16.mxu0 %vm513_vm0, %v3533_v4  ;;  %s4499_s22 = smul.u32 164, %s5705_s13  ;;  %4490 = vmatprep.subr.msk.bf16.mxu1 %vm513_vm0, %v213_v5  ;;  %vm458_vm3 = vcmask 31744   ;;  %v1907_v8 = vsel %vm513_vm0, %v3533_v4, 0  ;;  %v731_v10 = vsel %vm513_vm0, %v213_v5, 0  ;;  %v4646_v36 = vld [vmem:[%s5634_s1 + $0x4] sm:$0x3] }
  0x11   : > { %v4677_v51 = vld [vmem:[%s5634_s1 + $0xc] sm:$0x3]  ;;  %vm1814_vm4 = vcmask 1045504   ;;  %vm2358_vm5 = vsmask.f32 5376  ;;  %vm912_vm6 = vcmask 1046528  }
  0x12   : > { %s4599_s25 = scalar_lea.vmem %s5633_s0, %s4499_s22  ;;  %vm2716_vm7 = vcmask 1044480   ;;  %s4500_s11 = smul.u32 144, %s5705_s13  ;;  %vm3319_vm10 = vcmask 60416  }
  0x13   : > { %v4602_v6 = vld [vmem:[%s4599_s25] sm:$0xff]   ;;  %v4605_v7 = vld [vmem:[%s4599_s25 + $0x8] sm:$0xff]   ;;  %v4609_v9 = vld [vmem:[%s4599_s25 + $0x10] sm:$0xff]  }
  0x14   : > { %v311_v11 = vshrl.u32 %v4602_v6, 16  ;;  %v313_v12 = vshll.u32 %v4602_v6, 16  ;;  %v318_v13 = vshll.u32 %v4605_v7, 16  ;;  %v322_v14 = vshrl.u32 %v4605_v7, 16  ;;  %v4623_v17 = vld [vmem:[%s4599_s25 + $0x18] sm:$0xff]   ;;  %v4626_v18 = vld [vmem:[%s4599_s25 + $0x20] sm:$0xff]   ;;  %s5512_s16 = scalar_lea.vmem %s5636_s3, %s4500_s11 }
  0x15   : > { %v4617_v15 = vshll.u32 %v4609_v9, 16  ;;  %v4620_v16 = vshrl.u32 %v4609_v9, 16  ;;  %v4632_v26 = vshll.u32 %v4623_v17, 16  ;;  %v4635_v30 = vshrl.u32 %v4623_v17, 16  ;;  %v4638_v31 = vld [vmem:[%s4599_s25 + $0x28] sm:$0xff]   ;;  %v4655_v41 = vld [vmem:[%s4599_s25 + $0x30] sm:$0xff]  }
  0x16   : > { %v315_v19 = vrot.slane %v313_v12, 1  ;;  %v320_v20 = vrot.slane %v318_v13, 1  ;;  %v1457_v21 = vrot.slane %v322_v14, 1  ;;  %v1458_v22 = vrot.slane %v318_v13, 2  ;;  %v4672_v50 = vld [vmem:[%s4599_s25 + $0x38] sm:$0xff]   ;;  %v4700_v63 = vld [vmem:[%s4599_s25 + $0x40] sm:$0xff]  }
  0x17   : > { %v1460_v23 = vrot.slane %v4620_v16, 1  ;;  %v1461_v24 = vrot.slane %v4617_v15, 2  ;;  %v328_v25 = vrot.slane %v4617_v15, 1  ;;  %v1465_v33 = vrot.slane %v4632_v26, 2 }
  0x18   : > { %v316_v27 = vor.u32 %v315_v19, %v311_v11  ;;  %v324_v28 = vor.u32 %v322_v14, %v320_v20  ;;  %v1459_v29 = vor.u32 %v1458_v22, %v1457_v21  ;;  %v336_v35 = vrot.slane %v4632_v26, 1 }
  0x19   : > { %v1462_v32 = vor.u32 %v1461_v24, %v1460_v23  ;;  %v332_v34 = vor.u32 %v4620_v16, %v328_v25  ;;  %v1464_v39 = vrot.slane %v4635_v30, 1  ;;  %v4652_v40 = vshll.u32 %v4626_v18, 16  ;;  %v4727_v23 = vld [vmem:[%s4599_s25 + $0x48] sm:$0xff]  }
  0x1a   : > { %v321_v37 = vsel %vm309_vm1, %v316_v27, %v320_v20  ;;  %v329_v38 = vsel %vm309_vm1, %v324_v28, %v328_v25  ;;  %v4661_v44 = vshrl.u32 %v4626_v18, 16  ;;  %v340_v45 = vor.u32 %v4635_v30, %v336_v35  ;;  %v4734_v28 = vld [vmem:[%s4599_s25 + $0x50] sm:$0xff]  }
  0x1b   : > { %3859 = vmatprep.mubr.msk.bf16.mxu1 %vm458_vm3, %v321_v37  ;;  %v1463_v42 = vsel %vm1456_vm2, %v1459_v29, %v1462_v32  ;;  %v337_v43 = vsel %vm309_vm1, %v332_v34, %v336_v35  ;;  %v1466_v46 = vor.u32 %v1465_v33, %v1464_v39  ;;  %v1469_v47 = vrot.slane %v4652_v40, 2 }
  0x1c   : > { %4011 = vmatprep.mubr.msk.bf16.mxu0 %vm458_vm3, %v1463_v42  ;;  %3860 = vmatmul.mubr.msk.bf16.vlgmr.msra.gmra.mrb[0].mxu1 %vm458_vm3, %v329_v38  ;;  %v344_v48 = vrot.slane %v4652_v40, 1  ;;  %v4669_v49 = vshll.u32 %v4638_v31, 16  ;;  %v1468_v52 = vrot.slane %v4661_v44, 1  ;;  %v4682_v53 = vshrl.u32 %v4638_v31, 16 }
  0x1d   : > { %3863 = vmatprep.mubr.msk.bf16.mxu1 %vm458_vm3, %v337_v43  ;;  %3896 = vmatpush3.bf16.msra.mxu1 %v731_v10  ;;  %v4685_v54 = vshll.u32 %v4655_v41, 16  ;;  %v4688_v55 = vshrl.u32 %v4655_v41, 16  ;;  %v1467_v56 = vsel %vm1456_vm2, %v1462_v32, %v1466_v46  ;;  %v4704_v3 = vshll.u32 %v4672_v50, 16 }
  0x1e   : > { %v1473_v57 = vrot.slane %v4669_v49, 2  ;;  %v348_v58 = vor.u32 %v4661_v44, %v344_v48  ;;  %4491 = vmatprep.subr.msk.bf16.mxu1 %vm513_vm0, %v4646_v36  ;;  %4012 = vmatmul.mubr.msk.bf16.vlgmr.msra.gmra.mrb[0].mxu0 %vm458_vm3, %v1467_v56  ;;  %v1470_v59 = vor.u32 %v1469_v47, %v1468_v52  ;;  %v1472_v60 = vrot.slane %v4682_v53, 1  ;;  %v4761_v56 = vld [vmem:[%s4599_s25 + $0x58] sm:$0xff]  }
  0x1f   : > { %v352_v61 = vrot.slane %v4669_v49, 1  ;;  %v1476_v62 = vrot.slane %v4688_v55, 1  ;;  %4048 = vmatpush3.bf16.msra.mxu0 %v1907_v8  ;;  %v1477_v1 = vrot.slane %v4685_v54, 2  ;;  %v4707_v4 = vshrl.u32 %v4672_v50, 16 }
  0x20   : > { %v1471_v5 = vsel %vm1456_vm2, %v1466_v46, %v1470_v59  ;;  %v345_v10 = vsel %vm309_vm1, %v340_v45, %v344_v48  ;;  %v1474_v11 = vor.u32 %v1473_v57, %v1472_v60  ;;  %4496 = vmatprep.subr.msk.bf16.mxu0 %vm513_vm0, %v4677_v51  ;;  %v360_v13 = vrot.slane %v4685_v54, 1 }
  0x21   : > { %4015 = vmatprep.mubr.msk.bf16.mxu0 %vm458_vm3, %v1471_v5  ;;  %v353_v8 = vsel %vm309_vm1, %v348_v58, %v352_v61  ;;  %v1478_v12 = vor.u32 %v1477_v1, %v1476_v62  ;;  %v4717_v14 = vshll.u32 %v4700_v63, 16  ;;  %v1480_v20 = vrot.slane %v4707_v4, 1 }
  0x22   : > { %v1475_v19 = vsel %vm1456_vm2, %v1470_v59, %v1474_v11  ;;  %v1481_v21 = vrot.slane %v4704_v3, 2  ;;  %v4724_v22 = vshrl.u32 %v4700_v63, 16  ;;  %v356_v25 = vor.u32 %v4682_v53, %v352_v61 }
  0x23   : > { %v1479_v24 = vsel %vm1456_vm2, %v1474_v11, %v1478_v12  ;;  %v1485_v27 = vrot.slane %v4717_v14, 2  ;;  %v364_v29 = vor.u32 %v4688_v55, %v360_v13  ;;  %v368_v32 = vrot.slane %v4704_v3, 1 }
  0x24   : > { %3864 = vmatmul.mubr.msk.bf16.gmra.mrb[4].mxu1 %vm458_vm3, %v345_v10  ;;  %v1484_v33 = vrot.slane %v4724_v22, 1  ;;  %v1482_v34 = vor.u32 %v1481_v21, %v1480_v20  ;;  %v4742_v35 = vshll.u32 %v4727_v23, 16  ;;  %v4745_v37 = vshrl.u32 %v4727_v23, 16 }
  0x25   : > { %3867 = vmatprep.mubr.msk.bf16.mxu1 %vm458_vm3, %v353_v8  ;;  %v361_v38 = vsel %vm309_vm1, %v356_v25, %v360_v13  ;;  %v4749_v42 = vshll.u32 %v4734_v28, 16  ;;  %v4752_v43 = vshrl.u32 %v4734_v28, 16  ;;  %v369_v45 = vsel %vm309_vm1, %v364_v29, %v368_v32  ;;  %v4781_v13 = vld [vmem:[%s4599_s25 + $0x88] sm:$0xff]   ;;  %v4789_v25 = vld [vmem:[%s4599_s25 + $0x60] sm:$0xff]  }
  0x26   : > { %4016 = vmatmul.mubr.msk.bf16.gmra.mrb[4].mxu0 %vm458_vm3, %v1475_v19  ;;  %v1486_v39 = vor.u32 %v1485_v27, %v1484_v33  ;;  %v1483_v46 = vsel %vm1456_vm2, %v1478_v12, %v1482_v34  ;;  %v376_v47 = vrot.slane %v4717_v14, 1  ;;  %v1488_v48 = vrot.slane %v4745_v37, 1  ;;  %v208_v27 = vld [vmem:[%s4599_s25 + $0x90] sm:$0xf] }
  0x27   : > { %4019 = vmatprep.mubr.msk.bf16.mxu0 %vm458_vm3, %v1479_v24  ;;  %v1489_v52 = vrot.slane %v4742_v35, 2  ;;  %v372_v58 = vor.u32 %v4707_v4, %v368_v32  ;;  %v1492_v59 = vrot.slane %v4752_v43, 1  ;;  %v1493_v60 = vrot.slane %v4749_v42, 2 }
  0x28   : > { %v1487_v57 = vsel %vm1456_vm2, %v1482_v34, %v1486_v39  ;;  %v380_v61 = vor.u32 %v4724_v22, %v376_v47  ;;  %v384_v62 = vrot.slane %v4742_v35, 1  ;;  %v4773_v5 = vshll.u32 %v4761_v56, 16 }
  0x29   : > { %v1490_v1 = vor.u32 %v1489_v52, %v1488_v48  ;;  %v4776_v10 = vshrl.u32 %v4761_v56, 16  ;;  %v377_v11 = vsel %vm309_vm1, %v372_v58, %v376_v47  ;;  %v1494_v8 = vor.u32 %v1493_v60, %v1492_v59 }
  0x2a   : > { %5669 = vst [vmem:[#allocation3_spill] sm:$0xff] %v4773_v5  ;;  %v385_v12 = vsel %vm309_vm1, %v380_v61, %v384_v62  ;;  %v392_v20 = vrot.slane %v4749_v42, 1  ;;  %v1497_v24 = vrot.slane %v4773_v5, 2  ;;  %v388_v32 = vor.u32 %v4745_v37, %v384_v62 }
  0x2b   : > { %5670 = vst [vmem:[#allocation4_spill] sm:$0xff] %v4776_v10  ;;  %v1491_v19 = vsel %vm1456_vm2, %v1486_v39, %v1490_v1  ;;  %v1496_v21 = vrot.slane %v4776_v10, 1  ;;  %v1495_v29 = vsel %vm1456_vm2, %v1490_v1, %v1494_v8  ;;  %v400_v34 = vrot.slane %v4773_v5, 1 }
  0x2c   : > { %3868 = vmatmul.mubr.msk.bf16.gmra.mrb[8].mxu1 %vm458_vm3, %v361_v38  ;;  %v396_v33 = vor.u32 %v4752_v43, %v392_v20  ;;  %v4798_v38 = vld [vmem:[%s4599_s25 + $0x68] sm:$0xff]   ;;  %v4801_v39 = vshll.u32 %v4781_v13, 16  ;;  %v4813_v48 = vshll.u32 %v4789_v25, 16  ;;  %v1815_v58 = vrot.slane %v4605_v7, 2 }
  0x2d   : > { %3871 = vmatprep.mubr.msk.bf16.mxu1 %vm458_vm3, %v369_v45  ;;  %v4804_v45 = vcombine.low %v208_v27, %v208_v27  ;;  %v4810_v47 = vor.u32 %v1497_v24, %v1496_v21  ;;  %v1816_v59 = vrot.slane %v4609_v9, 2  ;;  %v4822_v62 = vshrl.u32 %v4789_v25, 16  ;;  %v4835_v21 = vld [vmem:[%s4599_s25 + $0x70] sm:$0xff]  }
  0x2e   : > { %4020 = vmatmul.mubr.msk.bf16.gmra.mrb[8].mxu0 %vm458_vm3, %v1483_v46  ;;  %v4807_v46 = vshrl.u32 %v4781_v13, 16  ;;  %5674 = vst [vmem:[#allocation8_spill] sm:$0xff] %v4813_v48  ;;  %v5637_v52 = vrot.slane %v4801_v39, 1  ;;  %v401_v61 = vsel %vm309_vm1, %v396_v33, %v400_v34  ;;  %v4825_v1 = vshll.u32 %v4798_v38, 16 }
  0x2f   : > { %4023 = vmatprep.mubr.msk.bf16.mxu0 %vm458_vm3, %v1487_v57  ;;  %5671 = vst [vmem:[#allocation5_spill] sm:$0xff] %v4804_v45  ;;  %5673 = vst [vmem:[#allocation7_spill] sm:$0xff] %v4810_v47  ;;  %v393_v57 = vsel %vm309_vm1, %v388_v32, %v392_v20  ;;  %v454_v60 = vshll.u32 %v4804_v45, 16  ;;  %v408_v20 = vrot.slane %v4813_v48, 1  ;;  %v1817_v24 = vsel %vm1814_vm4, %v1815_v58, %v1816_v59 }
  0x30   : > { %5672 = vst [vmem:[#allocation6_spill] sm:$0xff] %v4807_v46  ;;  %5675 = vst [vmem:[#allocation9_spill] sm:$0xff] %v4822_v62  ;;  %v4852_v58 = vshll.u32 %v4835_v21, 16  ;;  %v5685_v5 = vrot.slane %v4801_v39, 1  ;;  %v2367_v45 = vrot.slane %v4652_v40, 3  ;;  %v1830_v40 = vrot.slane %v4727_v23, 2 }
  0x31   : > { %5676 = vst [vmem:[#allocation10_spill] sm:$0xff] %v4825_v1  ;;  %v412_v33 = vor.u32 %v4822_v62, %v408_v20 }
  0x32   : > { %5677 = vst [vmem:[#allocation11_spill] sm:$0xff] %v4852_v58 }
  0x34   : > { %3872 = vmatmul.mubr.msk.bf16.gmra.mrb[12].mxu1 %vm458_vm3, %v377_v11  ;;  %v452_v11 = vor.u32 %v4807_v46, %v5637_v52  ;;  %v4861_v52 = vshrl.u32 %v4835_v21, 16 }
  0x35   : > { %3875 = vmatprep.mubr.msk.bf16.mxu1 %vm458_vm3, %v385_v12  ;;  %v456_v12 = vrot.slane %v454_v60, 1  ;;  %v1818_v60 = vrot.slane %v4623_v17, 2 }
  0x36   : > { %4024 = vmatmul.mubr.msk.bf16.gmra.mrb[12].mxu0 %vm458_vm3, %v1491_v19  ;;  %v1499_v19 = vsel %vm1456_vm2, %v1494_v8, %v4810_v47  ;;  %v4846_v8 = vld [vmem:[%s4599_s25 + $0x78] sm:$0xff]   ;;  %5679 = vst [vmem:[#allocation13_spill] sm:$0xff] %v4861_v52  ;;  %v4873_v47 = vld [vmem:[%s4599_s25 + $0x80] sm:$0xff]  }
  0x37   : > { %4027 = vmatprep.mubr.msk.bf16.mxu0 %vm458_vm3, %v1495_v29  ;;  %v404_v29 = vor.u32 %v4776_v10, %v400_v34  ;;  %v4841_v32 = vsel %vm309_vm1, %v452_v11, %v456_v12  ;;  %v4857_v11 = vshrl.u32 %v4798_v38, 16  ;;  %v2366_v10 = vrot.slane %v4661_v44, 2 }
  0x38   : > { %v2370_v44 = vrot.slane %v4682_v53, 2 }
  0x39   : > { %v409_v34 = vsel %vm309_vm1, %v404_v29, %v408_v20  ;;  %5678 = vst [vmem:[#allocation12_spill] sm:$0xff] %v4857_v11  ;;  %v4869_v20 = vsel %vm1814_vm4, %v1816_v59, %v1818_v60  ;;  %v424_v29 = vrot.slane %v4852_v58, 1  ;;  %v4889_v58 = vld [vmem:[%s5634_s1 + $0xe] sm:$0x3] }
  0x3c   : > { %3876 = vmatmul.mubr.msk.bf16.gmra.mrb[16].mxu1 %vm458_vm3, %v393_v57  ;;  %v416_v57 = vrot.slane %v4825_v1, 1  ;;  %v428_v1 = vor.u32 %v4861_v52, %v424_v29  ;;  %v4909_v52 = vshrl.u32 %v4846_v8, 16 }
  0x3d   : > { %3879 = vmatprep.mubr.msk.bf16.mxu1 %vm458_vm3, %v401_v61  ;;  %v1820_v61 = vrot.slane %v4626_v18, 2 }
  0x3e   : > { %4028 = vmatmul.mubr.msk.bf16.gmra.mrb[16].mxu0 %vm458_vm3, %v1499_v19  ;;  %v417_v12 = vsel %vm309_vm1, %v412_v33, %v416_v57  ;;  %v4864_v19 = vshll.u32 %v4846_v8, 16  ;;  %v2141_v33 = vsel %vm513_vm0, %v4677_v51, 0  ;;  %v420_v2 = vor.u32 %v4857_v11, %v416_v57  ;;  %v4894_v51 = vld [vmem:[%s4599_s25 + $0x98] sm:$0xf]  ;;  %5683 = vst [vmem:[#allocation17_spill] sm:$0xff] %v4909_v52 }
  0x3f   : > { %4049 = vmatprep.mubr.msk.bf16.mxu0 %vm458_vm3, %v1817_v24  ;;  %v209_v24 = vld [vmem:[%s4599_s25 + $0x94] sm:$0xf]  ;;  %v4879_v46 = vsel %vm1814_vm4, %v1818_v60, %v1820_v61  ;;  %v211_v60 = vld [vmem:[%s4599_s25 + $0x9c] sm:$0xf]  ;;  %v1822_v57 = vrot.slane %v4638_v31, 2  ;;  %v4915_v11 = vshrl.u32 %v4873_v47, 16 }
  0x40   : > { %5680 = vst [vmem:[#allocation14_spill] sm:$0xff] %v4864_v19  ;;  %v4884_v59 = vcombine.low %v208_v27, %v209_v24  ;;  %v4901_v27 = vshll.u32 %v4873_v47, 16  ;;  %v425_v24 = vsel %vm309_vm1, %v420_v2, %v424_v29 }
  0x41   : > { %5684 = vst [vmem:[#allocation18_spill] sm:$0xff] %v4915_v11  ;;  %v4923_v2 = vsel %vm1814_vm4, %v1820_v61, %v1822_v57  ;;  %v2359_v61 = vrot.slane %v4620_v16, 2 }
  0x42   : > { %5681 = vst [vmem:[#allocation15_spill] sm:$0xff] %v4884_v59  ;;  %5682 = vst [vmem:[#allocation16_spill] sm:$0xff] %v4901_v27  ;;  %v4918_v48 = vrot.slane %v4884_v59, 2  ;;  %v440_v29 = vrot.slane %v4901_v27, 1  ;;  %v2360_v27 = vrot.slane %v4617_v15, 3 }
  0x44   : > { %3880 = vmatmul.mubr.msk.bf16.gmra.mrb[20].mxu1 %vm458_vm3, %v409_v34  ;;  %v432_v34 = vrot.slane %v4864_v19, 1  ;;  %v1824_v19 = vrot.slane %v4655_v41, 2 }
  0x45   : > { %3883 = vmatprep.mubr.msk.bf16.mxu1 %vm458_vm3, %v417_v12  ;;  %v4904_v12 = vcombine.low %v4894_v51, %v211_v60 }
  0x46   : > { %4050 = vmatmul.mubr.msk.bf16.vlgmr.msra.gmra.mrb[0].mxu0 %vm458_vm3, %v4869_v20  ;;  %v4934_v59 = vsel %vm1814_vm4, %v1822_v57, %v1824_v19  ;;  %v436_v62 = vor.u32 %v4909_v52, %v432_v34  ;;  %v2363_v57 = vrot.slane %v4632_v26, 3  ;;  %v2361_v52 = vor.u32 %v2360_v27, %v2359_v61 }
  0x47   : > { %4086 = vmatpush3.bf16.msra.mxu0 %v2141_v33  ;;  %4053 = vmatprep.mubr.msk.bf16.mxu0 %vm458_vm3, %v4879_v46  ;;  %v433_v33 = vsel %vm309_vm1, %v428_v1, %v432_v34  ;;  %v5660_v60 = vrot.slane %v4904_v12, 2  ;;  %v1836_v61 = vrot.slane %v4789_v25, 2 }
  0x48   : > { %4497 = vmatprep.subr.msk.bf16.mxu0 %vm513_vm0, %v4889_v58  ;;  %v441_v34 = vsel %vm309_vm1, %v436_v62, %v440_v29  ;;  %v2368_v62 = vor.u32 %v2367_v45, %v2366_v10  ;;  %v2371_v10 = vrot.slane %v4669_v49, 3  ;;  %v1832_v45 = vrot.slane %v4734_v28, 2 }
  0x49   : > { %v4930_v1 = vsel %vm1814_vm4, %v4918_v48, %v5660_v60  ;;  %v1826_v60 = vrot.slane %v4672_v50, 2 }
  0x4a   : > { %v4989_v49 = vsel %vm1814_vm4, %v1830_v40, %v1832_v45 }
  0x4c   : > { %3884 = vmatmul.mubr.msk.bf16.gmra.mrb[24].mxu1 %vm458_vm3, %v425_v24  ;;  %v444_v24 = vor.u32 %v4915_v11, %v440_v29  ;;  %v1828_v11 = vrot.slane %v4700_v63, 2 }
  0x4d   : > { %3887 = vmatprep.mubr.msk.bf16.mxu1 %vm458_vm3, %v433_v33  ;;  %v2362_v33 = vrot.slane %v4635_v30, 2  ;;  %v4956_v30 = vsel %vm1814_vm4, %v1824_v19, %v1826_v60  ;;  %v2374_v19 = vrot.slane %v4688_v55, 2  ;;  %v2378_v55 = vrot.slane %v4707_v4, 2  ;;  %v5009_v4 = vld [vmem:[%s5634_s1 + $0x6] sm:$0x3] }
  0x4e   : > { %4054 = vmatmul.mubr.msk.bf16.gmra.mrb[4].mxu0 %vm458_vm3, %v4923_v2  ;;  %v449_v16 = vsel %vm309_vm1, %v444_v24, %v5685_v5  ;;  %v4963_v27 = vsel %vm1814_vm4, %v1826_v60, %v1828_v11  ;;  %v2375_v60 = vrot.slane %v4685_v54, 3  ;;  %v4981_v29 = vsel %vm1814_vm4, %v1828_v11, %v1830_v40 }
  0x4f   : > { %4057 = vmatprep.mubr.msk.bf16.mxu0 %vm458_vm3, %v4934_v59  ;;  %v2364_v15 = vor.u32 %v2363_v57, %v2362_v33  ;;  %v1834_v11 = vrot.slane %v4761_v56, 2  ;;  %v1005_v57 = vsel %vm513_vm0, %v4646_v36, 0  ;;  %v2387_v40 = vrot.slane %v4742_v35, 3 }
  0x50   : > { %v2376_v53 = vor.u32 %v2375_v60, %v2374_v19  ;;  %v2391_v19 = vrot.slane %v4749_v42, 3 }
  0x51   : > { %v4959_v26 = vsel %vm2358_vm5, %v2361_v52, %v2364_v15  ;;  %v4966_v5 = vsel %vm2358_vm5, %v2364_v15, %v2368_v62  ;;  %v2372_v52 = vor.u32 %v2371_v10, %v2370_v44  ;;  %v5017_v15 = vsel %vm1814_vm4, %v1832_v45, %v1834_v11 }
  0x52   : > { %v5022_v36 = vsel %vm1814_vm4, %v1834_v11, %v1836_v61  ;;  %v1838_v44 = vrot.slane %v4798_v38, 2  ;;  %v1840_v10 = vrot.slane %v4835_v21, 2 }
  0x53   : > { %v4984_v24 = vsel %vm2358_vm5, %v2368_v62, %v2372_v52  ;;  %v4994_v54 = vsel %vm2358_vm5, %v2372_v52, %v2376_v53  ;;  %v2390_v52 = vrot.slane %v4752_v43, 2  ;;  %v1842_v43 = vrot.slane %v4846_v8, 2 }
  0x54   : > { %3888 = vmatmul.mubr.msk.bf16.gmra.mrb[28].mxu1 %vm458_vm3, %v441_v34  ;;  %v2382_v34 = vrot.slane %v4724_v22, 2  ;;  %v2386_v22 = vrot.slane %v4745_v37, 2  ;;  %v5045_v35 = vsel %vm1814_vm4, %v1836_v61, %v1838_v44  ;;  %v1846_v61 = vrot.slane %v4781_v13, 2 }
  0x55   : > { %3891 = vmatprep.mubr.msk.bf16.mxu1 %vm458_vm3, %v449_v16  ;;  %v2383_v16 = vrot.slane %v4717_v14, 3  ;;  %v5047_v37 = vor.u32 %v2391_v19, %v2390_v52  ;;  %v5214_v52 = vld [vmem:[%s4599_s25 + $0xa0] ss:$0 sps:$4 sm:$0xff]   ;;  %v932_v19 = vrot.slane %v4734_v28, 1 }
  0x56   : > { %4058 = vmatmul.mubr.msk.bf16.gmra.mrb[8].mxu0 %vm458_vm3, %v4956_v30  ;;  %v2388_v45 = vor.u32 %v2387_v40, %v2386_v22  ;;  %v928_v40 = vrot.slane %v4700_v63, 1 }
  0x57   : > { %4061 = vmatprep.mubr.msk.bf16.mxu0 %vm458_vm3, %v4963_v27  ;;  %v2384_v62 = vor.u32 %v2383_v16, %v2382_v34  ;;  %v5092_v34 = vsel %vm1814_vm4, %v1846_v61, %v4918_v48 }
  0x58   : > { %v5056_v42 = vsel %vm2358_vm5, %v2388_v45, %v5047_v37 }
  0x59   : > { %v5040_v60 = vsel %vm2358_vm5, %v2384_v62, %v2388_v45 }
  0x5c   : > { %3892 = vmatmul.mubr.msk.bf16.gmra.mrb[32].mxu1 %vm458_vm3, %v4841_v32  ;;  %v2379_v32 = vrot.slane %v4704_v3, 3 }
  0x5d   : > { %3897 = vmatprep.mubr.msk.bf16.mxu1 %vm458_vm3, %v4602_v6 }
  0x5e   : > { %4062 = vmatmul.mubr.msk.bf16.gmra.mrb[12].mxu0 %vm458_vm3, %v4981_v29  ;;  %v2380_v33 = vor.u32 %v2379_v32, %v2378_v55  ;;  %v1844_v55 = vrot.slane %v4873_v47, 2  ;;  %v5067_v32 = vsel %vm1814_vm4, %v1840_v10, %v1842_v43 }
  0x5f   : > { %4065 = vmatprep.mubr.msk.bf16.mxu0 %vm458_vm3, %v4989_v49 }
  0x60   : > { %v5012_v3 = vsel %vm2358_vm5, %v2376_v53, %v2380_v33  ;;  %v5027_v14 = vsel %vm2358_vm5, %v2380_v33, %v2384_v62  ;;  %v5052_v53 = vsel %vm1814_vm4, %v1838_v44, %v1840_v10  ;;  %v5072_v11 = vsel %vm1814_vm4, %v1842_v43, %v1844_v55 }
  0x61   : > { %v5082_v33 = vsel %vm1814_vm4, %v1844_v55, %v1846_v61  ;;  %v2499_v62 = vsel %vm513_vm0, %v4889_v58, 0  ;;  %v914_v58 = vrot.slane %v4605_v7, 1  ;;  %v930_v44 = vrot.slane %v4727_v23, 1 }
  0x62   : > { %v938_v61 = vrot.slane %v4798_v38, 1 }
  0x63   : > { %v5209_v45 = vsel %vm912_vm6, %v928_v40, %v930_v44  ;;  %v5226_v43 = vsel %vm912_vm6, %v930_v44, %v932_v19 }
  0x64   : > { %3898 = vmatmul.mubr.msk.bf16.vlgmr.msra.gmra.mrb[0].mxu1 %vm458_vm3, %v4605_v7 }
  0x65   : > { %3901 = vmatprep.mubr.msk.bf16.mxu1 %vm458_vm3, %v4609_v9  ;;  %3934 = vmatpush3.bf16.msra.mxu1 %v1005_v57  ;;  %v5086_v57 = vcombine.low %v4894_v51, %v4894_v51 }
  0x66   : > { %4492 = vmatprep.subr.msk.bf16.mxu1 %vm513_vm0, %v5009_v4  ;;  %4066 = vmatmul.mubr.msk.bf16.gmra.mrb[16].mxu0 %vm458_vm3, %v5017_v15 }
  0x67   : > { %4069 = vmatprep.mubr.msk.bf16.mxu0 %vm458_vm3, %v5022_v36  ;;  %v1850_v16 = vrot.slane %v5086_v57, 2 }
  0x69   : > { %v1851_v51 = vsel %vm1814_vm4, %v4918_v48, %v1850_v16  ;;  %v5117_v48 = vld [vmem:[%s5634_s1 + $0x10] sm:$0x3] }
  0x6a   : > { %v2809_v16 = vsel %vm513_vm0, %v5117_v48, 0 }
  0x6c   : > { %3902 = vmatmul.mubr.msk.bf16.gmra.mrb[4].mxu1 %vm458_vm3, %v4623_v17 }
  0x6d   : > { %3905 = vmatprep.mubr.msk.bf16.mxu1 %vm458_vm3, %v4626_v18 }
  0x6e   : > { %4070 = vmatmul.mubr.msk.bf16.gmra.mrb[20].mxu0 %vm458_vm3, %v5045_v35 }
  0x6f   : > { %4073 = vmatprep.mubr.msk.bf16.mxu0 %vm458_vm3, %v5052_v53 }
  0x74   : > { %3906 = vmatmul.mubr.msk.bf16.gmra.mrb[8].mxu1 %vm458_vm3, %v4638_v31 }
  0x75   : > { %3909 = vmatprep.mubr.msk.bf16.mxu1 %vm458_vm3, %v4655_v41 }
  0x76   : > { %4074 = vmatmul.mubr.msk.bf16.gmra.mrb[24].mxu0 %vm458_vm3, %v5067_v32 }
  0x77   : > { %4077 = vmatprep.mubr.msk.bf16.mxu0 %vm458_vm3, %v5072_v11 }
  0x7c   : > { %3910 = vmatmul.mubr.msk.bf16.gmra.mrb[12].mxu1 %vm458_vm3, %v4672_v50 }
  0x7d   : > { %3913 = vmatprep.mubr.msk.bf16.mxu1 %vm458_vm3, %v4700_v63 }
  0x7e   : > { %4078 = vmatmul.mubr.msk.bf16.gmra.mrb[28].mxu0 %vm458_vm3, %v5082_v33 }
  0x7f   : > { %4081 = vmatprep.mubr.msk.bf16.mxu0 %vm458_vm3, %v5092_v34 }
  0x84   : > { %3914 = vmatmul.mubr.msk.bf16.gmra.mrb[16].mxu1 %vm458_vm3, %v4727_v23 }
  0x85   : > { %3917 = vmatprep.mubr.msk.bf16.mxu1 %vm458_vm3, %v4734_v28 }
  0x86   : > { %4082 = vmatmul.mubr.msk.bf16.gmra.mrb[32].mxu0 %vm458_vm3, %v1851_v51  ;;  %v940_v51 = vrot.slane %v4835_v21, 1 }
  0x87   : > { %4087 = vmatprep.mubr.msk.bf16.mxu0 %vm458_vm3, %v4869_v20 }
  0x8c   : > { %3918 = vmatmul.mubr.msk.bf16.gmra.mrb[20].mxu1 %vm458_vm3, %v4761_v56 }
  0x8d   : > { %3921 = vmatprep.mubr.msk.bf16.mxu1 %vm458_vm3, %v4789_v25 }
  0x8e   : > { %4088 = vmatmul.mubr.msk.bf16.vlgmr.msra.gmra.mrb[0].mxu0 %vm458_vm3, %v4879_v46  ;;  %v913_v46 = vrot.slane %v4602_v6, 1  ;;  %v918_v6 = vrot.slane %v4623_v17, 1 }
  0x8f   : > { %4124 = vmatpush3.bf16.msra.mxu0 %v2499_v62  ;;  %4091 = vmatprep.mubr.msk.bf16.mxu0 %vm458_vm3, %v4923_v2  ;;  %v942_v62 = vrot.slane %v4846_v8, 1 }
  0x90   : > { %4498 = vmatprep.subr.msk.bf16.mxu0 %vm513_vm0, %v5117_v48  ;;  %v915_v20 = vsel %vm912_vm6, %v913_v46, %v914_v58  ;;  %v944_v48 = vrot.slane %v4873_v47, 1 }
  0x91   : > { %v5265_v46 = vsel %vm912_vm6, %v940_v51, %v942_v62 }
  0x94   : > { %3922 = vmatmul.mubr.msk.bf16.gmra.mrb[24].mxu1 %vm458_vm3, %v4798_v38 }
  0x95   : > { %3925 = vmatprep.mubr.msk.bf16.mxu1 %vm458_vm3, %v4835_v21 }
  0x96   : > { %4092 = vmatmul.mubr.msk.bf16.gmra.mrb[4].mxu0 %vm458_vm3, %v4934_v59  ;;  %v916_v59 = vrot.slane %v4609_v9, 1 }
  0x97   : > { %4095 = vmatprep.mubr.msk.bf16.mxu0 %vm458_vm3, %v4956_v30  ;;  %v1239_v30 = vsel %vm513_vm0, %v5009_v4, 0 }
  0x98   : > { %v5154_v7 = vsel %vm912_vm6, %v914_v58, %v916_v59  ;;  %v5157_v2 = vsel %vm912_vm6, %v916_v59, %v918_v6 }
  0x9c   : > { %3926 = vmatmul.mubr.msk.bf16.gmra.mrb[28].mxu1 %vm458_vm3, %v4846_v8 }
  0x9d   : > { %3929 = vmatprep.mubr.msk.bf16.mxu1 %vm458_vm3, %v4873_v47 }
  0x9e   : > { %4096 = vmatmul.mubr.msk.bf16.gmra.mrb[8].mxu0 %vm458_vm3, %v4963_v27  ;;  %v920_v27 = vrot.slane %v4626_v18, 1 }
  0x9f   : > { %4099 = vmatprep.mubr.msk.bf16.mxu0 %vm458_vm3, %v4981_v29  ;;  %v922_v29 = vrot.slane %v4638_v31, 1 }
  0xa1   : > { %v5177_v4 = vsel %vm912_vm6, %v920_v27, %v922_v29 }
  0xa4   : > { %3930 = vmatmul.mubr.msk.bf16.gmra.mrb[32].mxu1 %vm458_vm3, %v4781_v13 }
  0xa5   : > { %3935 = vmatprep.mubr.msk.bf16.mxu1 %vm458_vm3, %v915_v20  ;;  %v5687_v20 = vld [vmem:[#allocation5_spill] sm:$0xff] }
  0xa6   : > { %4100 = vmatmul.mubr.msk.bf16.gmra.mrb[12].mxu0 %vm458_vm3, %v4989_v49  ;;  %v5174_v49 = vsel %vm912_vm6, %v918_v6, %v920_v27  ;;  %v948_v59 = vrot.slane %v5687_v20, 1  ;;  %v5688_v6 = vld [vmem:[#allocation4_spill] sm:$0xff]  ;;  %v5698_v20 = vld [vmem:[#allocation14_spill] sm:$0xff] }
  0xa7   : > { %4103 = vmatprep.mubr.msk.bf16.mxu0 %vm458_vm3, %v5017_v15  ;;  %v926_v15 = vrot.slane %v4672_v50, 1 }
  0xa9   : > { %v5206_v10 = vsel %vm912_vm6, %v926_v15, %v928_v40  ;;  %v5691_v40 = vld [vmem:[#allocation8_spill] sm:$0xff] }
  0xaa   : > { %v2399_v44 = vrot.slane %v5691_v40, 3 }
  0xac   : > { %3936 = vmatmul.mubr.msk.bf16.vlgmr.msra.gmra.mrb[0].mxu1 %vm458_vm3, %v5154_v7 }
  0xad   : > { %3939 = vmatprep.mubr.msk.bf16.mxu1 %vm458_vm3, %v5157_v2  ;;  %3972 = vmatpush3.bf16.msra.mxu1 %v1239_v30  ;;  %v5689_v30 = vld [vmem:[#allocation3_spill] sm:$0xff] }
  0xae   : > { %4494 = vmatprep.subr.msk.bf16.mxu1 %vm513_vm0, %v4571_v0  ;;  %4104 = vmatmul.mubr.msk.bf16.gmra.mrb[16].mxu0 %vm458_vm3, %v5022_v36  ;;  %v924_v0 = vrot.slane %v4655_v41, 1  ;;  %v2395_v27 = vrot.slane %v5689_v30, 3 }
  0xaf   : > { %4107 = vmatprep.mubr.msk.bf16.mxu0 %vm458_vm3, %v5045_v35  ;;  %v934_v35 = vrot.slane %v4761_v56, 1 }
  0xb0   : > { %v5190_v36 = vsel %vm912_vm6, %v922_v29, %v924_v0  ;;  %v5193_v22 = vsel %vm912_vm6, %v924_v0, %v926_v15  ;;  %v5690_v0 = vld [vmem:[#allocation9_spill] sm:$0xff] }
  0xb1   : > { %v5229_v55 = vsel %vm912_vm6, %v932_v19, %v934_v35  ;;  %v2398_v15 = vrot.slane %v5690_v0, 2 }
  0xb4   : > { %3940 = vmatmul.mubr.msk.bf16.gmra.mrb[4].mxu1 %vm458_vm3, %v5174_v49 }
  0xb5   : > { %3943 = vmatprep.mubr.msk.bf16.mxu1 %vm458_vm3, %v5177_v4 }
  0xb6   : > { %4108 = vmatmul.mubr.msk.bf16.gmra.mrb[20].mxu0 %vm458_vm3, %v5052_v53  ;;  %v2132_v53 = vrot.slane %v5214_v52, 2 }
  0xb7   : > { %4111 = vmatprep.mubr.msk.bf16.mxu0 %vm458_vm3, %v5067_v32  ;;  %v5686_v32 = vrot.slane %v4904_v12, 2 }
  0xbc   : > { %3944 = vmatmul.mubr.msk.bf16.gmra.mrb[8].mxu1 %vm458_vm3, %v5190_v36 }
  0xbd   : > { %3947 = vmatprep.mubr.msk.bf16.mxu1 %vm458_vm3, %v5193_v22 }
  0xbe   : > { %4112 = vmatmul.mubr.msk.bf16.gmra.mrb[24].mxu0 %vm458_vm3, %v5072_v11  ;;  %v2133_v11 = vsel %vm1814_vm4, %v5686_v32, %v2132_v53  ;;  %v5693_v53 = vld [vmem:[#allocation10_spill] sm:$0xff]  ;;  %v2400_v32 = vor.u32 %v2399_v44, %v2398_v15 }
  0xbf   : > { %4115 = vmatprep.mubr.msk.bf16.mxu0 %vm458_vm3, %v5082_v33  ;;  %v5701_v15 = vld [vmem:[#allocation6_spill] sm:$0xff] }
  0xc0   : > { %v2418_v44 = vrot.slane %v5701_v15, 2 }
  0xc4   : > { %3948 = vmatmul.mubr.msk.bf16.gmra.mrb[12].mxu1 %vm458_vm3, %v5206_v10 }
  0xc5   : > { %3951 = vmatprep.mubr.msk.bf16.mxu1 %vm458_vm3, %v5209_v45 }
  0xc6   : > { %4116 = vmatmul.mubr.msk.bf16.gmra.mrb[28].mxu0 %vm458_vm3, %v5092_v34 }
  0xc7   : > { %4119 = vmatprep.mubr.msk.bf16.mxu0 %vm458_vm3, %v4930_v1  ;;  %v936_v1 = vrot.slane %v4789_v25, 1 }
  0xc9   : > { %v5244_v33 = vsel %vm912_vm6, %v934_v35, %v936_v1  ;;  %v5247_v34 = vsel %vm912_vm6, %v936_v1, %v938_v61 }
  0xcc   : > { %3952 = vmatmul.mubr.msk.bf16.gmra.mrb[16].mxu1 %vm458_vm3, %v5226_v43 }
  0xcd   : > { %3955 = vmatprep.mubr.msk.bf16.mxu1 %vm458_vm3, %v5229_v55 }
  0xce   : > { %4120 = vmatmul.mubr.msk.bf16.gmra.mrb[32].mxu0 %vm458_vm3, %v2133_v11 }
  0xcf   : > { %4125 = vmatprep.mubr.msk.bf16.mxu0 %vm458_vm3, %v4959_v26  ;;  %v5262_v26 = vsel %vm912_vm6, %v938_v61, %v940_v51 }
  0xd4   : > { %3956 = vmatmul.mubr.msk.bf16.gmra.mrb[20].mxu1 %vm458_vm3, %v5244_v33 }
  0xd5   : > { %3959 = vmatprep.mubr.msk.bf16.mxu1 %vm458_vm3, %v5247_v34 }
  0xd6   : > { %4126 = vmatmul.mubr.msk.bf16.vlgmr.msra.gmra.mrb[0].mxu0 %vm458_vm3, %v4966_v5  ;;  %v5273_v5 = vrot.slane %v4781_v13, 1 }
  0xd7   : > { %4162 = vmatpush3.bf16.msra.mxu0 %v2809_v16  ;;  %4129 = vmatprep.mubr.msk.bf16.mxu0 %vm458_vm3, %v4984_v24  ;;  %v5280_v24 = vsel %vm912_vm6, %v942_v62, %v944_v48  ;;  %v5695_v16 = vld [vmem:[#allocation11_spill] sm:$0xff]  ;;  %v5696_v62 = vld [vmem:[#allocation2_spill] sm:$0xff] }
  0xd8   : > { %v5284_v58 = vsel %vm912_vm6, %v944_v48, %v5273_v5 }
  0xdc   : > { %3960 = vmatmul.mubr.msk.bf16.gmra.mrb[24].mxu1 %vm458_vm3, %v5262_v26 }
  0xdd   : > { %3963 = vmatprep.mubr.msk.bf16.mxu1 %vm458_vm3, %v5265_v46 }
  0xde   : > { %4130 = vmatmul.mubr.msk.bf16.gmra.mrb[4].mxu0 %vm458_vm3, %v4994_v54  ;;  %v2394_v54 = vrot.slane %v5688_v6, 2 }
  0xdf   : > { %4133 = vmatprep.mubr.msk.bf16.mxu0 %vm458_vm3, %v5012_v3  ;;  %v949_v3 = vsel %vm912_vm6, %v5273_v5, %v948_v59  ;;  %v2411_v59 = vrot.slane %v5698_v20, 3 }
  0xe0   : > { %v2396_v29 = vor.u32 %v2395_v27, %v2394_v54  ;;  %v5700_v27 = vld [vmem:[#allocation16_spill] sm:$0xff] }
  0xe2   : > { %v2397_v19 = vsel %vm2358_vm5, %v5047_v37, %v2396_v29  ;;  %v2401_v1 = vsel %vm2358_vm5, %v2396_v29, %v2400_v32  ;;  %v2407_v37 = vrot.slane %v5695_v16, 3 }
  0xe4   : > { %3964 = vmatmul.mubr.msk.bf16.gmra.mrb[28].mxu1 %vm458_vm3, %v5280_v24 }
  0xe5   : > { %3967 = vmatprep.mubr.msk.bf16.mxu1 %vm458_vm3, %v5284_v58 }
  0xe6   : > { %4134 = vmatmul.mubr.msk.bf16.gmra.mrb[8].mxu0 %vm458_vm3, %v5027_v14  ;;  %v5692_v14 = vld [vmem:[#allocation12_spill] sm:$0xff] }
  0xe7   : > { %4137 = vmatprep.mubr.msk.bf16.mxu0 %vm458_vm3, %v5040_v60  ;;  %v2402_v35 = vrot.slane %v5692_v14, 2  ;;  %v2403_v60 = vrot.slane %v5693_v53, 3 }
  0xe9   : > { %v2404_v11 = vor.u32 %v2403_v60, %v2402_v35  ;;  %v5702_v35 = vld [vmem:[#allocation15_spill] sm:$0xff] }
  0xea   : > { %v1525_v60 = vshrl.u32 %v5702_v35, 16 }
  0xeb   : > { %v2405_v51 = vsel %vm2358_vm5, %v2400_v32, %v2404_v11  ;;  %v1528_v32 = vshll.u32 %v5702_v35, 16 }
  0xec   : > { %3968 = vmatmul.mubr.msk.bf16.gmra.mrb[32].mxu1 %vm458_vm3, %v949_v3  ;;  %v2415_v3 = vrot.slane %v5700_v27, 3 }
  0xed   : > { %3973 = vmatprep.mubr.msk.bf16.mxu1 %vm458_vm3, %v5154_v7  ;;  %v5694_v7 = vld [vmem:[#allocation13_spill] sm:$0xff] }
  0xee   : > { %4138 = vmatmul.mubr.msk.bf16.gmra.mrb[12].mxu0 %vm458_vm3, %v5056_v42  ;;  %v2406_v61 = vrot.slane %v5694_v7, 2  ;;  %v5697_v42 = vld [vmem:[#allocation17_spill] sm:$0xff] }
  0xef   : > { %4141 = vmatprep.mubr.msk.bf16.mxu0 %vm458_vm3, %v2397_v19  ;;  %v2410_v48 = vrot.slane %v5697_v42, 2  ;;  %v2419_v19 = vrot.slane %v4801_v39, 3 }
  0xf1   : > { %v2412_v6 = vor.u32 %v2411_v59, %v2410_v48 }
  0xf4   : > { %3974 = vmatmul.mubr.msk.bf16.vlgmr.msra.gmra.mrb[0].mxu1 %vm458_vm3, %v5157_v2  ;;  %v2408_v2 = vor.u32 %v2407_v37, %v2406_v61  ;;  %v2422_v37 = vrot.slane %v1525_v60, 2 }
  0xf5   : > { %3977 = vmatprep.mubr.msk.bf16.mxu1 %vm458_vm3, %v5174_v49  ;;  %4200 = vmatpush3.bf16.msra.mxu1 %v5696_v62  ;;  %v5699_v49 = vld [vmem:[#allocation18_spill] sm:$0xff] }
  0xf6   : > { %4142 = vmatmul.mubr.msk.bf16.gmra.mrb[16].mxu0 %vm458_vm3, %v2401_v1  ;;  %v2409_v54 = vsel %vm2358_vm5, %v2404_v11, %v2408_v2  ;;  %v2414_v30 = vrot.slane %v5699_v49, 2  ;;  %v2413_v29 = vsel %vm2358_vm5, %v2408_v2, %v2412_v6  ;;  %v2420_v11 = vor.u32 %v2419_v19, %v2418_v44 }
  0xf7   : > { %4145 = vmatprep.mubr.msk.bf16.mxu0 %vm458_vm3, %v2405_v51  ;;  %v2427_v1 = vshrl.u32 %v4904_v12, 16  ;;  %v2423_v51 = vrot.slane %v1528_v32, 3  ;;  %v2436_v2 = vshrl.u32 %v5214_v52, 16  ;;  %v2717_v19 = vrot.slane %v4609_v9, 3 }
  0xf8   : > { %v2722_v9 = vrot.slane %v4638_v31, 3 }
  0xf9   : > { %v2429_v48 = vrot.slane %v2427_v1, 2  ;;  %v1500_v1 = vrot.slane %v5690_v0, 1  ;;  %v2734_v0 = vrot.slane %v4761_v56, 3 }
  0xfc   : > { %3978 = vmatmul.mubr.msk.bf16.gmra.mrb[4].mxu1 %vm458_vm3, %v5177_v4  ;;  %v2416_v4 = vor.u32 %v2415_v3, %v2414_v30 }
  0xfd   : > { %3981 = vmatprep.mubr.msk.bf16.mxu1 %vm458_vm3, %v5190_v36  ;;  %v2430_v36 = vshll.u32 %v4904_v12, 16 }
  0xfe   : > { %4146 = vmatmul.mubr.msk.bf16.gmra.mrb[20].mxu0 %vm458_vm3, %v2409_v54  ;;  %v2417_v61 = vsel %vm2358_vm5, %v2412_v6, %v2416_v4  ;;  %v2421_v62 = vsel %vm2358_vm5, %v2416_v4, %v2420_v11  ;;  %v2439_v6 = vshll.u32 %v5214_v52, 16  ;;  %v2718_v4 = vrot.slane %v4623_v17, 3 }
  0xff   : > { %4149 = vmatprep.mubr.msk.bf16.mxu0 %vm458_vm3, %v2413_v29  ;;  %v2432_v59 = vrot.slane %v2430_v36, 3  ;;  %v1501_v36 = vrot.slane %v5691_v40, 2  ;;  %v1505_v40 = vrot.slane %v5693_v53, 2 }
 0x100   : > { %v2441_v3 = vrot.slane %v2439_v6, 3  ;;  %v1513_v6 = vrot.slane %v5698_v20, 2 }
 0x101   : > { %v2433_v54 = vor.u32 %v2432_v59, %v2429_v48  ;;  %v1508_v48 = vrot.slane %v5694_v7, 1  ;;  %v1509_v59 = vrot.slane %v5695_v16, 2  ;;  %v2738_v7 = vrot.slane %v4798_v38, 3 }
 0x102   : > { %v1512_v16 = vrot.slane %v5697_v42, 1  ;;  %v2740_v42 = vrot.slane %v4835_v21, 3 }
 0x104   : > { %3982 = vmatmul.mubr.msk.bf16.gmra.mrb[8].mxu1 %vm458_vm3, %v5193_v22  ;;  %v2424_v22 = vor.u32 %v2423_v51, %v2422_v37  ;;  %v1502_v37 = vor.u32 %v1501_v36, %v1500_v1  ;;  %v5703_v51 = vld [vmem:[#allocation7_spill] sm:$0xff]  ;;  %v2741_v21 = vsel %vm2716_vm7, %v2738_v7, %v2740_v42 }
 0x105   : > { %3985 = vmatprep.mubr.msk.bf16.mxu1 %vm458_vm3, %v5206_v10  ;;  %v2438_v10 = vrot.slane %v2436_v2, 2  ;;  %v1510_v2 = vor.u32 %v1509_v59, %v1508_v48 }
 0x106   : > { %4150 = vmatmul.mubr.msk.bf16.gmra.mrb[24].mxu0 %vm458_vm3, %v2417_v61  ;;  %v2425_v30 = vsel %vm2358_vm5, %v2420_v11, %v2424_v22  ;;  %v2434_v29 = vsel %vm2358_vm5, %v2424_v22, %v2433_v54  ;;  %v2720_v11 = vrot.slane %v4626_v18, 3  ;;  %v2726_v18 = vrot.slane %v4672_v50, 3 }
 0x107   : > { %4153 = vmatprep.mubr.msk.bf16.mxu0 %vm458_vm3, %v2421_v62  ;;  %v2442_v44 = vor.u32 %v2441_v3, %v2438_v10  ;;  %v2730_v50 = vrot.slane %v4727_v23, 3  ;;  %v2732_v23 = vrot.slane %v4734_v28, 3  ;;  %v1503_v62 = vsel %vm1456_vm2, %v5703_v51, %v1502_v37 }
 0x108   : > { %v2721_v17 = vsel %vm2716_vm7, %v2718_v4, %v2720_v11  ;;  %v1517_v10 = vrot.slane %v5700_v27, 2  ;;  %v1520_v27 = vrot.slane %v5701_v15, 1  ;;  %v1534_v15 = vshrl.u32 %v5086_v57, 16 }
 0x109   : > { %v2733_v22 = vsel %vm2716_vm7, %v2730_v50, %v2732_v23  ;;  %v2735_v28 = vsel %vm2716_vm7, %v2732_v23, %v2734_v0 }
 0x10c   : > { %3986 = vmatmul.mubr.msk.bf16.gmra.mrb[12].mxu1 %vm458_vm3, %v5209_v45  ;;  %v2443_v45 = vsel %vm2358_vm5, %v2433_v54, %v2442_v44  ;;  %v1521_v44 = vrot.slane %v4801_v39, 2  ;;  %v1537_v39 = vshll.u32 %v5086_v57, 16 }
 0x10d   : > { %3989 = vmatprep.mubr.msk.bf16.mxu1 %vm458_vm3, %v5226_v43  ;;  %v2719_v43 = vsel %vm2716_vm7, %v2717_v19, %v2718_v4  ;;  %v1527_v4 = vrot.slane %v1525_v60, 1  ;;  %v2744_v60 = vrot.slane %v4873_v47, 3  ;;  %v2748_v47 = vrot.slane %v5702_v35, 3 }
 0x10e   : > { %4154 = vmatmul.mubr.msk.bf16.gmra.mrb[28].mxu0 %vm458_vm3, %v2425_v30  ;;  %v1516_v30 = vrot.slane %v5699_v49, 1  ;;  %v2742_v49 = vrot.slane %v4846_v8, 3 }
 0x10f   : > { %4157 = vmatprep.mubr.msk.bf16.mxu0 %vm458_vm3, %v2434_v29  ;;  %v1514_v29 = vor.u32 %v1513_v6, %v1512_v16 }
 0x110   : > { %v1518_v38 = vor.u32 %v1517_v10, %v1516_v30  ;;  %v2743_v8 = vsel %vm2716_vm7, %v2740_v42, %v2742_v49 }
 0x111   : > { %v1515_v20 = vsel %vm1456_vm2, %v1510_v2, %v1514_v29 }
 0x112   : > { %v1519_v19 = vsel %vm1456_vm2, %v1514_v29, %v1518_v38 }
 0x114   : > { %3990 = vmatmul.mubr.msk.bf16.gmra.mrb[16].mxu1 %vm458_vm3, %v5229_v55  ;;  %v2723_v55 = vsel %vm2716_vm7, %v2720_v11, %v2722_v9 }
 0x115   : > { %3993 = vmatprep.mubr.msk.bf16.mxu1 %vm458_vm3, %v5244_v33  ;;  %v2724_v33 = vrot.slane %v4655_v41, 3  ;;  %v2728_v41 = vrot.slane %v4700_v63, 3  ;;  %v1230_v63 = vrot.slane %v5086_v57, 1 }
 0x116   : > { %4158 = vmatmul.mubr.msk.bf16.gmra.mrb[32].mxu0 %vm458_vm3, %v2443_v45  ;;  %v1530_v45 = vrot.slane %v1528_v32, 2 }
 0x117   : > { %4163 = vmatprep.mubr.msk.bf16.mxu0 %vm458_vm3, %v2719_v43  ;;  %v2725_v31 = vsel %vm2716_vm7, %v2722_v9, %v2724_v33  ;;  %v2731_v61 = vsel %vm2716_vm7, %v2728_v41, %v2730_v50  ;;  %v1522_v43 = vor.u32 %v1521_v44, %v1520_v27  ;;  %v2746_v9 = vrot.slane %v4781_v13, 3 }
 0x118   : > { %v1531_v11 = vor.u32 %v1530_v45, %v1527_v4  ;;  %v2752_v50 = vrot.slane %v5214_v52, 3 }
 0x119   : > { %v1523_v32 = vsel %vm1456_vm2, %v1518_v38, %v1522_v43  ;;  %v2747_v57 = vsel %vm2716_vm7, %v2744_v60, %v2746_v9 }
 0x11c   : > { %3994 = vmatmul.mubr.msk.bf16.gmra.mrb[20].mxu1 %vm458_vm3, %v5247_v34  ;;  %v2727_v34 = vsel %vm2716_vm7, %v2724_v33, %v2726_v18  ;;  %v1532_v33 = vsel %vm1456_vm2, %v1522_v43, %v1531_v11 }
 0x11d   : > { %3997 = vmatprep.mubr.msk.bf16.mxu1 %vm458_vm3, %v5262_v26  ;;  %v1228_v26 = vrot.slane %v5702_v35, 1 }
 0x11e   : > { %4164 = vmatmul.mubr.msk.bf16.vlgmr.msra.gmra.mrb[0].mxu0 %vm458_vm3, %v2721_v17  ;;  %v1536_v17 = vrot.slane %v1534_v15, 1 }
 0x11f   : > { %4167 = vmatprep.mubr.msk.bf16.mxu0 %vm458_vm3, %v2723_v55  ;;  %v1539_v55 = vrot.slane %v1537_v39, 2 }
 0x124   : > { %3998 = vmatmul.mubr.msk.bf16.gmra.mrb[24].mxu1 %vm458_vm3, %v5265_v46  ;;  %v1229_v46 = vsel %vm912_vm6, %v5273_v5, %v1228_v26  ;;  %v1231_v5 = vsel %vm912_vm6, %v1228_v26, %v1230_v63  ;;  %v2749_v26 = vsel %vm2716_vm7, %v2746_v9, %v2748_v47 }
 0x125   : > { %4001 = vmatprep.mubr.msk.bf16.mxu1 %vm458_vm3, %v5280_v24  ;;  %v2729_v24 = vsel %vm2716_vm7, %v2726_v18, %v2728_v41  ;;  %v2745_v18 = vsel %vm2716_vm7, %v2742_v49, %v2744_v60 }
 0x126   : > { %4168 = vmatmul.mubr.msk.bf16.gmra.mrb[4].mxu0 %vm458_vm3, %v2725_v31  ;;  %v1540_v31 = vor.u32 %v1539_v55, %v1536_v17 }
 0x127   : > { %4171 = vmatprep.mubr.msk.bf16.mxu0 %vm458_vm3, %v2727_v34  ;;  %v2750_v34 = vrot.slane %v4904_v12, 3 }
 0x128   : > { %v1541_v13 = vsel %vm1456_vm2, %v1531_v11, %v1540_v31 }
 0x129   : > { %v2751_v41 = vsel %vm2716_vm7, %v2748_v47, %v2750_v34 }
 0x12c   : > { %4002 = vmatmul.mubr.msk.bf16.gmra.mrb[28].mxu1 %vm458_vm3, %v5284_v58  ;;  %v1504_v58 = vrot.slane %v5692_v14, 1  ;;  %v2736_v14 = vrot.slane %v4789_v25, 3 }
 0x12d   : > { %4005 = vmatprep.mubr.msk.bf16.mxu1 %vm458_vm3, %v1229_v46  ;;  %v2753_v46 = vsel %vm2716_vm7, %v2750_v34, %v2752_v50 }
 0x12e   : > { %4172 = vmatmul.mubr.msk.bf16.gmra.mrb[8].mxu0 %vm458_vm3, %v2729_v24  ;;  %v1506_v56 = vor.u32 %v1505_v40, %v1504_v58  ;;  %v2737_v3 = vsel %vm2716_vm7, %v2734_v0, %v2736_v14  ;;  %v2739_v25 = vsel %vm2716_vm7, %v2736_v14, %v2738_v7 }
 0x12f   : > { %4175 = vmatprep.mubr.msk.bf16.mxu0 %vm458_vm3, %v2731_v61 }
 0x130   : > { %v1507_v53 = vsel %vm1456_vm2, %v1502_v37, %v1506_v56  ;;  %v1511_v54 = vsel %vm1456_vm2, %v1506_v56, %v1510_v2  ;;  %v5502_v2 = vld [vmem:[%s5635_s2] ss:$0 sm:$0xff] }
 0x134   : > { %4006 = vmatmul.mubr.msk.bf16.gmra.mrb[32].mxu1 %vm458_vm3, %v1231_v5 }
 0x135   : > { %4031 = vmatprep.mubr.msk.bf16.mxu1 %vm458_vm3, %v1503_v62 }
 0x136   : > { %4176 = vmatmul.mubr.msk.bf16.gmra.mrb[12].mxu0 %vm458_vm3, %v2733_v22 }
 0x137   : > { %4179 = vmatprep.mubr.msk.bf16.mxu0 %vm458_vm3, %v2735_v28 }
 0x13c   : > { %4032 = vmatmul.mubr.msk.bf16.vlgmr.msra.gmra.mrb[20].mxu1 %vm458_vm3, %v1507_v53 }
 0x13d   : > { %4035 = vmatprep.mubr.msk.bf16.mxu1 %vm458_vm3, %v1511_v54 }
 0x13e   : > { %4180 = vmatmul.mubr.msk.bf16.gmra.mrb[16].mxu0 %vm458_vm3, %v2737_v3 }
 0x13f   : > { %4183 = vmatprep.mubr.msk.bf16.mxu0 %vm458_vm3, %v2739_v25 }
 0x144   : > { %4036 = vmatmul.mubr.msk.bf16.gmra.mrb[24].mxu1 %vm458_vm3, %v1515_v20 }
 0x145   : > { %4039 = vmatprep.mubr.msk.bf16.mxu1 %vm458_vm3, %v1519_v19 }
 0x146   : > { %4184 = vmatmul.mubr.msk.bf16.gmra.mrb[20].mxu0 %vm458_vm3, %v2741_v21 }
 0x147   : > { %4187 = vmatprep.mubr.msk.bf16.mxu0 %vm458_vm3, %v2743_v8 }
 0x14c   : > { %4040 = vmatmul.mubr.msk.bf16.gmra.mrb[28].mxu1 %vm458_vm3, %v1523_v32 }
 0x14d   : > { %4043 = vmatprep.mubr.msk.bf16.mxu1 %vm458_vm3, %v1532_v33 }
 0x14e   : > { %4188 = vmatmul.mubr.msk.bf16.gmra.mrb[24].mxu0 %vm458_vm3, %v2745_v18 }
 0x14f   : > { %4191 = vmatprep.mubr.msk.bf16.mxu0 %vm458_vm3, %v2747_v57 }
 0x154   : > { %4044 = vmatmul.mubr.msk.bf16.gmra.mrb[32].mxu1 %vm458_vm3, %v1541_v13 }
 0x156   : > { %4192 = vmatmul.mubr.msk.bf16.gmra.mrb[28].mxu0 %vm458_vm3, %v2749_v26 }
 0x157   : > { %4195 = vmatprep.mubr.msk.bf16.mxu0 %vm458_vm3, %v2751_v41 }
 0x15e   : > { %4196 = vmatmul.mubr.msk.bf16.gmra.mrb[32].mxu0 %vm458_vm3, %v2753_v46 }
 0x1c7   : > { %v3975_v35 = vpop.f32.mrb[0].mxu1 }
 0x1c8   : > { %v1275_v1 = vpop.f32.mrb[1].mxu1 }
 0x1c9   : > { %v3976_v36 = vpop.f32.mrb[2].mxu1 }
 0x1ca   : > { %v1278_v12 = vpop.f32.mrb[3].mxu1 }
 0x1cf   : > { %v3979_v24 = vpop.f32.mrb[4].mxu1 }
 0x1d0   : > { %v1291_v61 = vpop.f32.mrb[5].mxu1 }
 0x1d1   : > { %v3980_v63 = vpop.f32.mrb[6].mxu1 }
 0x1d2   : > { %v1294_v37 = vpop.f32.mrb[7].mxu1 }
 0x1d7   : > { %v5475_v23 = vpop.f32.mrb[8].mxu1 }
 0x1d8   : > { %v5477_v5 = vpop.f32.mrb[9].mxu1 }
 0x1d9   : > { %v5479_v0 = vpop.f32.mrb[10].mxu1 }
 0x1da   : > { %v5481_v52 = vpop.f32.mrb[11].mxu1 }
 0x1df   : > { %v5483_v58 = vpop.f32.mrb[12].mxu1 }
 0x1e0   : > { %v5485_v40 = vpop.f32.mrb[13].mxu1 }
 0x1e1   : > { %v5487_v51 = vpop.f32.mrb[14].mxu1 }
 0x1e2   : > { %v5489_v62 = vpop.f32.mrb[15].mxu1 }
 0x1e7   : > { %v5491_v48 = vpop.f32.mrb[16].mxu1 }
 0x1e8   : > { %v5493_v59 = vpop.f32.mrb[17].mxu1 }
 0x1e9   : > { %v5495_v22 = vpop.f32.mrb[18].mxu1 }
 0x1ea   : > { %v5497_v28 = vpop.f32.mrb[19].mxu1 }
 0x1f1   : > { %v4165_v56 = vpop.f32.mrb[0].mxu0 }
 0x1f2   : > { %v4201_v14 = vadd.f32 %v4165_v56, %v3975_v35  ;;  %v2845_v53 = vpop.f32.mrb[1].mxu0 }
 0x1f3   : > { %v4202_v7 = vadd.f32 %v2845_v53, %v1275_v1  ;;  %v4166_v16 = vpop.f32.mrb[2].mxu0 }
 0x1f4   : > { %v3033_v6 = vadd.f32 %v4201_v14, %v5502_v2  ;;  %v4203_v54 = vadd.f32 %v4166_v16, %v3976_v36  ;;  %v2848_v30 = vpop.f32.mrb[3].mxu0 }
 0x1f5   : > { %v3031_v10 = vadd.f32 %v4202_v7, %v5502_v2  ;;  %v4204_v3 = vadd.f32 %v2848_v30, %v1278_v12 }
 0x1f6   : > { %vm3069_vm8 = vcmp.gt.f32.partialorder %v3033_v6, 0.0  ;;  %v3105_v25 = vmul.f32 0.01, %v3033_v6  ;;  %v3034_v29 = vadd.f32 %v4203_v54, %v5502_v2 }
 0x1f7   : > { %vm3067_vm9 = vcmp.gt.f32.partialorder %v3031_v10, 0.0  ;;  %v3103_v38 = vmul.f32 0.01, %v3031_v10  ;;  %v3032_v42 = vadd.f32 %v4204_v3, %v5502_v2 }
 0x1f8   : > { %v3141_v20 = vsel %vm3069_vm8, %v3033_v6, %v3105_v25  ;;  %vm3070_vm11 = vcmp.gt.f32.partialorder %v3034_v29, 0.0  ;;  %v3106_v49 = vmul.f32 0.01, %v3034_v29 }
 0x1f9   : > { %v3652_v27 = vpack.c.bf16 %v3141_v20, %v3141_v20  ;;  %v3139_v44 = vsel %vm3067_vm9, %v3031_v10, %v3103_v38  ;;  %vm3068_vm12 = vcmp.gt.f32.partialorder %v3032_v42, 0.0  ;;  %v3104_v19 = vmul.f32 0.01, %v3032_v42  ;;  %v4169_v4 = vpop.f32.mrb[4].mxu0 }
 0x1fa   : > { %v3650_v45 = vpack.c.bf16 %v3139_v44, %v3139_v44  ;;  %v3142_v21 = vsel %vm3070_vm11, %v3034_v29, %v3106_v49  ;;  %v4205_v8 = vadd.f32 %v4169_v4, %v3979_v24  ;;  %v2861_v43 = vpop.f32.mrb[5].mxu0 }
 0x1fb   : > { %3322 = vst.msk [vmem:[%s5512_s16 + $0x8] sm:$0xf] %vm3319_vm10, %v3652_v27  ;;  %v3653_v15 = vpack.c.bf16 %v3142_v21, %v3142_v21  ;;  %v3140_v39 = vsel %vm3068_vm12, %v3032_v42, %v3104_v19  ;;  %v4206_v11 = vadd.f32 %v2861_v43, %v1291_v61  ;;  %v4170_v60 = vpop.f32.mrb[6].mxu0 }
 0x1fc   : > { %3320 = vst.msk [vmem:[%s5512_s16] sm:$0xf] %vm3319_vm10, %v3650_v45  ;;  %v3651_v32 = vpack.c.bf16 %v3140_v39, %v3140_v39  ;;  %v3037_v9 = vadd.f32 %v4205_v8, %v5502_v2  ;;  %v4207_v17 = vadd.f32 %v4170_v60, %v3980_v63  ;;  %v2864_v55 = vpop.f32.mrb[7].mxu0 }
 0x1fd   : > { %3323 = vst.msk [vmem:[%s5512_s16 + $0xc] sm:$0xf] %vm3319_vm10, %v3653_v15  ;;  %v3035_v33 = vadd.f32 %v4206_v11, %v5502_v2  ;;  %v4208_v18 = vadd.f32 %v2864_v55, %v1294_v37 }
 0x1fe   : > { %3321 = vst.msk [vmem:[%s5512_s16 + $0x4] sm:$0xf] %vm3319_vm10, %v3651_v32  ;;  %vm3073_vm13 = vcmp.gt.f32.partialorder %v3037_v9, 0.0  ;;  %v3109_v57 = vmul.f32 0.01, %v3037_v9  ;;  %v3038_v31 = vadd.f32 %v4207_v17, %v5502_v2 }
 0x1ff   : > { %vm3071_vm14 = vcmp.gt.f32.partialorder %v3035_v33, 0.0  ;;  %v3107_v47 = vmul.f32 0.01, %v3035_v33  ;;  %v3036_v13 = vadd.f32 %v4208_v18, %v5502_v2 }
 0x200   : > { %v3145_v34 = vsel %vm3073_vm13, %v3037_v9, %v3109_v57  ;;  %vm3074_vm15 = vcmp.gt.f32.partialorder %v3038_v31, 0.0  ;;  %v3110_v26 = vmul.f32 0.01, %v3038_v31 }
 0x201   : > { %v3656_v41 = vpack.c.bf16 %v3145_v34, %v3145_v34  ;;  %v3143_v50 = vsel %vm3071_vm14, %v3035_v33, %v3107_v47  ;;  %vm3072_vm0 = vcmp.gt.f32.partialorder %v3036_v13, 0.0  ;;  %v3108_v46 = vmul.f32 0.01, %v3036_v13  ;;  %v4173_v35 = vpop.f32.mrb[8].mxu0 }
 0x202   : > { %v3654_v1 = vpack.c.bf16 %v3143_v50, %v3143_v50  ;;  %v3146_v36 = vsel %vm3074_vm15, %v3038_v31, %v3110_v26  ;;  %v4209_v12 = vadd.f32 %v4173_v35, %v5475_v23  ;;  %v2877_v24 = vpop.f32.mrb[9].mxu0 }
 0x203   : > { %3326 = vst.msk [vmem:[%s5512_s16 + $0x18] sm:$0xf] %vm3319_vm10, %v3656_v41  ;;  %v3657_v61 = vpack.c.bf16 %v3146_v36, %v3146_v36  ;;  %v3144_v63 = vsel %vm3072_vm0, %v3036_v13, %v3108_v46  ;;  %v4210_v37 = vadd.f32 %v2877_v24, %v5477_v5  ;;  %v4174_v56 = vpop.f32.mrb[10].mxu0 }
 0x204   : > { %3324 = vst.msk [vmem:[%s5512_s16 + $0x10] sm:$0xf] %vm3319_vm10, %v3654_v1  ;;  %v3655_v14 = vpack.c.bf16 %v3144_v63, %v3144_v63  ;;  %v3041_v53 = vadd.f32 %v4209_v12, %v5502_v2  ;;  %v4211_v7 = vadd.f32 %v4174_v56, %v5479_v0  ;;  %v2880_v16 = vpop.f32.mrb[11].mxu0 }
 0x205   : > { %3327 = vst.msk [vmem:[%s5512_s16 + $0x1c] sm:$0xf] %vm3319_vm10, %v3657_v61  ;;  %v3039_v23 = vadd.f32 %v4210_v37, %v5502_v2  ;;  %v4212_v6 = vadd.f32 %v2880_v16, %v5481_v52 }
 0x206   : > { %3325 = vst.msk [vmem:[%s5512_s16 + $0x14] sm:$0xf] %vm3319_vm10, %v3655_v14  ;;  %vm3077_vm1 = vcmp.gt.f32.partialorder %v3041_v53, 0.0  ;;  %v3113_v54 = vmul.f32 0.01, %v3041_v53  ;;  %v3042_v5 = vadd.f32 %v4211_v7, %v5502_v2 }
 0x207   : > { %vm3075_vm2 = vcmp.gt.f32.partialorder %v3039_v23, 0.0  ;;  %v3111_v30 = vmul.f32 0.01, %v3039_v23  ;;  %v3040_v10 = vadd.f32 %v4212_v6, %v5502_v2 }
 0x208   : > { %v3149_v3 = vsel %vm3077_vm1, %v3041_v53, %v3113_v54  ;;  %vm3078_vm3 = vcmp.gt.f32.partialorder %v3042_v5, 0.0  ;;  %v3114_v0 = vmul.f32 0.01, %v3042_v5 }
 0x209   : > { %v3660_v25 = vpack.c.bf16 %v3149_v3, %v3149_v3  ;;  %v3147_v29 = vsel %vm3075_vm2, %v3039_v23, %v3111_v30  ;;  %vm3076_vm4 = vcmp.gt.f32.partialorder %v3040_v10, 0.0  ;;  %v3112_v38 = vmul.f32 0.01, %v3040_v10  ;;  %v4177_v52 = vpop.f32.mrb[12].mxu0 }
 0x20a   : > { %v3658_v42 = vpack.c.bf16 %v3147_v29, %v3147_v29  ;;  %v3150_v20 = vsel %vm3078_vm3, %v3042_v5, %v3114_v0  ;;  %v4213_v49 = vadd.f32 %v4177_v52, %v5483_v58  ;;  %v2893_v27 = vpop.f32.mrb[13].mxu0 }
 0x20b   : > { %3330 = vst.msk [vmem:[%s5512_s16 + $0x28] sm:$0xf] %vm3319_vm10, %v3660_v25  ;;  %v3661_v44 = vpack.c.bf16 %v3150_v20, %v3150_v20  ;;  %v3148_v19 = vsel %vm3076_vm4, %v3040_v10, %v3112_v38  ;;  %v4214_v4 = vadd.f32 %v2893_v27, %v5485_v40  ;;  %v4178_v45 = vpop.f32.mrb[14].mxu0 }
 0x20c   : > { %3328 = vst.msk [vmem:[%s5512_s16 + $0x20] sm:$0xf] %vm3319_vm10, %v3658_v42  ;;  %v3659_v21 = vpack.c.bf16 %v3148_v19, %v3148_v19  ;;  %v3045_v8 = vadd.f32 %v4213_v49, %v5502_v2  ;;  %v4215_v43 = vadd.f32 %v4178_v45, %v5487_v51  ;;  %v2896_v15 = vpop.f32.mrb[15].mxu0 }
 0x20d   : > { %3331 = vst.msk [vmem:[%s5512_s16 + $0x2c] sm:$0xf] %vm3319_vm10, %v3661_v44  ;;  %v3043_v58 = vadd.f32 %v4214_v4, %v5502_v2  ;;  %v4216_v39 = vadd.f32 %v2896_v15, %v5489_v62 }
 0x20e   : > { %3329 = vst.msk [vmem:[%s5512_s16 + $0x24] sm:$0xf] %vm3319_vm10, %v3659_v21  ;;  %vm3081_vm5 = vcmp.gt.f32.partialorder %v3045_v8, 0.0  ;;  %v3117_v11 = vmul.f32 0.01, %v3045_v8  ;;  %v3046_v40 = vadd.f32 %v4215_v43, %v5502_v2 }
 0x20f   : > { %v4033_v60 = vpop.f32.mrb[20].mxu1  ;;  %vm3079_vm6 = vcmp.gt.f32.partialorder %v3043_v58, 0.0  ;;  %v3115_v32 = vmul.f32 0.01, %v3043_v58  ;;  %v3044_v9 = vadd.f32 %v4216_v39, %v5502_v2 }
 0x210   : > { %v1713_v51 = vpop.f32.mrb[21].mxu1  ;;  %v3153_v17 = vsel %vm3081_vm5, %v3045_v8, %v3117_v11  ;;  %vm3082_vm7 = vcmp.gt.f32.partialorder %v3046_v40, 0.0  ;;  %v3118_v55 = vmul.f32 0.01, %v3046_v40 }
 0x211   : > { %v4034_v33 = vpop.f32.mrb[22].mxu1  ;;  %v3664_v18 = vpack.c.bf16 %v3153_v17, %v3153_v17  ;;  %v3151_v62 = vsel %vm3079_vm6, %v3043_v58, %v3115_v32  ;;  %vm3080_vm8 = vcmp.gt.f32.partialorder %v3044_v9, 0.0  ;;  %v3116_v57 = vmul.f32 0.01, %v3044_v9  ;;  %v4181_v31 = vpop.f32.mrb[16].mxu0 }
 0x212   : > { %v1716_v47 = vpop.f32.mrb[23].mxu1  ;;  %v3662_v13 = vpack.c.bf16 %v3151_v62, %v3151_v62  ;;  %v3154_v34 = vsel %vm3082_vm7, %v3046_v40, %v3118_v55  ;;  %v4217_v26 = vadd.f32 %v4181_v31, %v5491_v48  ;;  %v2909_v41 = vpop.f32.mrb[17].mxu0 }
 0x213   : > { %3334 = vst.msk [vmem:[%s5512_s16 + $0x38] sm:$0xf] %vm3319_vm10, %v3664_v18  ;;  %v3665_v50 = vpack.c.bf16 %v3154_v34, %v3154_v34  ;;  %v3152_v46 = vsel %vm3080_vm8, %v3044_v9, %v3116_v57  ;;  %v4218_v35 = vadd.f32 %v2909_v41, %v5493_v59  ;;  %v4182_v1 = vpop.f32.mrb[18].mxu0 }
 0x214   : > { %3332 = vst.msk [vmem:[%s5512_s16 + $0x30] sm:$0xf] %vm3319_vm10, %v3662_v13  ;;  %v3663_v36 = vpack.c.bf16 %v3152_v46, %v3152_v46  ;;  %v3049_v12 = vadd.f32 %v4217_v26, %v5502_v2  ;;  %v4219_v24 = vadd.f32 %v4182_v1, %v5495_v22  ;;  %v2912_v61 = vpop.f32.mrb[19].mxu0 }
 0x215   : > { %3335 = vst.msk [vmem:[%s5512_s16 + $0x3c] sm:$0xf] %vm3319_vm10, %v3665_v50  ;;  %v3047_v48 = vadd.f32 %v4218_v35, %v5502_v2  ;;  %v4220_v63 = vadd.f32 %v2912_v61, %v5497_v28 }
 0x216   : > { %3333 = vst.msk [vmem:[%s5512_s16 + $0x34] sm:$0xf] %vm3319_vm10, %v3663_v36  ;;  %vm3085_vm9 = vcmp.gt.f32.partialorder %v3049_v12, 0.0  ;;  %v3121_v37 = vmul.f32 0.01, %v3049_v12  ;;  %v3050_v59 = vadd.f32 %v4219_v24, %v5502_v2 }
 0x217   : > { %v4037_v56 = vpop.f32.mrb[24].mxu1  ;;  %vm3083_vm11 = vcmp.gt.f32.partialorder %v3047_v48, 0.0  ;;  %v3119_v14 = vmul.f32 0.01, %v3047_v48  ;;  %v3048_v53 = vadd.f32 %v4220_v63, %v5502_v2 }
 0x218   : > { %v1729_v22 = vpop.f32.mrb[25].mxu1  ;;  %v3157_v7 = vsel %vm3085_vm9, %v3049_v12, %v3121_v37  ;;  %vm3086_vm12 = vcmp.gt.f32.partialorder %v3050_v59, 0.0  ;;  %v3122_v16 = vmul.f32 0.01, %v3050_v59 }
 0x219   : > { %v4038_v23 = vpop.f32.mrb[26].mxu1  ;;  %v3668_v6 = vpack.c.bf16 %v3157_v7, %v3157_v7  ;;  %v3155_v28 = vsel %vm3083_vm11, %v3047_v48, %v3119_v14  ;;  %vm3084_vm13 = vcmp.gt.f32.partialorder %v3048_v53, 0.0  ;;  %v3120_v54 = vmul.f32 0.01, %v3048_v53  ;;  %v4185_v5 = vpop.f32.mrb[20].mxu0 }
 0x21a   : > { %v1732_v30 = vpop.f32.mrb[27].mxu1  ;;  %v3666_v10 = vpack.c.bf16 %v3155_v28, %v3155_v28  ;;  %v3158_v3 = vsel %vm3086_vm12, %v3050_v59, %v3122_v16  ;;  %v4221_v0 = vadd.f32 %v4185_v5, %v4033_v60  ;;  %v2925_v25 = vpop.f32.mrb[21].mxu0 }
 0x21b   : > { %3338 = vst.msk [vmem:[%s5512_s16 + $0x48] sm:$0xf] %vm3319_vm10, %v3668_v6  ;;  %v3669_v29 = vpack.c.bf16 %v3158_v3, %v3158_v3  ;;  %v3156_v38 = vsel %vm3084_vm13, %v3048_v53, %v3120_v54  ;;  %v4222_v52 = vadd.f32 %v2925_v25, %v1713_v51  ;;  %v4186_v42 = vpop.f32.mrb[22].mxu0 }
 0x21c   : > { %3336 = vst.msk [vmem:[%s5512_s16 + $0x40] sm:$0xf] %vm3319_vm10, %v3666_v10  ;;  %v3667_v20 = vpack.c.bf16 %v3156_v38, %v3156_v38  ;;  %v3053_v49 = vadd.f32 %v4221_v0, %v5502_v2  ;;  %v4223_v27 = vadd.f32 %v4186_v42, %v4034_v33  ;;  %v2928_v44 = vpop.f32.mrb[23].mxu0 }
 0x21d   : > { %3339 = vst.msk [vmem:[%s5512_s16 + $0x4c] sm:$0xf] %vm3319_vm10, %v3669_v29  ;;  %v3051_v19 = vadd.f32 %v4222_v52, %v5502_v2  ;;  %v4224_v4 = vadd.f32 %v2928_v44, %v1716_v47 }
 0x21e   : > { %3337 = vst.msk [vmem:[%s5512_s16 + $0x44] sm:$0xf] %vm3319_vm10, %v3667_v20  ;;  %vm3089_vm14 = vcmp.gt.f32.partialorder %v3053_v49, 0.0  ;;  %v3125_v45 = vmul.f32 0.01, %v3053_v49  ;;  %v3054_v21 = vadd.f32 %v4223_v27, %v5502_v2 }
 0x21f   : > { %v4041_v8 = vpop.f32.mrb[28].mxu1  ;;  %vm3087_vm15 = vcmp.gt.f32.partialorder %v3051_v19, 0.0  ;;  %v3123_v43 = vmul.f32 0.01, %v3051_v19  ;;  %v3052_v15 = vadd.f32 %v4224_v4, %v5502_v2 }
 0x220   : > { %v1745_v58 = vpop.f32.mrb[29].mxu1  ;;  %v3161_v39 = vsel %vm3089_vm14, %v3053_v49, %v3125_v45  ;;  %vm3090_vm0 = vcmp.gt.f32.partialorder %v3054_v21, 0.0  ;;  %v3126_v11 = vmul.f32 0.01, %v3054_v21 }
 0x221   : > { %v4042_v40 = vpop.f32.mrb[30].mxu1  ;;  %v3672_v60 = vpack.c.bf16 %v3161_v39, %v3161_v39  ;;  %v3159_v32 = vsel %vm3087_vm15, %v3051_v19, %v3123_v43  ;;  %vm3088_vm1 = vcmp.gt.f32.partialorder %v3052_v15, 0.0  ;;  %v3124_v9 = vmul.f32 0.01, %v3052_v15  ;;  %v4189_v51 = vpop.f32.mrb[24].mxu0 }
 0x222   : > { %v1748_v17 = vpop.f32.mrb[31].mxu1  ;;  %v3670_v55 = vpack.c.bf16 %v3159_v32, %v3159_v32  ;;  %v3162_v33 = vsel %vm3090_vm0, %v3054_v21, %v3126_v11  ;;  %v4225_v18 = vadd.f32 %v4189_v51, %v4037_v56  ;;  %v2941_v62 = vpop.f32.mrb[25].mxu0 }
 0x223   : > { %3342 = vst.msk [vmem:[%s5512_s16 + $0x58] sm:$0xf] %vm3319_vm10, %v3672_v60  ;;  %v3673_v57 = vpack.c.bf16 %v3162_v33, %v3162_v33  ;;  %v3160_v31 = vsel %vm3088_vm1, %v3052_v15, %v3124_v9  ;;  %v4226_v47 = vadd.f32 %v2941_v62, %v1729_v22  ;;  %v4190_v13 = vpop.f32.mrb[26].mxu0 }
 0x224   : > { %3340 = vst.msk [vmem:[%s5512_s16 + $0x50] sm:$0xf] %vm3319_vm10, %v3670_v55  ;;  %v3671_v34 = vpack.c.bf16 %v3160_v31, %v3160_v31  ;;  %v3057_v26 = vadd.f32 %v4225_v18, %v5502_v2  ;;  %v4227_v41 = vadd.f32 %v4190_v13, %v4038_v23  ;;  %v2944_v50 = vpop.f32.mrb[27].mxu0 }
 0x225   : > { %3343 = vst.msk [vmem:[%s5512_s16 + $0x5c] sm:$0xf] %vm3319_vm10, %v3673_v57  ;;  %v3055_v46 = vadd.f32 %v4226_v47, %v5502_v2  ;;  %v4228_v35 = vadd.f32 %v2944_v50, %v1732_v30 }
 0x226   : > { %3341 = vst.msk [vmem:[%s5512_s16 + $0x54] sm:$0xf] %vm3319_vm10, %v3671_v34  ;;  %vm3093_vm2 = vcmp.gt.f32.partialorder %v3057_v26, 0.0  ;;  %v3129_v1 = vmul.f32 0.01, %v3057_v26  ;;  %v3058_v36 = vadd.f32 %v4227_v41, %v5502_v2 }
 0x227   : > { %v4045_v12 = vpop.f32.mrb[32].mxu1  ;;  %vm3091_vm3 = vcmp.gt.f32.partialorder %v3055_v46, 0.0  ;;  %v3127_v24 = vmul.f32 0.01, %v3055_v46  ;;  %v3056_v61 = vadd.f32 %v4228_v35, %v5502_v2 }
 0x228   : > { %v1761_v48 = vpop.f32.mrb[33].mxu1  ;;  %v3165_v63 = vsel %vm3093_vm2, %v3057_v26, %v3129_v1  ;;  %vm3094_vm4 = vcmp.gt.f32.partialorder %v3058_v36, 0.0  ;;  %v3130_v37 = vmul.f32 0.01, %v3058_v36 }
 0x229   : > { %v4046_v59 = vpop.f32.mrb[34].mxu1  ;;  %v3676_v56 = vpack.c.bf16 %v3165_v63, %v3165_v63  ;;  %v3163_v14 = vsel %vm3091_vm3, %v3055_v46, %v3127_v24  ;;  %vm3092_vm5 = vcmp.gt.f32.partialorder %v3056_v61, 0.0  ;;  %v3128_v53 = vmul.f32 0.01, %v3056_v61  ;;  %v4193_v22 = vpop.f32.mrb[28].mxu0 }
 0x22a   : > { %v1764_v7 = vpop.f32.mrb[35].mxu1  ;;  %v3674_v16 = vpack.c.bf16 %v3163_v14, %v3163_v14  ;;  %v3166_v23 = vsel %vm3094_vm4, %v3058_v36, %v3130_v37  ;;  %v4229_v6 = vadd.f32 %v4193_v22, %v4041_v8  ;;  %v2957_v28 = vpop.f32.mrb[29].mxu0 }
 0x22b   : > { %3346 = vst.msk [vmem:[%s5512_s16 + $0x68] sm:$0xf] %vm3319_vm10, %v3676_v56  ;;  %v3677_v54 = vpack.c.bf16 %v3166_v23, %v3166_v23  ;;  %v3164_v5 = vsel %vm3092_vm5, %v3056_v61, %v3128_v53  ;;  %v4230_v30 = vadd.f32 %v2957_v28, %v1745_v58  ;;  %v4194_v10 = vpop.f32.mrb[30].mxu0 }
 0x22c   : > { %3344 = vst.msk [vmem:[%s5512_s16 + $0x60] sm:$0xf] %vm3319_vm10, %v3674_v16  ;;  %v3675_v3 = vpack.c.bf16 %v3164_v5, %v3164_v5  ;;  %v3061_v0 = vadd.f32 %v4229_v6, %v5502_v2  ;;  %v4231_v25 = vadd.f32 %v4194_v10, %v4042_v40  ;;  %v2960_v29 = vpop.f32.mrb[31].mxu0 }
 0x22d   : > { %3347 = vst.msk [vmem:[%s5512_s16 + $0x6c] sm:$0xf] %vm3319_vm10, %v3677_v54  ;;  %v3059_v38 = vadd.f32 %v4230_v30, %v5502_v2  ;;  %v4232_v52 = vadd.f32 %v2960_v29, %v1748_v17 }
 0x22e   : > { %3345 = vst.msk [vmem:[%s5512_s16 + $0x64] sm:$0xf] %vm3319_vm10, %v3675_v3  ;;  %vm3097_vm6 = vcmp.gt.f32.partialorder %v3061_v0, 0.0  ;;  %v3133_v42 = vmul.f32 0.01, %v3061_v0  ;;  %v3062_v20 = vadd.f32 %v4231_v25, %v5502_v2 }
 0x22f   : > { %vm3095_vm7 = vcmp.gt.f32.partialorder %v3059_v38, 0.0  ;;  %v3131_v49 = vmul.f32 0.01, %v3059_v38  ;;  %v3060_v27 = vadd.f32 %v4232_v52, %v5502_v2 }
 0x230   : > { %v3169_v44 = vsel %vm3097_vm6, %v3061_v0, %v3133_v42  ;;  %vm3098_vm8 = vcmp.gt.f32.partialorder %v3062_v20, 0.0  ;;  %v3134_v19 = vmul.f32 0.01, %v3062_v20 }
 0x231   : > { %v3680_v4 = vpack.c.bf16 %v3169_v44, %v3169_v44  ;;  %v3167_v45 = vsel %vm3095_vm7, %v3059_v38, %v3131_v49  ;;  %vm3096_vm9 = vcmp.gt.f32.partialorder %v3060_v27, 0.0  ;;  %v3132_v21 = vmul.f32 0.01, %v3060_v27  ;;  %v4197_v8 = vpop.f32.mrb[32].mxu0 }
 0x232   : > { %v3678_v43 = vpack.c.bf16 %v3167_v45, %v3167_v45  ;;  %v3170_v15 = vsel %vm3098_vm8, %v3062_v20, %v3134_v19  ;;  %v4233_v58 = vadd.f32 %v4197_v8, %v4045_v12  ;;  %v2973_v39 = vpop.f32.mrb[33].mxu0 }
 0x233   : > { %3350 = vst.msk [vmem:[%s5512_s16 + $0x78] sm:$0xf] %vm3319_vm10, %v3680_v4  ;;  %v3681_v11 = vpack.c.bf16 %v3170_v15, %v3170_v15  ;;  %v3168_v40 = vsel %vm3096_vm9, %v3060_v27, %v3132_v21  ;;  %v4234_v60 = vadd.f32 %v2973_v39, %v1761_v48  ;;  %v4198_v32 = vpop.f32.mrb[34].mxu0 }
 0x234   : > { %3348 = vst.msk [vmem:[%s5512_s16 + $0x70] sm:$0xf] %vm3319_vm10, %v3678_v43  ;;  %v3679_v9 = vpack.c.bf16 %v3168_v40, %v3168_v40  ;;  %v3065_v51 = vadd.f32 %v4233_v58, %v5502_v2  ;;  %v4235_v17 = vadd.f32 %v4198_v32, %v4046_v59  ;;  %v2976_v55 = vpop.f32.mrb[35].mxu0 }
 0x235   : > { %3351 = vst.msk [vmem:[%s5512_s16 + $0x7c] sm:$0xf] %vm3319_vm10, %v3681_v11  ;;  %v3063_v33 = vadd.f32 %v4234_v60, %v5502_v2  ;;  %v4236_v18 = vadd.f32 %v2976_v55, %v1764_v7 }
 0x236   : > { %3349 = vst.msk [vmem:[%s5512_s16 + $0x74] sm:$0xf] %vm3319_vm10, %v3679_v9  ;;  %vm3101_vm11 = vcmp.gt.f32.partialorder %v3065_v51, 0.0  ;;  %v3137_v62 = vmul.f32 0.01, %v3065_v51  ;;  %v3066_v57 = vadd.f32 %v4235_v17, %v5502_v2 }
 0x237   : > { %vm3099_vm12 = vcmp.gt.f32.partialorder %v3063_v33, 0.0  ;;  %v3135_v31 = vmul.f32 0.01, %v3063_v33  ;;  %v3064_v47 = vadd.f32 %v4236_v18, %v5502_v2 }
 0x238   : > { %v3173_v13 = vsel %vm3101_vm11, %v3065_v51, %v3137_v62  ;;  %vm3102_vm13 = vcmp.gt.f32.partialorder %v3066_v57, 0.0  ;;  %v3138_v34 = vmul.f32 0.01, %v3066_v57 }
 0x239   : > { %v3684_v26 = vpack.c.bf16 %v3173_v13, %v3173_v13  ;;  %v3171_v41 = vsel %vm3099_vm12, %v3063_v33, %v3135_v31  ;;  %vm3100_vm14 = vcmp.gt.f32.partialorder %v3064_v47, 0.0  ;;  %v3136_v50 = vmul.f32 0.01, %v3064_v47 }
 0x23a   : > { %v3682_v46 = vpack.c.bf16 %v3171_v41, %v3171_v41  ;;  %v3174_v35 = vsel %vm3102_vm13, %v3066_v57, %v3138_v34 }
 0x23b   : > { %3354 = vst.msk [vmem:[%s5512_s16 + $0x88] sm:$0xf] %vm3319_vm10, %v3684_v26  ;;  %v3685_v1 = vpack.c.bf16 %v3174_v35, %v3174_v35  ;;  %v3172_v36 = vsel %vm3100_vm14, %v3064_v47, %v3136_v50 }
 0x23c   : > { %3352 = vst.msk [vmem:[%s5512_s16 + $0x80] sm:$0xf] %vm3319_vm10, %v3682_v46  ;;  %v3683_v12 = vpack.c.bf16 %v3172_v36, %v3172_v36 }
 0x23d   : > { %3355 = vst.msk [vmem:[%s5512_s16 + $0x8c] sm:$0xf] %vm3319_vm10, %v3685_v1 }
 0x23e   : > { %3353 = vst.msk [vmem:[%s5512_s16 + $0x84] sm:$0xf] %vm3319_vm10, %v3683_v12 }
 0x23f PF: > { %s13_s12 = sadd.s32 1, %s4538_s12  }
 0x240   : > { %p10_p4 = scmp.ge.s32.totalorder %s13_s12, 4  }
 0x242   :  { %12 = sbr.rel (!%p10_p4) target bundleno = 1 (0x1), region = 70 }

// kernel: encoder_forward.7
= control target key start
LH: loop header
LB: loop body
LE: loop exit
PB: predicated region body
PF: predicated region fallthrough
CT: control target
= control target key end

     0   :  { %s4817_s12 = smov 0   ;;  %s6114_s0 = inlined_call_operand.vmem [shape: bf16[2,328,8], index: 0, kind: input, shape index: {}]   ;;  %s6115_s1 = inlined_call_operand.vmem [shape: bf16[9,8,8], index: 1, kind: input, shape index: {}]   ;;  %s6116_s2 = inlined_call_operand.vmem [shape: f32[1,8], index: 2, kind: input, shape index: {}]   ;;  %s6117_s3 = inlined_call_operand.vmem [shape: bf16[2,288,8], index: 3, kind: output, shape index: {}]  }
   0x1 LB: > { %s3631_s13 = sadd.s32 4294967295, %s4795_s12   ;;  %p3635_p0 = scmp.ge.s32.totalorder %s4795_s12, 1  ;;  %s4795_s12 = sphi %s4817_s12, %s13_s12  }
   0x2   : > { %p137_p1 = scmp.lt.s32.totalorder %s4795_s12, 3 }
   0x4   : > { %p138_p2 = pnand %p3635_p0, %p137_p1 }
   0x6   : > { %141 = sbr.rel (%p138_p2) target bundleno = 577 (0x241), region = 32 }
   0xd   : > { %vm513_vm0 = vcmask 1043456   ;;  %v4828_v0 = vld [vmem:[%s6115_s1 + $0x10] sm:$0xf]  ;;  %v3638_v1 = vld [vmem:[%s6115_s1 + $0x4] sm:$0xf]  ;;  %p161_p3 = scmp.lt.s32.totalorder %s3631_s13, 1 }
   0xe   : > { %6149 = vst [vmem:[#allocation2_spill] sm:$0xff] %v4828_v0  ;;  %4713 = vmatprep.subr.msk.bf16.mxu0 %vm513_vm0, %v4828_v0  ;;  %4709 = vmatprep.subr.msk.bf16.mxu1 %vm513_vm0, %v3638_v1  ;;  %v4838_v2 = vsel %vm513_vm0, %v4828_v0, 0  ;;  %v515_v3 = vsel %vm513_vm0, %v3638_v1, 0  ;;  %v3753_v4 = vld [vmem:[%s6115_s1 + $0x14] sm:$0xf]  ;;  %vm458_vm2 = vcmask 64512  }
   0xf   : > { %6150 = vst [vmem:[#allocation3_spill] sm:$0xff] %v4838_v2  ;;  %4230 = vmatpush3.bf16.msra.mxu0 %v4838_v2  ;;  %4078 = vmatpush3.bf16.msra.mxu1 %v515_v3  ;;  %s6186_s13 = smov (!%p161_p3, %s3631_s13), 1  ;;  %v213_v5 = vld [vmem:[%s6115_s1] sm:$0xf]  ;;  %vm309_vm1 = vsmask.f32 7424 }
  0x10   : > { %4715 = vmatprep.subr.msk.bf16.mxu0 %vm513_vm0, %v3753_v4  ;;  %s4719_s22 = smul.u32 164, %s6186_s13  ;;  %4710 = vmatprep.subr.msk.bf16.mxu1 %vm513_vm0, %v213_v5  ;;  %vm1456_vm3 = vsmask.f32 6400  ;;  %v1907_v10 = vsel %vm513_vm0, %v3753_v4, 0  ;;  %v731_v11 = vsel %vm513_vm0, %v213_v5, 0  ;;  %vm1814_vm4 = vcmask 1045504  }
  0x11   : > { %v4931_v50 = vld [vmem:[%s6115_s1 + $0x18] sm:$0xf]  ;;  %v4936_v51 = vld [vmem:[%s6115_s1 + $0x8] sm:$0xf]  ;;  %vm2358_vm5 = vsmask.f32 5376 }
  0x12   : > { %s4856_s25 = scalar_lea.vmem %s6114_s0, %s4719_s22  ;;  %vm912_vm6 = vcmask 1046528   ;;  %vm2716_vm7 = vcmask 1044480   ;;  %vm3539_vm8 = vcmask 60416   ;;  %s4720_s11 = smul.u32 144, %s6186_s13 }
  0x13   : > { %v4859_v6 = vld [vmem:[%s4856_s25 + $0x8] sm:$0xff]   ;;  %v4862_v7 = vld [vmem:[%s4856_s25] sm:$0xff]   ;;  %v4865_v8 = vld [vmem:[%s4856_s25 + $0x10] sm:$0xff]  }
  0x14   : > { %v4868_v9 = vld [vmem:[%s4856_s25 + $0x18] sm:$0xff]   ;;  %v311_v12 = vshrl.u32 %v4862_v7, 16  ;;  %v313_v13 = vshll.u32 %v4862_v7, 16  ;;  %v318_v14 = vshll.u32 %v4859_v6, 16  ;;  %v322_v15 = vshrl.u32 %v4859_v6, 16  ;;  %v4889_v24 = vld [vmem:[%s4856_s25 + $0x20] sm:$0xff]   ;;  %s5885_s15 = scalar_lea.vmem %s6117_s3, %s4720_s11 }
  0x15   : > { %v4877_v16 = vshll.u32 %v4865_v8, 16  ;;  %v4880_v17 = vshrl.u32 %v4865_v8, 16  ;;  %v4883_v18 = vshll.u32 %v4868_v9, 16  ;;  %v4886_v19 = vshrl.u32 %v4868_v9, 16  ;;  %v4896_v29 = vld [vmem:[%s4856_s25 + $0x28] sm:$0xff]   ;;  %v4904_v40 = vld [vmem:[%s4856_s25 + $0x30] sm:$0xff]  }
  0x16   : > { %v315_v20 = vrot.slane %v313_v13, 1  ;;  %v320_v21 = vrot.slane %v318_v14, 1  ;;  %v1457_v22 = vrot.slane %v322_v15, 1  ;;  %v1458_v23 = vrot.slane %v318_v14, 2  ;;  %v4916_v45 = vld [vmem:[%s4856_s25 + $0x38] sm:$0xff]   ;;  %v4961_v1 = vld [vmem:[%s4856_s25 + $0x40] sm:$0xff]  }
  0x17   : > { %v1460_v25 = vrot.slane %v4880_v17, 1  ;;  %v1461_v26 = vrot.slane %v4877_v16, 2  ;;  %v328_v27 = vrot.slane %v4877_v16, 1  ;;  %v1464_v28 = vrot.slane %v4886_v19, 1  ;;  %v5139_v2 = vld [vmem:[%s4856_s25 + $0x98] sm:$0xf] }
  0x18   : > { %v316_v30 = vor.u32 %v315_v20, %v311_v12  ;;  %v324_v31 = vor.u32 %v322_v15, %v320_v21  ;;  %v1459_v32 = vor.u32 %v1458_v23, %v1457_v22  ;;  %v1465_v33 = vrot.slane %v4883_v18, 2  ;;  %v4971_v12 = vld [vmem:[%s4856_s25 + $0x50] sm:$0xff]  }
  0x19   : > { %v1462_v34 = vor.u32 %v1461_v26, %v1460_v25  ;;  %v332_v35 = vor.u32 %v4880_v17, %v328_v27  ;;  %v336_v36 = vrot.slane %v4883_v18, 1  ;;  %v4910_v43 = vshll.u32 %v4889_v24, 16 }
  0x1a   : > { %v321_v37 = vsel %vm309_vm1, %v316_v30, %v320_v21  ;;  %v329_v38 = vsel %vm309_vm1, %v324_v31, %v328_v27  ;;  %v1466_v39 = vor.u32 %v1465_v33, %v1464_v28  ;;  %v4913_v44 = vshrl.u32 %v4889_v24, 16 }
  0x1b   : > { %4079 = vmatprep.mubr.msk.bf16.mxu1 %vm458_vm2, %v321_v37  ;;  %v1463_v41 = vsel %vm1456_vm3, %v1459_v32, %v1462_v34  ;;  %v337_v42 = vsel %vm309_vm1, %v332_v35, %v336_v36  ;;  %v340_v47 = vor.u32 %v4886_v19, %v336_v36  ;;  %v4923_v48 = vshll.u32 %v4896_v29, 16 }
  0x1c   : > { %4231 = vmatprep.mubr.msk.bf16.mxu0 %vm458_vm2, %v1463_v41  ;;  %4080 = vmatmul.mubr.msk.bf16.vlgmr.msra.gmra.mrb[0].mxu1 %vm458_vm2, %v329_v38  ;;  %v1467_v46 = vsel %vm1456_vm3, %v1462_v34, %v1466_v39  ;;  %v4926_v49 = vshrl.u32 %v4896_v29, 16  ;;  %v1468_v52 = vrot.slane %v4913_v44, 1  ;;  %v1469_v53 = vrot.slane %v4910_v43, 2  ;;  %v5008_v38 = vld [vmem:[%s4856_s25 + $0x58] sm:$0xff]  }
  0x1d   : > { %4232 = vmatmul.mubr.msk.bf16.vlgmr.msra.gmra.mrb[0].mxu0 %vm458_vm2, %v1467_v46  ;;  %4083 = vmatprep.mubr.msk.bf16.mxu1 %vm458_vm2, %v337_v42  ;;  %v344_v54 = vrot.slane %v4910_v43, 1  ;;  %v1473_v56 = vrot.slane %v4923_v48, 2  ;;  %v352_v57 = vrot.slane %v4923_v48, 1  ;;  %v4948_v60 = vshll.u32 %v4904_v40, 16 }
  0x1e   : > { %4268 = vmatpush3.bf16.msra.mxu0 %v1907_v10  ;;  %4116 = vmatpush3.bf16.msra.mxu1 %v731_v11  ;;  %v1472_v55 = vrot.slane %v4926_v49, 1  ;;  %v1470_v58 = vor.u32 %v1469_v53, %v1468_v52  ;;  %v4955_v62 = vshrl.u32 %v4904_v40, 16  ;;  %v4958_v63 = vshll.u32 %v4916_v45, 16  ;;  %v4968_v11 = vld [vmem:[%s4856_s25 + $0x48] sm:$0xff]  }
  0x1f   : > { %v348_v59 = vor.u32 %v4913_v44, %v344_v54  ;;  %4716 = vmatprep.subr.msk.bf16.mxu0 %vm513_vm0, %v4931_v50  ;;  %4711 = vmatprep.subr.msk.bf16.mxu1 %vm513_vm0, %v4936_v51  ;;  %v345_v4 = vsel %vm309_vm1, %v340_v47, %v344_v54  ;;  %v1477_v10 = vrot.slane %v4948_v60, 2  ;;  %v4977_v15 = vshrl.u32 %v4916_v45, 16 }
  0x20   : > { %v1474_v61 = vor.u32 %v1473_v56, %v1472_v55  ;;  %v1471_v3 = vsel %vm1456_vm3, %v1466_v39, %v1470_v58  ;;  %v1476_v14 = vrot.slane %v4955_v62, 1  ;;  %v1481_v20 = vrot.slane %v4958_v63, 2 }
  0x21   : > { %v353_v5 = vsel %vm309_vm1, %v348_v59, %v352_v57  ;;  %4235 = vmatprep.mubr.msk.bf16.mxu0 %vm458_vm2, %v1471_v3  ;;  %v356_v21 = vor.u32 %v4926_v49, %v352_v57  ;;  %v360_v22 = vrot.slane %v4948_v60, 1  ;;  %v1480_v25 = vrot.slane %v4977_v15, 1 }
  0x22   : > { %v1475_v13 = vsel %vm1456_vm3, %v1470_v58, %v1474_v61  ;;  %v1478_v23 = vor.u32 %v1477_v10, %v1476_v14  ;;  %v368_v27 = vrot.slane %v4958_v63, 1  ;;  %v4989_v28 = vshll.u32 %v4961_v1, 16  ;;  %v5037_v14 = vld [vmem:[%s4856_s25 + $0x60] sm:$0xff]  }
  0x23   : > { %v364_v26 = vor.u32 %v4955_v62, %v360_v22  ;;  %v4992_v30 = vshrl.u32 %v4961_v1, 16  ;;  %v1482_v32 = vor.u32 %v1481_v20, %v1480_v25  ;;  %v4996_v33 = vshll.u32 %v4968_v11, 16 }
  0x24   : > { %4084 = vmatmul.mubr.msk.bf16.gmra.mrb[4].mxu1 %vm458_vm2, %v345_v4  ;;  %v1479_v31 = vsel %vm1456_vm3, %v1474_v61, %v1478_v23  ;;  %v4999_v34 = vshrl.u32 %v4968_v11, 16  ;;  %v1485_v36 = vrot.slane %v4989_v28, 2  ;;  %v5005_v37 = vshll.u32 %v4971_v12, 16 }
  0x25   : > { %4236 = vmatmul.mubr.msk.bf16.gmra.mrb[4].mxu0 %vm458_vm2, %v1475_v13  ;;  %4087 = vmatprep.mubr.msk.bf16.mxu1 %vm458_vm2, %v353_v5  ;;  %v1484_v35 = vrot.slane %v4992_v30, 1  ;;  %v361_v39 = vsel %vm309_vm1, %v356_v21, %v360_v22  ;;  %v5012_v42 = vshrl.u32 %v4971_v12, 16  ;;  %v1483_v46 = vsel %vm1456_vm3, %v1478_v23, %v1482_v32 }
  0x26   : > { %4239 = vmatprep.mubr.msk.bf16.mxu0 %vm458_vm2, %v1479_v31  ;;  %v369_v47 = vsel %vm309_vm1, %v364_v26, %v368_v27  ;;  %v1488_v52 = vrot.slane %v4999_v34, 1  ;;  %v1489_v53 = vrot.slane %v4996_v33, 2  ;;  %v1493_v56 = vrot.slane %v5005_v37, 2  ;;  %v5045_v26 = vld [vmem:[%s4856_s25 + $0x68] sm:$0xff]  }
  0x27   : > { %v1486_v41 = vor.u32 %v1485_v36, %v1484_v35  ;;  %v1492_v55 = vrot.slane %v5012_v42, 1  ;;  %v376_v57 = vrot.slane %v4989_v28, 1  ;;  %v372_v58 = vor.u32 %v4977_v15, %v368_v27 }
  0x28   : > { %v384_v59 = vrot.slane %v4996_v33, 1  ;;  %v1490_v61 = vor.u32 %v1489_v53, %v1488_v52  ;;  %v5030_v4 = vshll.u32 %v5008_v38, 16  ;;  %v5033_v5 = vshrl.u32 %v5008_v38, 16  ;;  %v5064_v52 = vld [vmem:[%s4856_s25 + $0x70] sm:$0xff]  }
  0x29   : > { %v1487_v54 = vsel %vm1456_vm3, %v1482_v32, %v1486_v41  ;;  %v380_v3 = vor.u32 %v4992_v30, %v376_v57  ;;  %v1494_v10 = vor.u32 %v1493_v56, %v1492_v55  ;;  %v377_v13 = vsel %vm309_vm1, %v372_v58, %v376_v57  ;;  %v5077_v58 = vld [vmem:[%s4856_s25 + $0x78] sm:$0xff]  }
  0x2a   : > { %v1491_v20 = vsel %vm1456_vm3, %v1486_v41, %v1490_v61  ;;  %v1496_v22 = vrot.slane %v5033_v5, 1  ;;  %v1497_v23 = vrot.slane %v5030_v4, 2  ;;  %v392_v27 = vrot.slane %v5005_v37, 1 }
  0x2b   : > { %v385_v21 = vsel %vm309_vm1, %v380_v3, %v384_v59  ;;  %v1495_v25 = vsel %vm1456_vm3, %v1490_v61, %v1494_v10  ;;  %v388_v31 = vor.u32 %v4999_v34, %v384_v59  ;;  %v400_v36 = vrot.slane %v5030_v4, 1 }
  0x2c   : > { %4088 = vmatmul.mubr.msk.bf16.gmra.mrb[8].mxu1 %vm458_vm2, %v361_v39  ;;  %v5053_v32 = vor.u32 %v1497_v23, %v1496_v22  ;;  %v396_v35 = vor.u32 %v5012_v42, %v392_v27  ;;  %v1815_v39 = vrot.slane %v4859_v6, 2  ;;  %v1816_v41 = vrot.slane %v4865_v8, 2 }
  0x2d   : > { %4240 = vmatmul.mubr.msk.bf16.gmra.mrb[8].mxu0 %vm458_vm2, %v1483_v46  ;;  %4091 = vmatprep.mubr.msk.bf16.mxu1 %vm458_vm2, %v369_v47  ;;  %v5060_v46 = vshll.u32 %v5037_v14, 16  ;;  %v393_v47 = vsel %vm309_vm1, %v388_v31, %v392_v27  ;;  %v5070_v55 = vshrl.u32 %v5037_v14, 16  ;;  %v5073_v56 = vshll.u32 %v5045_v26, 16 }
  0x2e   : > { %4243 = vmatprep.mubr.msk.bf16.mxu0 %vm458_vm2, %v1487_v54  ;;  %6151 = vst [vmem:[#allocation4_spill] sm:$0xff] %v5053_v32  ;;  %v1499_v53 = vsel %vm1456_vm3, %v1494_v10, %v5053_v32  ;;  %v401_v54 = vsel %vm309_vm1, %v396_v35, %v400_v36  ;;  %v1817_v57 = vsel %vm1814_vm4, %v1815_v39, %v1816_v41  ;;  %v1818_v3 = vrot.slane %v4868_v9, 2  ;;  %v209_v39 = vld [vmem:[%s4856_s25 + $0x94] sm:$0xf] }
  0x2f   : > { %6152 = vst [vmem:[#allocation5_spill] sm:$0xff] %v5060_v46  ;;  %6153 = vst [vmem:[#allocation6_spill] sm:$0xff] %v5070_v55  ;;  %v408_v59 = vrot.slane %v5060_v46, 1  ;;  %v404_v61 = vor.u32 %v5033_v5, %v400_v36  ;;  %v5094_v23 = vshrl.u32 %v5045_v26, 16  ;;  %v5104_v35 = vshrl.u32 %v5064_v52, 16 }
  0x30   : > { %6154 = vst [vmem:[#allocation7_spill] sm:$0xff] %v5073_v56  ;;  %v5100_v27 = vsel %vm1814_vm4, %v1816_v41, %v1818_v3  ;;  %v5107_v36 = vshll.u32 %v5077_v58, 16 }
  0x31   : > { %v412_v10 = vor.u32 %v5070_v55, %v408_v59  ;;  %v409_v22 = vsel %vm309_vm1, %v404_v61, %v408_v59  ;;  %6156 = vst [vmem:[#allocation9_spill] sm:$0xff] %v5094_v23  ;;  %6157 = vst [vmem:[#allocation10_spill] sm:$0xff] %v5104_v35  ;;  %v5124_v59 = vld [vmem:[%s6115_s1 + $0x1c] sm:$0xf] }
  0x32   : > { %6158 = vst [vmem:[#allocation11_spill] sm:$0xff] %v5107_v36  ;;  %v432_v32 = vrot.slane %v5107_v36, 1 }
  0x34   : > { %4092 = vmatmul.mubr.msk.bf16.gmra.mrb[12].mxu1 %vm458_vm2, %v377_v13  ;;  %v416_v13 = vrot.slane %v5073_v56, 1 }
  0x35   : > { %4244 = vmatmul.mubr.msk.bf16.gmra.mrb[12].mxu0 %vm458_vm2, %v1491_v20  ;;  %4095 = vmatprep.mubr.msk.bf16.mxu1 %vm458_vm2, %v385_v21  ;;  %v1820_v20 = vrot.slane %v4889_v24, 2  ;;  %v5090_v21 = vshll.u32 %v5064_v52, 16 }
  0x36   : > { %4247 = vmatprep.mubr.msk.bf16.mxu0 %vm458_vm2, %v1495_v25  ;;  %v5097_v25 = vld [vmem:[%s4856_s25 + $0x80] sm:$0xff]   ;;  %v417_v31 = vsel %vm309_vm1, %v412_v10, %v416_v13  ;;  %v1822_v10 = vrot.slane %v4896_v29, 2 }
  0x37   : > { %6155 = vst [vmem:[#allocation8_spill] sm:$0xff] %v5090_v21  ;;  %v424_v41 = vrot.slane %v5090_v21, 1  ;;  %v1824_v21 = vrot.slane %v4904_v40, 2 }
  0x38   : > { %v5159_v56 = vsel %vm1814_vm4, %v1820_v20, %v1822_v10 }
  0x3c   : > { %4096 = vmatmul.mubr.msk.bf16.gmra.mrb[16].mxu1 %vm458_vm2, %v393_v47  ;;  %v2141_v47 = vsel %vm513_vm0, %v4931_v50, 0  ;;  %v420_v50 = vor.u32 %v5094_v23, %v416_v13 }
  0x3d   : > { %4248 = vmatmul.mubr.msk.bf16.gmra.mrb[16].mxu0 %vm458_vm2, %v1499_v53  ;;  %4099 = vmatprep.mubr.msk.bf16.mxu1 %vm458_vm2, %v401_v54  ;;  %v5113_v53 = vsel %vm1814_vm4, %v1818_v3, %v1820_v20  ;;  %v5116_v54 = vld [vmem:[%s4856_s25 + $0x88] sm:$0xff]   ;;  %v211_v3 = vld [vmem:[%s4856_s25 + $0x9c] sm:$0xf] }
  0x3e   : > { %4269 = vmatprep.mubr.msk.bf16.mxu0 %vm458_vm2, %v1817_v57  ;;  %v208_v57 = vld [vmem:[%s4856_s25 + $0x90] sm:$0xf]  ;;  %v5145_v13 = vcombine.low %v5139_v2, %v211_v3  ;;  %v5163_v3 = vshrl.u32 %v5097_v25, 16  ;;  %v5166_v46 = vshll.u32 %v5116_v54, 16  ;;  %v5199_v0 = vshrl.u32 %v5116_v54, 16 }
  0x3f   : > { %v5130_v61 = vcombine.low %v208_v57, %v209_v39  ;;  %v425_v39 = vsel %vm309_vm1, %v420_v50, %v424_v41  ;;  %v5184_v55 = vcombine.low %v208_v57, %v208_v57 }
  0x40   : > { %6160 = vst [vmem:[#allocation13_spill] sm:$0xff] %v5145_v13  ;;  %6163 = vst [vmem:[#allocation16_spill] sm:$0xff] %v5163_v3 }
  0x41   : > { %6159 = vst [vmem:[#allocation12_spill] sm:$0xff] %v5130_v61  ;;  %v5155_v36 = vrot.slane %v5130_v61, 2  ;;  %6164 = vst [vmem:[#allocation17_spill] sm:$0xff] %v5166_v46  ;;  %v2359_v61 = vrot.slane %v4880_v17, 2  ;;  %v2366_v17 = vrot.slane %v4913_v44, 2 }
  0x44   : > { %4100 = vmatmul.mubr.msk.bf16.gmra.mrb[20].mxu1 %vm458_vm2, %v409_v22  ;;  %v428_v22 = vor.u32 %v5104_v35, %v424_v41  ;;  %v6136_v35 = vrot.slane %v5145_v13, 2  ;;  %v5169_v41 = vsel %vm1814_vm4, %v1822_v10, %v1824_v21  ;;  %v2362_v13 = vrot.slane %v4886_v19, 2 }
  0x45   : > { %4270 = vmatmul.mubr.msk.bf16.vlgmr.msra.gmra.mrb[0].mxu0 %vm458_vm2, %v5100_v27  ;;  %4103 = vmatprep.mubr.msk.bf16.mxu1 %vm458_vm2, %v417_v31  ;;  %v5148_v31 = vshll.u32 %v5097_v25, 16 }
  0x46   : > { %4306 = vmatpush3.bf16.msra.mxu0 %v2141_v47  ;;  %4273 = vmatprep.mubr.msk.bf16.mxu0 %vm458_vm2, %v5113_v53  ;;  %v5152_v47 = vshrl.u32 %v5077_v58, 16  ;;  %v433_v23 = vsel %vm309_vm1, %v428_v22, %v432_v32  ;;  %v5175_v50 = vsel %vm1814_vm4, %v5155_v36, %v6136_v35  ;;  %v1826_v22 = vrot.slane %v4916_v45, 2 }
  0x47   : > { %4717 = vmatprep.subr.msk.bf16.mxu0 %vm513_vm0, %v5124_v59  ;;  %6161 = vst [vmem:[#allocation14_spill] sm:$0xff] %v5148_v31  ;;  %6165 = vst [vmem:[#allocation18_spill] sm:$0xff] %v5175_v50  ;;  %v440_v20 = vrot.slane %v5148_v31, 1  ;;  %v2360_v35 = vrot.slane %v4877_v16, 3  ;;  %v448_v31 = vrot.slane %v5166_v46, 1  ;;  %v2363_v50 = vrot.slane %v4883_v18, 3 }
  0x48   : > { %6162 = vst [vmem:[#allocation15_spill] sm:$0xff] %v5152_v47  ;;  %v436_v10 = vor.u32 %v5152_v47, %v432_v32  ;;  %v2367_v16 = vrot.slane %v4910_v43, 3  ;;  %v454_v46 = vshll.u32 %v5184_v55, 16  ;;  %v5203_v19 = vsel %vm1814_vm4, %v1824_v21, %v1826_v22 }
  0x49   : > { %v2361_v32 = vor.u32 %v2360_v35, %v2359_v61  ;;  %v2364_v57 = vor.u32 %v2363_v50, %v2362_v13  ;;  %v452_v21 = vor.u32 %v5199_v0, %v448_v31  ;;  %v1830_v13 = vrot.slane %v4968_v11, 2 }
  0x4a   : > { %v441_v47 = vsel %vm309_vm1, %v436_v10, %v440_v20  ;;  %v2368_v35 = vor.u32 %v2367_v16, %v2366_v17  ;;  %v456_v61 = vrot.slane %v454_v46, 1  ;;  %v2370_v50 = vrot.slane %v4926_v49, 2 }
  0x4b   : > { %v2374_v10 = vrot.slane %v4955_v62, 2  ;;  %v2379_v62 = vrot.slane %v4958_v63, 3  ;;  %v1836_v17 = vrot.slane %v5037_v14, 2 }
  0x4c   : > { %4104 = vmatmul.mubr.msk.bf16.gmra.mrb[24].mxu1 %vm458_vm2, %v425_v39  ;;  %v444_v39 = vor.u32 %v5163_v3, %v440_v20  ;;  %v5207_v3 = vsel %vm2358_vm5, %v2361_v32, %v2364_v57  ;;  %v5214_v43 = vsel %vm2358_vm5, %v2364_v57, %v2368_v35  ;;  %v1832_v20 = vrot.slane %v4971_v12, 2 }
  0x4d   : > { %4274 = vmatmul.mubr.msk.bf16.gmra.mrb[4].mxu0 %vm458_vm2, %v5159_v56  ;;  %4107 = vmatprep.mubr.msk.bf16.mxu1 %vm458_vm2, %v433_v23  ;;  %v1828_v23 = vrot.slane %v4961_v1, 2  ;;  %v2375_v32 = vrot.slane %v4948_v60, 3  ;;  %v2378_v60 = vrot.slane %v4977_v15, 2 }
  0x4e   : > { %4277 = vmatprep.mubr.msk.bf16.mxu0 %vm458_vm2, %v5169_v41  ;;  %v449_v18 = vsel %vm309_vm1, %v444_v39, %v448_v31  ;;  %v457_v39 = vsel %vm309_vm1, %v452_v21, %v456_v61  ;;  %v5236_v57 = vsel %vm1814_vm4, %v1830_v13, %v1832_v20 }
  0x4f   : > { %v5210_v44 = vsel %vm1814_vm4, %v1826_v22, %v1828_v23  ;;  %v5230_v46 = vsel %vm1814_vm4, %v1828_v23, %v1830_v13  ;;  %v2376_v49 = vor.u32 %v2375_v32, %v2374_v10  ;;  %v1834_v23 = vrot.slane %v5008_v38, 2 }
  0x50   : > { %v2380_v16 = vor.u32 %v2379_v62, %v2378_v60  ;;  %v1005_v13 = vsel %vm513_vm0, %v4936_v51, 0  ;;  %v2387_v51 = vrot.slane %v4996_v33, 3  ;;  %v2390_v10 = vrot.slane %v5012_v42, 2 }
  0x51   : > { %v5258_v61 = vsel %vm1814_vm4, %v1832_v20, %v1834_v23  ;;  %v5261_v63 = vsel %vm1814_vm4, %v1834_v23, %v1836_v17  ;;  %v1840_v20 = vrot.slane %v5064_v52, 2  ;;  %v2395_v42 = vrot.slane %v5030_v4, 3 }
  0x52   : > { %v5255_v21 = vsel %vm2358_vm5, %v2376_v49, %v2380_v16  ;;  %v1842_v62 = vrot.slane %v5077_v58, 2  ;;  %v1844_v23 = vrot.slane %v5097_v25, 2  ;;  %v1846_v4 = vrot.slane %v5116_v54, 2 }
  0x54   : > { %4108 = vmatmul.mubr.msk.bf16.gmra.mrb[28].mxu1 %vm458_vm2, %v441_v47  ;;  %v2371_v47 = vrot.slane %v4923_v48, 3 }
  0x55   : > { %4278 = vmatmul.mubr.msk.bf16.gmra.mrb[8].mxu0 %vm458_vm2, %v5203_v19  ;;  %4111 = vmatprep.mubr.msk.bf16.mxu1 %vm458_vm2, %v449_v18  ;;  %v2382_v18 = vrot.slane %v4992_v30, 2 }
  0x56   : > { %4281 = vmatprep.mubr.msk.bf16.mxu0 %vm458_vm2, %v5210_v44  ;;  %v2372_v22 = vor.u32 %v2371_v47, %v2370_v50  ;;  %v2386_v50 = vrot.slane %v4999_v34, 2  ;;  %v1838_v47 = vrot.slane %v5045_v26, 2 }
  0x58   : > { %v5233_v31 = vsel %vm2358_vm5, %v2368_v35, %v2372_v22  ;;  %v5244_v48 = vsel %vm2358_vm5, %v2372_v22, %v2376_v49  ;;  %v2383_v35 = vrot.slane %v4989_v28, 3  ;;  %v5270_v28 = vld [vmem:[%s6115_s1 + $0xc] sm:$0xf]  ;;  %v2388_v22 = vor.u32 %v2387_v51, %v2386_v50 }
  0x59   : > { %v5293_v33 = vsel %vm1814_vm4, %v1836_v17, %v1838_v47  ;;  %v5296_v49 = vsel %vm1814_vm4, %v1838_v47, %v1840_v20  ;;  %v2499_v51 = vsel %vm513_vm0, %v5124_v59, 0  ;;  %v916_v59 = vrot.slane %v4865_v8, 1 }
  0x5a   : > { %v2384_v15 = vor.u32 %v2383_v35, %v2382_v18  ;;  %v5320_v18 = vsel %vm1814_vm4, %v1840_v20, %v1842_v62  ;;  %v5335_v35 = vsel %vm1814_vm4, %v1844_v23, %v1846_v4  ;;  %v926_v47 = vrot.slane %v4916_v45, 1 }
  0x5c   : > { %4112 = vmatmul.mubr.msk.bf16.gmra.mrb[32].mxu1 %vm458_vm2, %v457_v39  ;;  %v5273_v30 = vsel %vm2358_vm5, %v2380_v16, %v2384_v15  ;;  %v2391_v39 = vrot.slane %v5005_v37, 3  ;;  %v5290_v34 = vsel %vm2358_vm5, %v2384_v15, %v2388_v22  ;;  %v2394_v37 = vrot.slane %v5033_v5, 2 }
  0x5d   : > { %4282 = vmatmul.mubr.msk.bf16.gmra.mrb[12].mxu0 %vm458_vm2, %v5230_v46  ;;  %4117 = vmatprep.mubr.msk.bf16.mxu1 %vm458_vm2, %v4862_v7  ;;  %v5323_v5 = vsel %vm1814_vm4, %v1842_v62, %v1844_v23  ;;  %v5339_v15 = vcombine.low %v5139_v2, %v5139_v2  ;;  %v934_v23 = vrot.slane %v5008_v38, 1 }
  0x5e   : > { %4285 = vmatprep.mubr.msk.bf16.mxu0 %vm458_vm2, %v5236_v57  ;;  %v2392_v32 = vor.u32 %v2391_v39, %v2390_v10  ;;  %v5313_v17 = vor.u32 %v2395_v42, %v2394_v37  ;;  %v928_v10 = vrot.slane %v4961_v1, 1  ;;  %v930_v39 = vrot.slane %v4968_v11, 1  ;;  %v6167_v42 = vld [vmem:[#allocation18_spill] sm:$0xff] }
  0x5f   : > { %v1850_v50 = vrot.slane %v5339_v15, 2  ;;  %v932_v37 = vrot.slane %v4971_v12, 1 }
  0x60   : > { %v5301_v60 = vsel %vm2358_vm5, %v2388_v22, %v2392_v32  ;;  %v5317_v16 = vsel %vm2358_vm5, %v2392_v32, %v5313_v17  ;;  %v5464_v32 = vsel %vm912_vm6, %v928_v10, %v930_v39 }
  0x61   : > { %v1851_v2 = vsel %vm1814_vm4, %v5155_v36, %v1850_v50  ;;  %v6170_v50 = vld [vmem:[#allocation12_spill] sm:$0xff] }
  0x64   : > { %4118 = vmatmul.mubr.msk.bf16.vlgmr.msra.gmra.mrb[0].mxu1 %vm458_vm2, %v4859_v6 }
  0x65   : > { %4286 = vmatmul.mubr.msk.bf16.gmra.mrb[16].mxu0 %vm458_vm2, %v5258_v61  ;;  %4121 = vmatprep.mubr.msk.bf16.mxu1 %vm458_vm2, %v4865_v8 }
  0x66   : > { %4289 = vmatprep.mubr.msk.bf16.mxu0 %vm458_vm2, %v5261_v63  ;;  %4154 = vmatpush3.bf16.msra.mxu1 %v1005_v13  ;;  %v5343_v13 = vsel %vm1814_vm4, %v1846_v4, %v5155_v36  ;;  %v5370_v36 = vld [vmem:[%s6115_s1 + $0x20] sm:$0xf] }
  0x67   : > { %4712 = vmatprep.subr.msk.bf16.mxu1 %vm513_vm0, %v5270_v28 }
  0x6c   : > { %4122 = vmatmul.mubr.msk.bf16.gmra.mrb[4].mxu1 %vm458_vm2, %v4868_v9 }
  0x6d   : > { %4290 = vmatmul.mubr.msk.bf16.gmra.mrb[20].mxu0 %vm458_vm2, %v5293_v33  ;;  %4125 = vmatprep.mubr.msk.bf16.mxu1 %vm458_vm2, %v4889_v24 }
  0x6e   : > { %4293 = vmatprep.mubr.msk.bf16.mxu0 %vm458_vm2, %v5296_v49 }
  0x74   : > { %4126 = vmatmul.mubr.msk.bf16.gmra.mrb[8].mxu1 %vm458_vm2, %v4896_v29 }
  0x75   : > { %4294 = vmatmul.mubr.msk.bf16.gmra.mrb[24].mxu0 %vm458_vm2, %v5320_v18  ;;  %4129 = vmatprep.mubr.msk.bf16.mxu1 %vm458_vm2, %v4904_v40 }
  0x76   : > { %4297 = vmatprep.mubr.msk.bf16.mxu0 %vm458_vm2, %v5323_v5 }
  0x7c   : > { %4130 = vmatmul.mubr.msk.bf16.gmra.mrb[12].mxu1 %vm458_vm2, %v4916_v45 }
  0x7d   : > { %4298 = vmatmul.mubr.msk.bf16.gmra.mrb[28].mxu0 %vm458_vm2, %v5335_v35  ;;  %4133 = vmatprep.mubr.msk.bf16.mxu1 %vm458_vm2, %v4961_v1 }
  0x7e   : > { %4301 = vmatprep.mubr.msk.bf16.mxu0 %vm458_vm2, %v5343_v13 }
  0x84   : > { %4134 = vmatmul.mubr.msk.bf16.gmra.mrb[16].mxu1 %vm458_vm2, %v4968_v11 }
  0x85   : > { %4302 = vmatmul.mubr.msk.bf16.gmra.mrb[32].mxu0 %vm458_vm2, %v1851_v2  ;;  %4137 = vmatprep.mubr.msk.bf16.mxu1 %vm458_vm2, %v4971_v12  ;;  %v1525_v2 = vshrl.u32 %v6170_v50, 16 }
  0x86   : > { %4307 = vmatprep.mubr.msk.bf16.mxu0 %vm458_vm2, %v5100_v27  ;;  %v914_v27 = vrot.slane %v4859_v6, 1 }
  0x88   : > { %v5409_v6 = vsel %vm912_vm6, %v914_v27, %v916_v59 }
  0x8c   : > { %4138 = vmatmul.mubr.msk.bf16.gmra.mrb[20].mxu1 %vm458_vm2, %v5008_v38 }
  0x8d   : > { %4308 = vmatmul.mubr.msk.bf16.vlgmr.msra.gmra.mrb[0].mxu0 %vm458_vm2, %v5113_v53  ;;  %4141 = vmatprep.mubr.msk.bf16.mxu1 %vm458_vm2, %v5037_v14 }
  0x8e   : > { %4344 = vmatpush3.bf16.msra.mxu0 %v2499_v51  ;;  %4311 = vmatprep.mubr.msk.bf16.mxu0 %vm458_vm2, %v5159_v56  ;;  %v913_v56 = vrot.slane %v4862_v7, 1  ;;  %v918_v7 = vrot.slane %v4868_v9, 1  ;;  %v6148_v51 = vshll.u32 %v6170_v50, 16 }
  0x8f   : > { %4718 = vmatprep.subr.msk.bf16.mxu0 %vm513_vm0, %v5370_v36 }
  0x90   : > { %v915_v53 = vsel %vm912_vm6, %v913_v56, %v914_v27  ;;  %v936_v56 = vrot.slane %v5037_v14, 1  ;;  %v1527_v27 = vrot.slane %v1525_v2, 1 }
  0x94   : > { %4142 = vmatmul.mubr.msk.bf16.gmra.mrb[24].mxu1 %vm458_vm2, %v5045_v26 }
  0x95   : > { %4312 = vmatmul.mubr.msk.bf16.gmra.mrb[4].mxu0 %vm458_vm2, %v5169_v41  ;;  %4145 = vmatprep.mubr.msk.bf16.mxu1 %vm458_vm2, %v5064_v52  ;;  %v5412_v41 = vsel %vm912_vm6, %v916_v59, %v918_v7  ;;  %v938_v59 = vrot.slane %v5045_v26, 1 }
  0x96   : > { %4315 = vmatprep.mubr.msk.bf16.mxu0 %vm458_vm2, %v5203_v19  ;;  %v1239_v19 = vsel %vm513_vm0, %v5270_v28, 0 }
  0x9c   : > { %4146 = vmatmul.mubr.msk.bf16.gmra.mrb[28].mxu1 %vm458_vm2, %v5077_v58 }
  0x9d   : > { %4316 = vmatmul.mubr.msk.bf16.gmra.mrb[8].mxu0 %vm458_vm2, %v5210_v44  ;;  %4149 = vmatprep.mubr.msk.bf16.mxu1 %vm458_vm2, %v5097_v25  ;;  %v920_v44 = vrot.slane %v4889_v24, 1 }
  0x9e   : > { %4319 = vmatprep.mubr.msk.bf16.mxu0 %vm458_vm2, %v5230_v46  ;;  %v922_v46 = vrot.slane %v4896_v29, 1 }
  0xa0   : > { %v5432_v28 = vsel %vm912_vm6, %v920_v44, %v922_v46 }
  0xa4   : > { %4150 = vmatmul.mubr.msk.bf16.gmra.mrb[32].mxu1 %vm458_vm2, %v5116_v54 }
  0xa5   : > { %4320 = vmatmul.mubr.msk.bf16.gmra.mrb[12].mxu0 %vm458_vm2, %v5236_v57  ;;  %4155 = vmatprep.mubr.msk.bf16.mxu1 %vm458_vm2, %v915_v53  ;;  %v6166_v57 = vld [vmem:[#allocation2_spill] sm:$0xff]  ;;  %v1530_v53 = vrot.slane %v6148_v51, 2 }
  0xa6   : > { %4323 = vmatprep.mubr.msk.bf16.mxu0 %vm458_vm2, %v5258_v61  ;;  %v5429_v61 = vsel %vm912_vm6, %v918_v7, %v920_v44  ;;  %v5510_v44 = vsel %vm912_vm6, %v936_v56, %v938_v59 }
  0xa7   : > { %v5504_v7 = vor.u32 %v1530_v53, %v1527_v27  ;;  %v6175_v27 = vld [vmem:[#allocation10_spill] sm:$0xff] }
  0xa8   : > { %v2406_v53 = vrot.slane %v6175_v27, 2 }
  0xac   : > { %4156 = vmatmul.mubr.msk.bf16.vlgmr.msra.gmra.mrb[0].mxu1 %vm458_vm2, %v5409_v6 }
  0xad   : > { %4324 = vmatmul.mubr.msk.bf16.gmra.mrb[16].mxu0 %vm458_vm2, %v5261_v63  ;;  %4159 = vmatprep.mubr.msk.bf16.mxu1 %vm458_vm2, %v5412_v41  ;;  %v924_v63 = vrot.slane %v4904_v40, 1 }
  0xae   : > { %4327 = vmatprep.mubr.msk.bf16.mxu0 %vm458_vm2, %v5293_v33  ;;  %4192 = vmatpush3.bf16.msra.mxu1 %v1239_v19  ;;  %v5461_v33 = vsel %vm912_vm6, %v926_v47, %v928_v10  ;;  %v5507_v19 = vsel %vm912_vm6, %v934_v23, %v936_v56 }
  0xaf   : > { %4714 = vmatprep.subr.msk.bf16.mxu1 %vm513_vm0, %v6166_v57  ;;  %v5445_v20 = vsel %vm912_vm6, %v922_v46, %v924_v63  ;;  %v5448_v22 = vsel %vm912_vm6, %v924_v63, %v926_v47  ;;  %v2809_v46 = vsel %vm513_vm0, %v5370_v36, 0  ;;  %v942_v57 = vrot.slane %v5077_v58, 1 }
  0xb4   : > { %4160 = vmatmul.mubr.msk.bf16.gmra.mrb[4].mxu1 %vm458_vm2, %v5429_v61 }
  0xb5   : > { %4328 = vmatmul.mubr.msk.bf16.gmra.mrb[20].mxu0 %vm458_vm2, %v5296_v49  ;;  %4163 = vmatprep.mubr.msk.bf16.mxu1 %vm458_vm2, %v5432_v28  ;;  %v5467_v49 = vld [vmem:[%s4856_s25 + $0xa0] ss:$0 sps:$4 sm:$0xff]  }
  0xb6   : > { %4331 = vmatprep.mubr.msk.bf16.mxu0 %vm458_vm2, %v5320_v18  ;;  %v2132_v62 = vrot.slane %v5467_v49, 2  ;;  %v5481_v18 = vsel %vm912_vm6, %v930_v39, %v932_v37  ;;  %v6171_v39 = vld [vmem:[#allocation6_spill] sm:$0xff] }
  0xbc   : > { %4164 = vmatmul.mubr.msk.bf16.gmra.mrb[8].mxu1 %vm458_vm2, %v5445_v20 }
  0xbd   : > { %4332 = vmatmul.mubr.msk.bf16.gmra.mrb[24].mxu0 %vm458_vm2, %v5323_v5  ;;  %4167 = vmatprep.mubr.msk.bf16.mxu1 %vm458_vm2, %v5448_v22  ;;  %v6168_v5 = vld [vmem:[#allocation13_spill] sm:$0xff] }
  0xbe   : > { %4335 = vmatprep.mubr.msk.bf16.mxu0 %vm458_vm2, %v5335_v35  ;;  %v6169_v4 = vrot.slane %v6168_v5, 2 }
  0xc0   : > { %v2133_v35 = vsel %vm1814_vm4, %v6169_v4, %v2132_v62 }
  0xc4   : > { %4168 = vmatmul.mubr.msk.bf16.gmra.mrb[12].mxu1 %vm458_vm2, %v5461_v33 }
  0xc5   : > { %4336 = vmatmul.mubr.msk.bf16.gmra.mrb[28].mxu0 %vm458_vm2, %v5343_v13  ;;  %4171 = vmatprep.mubr.msk.bf16.mxu1 %vm458_vm2, %v5464_v32  ;;  %v5487_v13 = vsel %vm912_vm6, %v932_v37, %v934_v23  ;;  %v2398_v37 = vrot.slane %v6171_v39, 2  ;;  %v6173_v23 = vld [vmem:[#allocation9_spill] sm:$0xff] }
  0xc6   : > { %4339 = vmatprep.mubr.msk.bf16.mxu0 %vm458_vm2, %v6167_v42  ;;  %v6172_v42 = vld [vmem:[#allocation5_spill] sm:$0xff]  ;;  %v2402_v4 = vrot.slane %v6173_v23, 2 }
  0xc7   : > { %v2399_v62 = vrot.slane %v6172_v42, 3 }
  0xcc   : > { %4172 = vmatmul.mubr.msk.bf16.gmra.mrb[16].mxu1 %vm458_vm2, %v5481_v18 }
  0xcd   : > { %4340 = vmatmul.mubr.msk.bf16.gmra.mrb[32].mxu0 %vm458_vm2, %v2133_v35  ;;  %4175 = vmatprep.mubr.msk.bf16.mxu1 %vm458_vm2, %v5487_v13  ;;  %v6174_v35 = vld [vmem:[#allocation7_spill] sm:$0xff] }
  0xce   : > { %4345 = vmatprep.mubr.msk.bf16.mxu0 %vm458_vm2, %v5207_v3  ;;  %v940_v3 = vrot.slane %v5064_v52, 1  ;;  %v2403_v56 = vrot.slane %v6174_v35, 3 }
  0xd0   : > { %v5525_v63 = vsel %vm912_vm6, %v938_v59, %v940_v3  ;;  %v5528_v36 = vsel %vm912_vm6, %v940_v3, %v942_v57  ;;  %v6176_v59 = vld [vmem:[#allocation8_spill] sm:$0xff] }
  0xd4   : > { %4176 = vmatmul.mubr.msk.bf16.gmra.mrb[20].mxu1 %vm458_vm2, %v5507_v19 }
  0xd5   : > { %4346 = vmatmul.mubr.msk.bf16.vlgmr.msra.gmra.mrb[0].mxu0 %vm458_vm2, %v5214_v43  ;;  %4179 = vmatprep.mubr.msk.bf16.mxu1 %vm458_vm2, %v5510_v44  ;;  %v944_v43 = vrot.slane %v5097_v25, 1 }
  0xd6   : > { %4382 = vmatpush3.bf16.msra.mxu0 %v2809_v46  ;;  %4349 = vmatprep.mubr.msk.bf16.mxu0 %vm458_vm2, %v5233_v31  ;;  %v5540_v31 = vrot.slane %v5116_v54, 1  ;;  %v2407_v46 = vrot.slane %v6176_v59, 3 }
  0xd7   : > { %v5543_v47 = vsel %vm912_vm6, %v942_v57, %v944_v43  ;;  %v6177_v57 = vld [vmem:[#allocation15_spill] sm:$0xff] }
  0xd8   : > { %v5547_v10 = vsel %vm912_vm6, %v944_v43, %v5540_v31  ;;  %v2410_v43 = vrot.slane %v6177_v57, 2 }
  0xdc   : > { %4180 = vmatmul.mubr.msk.bf16.gmra.mrb[24].mxu1 %vm458_vm2, %v5525_v63 }
  0xdd   : > { %4350 = vmatmul.mubr.msk.bf16.gmra.mrb[4].mxu0 %vm458_vm2, %v5244_v48  ;;  %4183 = vmatprep.mubr.msk.bf16.mxu1 %vm458_vm2, %v5528_v36  ;;  %v948_v48 = vrot.slane %v5184_v55, 1  ;;  %v2400_v55 = vor.u32 %v2399_v62, %v2398_v37  ;;  %v6180_v37 = vld [vmem:[#allocation16_spill] sm:$0xff] }
  0xde   : > { %4353 = vmatprep.mubr.msk.bf16.mxu0 %vm458_vm2, %v5255_v21  ;;  %v2414_v62 = vrot.slane %v6180_v37, 2 }
  0xdf   : > { %v949_v21 = vsel %vm912_vm6, %v5540_v31, %v948_v48 }
  0xe4   : > { %4184 = vmatmul.mubr.msk.bf16.gmra.mrb[28].mxu1 %vm458_vm2, %v5543_v47 }
  0xe5   : > { %4354 = vmatmul.mubr.msk.bf16.gmra.mrb[8].mxu0 %vm458_vm2, %v5273_v30  ;;  %4187 = vmatprep.mubr.msk.bf16.mxu1 %vm458_vm2, %v5547_v10  ;;  %v2404_v30 = vor.u32 %v2403_v56, %v2402_v4  ;;  %v6181_v4 = vld [vmem:[#allocation14_spill] sm:$0xff] }
  0xe6   : > { %4357 = vmatprep.mubr.msk.bf16.mxu0 %vm458_vm2, %v5290_v34  ;;  %v2401_v34 = vsel %vm2358_vm5, %v5313_v17, %v2400_v55  ;;  %v6179_v17 = vld [vmem:[#allocation3_spill] sm:$0xff]  ;;  %v2415_v56 = vrot.slane %v6181_v4, 3 }
  0xe7   : > { %v2405_v3 = vsel %vm2358_vm5, %v2400_v55, %v2404_v30 }
  0xec   : > { %4188 = vmatmul.mubr.msk.bf16.gmra.mrb[32].mxu1 %vm458_vm2, %v949_v21 }
  0xed   : > { %4358 = vmatmul.mubr.msk.bf16.gmra.mrb[12].mxu0 %vm458_vm2, %v5301_v60  ;;  %4193 = vmatprep.mubr.msk.bf16.mxu1 %vm458_vm2, %v5409_v6  ;;  %v6178_v60 = vld [vmem:[#allocation11_spill] sm:$0xff] }
  0xee   : > { %4361 = vmatprep.mubr.msk.bf16.mxu0 %vm458_vm2, %v5317_v16  ;;  %v2411_v48 = vrot.slane %v6178_v60, 3  ;;  %v2408_v16 = vor.u32 %v2407_v46, %v2406_v53  ;;  %v2427_v53 = vshrl.u32 %v6168_v5, 16  ;;  %v2430_v46 = vshll.u32 %v6168_v5, 16 }
  0xf0   : > { %v2412_v6 = vor.u32 %v2411_v48, %v2410_v43  ;;  %v2409_v21 = vsel %vm2358_vm5, %v2404_v30, %v2408_v16  ;;  %v2422_v43 = vrot.slane %v1525_v2, 2  ;;  %v2436_v2 = vshrl.u32 %v5467_v49, 16 }
  0xf2   : > { %v2413_v55 = vsel %vm2358_vm5, %v2408_v16, %v2412_v6  ;;  %v2429_v16 = vrot.slane %v2427_v53, 2 }
  0xf4   : > { %4194 = vmatmul.mubr.msk.bf16.vlgmr.msra.gmra.mrb[0].mxu1 %vm458_vm2, %v5412_v41  ;;  %v2418_v41 = vrot.slane %v5199_v0, 2 }
  0xf5   : > { %4362 = vmatmul.mubr.msk.bf16.gmra.mrb[16].mxu0 %vm458_vm2, %v2401_v34  ;;  %4197 = vmatprep.mubr.msk.bf16.mxu1 %vm458_vm2, %v5429_v61  ;;  %v6182_v34 = vld [vmem:[#allocation17_spill] sm:$0xff]  ;;  %v2416_v61 = vor.u32 %v2415_v56, %v2414_v62  ;;  %v2438_v56 = vrot.slane %v2436_v2, 2  ;;  %v1513_v2 = vrot.slane %v6178_v60, 2  ;;  %v2742_v60 = vrot.slane %v5077_v58, 3 }
  0xf6   : > { %4365 = vmatprep.mubr.msk.bf16.mxu0 %vm458_vm2, %v2405_v3  ;;  %4420 = vmatpush3.bf16.msra.mxu1 %v6179_v17  ;;  %v2419_v51 = vrot.slane %v6182_v34, 3  ;;  %v1534_v58 = vshrl.u32 %v5339_v15, 16 }
  0xf7   : > { %v2417_v3 = vsel %vm2358_vm5, %v2412_v6, %v2416_v61  ;;  %v2439_v6 = vshll.u32 %v5467_v49, 16 }
  0xf8   : > { %v2420_v30 = vor.u32 %v2419_v51, %v2418_v41 }
  0xfa   : > { %v2421_v17 = vsel %vm2358_vm5, %v2416_v61, %v2420_v30  ;;  %v2718_v61 = vrot.slane %v4868_v9, 3 }
  0xfc   : > { %4198 = vmatmul.mubr.msk.bf16.gmra.mrb[4].mxu1 %vm458_vm2, %v5432_v28  ;;  %v6183_v28 = vshll.u32 %v6170_v50, 16 }
  0xfd   : > { %4366 = vmatmul.mubr.msk.bf16.gmra.mrb[20].mxu0 %vm458_vm2, %v2409_v21  ;;  %4201 = vmatprep.mubr.msk.bf16.mxu1 %vm458_vm2, %v5445_v20  ;;  %v2432_v20 = vrot.slane %v2430_v46, 3 }
  0xfe   : > { %4369 = vmatprep.mubr.msk.bf16.mxu0 %vm458_vm2, %v2413_v55  ;;  %v2423_v48 = vrot.slane %v6183_v28, 3  ;;  %v2441_v55 = vrot.slane %v2439_v6, 3  ;;  %v1505_v28 = vrot.slane %v6174_v35, 2 }
  0xff   : > { %v2433_v21 = vor.u32 %v2432_v20, %v2429_v16  ;;  %v1508_v16 = vrot.slane %v6175_v27, 1  ;;  %v1509_v20 = vrot.slane %v6176_v59, 2  ;;  %v1512_v59 = vrot.slane %v6177_v57, 1 }
 0x100   : > { %v2424_v51 = vor.u32 %v2423_v48, %v2422_v43  ;;  %v6184_v48 = vld [vmem:[#allocation4_spill] sm:$0xff] }
 0x101   : > { %v1510_v35 = vor.u32 %v1509_v20, %v1508_v16  ;;  %v4772_v16 = vld [vmem:[%s4856_s25 + $0x20] sm:$0xff]  }
 0x102   : > { %v2425_v62 = vsel %vm2358_vm5, %v2420_v30, %v2424_v51  ;;  %v2434_v41 = vsel %vm2358_vm5, %v2424_v51, %v2433_v21  ;;  %v2738_v51 = vrot.slane %v5045_v26, 3  ;;  %v2740_v26 = vrot.slane %v5064_v52, 3 }
 0x103   : > { %v3181_v20 = vunpack.c.l.bf16 %v4772_v16 }
 0x104   : > { %4202 = vmatmul.mubr.msk.bf16.gmra.mrb[8].mxu1 %vm458_vm2, %v5448_v22  ;;  %v2442_v22 = vor.u32 %v2441_v55, %v2438_v56  ;;  %v1517_v56 = vrot.slane %v6181_v4, 2  ;;  %v1520_v4 = vrot.slane %v5199_v0, 1  ;;  %v2744_v0 = vrot.slane %v5097_v25, 3 }
 0x105   : > { %4370 = vmatmul.mubr.msk.bf16.gmra.mrb[24].mxu0 %vm458_vm2, %v2417_v3  ;;  %4205 = vmatprep.mubr.msk.bf16.mxu1 %vm458_vm2, %v5461_v33  ;;  %v2717_v33 = vrot.slane %v4865_v8, 3  ;;  %v2722_v8 = vrot.slane %v4896_v29, 3  ;;  %v1501_v3 = vrot.slane %v6172_v42, 2  ;;  %v1504_v42 = vrot.slane %v6173_v23, 1 }
 0x106   : > { %4373 = vmatprep.mubr.msk.bf16.mxu0 %vm458_vm2, %v2421_v17  ;;  %v2443_v30 = vsel %vm2358_vm5, %v2433_v21, %v2442_v22  ;;  %v2736_v23 = vrot.slane %v5037_v14, 3  ;;  %v1514_v14 = vor.u32 %v1513_v2, %v1512_v59  ;;  %v2741_v22 = vsel %vm2716_vm7, %v2738_v51, %v2740_v26 }
 0x107   : > { %v2719_v53 = vsel %vm2716_vm7, %v2717_v33, %v2718_v61 }
 0x108   : > { %v2739_v55 = vsel %vm2716_vm7, %v2736_v23, %v2738_v51  ;;  %v4773_v51 = vld [vmem:[%s4856_s25 + $0x28] sm:$0xff]  }
 0x10c   : > { %4206 = vmatmul.mubr.msk.bf16.gmra.mrb[12].mxu1 %vm458_vm2, %v5464_v32  ;;  %v2720_v32 = vrot.slane %v4889_v24, 3  ;;  %v2726_v24 = vrot.slane %v4916_v45, 3  ;;  %v2730_v45 = vrot.slane %v4968_v11, 3  ;;  %v2732_v11 = vrot.slane %v4971_v12, 3 }
 0x10d   : > { %4374 = vmatmul.mubr.msk.bf16.gmra.mrb[28].mxu0 %vm458_vm2, %v2425_v62  ;;  %4209 = vmatprep.mubr.msk.bf16.mxu1 %vm458_vm2, %v5481_v18  ;;  %v1516_v62 = vrot.slane %v6180_v37, 1  ;;  %v1515_v37 = vsel %vm1456_vm3, %v1510_v35, %v1514_v14 }
 0x10e   : > { %4377 = vmatprep.mubr.msk.bf16.mxu0 %vm458_vm2, %v2434_v41  ;;  %v2721_v9 = vsel %vm2716_vm7, %v2718_v61, %v2720_v32  ;;  %v2723_v18 = vsel %vm2716_vm7, %v2720_v32, %v2722_v8  ;;  %v1521_v41 = vrot.slane %v6182_v34, 2  ;;  %v2743_v61 = vsel %vm2716_vm7, %v2740_v26, %v2742_v60 }
 0x10f   : > { %v1518_v57 = vor.u32 %v1517_v56, %v1516_v62  ;;  %v2746_v34 = vrot.slane %v5116_v54, 3  ;;  %v1536_v32 = vrot.slane %v1534_v58, 1  ;;  %v2748_v54 = vrot.slane %v6170_v50, 3 }
 0x110   : > { %v1522_v52 = vor.u32 %v1521_v41, %v1520_v4  ;;  %v4774_v41 = vld [vmem:[%s4856_s25 + $0x30] sm:$0xff]  }
 0x111   : > { %v1519_v33 = vsel %vm1456_vm3, %v1514_v14, %v1518_v57  ;;  %v3261_v14 = vrot.slane %v3181_v20, 3  ;;  %v3186_v58 = vunpack.c.h.bf16 %v4774_v41 }
 0x114   : > { %4210 = vmatmul.mubr.msk.bf16.gmra.mrb[16].mxu1 %vm458_vm2, %v5487_v13  ;;  %v2724_v13 = vrot.slane %v4904_v40, 3  ;;  %v1228_v40 = vrot.slane %v6170_v50, 1 }
 0x115   : > { %4378 = vmatmul.mubr.msk.bf16.gmra.mrb[32].mxu0 %vm458_vm2, %v2443_v30  ;;  %4213 = vmatprep.mubr.msk.bf16.mxu1 %vm458_vm2, %v5507_v19  ;;  %v1537_v30 = vshll.u32 %v5339_v15, 16 }
 0x116   : > { %4383 = vmatprep.mubr.msk.bf16.mxu0 %vm458_vm2, %v2719_v53  ;;  %v2725_v29 = vsel %vm2716_vm7, %v2722_v8, %v2724_v13  ;;  %v2727_v19 = vsel %vm2716_vm7, %v2724_v13, %v2726_v24  ;;  %v1229_v46 = vsel %vm912_vm6, %v5540_v31, %v1228_v40  ;;  %v1523_v53 = vsel %vm1456_vm3, %v1518_v57, %v1522_v52 }
 0x117   : > { %v1539_v8 = vrot.slane %v1537_v30, 2  ;;  %v2747_v13 = vsel %vm2716_vm7, %v2744_v0, %v2746_v34 }
 0x119   : > { %v1540_v25 = vor.u32 %v1539_v8, %v1536_v32  ;;  %v4776_v8 = vld [vmem:[%s4856_s25 + $0x40] sm:$0xff]  }
 0x11c   : > { %4214 = vmatmul.mubr.msk.bf16.gmra.mrb[20].mxu1 %vm458_vm2, %v5510_v44  ;;  %v2728_v44 = vrot.slane %v4961_v1, 3  ;;  %v1230_v1 = vrot.slane %v5339_v15, 1  ;;  %v2750_v15 = vrot.slane %v6168_v5, 3 }
 0x11d   : > { %4384 = vmatmul.mubr.msk.bf16.vlgmr.msra.gmra.mrb[0].mxu0 %vm458_vm2, %v2721_v9  ;;  %4217 = vmatprep.mubr.msk.bf16.mxu1 %vm458_vm2, %v5525_v63  ;;  %v2745_v9 = vsel %vm2716_vm7, %v2742_v60, %v2744_v0 }
 0x11e   : > { %4387 = vmatprep.mubr.msk.bf16.mxu0 %vm458_vm2, %v2723_v18  ;;  %v2729_v63 = vsel %vm2716_vm7, %v2726_v24, %v2728_v44  ;;  %v2731_v43 = vsel %vm2716_vm7, %v2728_v44, %v2730_v45  ;;  %v1532_v18 = vsel %vm1456_vm3, %v1522_v52, %v5504_v7  ;;  %v1541_v24 = vsel %vm1456_vm3, %v5504_v7, %v1540_v25 }
 0x11f   : > { %v2752_v44 = vrot.slane %v5467_v49, 3  ;;  %v3190_v25 = vunpack.c.h.bf16 %v4776_v8 }
 0x121   : > { %v2753_v50 = vsel %vm2716_vm7, %v2750_v15, %v2752_v44  ;;  %v4778_v44 = vld [vmem:[%s4856_s25 + $0x50] sm:$0xff]  }
 0x124   : > { %4218 = vmatmul.mubr.msk.bf16.gmra.mrb[24].mxu1 %vm458_vm2, %v5528_v36  ;;  %v1500_v36 = vrot.slane %v6171_v39, 1  ;;  %v1231_v39 = vsel %vm912_vm6, %v1228_v40, %v1230_v1 }
 0x125   : > { %4388 = vmatmul.mubr.msk.bf16.gmra.mrb[4].mxu0 %vm458_vm2, %v2725_v29  ;;  %4221 = vmatprep.mubr.msk.bf16.mxu1 %vm458_vm2, %v5543_v47  ;;  %v2734_v47 = vrot.slane %v5008_v38, 3  ;;  %v1506_v38 = vor.u32 %v1505_v28, %v1504_v42  ;;  %v2749_v29 = vsel %vm2716_vm7, %v2746_v34, %v2748_v54  ;;  %v4770_v42 = vld [vmem:[%s4856_s25 + $0x8] sm:$0xff]   ;;  %v3184_v34 = vunpack.c.h.bf16 %v4773_v51 }
 0x126   : > { %4391 = vmatprep.mubr.msk.bf16.mxu0 %vm458_vm2, %v2727_v19  ;;  %v1502_v31 = vor.u32 %v1501_v3, %v1500_v36  ;;  %v2751_v19 = vsel %vm2716_vm7, %v2748_v54, %v2750_v15  ;;  %v3175_v28 = vunpack.c.l.bf16 %v4770_v42  ;;  %v4777_v15 = vld [vmem:[%s4856_s25 + $0x48] sm:$0xff]  }
 0x127   : > { %v2735_v12 = vsel %vm2716_vm7, %v2732_v11, %v2734_v47  ;;  %v2737_v6 = vsel %vm2716_vm7, %v2734_v47, %v2736_v23  ;;  %v1511_v21 = vsel %vm1456_vm3, %v1506_v38, %v1510_v35  ;;  %v3267_v20 = vrot.slane %v3184_v34, 3 }
 0x128   : > { %v1503_v17 = vsel %vm1456_vm3, %v6184_v48, %v1502_v31  ;;  %v1507_v27 = vsel %vm1456_vm3, %v1502_v31, %v1506_v38  ;;  %v4769_v31 = vld [vmem:[%s4856_s25 + $0x10] sm:$0xff]   ;;  %v4771_v48 = vld [vmem:[%s4856_s25 + $0x18] sm:$0xff]  }
 0x129   : > { %v3177_v47 = vunpack.c.l.bf16 %v4769_v31  ;;  %v3180_v23 = vunpack.c.h.bf16 %v4771_v48 }
 0x12b   : > { %v3253_v2 = vrot.slane %v3177_v47, 3  ;;  %v3259_v57 = vrot.slane %v3180_v23, 3  ;;  %v3192_v47 = vunpack.c.h.bf16 %v4777_v15 }
 0x12c   : > { %4222 = vmatmul.mubr.msk.bf16.gmra.mrb[28].mxu1 %vm458_vm2, %v5547_v10  ;;  %v2733_v10 = vsel %vm2716_vm7, %v2730_v45, %v2732_v11 }
 0x12d   : > { %4392 = vmatmul.mubr.msk.bf16.gmra.mrb[8].mxu0 %vm458_vm2, %v2729_v63  ;;  %4225 = vmatprep.mubr.msk.bf16.mxu1 %vm458_vm2, %v1229_v46 }
 0x12e   : > { %4395 = vmatprep.mubr.msk.bf16.mxu0 %vm458_vm2, %v2731_v43 }
 0x134   : > { %4226 = vmatmul.mubr.msk.bf16.gmra.mrb[32].mxu1 %vm458_vm2, %v1231_v39  ;;  %v3178_v39 = vunpack.c.h.bf16 %v4769_v31  ;;  %v3194_v31 = vunpack.c.h.bf16 %v4778_v44 }
 0x135   : > { %4396 = vmatmul.mubr.msk.bf16.gmra.mrb[12].mxu0 %vm458_vm2, %v2733_v10  ;;  %4251 = vmatprep.mubr.msk.bf16.mxu1 %vm458_vm2, %v1503_v17  ;;  %v3176_v10 = vunpack.c.h.bf16 %v4770_v42  ;;  %v3179_v17 = vunpack.c.l.bf16 %v4771_v48  ;;  %v3271_v42 = vrot.slane %v3186_v58, 3  ;;  %v4780_v48 = vld [vmem:[%s4856_s25 + $0x60] sm:$0xff]  }
 0x136   : > { %4399 = vmatprep.mubr.msk.bf16.mxu0 %vm458_vm2, %v2735_v12  ;;  %v3182_v12 = vunpack.c.h.bf16 %v4772_v16  ;;  %v3198_v16 = vunpack.c.h.bf16 %v4780_v48 }
 0x137   : > { %v3251_v62 = vrot.slane %v3176_v10, 3 }
 0x138   : > { %v3263_v26 = vrot.slane %v3182_v12, 3 }
 0x13a   : > { %v5783_v52 = vsel %vm2716_vm7, %v3261_v14, %v3263_v26 }
 0x13c   : > { %4252 = vmatmul.mubr.msk.bf16.vlgmr.msra.gmra.mrb[20].mxu1 %vm458_vm2, %v1507_v27  ;;  %v3183_v27 = vunpack.c.l.bf16 %v4773_v51 }
 0x13d   : > { %4400 = vmatmul.mubr.msk.bf16.gmra.mrb[16].mxu0 %vm458_vm2, %v2737_v6  ;;  %4255 = vmatprep.mubr.msk.bf16.mxu1 %vm458_vm2, %v1511_v21  ;;  %v3255_v6 = vrot.slane %v3178_v39, 3  ;;  %v3250_v21 = vrot.slane %v3175_v28, 3  ;;  %v4779_v28 = vld [vmem:[%s4856_s25 + $0x58] sm:$0xff]  }
 0x13e   : > { %4403 = vmatprep.mubr.msk.bf16.mxu0 %vm458_vm2, %v2739_v55  ;;  %v3257_v55 = vrot.slane %v3179_v17, 3  ;;  %v3265_v60 = vrot.slane %v3183_v27, 3  ;;  %v3195_v10 = vunpack.c.l.bf16 %v4779_v28  ;;  %v3197_v17 = vunpack.c.l.bf16 %v4780_v48 }
 0x13f   : > { %v5773_v4 = vsel %vm2716_vm7, %v3250_v21, %v3251_v62  ;;  %v3196_v51 = vunpack.c.h.bf16 %v4779_v28  ;;  %v3279_v27 = vrot.slane %v3190_v25, 3  ;;  %v5806_v21 = vld [vmem:[%s4856_s25 + $0x68] sm:$0xff]  }
 0x140   : > { %v5788_v0 = vsel %vm2716_vm7, %v3257_v55, %v3259_v57  ;;  %v3289_v34 = vrot.slane %v3195_v10, 3 }
 0x144   : > { %4256 = vmatmul.mubr.msk.bf16.gmra.mrb[24].mxu1 %vm458_vm2, %v1515_v37  ;;  %v5770_v37 = vsel %vm2716_vm7, %v3253_v2, %v3255_v6 }
 0x145   : > { %4404 = vmatmul.mubr.msk.bf16.gmra.mrb[20].mxu0 %vm458_vm2, %v2741_v22  ;;  %4259 = vmatprep.mubr.msk.bf16.mxu1 %vm458_vm2, %v1519_v33  ;;  %v3185_v22 = vunpack.c.l.bf16 %v4774_v41  ;;  %v5777_v33 = vsel %vm2716_vm7, %v3255_v6, %v3257_v55  ;;  %v5810_v55 = vsel %vm2716_vm7, %v3259_v57, %v3261_v14  ;;  %v3287_v41 = vrot.slane %v3194_v31, 3 }
 0x146   : > { %4407 = vmatprep.mubr.msk.bf16.mxu0 %vm458_vm2, %v2743_v61  ;;  %v5780_v61 = vsel %vm2716_vm7, %v3251_v62, %v3253_v2  ;;  %v3199_v62 = vunpack.c.l.bf16 %v5806_v21  ;;  %v3291_v14 = vrot.slane %v3196_v51, 3  ;;  %v4782_v51 = vld [vmem:[%s4856_s25 + $0x70] sm:$0xff]  }
 0x147   : > { %v5852_v48 = vsel %vm2716_vm7, %v3287_v41, %v3289_v34 }
 0x14c   : > { %4260 = vmatmul.mubr.msk.bf16.gmra.mrb[28].mxu1 %vm458_vm2, %v1523_v53  ;;  %v4775_v53 = vld [vmem:[%s4856_s25 + $0x38] sm:$0xff]  }
 0x14d   : > { %4408 = vmatmul.mubr.msk.bf16.gmra.mrb[24].mxu0 %vm458_vm2, %v2745_v9  ;;  %4263 = vmatprep.mubr.msk.bf16.mxu1 %vm458_vm2, %v1532_v18  ;;  %v3187_v32 = vunpack.c.l.bf16 %v4775_v53  ;;  %v3189_v9 = vunpack.c.l.bf16 %v4776_v8  ;;  %v3188_v54 = vunpack.c.h.bf16 %v4775_v53  ;;  %v3293_v53 = vrot.slane %v3197_v17, 3 }
 0x14e   : > { %4411 = vmatprep.mubr.msk.bf16.mxu0 %vm458_vm2, %v2747_v13  ;;  %v5795_v13 = vsel %vm2716_vm7, %v3263_v26, %v3265_v60  ;;  %v5816_v8 = vsel %vm2716_vm7, %v3265_v60, %v3267_v20 }
 0x14f   : > { %v3273_v12 = vrot.slane %v3187_v32, 3  ;;  %v3277_v23 = vrot.slane %v3189_v9, 3  ;;  %v3275_v2 = vrot.slane %v3188_v54, 3  ;;  %v3295_v32 = vrot.slane %v3198_v16, 3  ;;  %v5827_v54 = vld [vmem:[%s6116_s2] ss:$0 sm:$0xff] }
 0x151   : > { %v5819_v9 = vsel %vm2716_vm7, %v3271_v42, %v3273_v12  ;;  %v5842_v31 = vsel %vm2716_vm7, %v3275_v2, %v3277_v23  ;;  %v5858_v17 = vsel %vm2716_vm7, %v3293_v53, %v3295_v32 }
 0x154   : > { %4264 = vmatmul.mubr.msk.bf16.gmra.mrb[32].mxu1 %vm458_vm2, %v1541_v24  ;;  %v3191_v24 = vunpack.c.l.bf16 %v4777_v15  ;;  %v5830_v15 = vsel %vm2716_vm7, %v3277_v23, %v3279_v27  ;;  %v5863_v23 = vsel %vm2716_vm7, %v3289_v34, %v3291_v14 }
 0x155   : > { %4412 = vmatmul.mubr.msk.bf16.gmra.mrb[28].mxu0 %vm458_vm2, %v2749_v29 }
 0x156   : > { %4415 = vmatprep.mubr.msk.bf16.mxu0 %vm458_vm2, %v2751_v19  ;;  %v3269_v19 = vrot.slane %v3185_v22, 3  ;;  %v3281_v6 = vrot.slane %v3191_v24, 3  ;;  %v3283_v22 = vrot.slane %v3192_v47, 3  ;;  %v5833_v24 = vsel %vm2716_vm7, %v3273_v12, %v3275_v2 }
 0x158   : > { %v5813_v58 = vsel %vm2716_vm7, %v3269_v19, %v3271_v42  ;;  %v5822_v25 = vsel %vm2716_vm7, %v3267_v20, %v3269_v19  ;;  %v5836_v60 = vsel %vm2716_vm7, %v3279_v27, %v3281_v6  ;;  %v5848_v42 = vsel %vm2716_vm7, %v3281_v6, %v3283_v22 }
 0x15d   : > { %4416 = vmatmul.mubr.msk.bf16.gmra.mrb[32].mxu0 %vm458_vm2, %v2753_v50  ;;  %v3193_v50 = vunpack.c.l.bf16 %v4778_v44  ;;  %v5838_v44 = vrot.slane %v3199_v62, 3  ;;  %v5873_v62 = vsel %vm2716_vm7, %v3291_v14, %v3293_v53 }
 0x15f   : > { %v3285_v26 = vrot.slane %v3193_v50, 3  ;;  %v5870_v6 = vsel %vm2716_vm7, %v3295_v32, %v5838_v44 }
 0x161   : > { %v5845_v47 = vsel %vm2716_vm7, %v3285_v26, %v3287_v41  ;;  %v3202_v41 = vunpack.c.h.bf16 %v4782_v51 }
 0x1c7   : > { %v5732_v5 = vpop.f32.mrb[0].mxu1 }
 0x1c8   : > { %v5734_v7 = vpop.f32.mrb[1].mxu1 }
 0x1c9   : > { %v5736_v40 = vpop.f32.mrb[2].mxu1 }
 0x1ca   : > { %v5738_v45 = vpop.f32.mrb[3].mxu1 }
 0x1cf   : > { %v5740_v63 = vpop.f32.mrb[4].mxu1 }
 0x1d0   : > { %v5742_v46 = vpop.f32.mrb[5].mxu1 }
 0x1d1   : > { %v5744_v49 = vpop.f32.mrb[6].mxu1 }
 0x1d2   : > { %v5746_v36 = vpop.f32.mrb[7].mxu1 }
 0x1d7   : > { %v5748_v3 = vpop.f32.mrb[8].mxu1 }
 0x1d8   : > { %v5750_v43 = vpop.f32.mrb[9].mxu1 }
 0x1d9   : > { %v5752_v1 = vpop.f32.mrb[10].mxu1 }
 0x1da   : > { %v5754_v11 = vpop.f32.mrb[11].mxu1 }
 0x1df   : > { %v5760_v38 = vpop.f32.mrb[12].mxu1 }
 0x1e0   : > { %v5762_v35 = vpop.f32.mrb[13].mxu1 }
 0x1e1   : > { %v5765_v59 = vpop.f32.mrb[14].mxu1 }
 0x1e2   : > { %v5767_v56 = vpop.f32.mrb[15].mxu1 }
 0x1e7   : > { %v5785_v30 = vpop.f32.mrb[16].mxu1 }
 0x1e8   : > { %v5792_v18 = vpop.f32.mrb[17].mxu1 }
 0x1e9   : > { %v5798_v29 = vpop.f32.mrb[18].mxu1 }
 0x1ea   : > { %v5801_v39 = vpop.f32.mrb[19].mxu1 }
 0x1f0   : > { %v4385_v57 = vpop.f32.mrb[0].mxu0 }
 0x1f1   : > { %v4421_v19 = vadd.f32 %v4385_v57, %v5732_v5  ;;  %v2845_v50 = vpop.f32.mrb[1].mxu0  ;;  %v5855_v5 = vsel %vm2716_vm7, %v3283_v22, %v3285_v26  ;;  %v3200_v57 = vunpack.c.h.bf16 %v5806_v21 }
 0x1f2   : > { %v4422_v28 = vadd.f32 %v2845_v50, %v5734_v7  ;;  %v4386_v10 = vpop.f32.mrb[2].mxu0  ;;  %v3201_v7 = vunpack.c.l.bf16 %v4782_v51 }
 0x1f3   : > { %v3033_v16 = vadd.f32 %v4421_v19, %v5827_v54  ;;  %v4423_v20 = vadd.f32 %v4386_v10, %v5736_v40  ;;  %v2848_v12 = vpop.f32.mrb[3].mxu0 }
 0x1f4   : > { %v3031_v27 = vadd.f32 %v4422_v28, %v5827_v54  ;;  %v4424_v2 = vadd.f32 %v2848_v12, %v5738_v45  ;;  %v5879_v32 = vrot.slane %v3201_v7, 3  ;;  %v5889_v12 = vrot.slane %v3202_v41, 3 }
 0x1f5   : > { %vm3069_vm9 = vcmp.gt.f32.partialorder %v3033_v16, 0.0  ;;  %v3105_v40 = vmul.f32 0.01, %v3033_v16  ;;  %v3034_v26 = vadd.f32 %v4423_v20, %v5827_v54 }
 0x1f6   : > { %vm3067_vm10 = vcmp.gt.f32.partialorder %v3031_v27, 0.0  ;;  %v3103_v22 = vmul.f32 0.01, %v3031_v27  ;;  %v3032_v34 = vadd.f32 %v4424_v2, %v5827_v54 }
 0x1f7   : > { %v3141_v45 = vsel %vm3069_vm9, %v3033_v16, %v3105_v40  ;;  %vm3070_vm11 = vcmp.gt.f32.partialorder %v3034_v26, 0.0  ;;  %v3106_v19 = vmul.f32 0.01, %v3034_v26 }
 0x1f8   : > { %v3361_v53 = vadd.f32 %v5770_v37, %v3141_v45  ;;  %v3139_v14 = vsel %vm3067_vm10, %v3031_v27, %v3103_v22  ;;  %vm3068_vm12 = vcmp.gt.f32.partialorder %v3032_v34, 0.0  ;;  %v3104_v50 = vmul.f32 0.01, %v3032_v34  ;;  %v4389_v28 = vpop.f32.mrb[4].mxu0 }
 0x1f9   : > { %v3359_v10 = vadd.f32 %v5773_v4, %v3139_v14  ;;  %v3142_v21 = vsel %vm3070_vm11, %v3034_v26, %v3106_v19  ;;  %v4425_v16 = vadd.f32 %v4389_v28, %v5740_v63  ;;  %v2861_v20 = vpop.f32.mrb[5].mxu0 }
 0x1fa   : > { %v3872_v37 = vpack.c.bf16 %v3361_v53, %v3361_v53  ;;  %v3362_v51 = vadd.f32 %v5777_v33, %v3142_v21  ;;  %v3140_v7 = vsel %vm3068_vm12, %v3032_v34, %v3104_v50  ;;  %v4426_v27 = vadd.f32 %v2861_v20, %v5742_v46  ;;  %v4390_v2 = vpop.f32.mrb[6].mxu0  ;;  %v5901_v34 = vld [vmem:[%s4856_s25 + $0x78] sm:$0xff]  }
 0x1fb   : > { %v3870_v40 = vpack.c.bf16 %v3359_v10, %v3359_v10  ;;  %v3360_v22 = vadd.f32 %v5780_v61, %v3140_v7  ;;  %v3037_v4 = vadd.f32 %v4425_v16, %v5827_v54  ;;  %v4427_v63 = vadd.f32 %v4390_v2, %v5744_v49  ;;  %v2864_v26 = vpop.f32.mrb[7].mxu0 }
 0x1fc   : > { %3542 = vst.msk [vmem:[%s5885_s15 + $0x8] sm:$0xf] %vm3539_vm8, %v3872_v37  ;;  %v3873_v41 = vpack.c.bf16 %v3362_v51, %v3362_v51  ;;  %v3035_v45 = vadd.f32 %v4426_v27, %v5827_v54  ;;  %v4428_v33 = vadd.f32 %v2864_v26, %v5746_v36  ;;  %v3203_v46 = vunpack.c.l.bf16 %v5901_v34 }
 0x1fd   : > { %3540 = vst.msk [vmem:[%s5885_s15] sm:$0xf] %vm3539_vm8, %v3870_v40  ;;  %v3871_v61 = vpack.c.bf16 %v3360_v22, %v3360_v22  ;;  %vm3073_vm13 = vcmp.gt.f32.partialorder %v3037_v4, 0.0  ;;  %v3109_v19 = vmul.f32 0.01, %v3037_v4  ;;  %v3038_v49 = vadd.f32 %v4427_v63, %v5827_v54 }
 0x1fe   : > { %3543 = vst.msk [vmem:[%s5885_s15 + $0xc] sm:$0xf] %vm3539_vm8, %v3873_v41  ;;  %vm3071_vm14 = vcmp.gt.f32.partialorder %v3035_v45, 0.0  ;;  %v3107_v53 = vmul.f32 0.01, %v3035_v45  ;;  %v3036_v14 = vadd.f32 %v4428_v33, %v5827_v54  ;;  %v3299_v50 = vrot.slane %v3200_v57, 3 }
 0x1ff   : > { %3541 = vst.msk [vmem:[%s5885_s15 + $0x4] sm:$0xf] %vm3539_vm8, %v3871_v61  ;;  %v3145_v36 = vsel %vm3073_vm13, %v3037_v4, %v3109_v19  ;;  %vm3074_vm15 = vcmp.gt.f32.partialorder %v3038_v49, 0.0  ;;  %v3110_v28 = vmul.f32 0.01, %v3038_v49  ;;  %v5915_v10 = vsel %vm2716_vm7, %v5879_v32, %v5889_v12 }
 0x200   : > { %v3365_v21 = vadd.f32 %v5783_v52, %v3145_v36  ;;  %v3143_v16 = vsel %vm3071_vm14, %v3035_v45, %v3107_v53  ;;  %vm3072_vm0 = vcmp.gt.f32.partialorder %v3036_v14, 0.0  ;;  %v3108_v20 = vmul.f32 0.01, %v3036_v14  ;;  %v4393_v37 = vpop.f32.mrb[8].mxu0 }
 0x201   : > { %v3363_v51 = vadd.f32 %v5788_v0, %v3143_v16  ;;  %v3146_v57 = vsel %vm3074_vm15, %v3038_v49, %v3110_v28  ;;  %v4429_v7 = vadd.f32 %v4393_v37, %v5748_v3  ;;  %v2877_v27 = vpop.f32.mrb[9].mxu0  ;;  %v5920_v2 = vrot.slane %v3203_v46, 3 }
 0x202   : > { %v3876_v40 = vpack.c.bf16 %v3365_v21, %v3365_v21  ;;  %v3366_v22 = vadd.f32 %v5795_v13, %v3146_v57  ;;  %v3144_v4 = vsel %vm3072_vm0, %v3036_v14, %v3108_v20  ;;  %v4430_v52 = vadd.f32 %v2877_v27, %v5750_v43  ;;  %v4394_v63 = vpop.f32.mrb[10].mxu0  ;;  %v4784_v57 = vld [vmem:[%s4856_s25 + $0x80] sm:$0xff]  }
 0x203   : > { %v3874_v26 = vpack.c.bf16 %v3363_v51, %v3363_v51  ;;  %v3364_v41 = vadd.f32 %v5810_v55, %v3144_v4  ;;  %v3041_v0 = vadd.f32 %v4429_v7, %v5827_v54  ;;  %v4431_v45 = vadd.f32 %v4394_v63, %v5752_v1  ;;  %v2880_v3 = vpop.f32.mrb[11].mxu0 }
 0x204   : > { %3546 = vst.msk [vmem:[%s5885_s15 + $0x18] sm:$0xf] %vm3539_vm8, %v3876_v40  ;;  %v3877_v33 = vpack.c.bf16 %v3366_v22, %v3366_v22  ;;  %v3039_v46 = vadd.f32 %v4430_v52, %v5827_v54  ;;  %v4432_v13 = vadd.f32 %v2880_v3, %v5754_v11  ;;  %v5933_v43 = vsel %vm2716_vm7, %v5838_v44, %v3299_v50 }
 0x205   : > { %3544 = vst.msk [vmem:[%s5885_s15 + $0x10] sm:$0xf] %vm3539_vm8, %v3874_v26  ;;  %v3875_v55 = vpack.c.bf16 %v3364_v41, %v3364_v41  ;;  %vm3077_vm1 = vcmp.gt.f32.partialorder %v3041_v0, 0.0  ;;  %v3113_v61 = vmul.f32 0.01, %v3041_v0  ;;  %v3042_v1 = vadd.f32 %v4431_v45, %v5827_v54 }
 0x206   : > { %3547 = vst.msk [vmem:[%s5885_s15 + $0x1c] sm:$0xf] %vm3539_vm8, %v3877_v33  ;;  %vm3075_vm2 = vcmp.gt.f32.partialorder %v3039_v46, 0.0  ;;  %v3111_v19 = vmul.f32 0.01, %v3039_v46  ;;  %v3040_v49 = vadd.f32 %v4432_v13, %v5827_v54  ;;  %v5944_v11 = vsel %vm2716_vm7, %v5889_v12, %v5920_v2 }
 0x207   : > { %3545 = vst.msk [vmem:[%s5885_s15 + $0x14] sm:$0xf] %vm3539_vm8, %v3875_v55  ;;  %v3149_v44 = vsel %vm3077_vm1, %v3041_v0, %v3113_v61  ;;  %vm3078_vm3 = vcmp.gt.f32.partialorder %v3042_v1, 0.0  ;;  %v3114_v53 = vmul.f32 0.01, %v3042_v1  ;;  %v5950_v14 = vsel %vm2716_vm7, %v3299_v50, %v5879_v32 }
 0x208   : > { %v3369_v36 = vadd.f32 %v5813_v58, %v3149_v44  ;;  %v3147_v28 = vsel %vm3075_vm2, %v3039_v46, %v3111_v19  ;;  %vm3076_vm4 = vcmp.gt.f32.partialorder %v3040_v49, 0.0  ;;  %v3112_v21 = vmul.f32 0.01, %v3040_v49  ;;  %v4397_v16 = vpop.f32.mrb[12].mxu0 }
 0x209   : > { %v3367_v20 = vadd.f32 %v5816_v8, %v3147_v28  ;;  %v3150_v12 = vsel %vm3078_vm3, %v3042_v1, %v3114_v53  ;;  %v4433_v37 = vadd.f32 %v4397_v16, %v5760_v38  ;;  %v2893_v51 = vpop.f32.mrb[13].mxu0  ;;  %v3205_v7 = vunpack.c.l.bf16 %v4784_v57 }
 0x20a   : > { %v3880_v27 = vpack.c.bf16 %v3369_v36, %v3369_v36  ;;  %v3370_v32 = vadd.f32 %v5819_v9, %v3150_v12  ;;  %v3148_v50 = vsel %vm3076_vm4, %v3040_v49, %v3112_v21  ;;  %v4434_v58 = vadd.f32 %v2893_v51, %v5762_v35  ;;  %v4398_v40 = vpop.f32.mrb[14].mxu0 }
 0x20b   : > { %v3878_v22 = vpack.c.bf16 %v3367_v20, %v3367_v20  ;;  %v3368_v4 = vadd.f32 %v5822_v25, %v3148_v50  ;;  %v3045_v8 = vadd.f32 %v4433_v37, %v5827_v54  ;;  %v4435_v52 = vadd.f32 %v4398_v40, %v5765_v59  ;;  %v2896_v38 = vpop.f32.mrb[15].mxu0 }
 0x20c   : > { %3550 = vst.msk [vmem:[%s5885_s15 + $0x28] sm:$0xf] %vm3539_vm8, %v3880_v27  ;;  %v3881_v63 = vpack.c.bf16 %v3370_v32, %v3370_v32  ;;  %v3043_v26 = vadd.f32 %v4434_v58, %v5827_v54  ;;  %v4436_v9 = vadd.f32 %v2896_v38, %v5767_v56  ;;  %v3206_v41 = vunpack.c.h.bf16 %v4784_v57 }
 0x20d   : > { %3548 = vst.msk [vmem:[%s5885_s15 + $0x20] sm:$0xf] %vm3539_vm8, %v3878_v22  ;;  %v3879_v35 = vpack.c.bf16 %v3368_v4, %v3368_v4  ;;  %vm3081_vm5 = vcmp.gt.f32.partialorder %v3045_v8, 0.0  ;;  %v3117_v0 = vmul.f32 0.01, %v3045_v8  ;;  %v3046_v25 = vadd.f32 %v4435_v52, %v5827_v54 }
 0x20e   : > { %3551 = vst.msk [vmem:[%s5885_s15 + $0x2c] sm:$0xf] %vm3539_vm8, %v3881_v63  ;;  %vm3079_vm6 = vcmp.gt.f32.partialorder %v3043_v26, 0.0  ;;  %v3115_v59 = vmul.f32 0.01, %v3043_v26  ;;  %v3044_v45 = vadd.f32 %v4436_v9, %v5827_v54  ;;  %v3204_v3 = vunpack.c.h.bf16 %v5901_v34 }
 0x20f   : > { %3549 = vst.msk [vmem:[%s5885_s15 + $0x24] sm:$0xf] %vm3539_vm8, %v3879_v35  ;;  %v3153_v33 = vsel %vm3081_vm5, %v3045_v8, %v3117_v0  ;;  %vm3082_vm9 = vcmp.gt.f32.partialorder %v3046_v25, 0.0  ;;  %v3118_v56 = vmul.f32 0.01, %v3046_v25  ;;  %v4253_v46 = vpop.f32.mrb[20].mxu1 }
 0x210   : > { %v5974_v13 = vrot.slane %v3205_v7, 3  ;;  %v3373_v55 = vadd.f32 %v5830_v15, %v3153_v33  ;;  %v3151_v61 = vsel %vm3079_vm6, %v3043_v26, %v3115_v59  ;;  %vm3080_vm10 = vcmp.gt.f32.partialorder %v3044_v45, 0.0  ;;  %v4401_v19 = vpop.f32.mrb[16].mxu0  ;;  %v1713_v49 = vpop.f32.mrb[21].mxu1 }
 0x211   : > { %v3116_v1 = vmul.f32 0.01, %v3044_v45  ;;  %v3371_v44 = vadd.f32 %v5833_v24, %v3151_v61  ;;  %v3154_v53 = vsel %vm3082_vm9, %v3046_v25, %v3118_v56  ;;  %v4437_v34 = vadd.f32 %v4401_v19, %v5785_v30  ;;  %v2909_v36 = vpop.f32.mrb[17].mxu0  ;;  %v4254_v28 = vpop.f32.mrb[22].mxu1 }
 0x212   : > { %v5979_v21 = vrot.slane %v3206_v41, 3  ;;  %v3884_v16 = vpack.c.bf16 %v3373_v55, %v3373_v55  ;;  %v3374_v20 = vadd.f32 %v5836_v60, %v3154_v53  ;;  %v4438_v12 = vadd.f32 %v2909_v36, %v5792_v18  ;;  %v4402_v37 = vpop.f32.mrb[18].mxu0  ;;  %v1716_v51 = vpop.f32.mrb[23].mxu1  ;;  %v5991_v18 = vld [vmem:[%s4856_s25 + $0x88] sm:$0xff]  }
 0x213   : > { %v3152_v15 = vsel %vm3080_vm10, %v3044_v45, %v3116_v1  ;;  %v3882_v57 = vpack.c.bf16 %v3371_v44, %v3371_v44  ;;  %v3049_v30 = vadd.f32 %v4437_v34, %v5827_v54  ;;  %v4439_v7 = vadd.f32 %v4402_v37, %v5798_v29  ;;  %v2912_v27 = vpop.f32.mrb[19].mxu0 }
 0x214   : > { %v3372_v24 = vadd.f32 %v5842_v31, %v3152_v15  ;;  %3554 = vst.msk [vmem:[%s5885_s15 + $0x38] sm:$0xf] %vm3539_vm8, %v3884_v16  ;;  %v3885_v32 = vpack.c.bf16 %v3374_v20, %v3374_v20  ;;  %v3047_v60 = vadd.f32 %v4438_v12, %v5827_v54  ;;  %v4440_v50 = vadd.f32 %v2912_v27, %v5801_v39 }
 0x215   : > { %v3207_v58 = vunpack.c.l.bf16 %v5991_v18  ;;  %3552 = vst.msk [vmem:[%s5885_s15 + $0x30] sm:$0xf] %vm3539_vm8, %v3882_v57  ;;  %vm3085_vm11 = vcmp.gt.f32.partialorder %v3049_v30, 0.0  ;;  %v3121_v40 = vmul.f32 0.01, %v3049_v30  ;;  %v3050_v29 = vadd.f32 %v4439_v7, %v5827_v54 }
 0x216   : > { %v3883_v31 = vpack.c.bf16 %v3372_v24, %v3372_v24  ;;  %3555 = vst.msk [vmem:[%s5885_s15 + $0x3c] sm:$0xf] %vm3539_vm8, %v3885_v32  ;;  %vm3083_vm12 = vcmp.gt.f32.partialorder %v3047_v60, 0.0  ;;  %v3119_v22 = vmul.f32 0.01, %v3047_v60  ;;  %v3048_v4 = vadd.f32 %v4440_v50, %v5827_v54 }
 0x217   : > { %v3307_v8 = vrot.slane %v3204_v3, 3  ;;  %v3157_v39 = vsel %vm3085_vm11, %v3049_v30, %v3121_v40  ;;  %vm3086_vm13 = vcmp.gt.f32.partialorder %v3050_v29, 0.0  ;;  %v3122_v52 = vmul.f32 0.01, %v3050_v29  ;;  %v4257_v38 = vpop.f32.mrb[24].mxu1 }
 0x218   : > { %3553 = vst.msk [vmem:[%s5885_s15 + $0x34] sm:$0xf] %vm3539_vm8, %v3883_v31  ;;  %v6005_v63 = vsel %vm2716_vm7, %v5974_v13, %v5979_v21  ;;  %v3377_v26 = vadd.f32 %v5845_v47, %v3157_v39  ;;  %v3155_v9 = vsel %vm3083_vm12, %v3047_v60, %v3119_v22  ;;  %vm3084_vm14 = vcmp.gt.f32.partialorder %v3048_v4, 0.0  ;;  %v4405_v35 = vpop.f32.mrb[20].mxu0  ;;  %v1729_v0 = vpop.f32.mrb[25].mxu1 }
 0x219   : > { %v3120_v41 = vmul.f32 0.01, %v3048_v4  ;;  %v3375_v25 = vadd.f32 %v5848_v42, %v3155_v9  ;;  %v3158_v59 = vsel %vm3086_vm13, %v3050_v29, %v3122_v52  ;;  %v4441_v45 = vadd.f32 %v4405_v35, %v4253_v46  ;;  %v2925_v3 = vpop.f32.mrb[21].mxu0  ;;  %v4258_v33 = vpop.f32.mrb[26].mxu1  ;;  %v4786_v22 = vld [vmem:[%s4856_s25 + $0x90] sm:$0xf] }
 0x21a   : > { %v6009_v56 = vrot.slane %v3207_v58, 3  ;;  %v3888_v55 = vpack.c.bf16 %v3377_v26, %v3377_v26  ;;  %v3378_v61 = vadd.f32 %v5852_v48, %v3158_v59  ;;  %v4442_v47 = vadd.f32 %v2925_v3, %v1713_v49  ;;  %v4406_v19 = vpop.f32.mrb[22].mxu0  ;;  %v1732_v44 = vpop.f32.mrb[27].mxu1 }
 0x21b   : > { %v3156_v1 = vsel %vm3084_vm14, %v3048_v4, %v3120_v41  ;;  %v3886_v53 = vpack.c.bf16 %v3375_v25, %v3375_v25  ;;  %v3053_v42 = vadd.f32 %v4441_v45, %v5827_v54  ;;  %v4443_v36 = vadd.f32 %v4406_v19, %v4254_v28  ;;  %v2928_v46 = vpop.f32.mrb[23].mxu0  ;;  %v4787_v45 = vld [vmem:[%s4856_s25 + $0x94] sm:$0xf] }
 0x21c   : > { %v3376_v34 = vadd.f32 %v5855_v5, %v3156_v1  ;;  %3558 = vst.msk [vmem:[%s5885_s15 + $0x48] sm:$0xf] %vm3539_vm8, %v3888_v55  ;;  %v3889_v16 = vpack.c.bf16 %v3378_v61, %v3378_v61  ;;  %v3051_v20 = vadd.f32 %v4442_v47, %v5827_v54  ;;  %v4444_v15 = vadd.f32 %v2928_v46, %v1716_v51 }
 0x21d   : > { %v6019_v48 = vsel %vm2716_vm7, %v5920_v2, %v3307_v8  ;;  %3556 = vst.msk [vmem:[%s5885_s15 + $0x40] sm:$0xf] %vm3539_vm8, %v3886_v53  ;;  %vm3089_vm15 = vcmp.gt.f32.partialorder %v3053_v42, 0.0  ;;  %v3125_v5 = vmul.f32 0.01, %v3053_v42  ;;  %v3054_v12 = vadd.f32 %v4443_v36, %v5827_v54 }
 0x21e   : > { %v3887_v49 = vpack.c.bf16 %v3376_v34, %v3376_v34  ;;  %3559 = vst.msk [vmem:[%s5885_s15 + $0x4c] sm:$0xf] %vm3539_vm8, %v3889_v16  ;;  %vm3087_vm0 = vcmp.gt.f32.partialorder %v3051_v20, 0.0  ;;  %v3123_v28 = vmul.f32 0.01, %v3051_v20  ;;  %v3052_v37 = vadd.f32 %v4444_v15, %v5827_v54 }
 0x21f   : > { %v6030_v51 = vsel %vm2716_vm7, %v5979_v21, %v6009_v56  ;;  %v3161_v2 = vsel %vm3089_vm15, %v3053_v42, %v3125_v5  ;;  %vm3090_vm1 = vcmp.gt.f32.partialorder %v3054_v12, 0.0  ;;  %v3126_v57 = vmul.f32 0.01, %v3054_v12  ;;  %v4261_v24 = vpop.f32.mrb[28].mxu1 }
 0x220   : > { %3557 = vst.msk [vmem:[%s5885_s15 + $0x44] sm:$0xf] %vm3539_vm8, %v3887_v49  ;;  %v6036_v30 = vsel %vm2716_vm7, %v3307_v8, %v5974_v13  ;;  %v3381_v7 = vadd.f32 %v5858_v17, %v3161_v2  ;;  %v3159_v27 = vsel %vm3087_vm0, %v3051_v20, %v3123_v28  ;;  %vm3088_vm2 = vcmp.gt.f32.partialorder %v3052_v37, 0.0  ;;  %v4409_v60 = vpop.f32.mrb[24].mxu0  ;;  %v1745_v50 = vpop.f32.mrb[29].mxu1 }
 0x221   : > { %v3124_v32 = vmul.f32 0.01, %v3052_v37  ;;  %v3379_v21 = vadd.f32 %v5863_v23, %v3159_v27  ;;  %v3162_v58 = vsel %vm3090_vm1, %v3054_v12, %v3126_v57  ;;  %v4445_v31 = vadd.f32 %v4409_v60, %v4257_v38  ;;  %v2941_v40 = vpop.f32.mrb[25].mxu0  ;;  %v4262_v29 = vpop.f32.mrb[30].mxu1 }
 0x222   : > { %v3209_v4 = vunpack.c.l.bf16 %v4786_v22  ;;  %v3892_v39 = vpack.c.bf16 %v3381_v7, %v3381_v7  ;;  %v3382_v13 = vadd.f32 %v5870_v6, %v3162_v58  ;;  %v4446_v8 = vadd.f32 %v2941_v40, %v1729_v0  ;;  %v4410_v52 = vpop.f32.mrb[26].mxu0  ;;  %v1748_v26 = vpop.f32.mrb[31].mxu1 }
 0x223   : > { %v3160_v17 = vsel %vm3088_vm2, %v3052_v37, %v3124_v32  ;;  %v3890_v9 = vpack.c.bf16 %v3379_v21, %v3379_v21  ;;  %v3057_v38 = vadd.f32 %v4445_v31, %v5827_v54  ;;  %v4447_v41 = vadd.f32 %v4410_v52, %v4258_v33  ;;  %v2944_v35 = vpop.f32.mrb[27].mxu0  ;;  %v4788_v31 = vld [vmem:[%s4856_s25 + $0x98] sm:$0xf] }
 0x224   : > { %v3380_v23 = vadd.f32 %v5873_v62, %v3160_v17  ;;  %3562 = vst.msk [vmem:[%s5885_s15 + $0x58] sm:$0xf] %vm3539_vm8, %v3892_v39  ;;  %v3893_v25 = vpack.c.bf16 %v3382_v13, %v3382_v13  ;;  %v3055_v59 = vadd.f32 %v4446_v8, %v5827_v54  ;;  %v4448_v6 = vadd.f32 %v2944_v35, %v1732_v44 }
 0x225   : > { %v3210_v3 = vunpack.c.l.bf16 %v4787_v45  ;;  %3560 = vst.msk [vmem:[%s5885_s15 + $0x50] sm:$0xf] %vm3539_vm8, %v3890_v9  ;;  %vm3093_vm3 = vcmp.gt.f32.partialorder %v3057_v38, 0.0  ;;  %v3129_v55 = vmul.f32 0.01, %v3057_v38  ;;  %v3058_v62 = vadd.f32 %v4447_v41, %v5827_v54 }
 0x226   : > { %v3891_v0 = vpack.c.bf16 %v3380_v23, %v3380_v23  ;;  %3563 = vst.msk [vmem:[%s5885_s15 + $0x5c] sm:$0xf] %vm3539_vm8, %v3893_v25  ;;  %vm3091_vm4 = vcmp.gt.f32.partialorder %v3055_v59, 0.0  ;;  %v3127_v33 = vmul.f32 0.01, %v3055_v59  ;;  %v3056_v61 = vadd.f32 %v4448_v6, %v5827_v54 }
 0x227   : > { %v3208_v1 = vunpack.c.h.bf16 %v5991_v18  ;;  %v3165_v47 = vsel %vm3093_vm3, %v3057_v38, %v3129_v55  ;;  %vm3094_vm5 = vcmp.gt.f32.partialorder %v3058_v62, 0.0  ;;  %v3130_v19 = vmul.f32 0.01, %v3058_v62  ;;  %v4265_v44 = vpop.f32.mrb[32].mxu1 }
 0x228   : > { %3561 = vst.msk [vmem:[%s5885_s15 + $0x54] sm:$0xf] %vm3539_vm8, %v3891_v0  ;;  %v6057_v53 = vrot.slane %v3209_v4, 3  ;;  %v3385_v34 = vadd.f32 %v5915_v10, %v3165_v47  ;;  %v3163_v42 = vsel %vm3091_vm4, %v3055_v59, %v3127_v33  ;;  %vm3092_vm6 = vcmp.gt.f32.partialorder %v3056_v61, 0.0  ;;  %v4413_v46 = vpop.f32.mrb[28].mxu0  ;;  %v1761_v16 = vpop.f32.mrb[33].mxu1 }
 0x229   : > { %v3128_v36 = vmul.f32 0.01, %v3056_v61  ;;  %v3383_v20 = vadd.f32 %v5933_v43, %v3163_v42  ;;  %v3166_v15 = vsel %vm3094_vm5, %v3058_v62, %v3130_v19  ;;  %v4449_v18 = vadd.f32 %v4413_v46, %v4261_v24  ;;  %v2957_v49 = vpop.f32.mrb[29].mxu0  ;;  %v4266_v5 = vpop.f32.mrb[34].mxu1 }
 0x22a   : > { %v6061_v12 = vrot.slane %v3210_v3, 3  ;;  %v3896_v28 = vpack.c.bf16 %v3385_v34, %v3385_v34  ;;  %v3386_v37 = vadd.f32 %v5944_v11, %v3166_v15  ;;  %v4450_v2 = vadd.f32 %v2957_v49, %v1745_v50  ;;  %v4414_v57 = vpop.f32.mrb[30].mxu0  ;;  %v1764_v7 = vpop.f32.mrb[35].mxu1 }
 0x22b   : > { %v3164_v10 = vsel %vm3092_vm6, %v3056_v61, %v3128_v36  ;;  %v3894_v27 = vpack.c.bf16 %v3383_v20, %v3383_v20  ;;  %v3061_v32 = vadd.f32 %v4449_v18, %v5827_v54  ;;  %v4451_v24 = vadd.f32 %v4414_v57, %v4262_v29  ;;  %v2960_v60 = vpop.f32.mrb[31].mxu0 }
 0x22c   : > { %v3384_v43 = vadd.f32 %v5950_v14, %v3164_v10  ;;  %3566 = vst.msk [vmem:[%s5885_s15 + $0x68] sm:$0xf] %vm3539_vm8, %v3896_v28  ;;  %v3897_v21 = vpack.c.bf16 %v3386_v37, %v3386_v37  ;;  %v3059_v58 = vadd.f32 %v4450_v2, %v5827_v54  ;;  %v4452_v11 = vadd.f32 %v2960_v60, %v1748_v26 }
 0x22d   : > { %v3211_v40 = vunpack.c.l.bf16 %v4788_v31  ;;  %3564 = vst.msk [vmem:[%s5885_s15 + $0x60] sm:$0xf] %vm3539_vm8, %v3894_v27  ;;  %vm3097_vm9 = vcmp.gt.f32.partialorder %v3061_v32, 0.0  ;;  %v3133_v22 = vmul.f32 0.01, %v3061_v32  ;;  %v3062_v14 = vadd.f32 %v4451_v24, %v5827_v54 }
 0x22e   : > { %v3895_v50 = vpack.c.bf16 %v3384_v43, %v3384_v43  ;;  %3567 = vst.msk [vmem:[%s5885_s15 + $0x6c] sm:$0xf] %vm3539_vm8, %v3897_v21  ;;  %vm3095_vm10 = vcmp.gt.f32.partialorder %v3059_v58, 0.0  ;;  %v3131_v29 = vmul.f32 0.01, %v3059_v58  ;;  %v3060_v4 = vadd.f32 %v4452_v11, %v5827_v54 }
 0x22f   : > { %v3315_v39 = vrot.slane %v3208_v1, 3  ;;  %v3169_v13 = vsel %vm3097_vm9, %v3061_v32, %v3133_v22  ;;  %vm3098_vm11 = vcmp.gt.f32.partialorder %v3062_v14, 0.0  ;;  %v3134_v17 = vmul.f32 0.01, %v3062_v14 }
 0x230   : > { %3565 = vst.msk [vmem:[%s5885_s15 + $0x64] sm:$0xf] %vm3539_vm8, %v3895_v50  ;;  %v3320_v8 = vsel %vm2716_vm7, %v6057_v53, %v6061_v12  ;;  %v3389_v52 = vadd.f32 %v6005_v63, %v3169_v13  ;;  %v3167_v26 = vsel %vm3095_vm10, %v3059_v58, %v3131_v29  ;;  %vm3096_vm12 = vcmp.gt.f32.partialorder %v3060_v4, 0.0  ;;  %v4417_v23 = vpop.f32.mrb[32].mxu0 }
 0x231   : > { %v3132_v9 = vmul.f32 0.01, %v3060_v4  ;;  %v3387_v38 = vadd.f32 %v6019_v48, %v3167_v26  ;;  %v3170_v41 = vsel %vm3098_vm11, %v3062_v14, %v3134_v17  ;;  %v4453_v35 = vadd.f32 %v4417_v23, %v4265_v44  ;;  %v2973_v25 = vpop.f32.mrb[33].mxu0 }
 0x232   : > { %v3321_v59 = vrot.slane %v3211_v40, 3  ;;  %v3900_v6 = vpack.c.bf16 %v3389_v52, %v3389_v52  ;;  %v3390_v45 = vadd.f32 %v6030_v51, %v3170_v41  ;;  %v4454_v0 = vadd.f32 %v2973_v25, %v1761_v16  ;;  %v4418_v55 = vpop.f32.mrb[34].mxu0 }
 0x233   : > { %v3168_v3 = vsel %vm3096_vm12, %v3060_v4, %v3132_v9  ;;  %v3898_v63 = vpack.c.bf16 %v3387_v38, %v3387_v38  ;;  %v3065_v33 = vadd.f32 %v4453_v35, %v5827_v54  ;;  %v4455_v61 = vadd.f32 %v4418_v55, %v4266_v5  ;;  %v2976_v1 = vpop.f32.mrb[35].mxu0 }
 0x234   : > { %v3388_v62 = vadd.f32 %v6036_v30, %v3168_v3  ;;  %3570 = vst.msk [vmem:[%s5885_s15 + $0x78] sm:$0xf] %vm3539_vm8, %v3900_v6  ;;  %v3901_v48 = vpack.c.bf16 %v3390_v45, %v3390_v45  ;;  %v3063_v47 = vadd.f32 %v4454_v0, %v5827_v54  ;;  %v3316_v51 = vsel %vm2716_vm7, %v6009_v56, %v3315_v39 }
 0x235   : > { %v4456_v19 = vadd.f32 %v2976_v1, %v1764_v7  ;;  %3568 = vst.msk [vmem:[%s5885_s15 + $0x70] sm:$0xf] %vm3539_vm8, %v3898_v63  ;;  %vm3101_vm13 = vcmp.gt.f32.partialorder %v3065_v33, 0.0  ;;  %v3137_v34 = vmul.f32 0.01, %v3065_v33  ;;  %v3066_v30 = vadd.f32 %v4455_v61, %v5827_v54 }
 0x236   : > { %v3899_v44 = vpack.c.bf16 %v3388_v62, %v3388_v62  ;;  %3571 = vst.msk [vmem:[%s5885_s15 + $0x7c] sm:$0xf] %vm3539_vm8, %v3901_v48  ;;  %vm3099_vm14 = vcmp.gt.f32.partialorder %v3063_v47, 0.0  ;;  %v3135_v42 = vmul.f32 0.01, %v3063_v47  ;;  %v3322_v36 = vsel %vm2716_vm7, %v6061_v12, %v3321_v59 }
 0x237   : > { %v3064_v46 = vadd.f32 %v4456_v19, %v5827_v54  ;;  %v3173_v56 = vsel %vm3101_vm13, %v3065_v33, %v3137_v34  ;;  %vm3102_vm15 = vcmp.gt.f32.partialorder %v3066_v30, 0.0  ;;  %v3138_v16 = vmul.f32 0.01, %v3066_v30 }
 0x238   : > { %3569 = vst.msk [vmem:[%s5885_s15 + $0x74] sm:$0xf] %vm3539_vm8, %v3899_v44  ;;  %v3318_v20 = vsel %vm2716_vm7, %v3315_v39, %v6057_v53  ;;  %v3393_v15 = vadd.f32 %v3320_v8, %v3173_v56  ;;  %v3171_v18 = vsel %vm3099_vm14, %v3063_v47, %v3135_v42 }
 0x239   : > { %vm3100_vm0 = vcmp.gt.f32.partialorder %v3064_v46, 0.0  ;;  %v3136_v49 = vmul.f32 0.01, %v3064_v46  ;;  %v3391_v5 = vadd.f32 %v3316_v51, %v3171_v18  ;;  %v3174_v12 = vsel %vm3102_vm15, %v3066_v30, %v3138_v16 }
 0x23a   : > { %v3904_v28 = vpack.c.bf16 %v3393_v15, %v3393_v15  ;;  %v3394_v54 = vadd.f32 %v3322_v36, %v3174_v12 }
 0x23b   : > { %v3172_v37 = vsel %vm3100_vm0, %v3064_v46, %v3136_v49  ;;  %v3902_v10 = vpack.c.bf16 %v3391_v5, %v3391_v5 }
 0x23c   : > { %v3392_v2 = vadd.f32 %v3318_v20, %v3172_v37  ;;  %3574 = vst.msk [vmem:[%s5885_s15 + $0x88] sm:$0xf] %vm3539_vm8, %v3904_v28  ;;  %v3905_v57 = vpack.c.bf16 %v3394_v54, %v3394_v54 }
 0x23d   : > { %3572 = vst.msk [vmem:[%s5885_s15 + $0x80] sm:$0xf] %vm3539_vm8, %v3902_v10 }
 0x23e   : > { %v3903_v7 = vpack.c.bf16 %v3392_v2, %v3392_v2  ;;  %3575 = vst.msk [vmem:[%s5885_s15 + $0x8c] sm:$0xf] %vm3539_vm8, %v3905_v57 }
 0x240   : > { %3573 = vst.msk [vmem:[%s5885_s15 + $0x84] sm:$0xf] %vm3539_vm8, %v3903_v7 }
 0x241 PF: > { %s13_s12 = sadd.s32 1, %s4795_s12  }
 0x242   : > { %p10_p4 = scmp.ge.s32.totalorder %s13_s12, 4  }
 0x244   :  { %12 = sbr.rel (!%p10_p4) target bundleno = 1 (0x1), region = 70 }

// kernel: encoder_forward.8
= control target key start
LH: loop header
LB: loop body
LE: loop exit
PB: predicated region body
PF: predicated region fallthrough
CT: control target
= control target key end

     0   :  { %s1144_s12 = smov 0   ;;  %s1342_s0 = inlined_call_operand.vmem [shape: bf16[2,88,32], index: 0, kind: input, shape index: {}]   ;;  %s1343_s1 = inlined_call_operand.vmem [shape: bf16[4,32,16], index: 1, kind: input, shape index: {}]   ;;  %s1344_s2 = inlined_call_operand.vmem [shape: f32[1,16], index: 2, kind: input, shape index: {}]   ;;  %s1345_s3 = inlined_call_operand.vmem [shape: bf16[2,72,16], index: 3, kind: output, shape index: {}]  }
   0x1 LB: > { %s880_s13 = sadd.s32 4294967295, %s1120_s12   ;;  %p884_p0 = scmp.ge.s32.totalorder %s1120_s12, 1  ;;  %s1120_s12 = sphi %s1144_s12, %s13_s12  }
   0x2   : > { %p137_p1 = scmp.lt.s32.totalorder %s1120_s12, 3 }
   0x4   : > { %p138_p2 = pnand %p884_p0, %p137_p1 }
   0x5   : > { %v1095_v0 = vld [vmem:[%s1343_s1 + $0x10] sm:$0xff] (!%p138_p2)   ;;  %v1122_v1 = vmov (!%p138_p2), 0.0   ;;  %v1096_v2 = vld [vmem:[%s1343_s1] sm:$0xff] (!%p138_p2)   ;;  %v1097_v3 = vld [vmem:[%s1343_s1 + $0x18] sm:$0xff] (!%p138_p2)   ;;  %vm1123_vm0 = vmmov (!%p138_p2), 0   ;;  %p161_p3 = scmp.lt.s32.totalorder (!%p138_p2), %s880_s13, 1 }
   0x6   : > { %141 = sbr.rel (%p138_p2) target bundleno = 323 (0x143), region = 32  ;;  %987 = vmatprep.subr.bf16.mxu0 (!%p138_p2), %v1122_v1  ;;  %1011 = vmatprep.subr.bf16.mxu1 (!%p138_p2), %v1122_v1  ;;  %v1098_v4 = vld [vmem:[%s1343_s1 + $0x8] sm:$0xff] (!%p138_p2)   ;;  %vm269_vm1 = vcmask (!%p138_p2), 261120   ;;  %v1104_v5 = vld [vmem:[%s1343_s1 + $0x30] sm:$0xff] (!%p138_p2)   ;;  %v1108_v18 = vld [vmem:[%s1343_s1 + $0x38] sm:$0xff] (!%p138_p2)   ;;  %vm617_vm3 = vcmask (!%p138_p2), 1046528  }
   0x7   : > { %988 = vmatpush3.bf16.msra.mxu0 (!%p138_p2), %v1095_v0  ;;  %1015 = vmatprep.mubr.msk.bf16.mxu1 (!%p138_p2), %vm1123_vm0, %v1122_v1  ;;  %vm217_vm2 = vsmask.f32 (!%p138_p2), 7424  ;;  %v1103_v22 = vld [vmem:[%s1343_s1 + $0x20] sm:$0xff] (!%p138_p2)   ;;  %v1107_v31 = vld [vmem:[%s1343_s1 + $0x28] sm:$0xff] (!%p138_p2)   ;;  %vm815_vm5 = vcmask (!%p138_p2), 125952  }
   0x8   : > { %1012 = vmatpush3.bf16.msra.mxu1 (!%p138_p2), %v1096_v2  ;;  %989 = vmatprep.subr.bf16.mxu0 (!%p138_p2), %v1122_v1 }
   0x9   : > { %1013 = vmatprep.subr.bf16.mxu1 (!%p138_p2), %v1122_v1  ;;  %991 = vmatprep.mubr.msk.bf16.mxu0 (!%p138_p2), %vm1123_vm0, %v1122_v1 }
   0xb   : > { %990 = vmatpush3.bf16.msra.mxu0 (!%p138_p2), %v1097_v3 }
   0xc   : > { %1014 = vmatpush3.bf16.msra.mxu1 (!%p138_p2), %v1098_v4  ;;  %1035 = vmatprep.subr.bf16.mxu0 (!%p138_p2), %v1122_v1 }
   0xd   : > { %s1347_s13 = smov (!%p161_p3, %s880_s13), 1  ;;  %1059 = vmatprep.subr.bf16.mxu1 %v1122_v1 }
   0xe   : > { %s1083_s22 = smul.u32 44, %s1347_s13 }
   0xf   : > { %s1084_s9 = smul.u32 36, %s1347_s13 }
  0x10   : > { %s1179_s25 = scalar_lea.vmem %s1342_s0, %s1083_s22 }
  0x11   : > { %v172_v6 = vld [vmem:[%s1179_s25] sm:$0xf]  ;;  %v173_v7 = vld [vmem:[%s1179_s25 + $0x4] sm:$0xf]  ;;  %v174_v8 = vld [vmem:[%s1179_s25 + $0x8] sm:$0xf]  ;;  %s1306_s14 = scalar_lea.vmem %s1345_s3, %s1084_s9 }
  0x12   : > { %v175_v9 = vld [vmem:[%s1179_s25 + $0xc] sm:$0xf]  ;;  %v176_v10 = vld [vmem:[%s1179_s25 + $0x10] sm:$0xf]  ;;  %v891_v11 = vcombine.low %v172_v6, %v173_v7  ;;  %v1191_v12 = vld [vmem:[%s1179_s25 + $0x14] sm:$0xf]  ;;  %v915_v45 = vcombine.low %v173_v7, %v174_v8 }
  0x13   : > { %v892_v13 = vcombine.low %v174_v8, %v175_v9  ;;  %v893_v16 = vcombine.low %v176_v10, %v1191_v12  ;;  %v178_v25 = vld [vmem:[%s1179_s25 + $0x18] sm:$0xf]  ;;  %v1206_v26 = vld [vmem:[%s1179_s25 + $0x1c] sm:$0xf]  ;;  %v180_v35 = vld [vmem:[%s1179_s25 + $0x20] sm:$0xf]  ;;  %v916_v48 = vcombine.low %v175_v9, %v176_v10 }
  0x14   : > { %1016 = vmatmul.mubr.msk.bf16.vlgmr.msra.gmra.mrb[0].mxu1 %vm269_vm1, %v891_v11  ;;  %v219_v14 = vshrl.u32 %v891_v11, 16  ;;  %v221_v15 = vshll.u32 %v891_v11, 16  ;;  %v894_v30 = vcombine.low %v178_v25, %v1206_v26  ;;  %v181_v36 = vld [vmem:[%s1179_s25 + $0x24] sm:$0xf]  ;;  %v903_v47 = vcombine.low %v180_v35, %v180_v35  ;;  %v182_v7 = vld [vmem:[%s1179_s25 + $0x28] sm:$0xf] }
  0x15   : > { %v226_v17 = vshll.u32 %v892_v13, 16  ;;  %1060 = vmatpush3.bf16.msra.mxu1 %v1104_v5  ;;  %1019 = vmatprep.mubr.msk.bf16.mxu1 %vm1123_vm0, %v1122_v1  ;;  %v230_v23 = vshrl.u32 %v892_v13, 16  ;;  %v234_v24 = vshll.u32 %v893_v16, 16  ;;  %v238_v33 = vshrl.u32 %v893_v16, 16 }
  0x16   : > { %v223_v19 = vrot.slane %v221_v15, 1  ;;  %1061 = vmatprep.subr.bf16.mxu1 %v1122_v1  ;;  %v242_v34 = vshll.u32 %v894_v30, 16  ;;  %v895_v39 = vcombine.low %v180_v35, %v181_v36  ;;  %v246_v41 = vshrl.u32 %v894_v30, 16 }
  0x17   : > { %v228_v20 = vrot.slane %v226_v17, 1  ;;  %v236_v29 = vrot.slane %v234_v24, 1  ;;  %v468_v50 = vshll.u32 %v915_v45, 16  ;;  %v618_v51 = vrot.slane %v915_v45, 1 }
  0x18   : > { %v224_v21 = vor.u32 %v223_v19, %v219_v14  ;;  %v244_v38 = vrot.slane %v242_v34, 1  ;;  %v250_v42 = vshll.u32 %v895_v39, 16  ;;  %v254_v49 = vshrl.u32 %v895_v39, 16 }
  0x19   : > { %1062 = vmatpush3.bf16.msra.mxu1 %v1108_v18  ;;  %v232_v28 = vor.u32 %v230_v23, %v228_v20  ;;  %v240_v37 = vor.u32 %v238_v33, %v236_v29  ;;  %v619_v52 = vrot.slane %v916_v48, 1  ;;  %v466_v54 = vshrl.u32 %v915_v45, 16 }
  0x1a   : > { %v229_v27 = vsel %vm217_vm2, %v224_v21, %v228_v20  ;;  %v248_v43 = vor.u32 %v246_v41, %v244_v38  ;;  %v252_v44 = vrot.slane %v250_v42, 1  ;;  %v470_v55 = vrot.slane %v468_v50, 1 }
  0x1b   : > { %992 = vmatmul.mubr.msk.bf16.vlgmr.msra.gmra.mrb[0].mxu0 %vm269_vm1, %v229_v27  ;;  %v237_v32 = vsel %vm217_vm2, %v232_v28, %v236_v29  ;;  %v245_v40 = vsel %vm217_vm2, %v240_v37, %v244_v38  ;;  %v473_v56 = vshll.u32 %v916_v48, 16  ;;  %v620_v57 = vsel %vm617_vm3, %v618_v51, %v619_v52 }
  0x1c   : > { %1036 = vmatpush3.bf16.msra.mxu0 %v1103_v22  ;;  %995 = vmatprep.mubr.msk.bf16.mxu0 %vm1123_vm0, %v1122_v1  ;;  %v253_v46 = vsel %vm217_vm2, %v248_v43, %v252_v44  ;;  %v256_v53 = vor.u32 %v254_v49, %v252_v44  ;;  %v917_v58 = vcombine.low %v1191_v12, %v178_v25  ;;  %v477_v63 = vshrl.u32 %v916_v48, 16 }
  0x1d   : > { %1020 = vmatmul.mubr.msk.bf16.gmra.mrb[4].mxu1 %vm269_vm1, %v892_v13  ;;  %1037 = vmatprep.subr.bf16.mxu0 %v1122_v1  ;;  %v471_v59 = vor.u32 %v470_v55, %v466_v54  ;;  %v475_v60 = vrot.slane %v473_v56, 1  ;;  %v918_v3 = vcombine.low %v1206_v26, %v180_v35  ;;  %v919_v12 = vcombine.low %v181_v36, %v182_v7 }
  0x1e   : > { %1023 = vmatprep.mubr.msk.bf16.mxu1 %vm1123_vm0, %v1122_v1  ;;  %v621_v61 = vrot.slane %v917_v58, 1  ;;  %v481_v0 = vshll.u32 %v917_v58, 16  ;;  %v485_v9 = vshrl.u32 %v917_v58, 16 }
  0x1f   : > { %v476_v62 = vsel %vm217_vm2, %v471_v59, %v475_v60  ;;  %v479_v4 = vor.u32 %v477_v63, %v475_v60  ;;  %v623_v6 = vrot.slane %v918_v3, 1  ;;  %v489_v10 = vshll.u32 %v918_v3, 16 }
  0x20   : > { %1038 = vmatpush3.bf16.msra.mxu0 %v1107_v31  ;;  %v622_v2 = vsel %vm617_vm3, %v619_v52, %v621_v61  ;;  %v483_v5 = vrot.slane %v481_v0, 1  ;;  %v625_v15 = vrot.slane %v919_v12, 1  ;;  %v493_v17 = vshrl.u32 %v918_v3, 16 }
  0x21   : > { %v624_v11 = vsel %vm617_vm3, %v621_v61, %v623_v6  ;;  %v491_v14 = vrot.slane %v489_v10, 1  ;;  %v497_v18 = vshll.u32 %v919_v12, 16  ;;  %v501_v23 = vshrl.u32 %v919_v12, 16 }
  0x22   : > { %v484_v8 = vsel %vm217_vm2, %v479_v4, %v483_v5  ;;  %v487_v13 = vor.u32 %v485_v9, %v483_v5  ;;  %v626_v19 = vsel %vm617_vm3, %v623_v6, %v625_v15 }
  0x23   : > { %996 = vmatmul.mubr.msk.bf16.gmra.mrb[4].mxu0 %vm269_vm1, %v237_v32  ;;  %v495_v20 = vor.u32 %v493_v17, %v491_v14  ;;  %v499_v21 = vrot.slane %v497_v18, 1  ;;  %v1298_v17 = vld [vmem:[%s1344_s2] ss:$0 sm:$0xff] }
  0x24   : > { %999 = vmatprep.mubr.msk.bf16.mxu0 %vm1123_vm0, %v1122_v1 }
  0x25   : > { %1024 = vmatmul.mubr.msk.bf16.gmra.mrb[8].mxu1 %vm269_vm1, %v893_v16  ;;  %v492_v16 = vsel %vm217_vm2, %v487_v13, %v491_v14  ;;  %v500_v22 = vsel %vm217_vm2, %v495_v20, %v499_v21  ;;  %v503_v24 = vor.u32 %v501_v23, %v499_v21 }
  0x26   : > { %1027 = vmatprep.mubr.msk.bf16.mxu1 %vm1123_vm0, %v1122_v1 }
  0x2b   : > { %1000 = vmatmul.mubr.msk.bf16.gmra.mrb[8].mxu0 %vm269_vm1, %v245_v40 }
  0x2c   : > { %1003 = vmatprep.mubr.msk.bf16.mxu0 %vm1123_vm0, %v1122_v1 }
  0x2d   : > { %1028 = vmatmul.mubr.msk.bf16.gmra.mrb[12].mxu1 %vm269_vm1, %v894_v30 }
  0x2e   : > { %1031 = vmatprep.mubr.msk.bf16.mxu1 %vm1123_vm0, %v1122_v1 }
  0x33   : > { %1004 = vmatmul.mubr.msk.bf16.gmra.mrb[12].mxu0 %vm269_vm1, %v253_v46 }
  0x34   : > { %1007 = vmatprep.mubr.msk.bf16.mxu0 %vm1123_vm0, %v1122_v1 }
  0x35   : > { %1032 = vmatmul.mubr.msk.bf16.gmra.mrb[16].mxu1 %vm269_vm1, %v903_v47 }
  0x36   : > { %1063 = vmatprep.mubr.msk.bf16.mxu1 %vm1123_vm0, %v1122_v1 }
  0x3b   : > { %1008 = vmatmul.mubr.msk.bf16.gmra.mrb[16].mxu0 %vm269_vm1, %v256_v53 }
  0x3c   : > { %1039 = vmatprep.mubr.msk.bf16.mxu0 %vm1123_vm0, %v1122_v1 }
  0x3d   : > { %1064 = vmatmul.mubr.msk.bf16.vlgmr.msra.gmra.mrb[20].mxu1 %vm269_vm1, %v620_v57 }
  0x3e   : > { %1067 = vmatprep.mubr.msk.bf16.mxu1 %vm1123_vm0, %v1122_v1 }
  0x43   : > { %1040 = vmatmul.mubr.msk.bf16.vlgmr.msra.gmra.mrb[20].mxu0 %vm269_vm1, %v476_v62 }
  0x44   : > { %1043 = vmatprep.mubr.msk.bf16.mxu0 %vm1123_vm0, %v1122_v1 }
  0x45   : > { %1068 = vmatmul.mubr.msk.bf16.gmra.mrb[24].mxu1 %vm269_vm1, %v622_v2 }
  0x46   : > { %1071 = vmatprep.mubr.msk.bf16.mxu1 %vm1123_vm0, %v1122_v1 }
  0x4b   : > { %1044 = vmatmul.mubr.msk.bf16.gmra.mrb[24].mxu0 %vm269_vm1, %v484_v8 }
  0x4c   : > { %1047 = vmatprep.mubr.msk.bf16.mxu0 %vm1123_vm0, %v1122_v1 }
  0x4d   : > { %1072 = vmatmul.mubr.msk.bf16.gmra.mrb[28].mxu1 %vm269_vm1, %v624_v11 }
  0x4e   : > { %1075 = vmatprep.mubr.msk.bf16.mxu1 %vm1123_vm0, %v1122_v1 }
  0x53   : > { %1048 = vmatmul.mubr.msk.bf16.gmra.mrb[28].mxu0 %vm269_vm1, %v492_v16 }
  0x54   : > { %1051 = vmatprep.mubr.msk.bf16.mxu0 %vm1123_vm0, %v1122_v1 }
  0x55   : > { %1076 = vmatmul.mubr.msk.bf16.gmra.mrb[32].mxu1 %vm269_vm1, %v626_v19 }
  0x56   : > { %1079 = vmatprep.mubr.msk.bf16.mxu1 %vm1123_vm0, %v1122_v1 }
  0x5b   : > { %1052 = vmatmul.mubr.msk.bf16.gmra.mrb[32].mxu0 %vm269_vm1, %v500_v22 }
  0x5c   : > { %1055 = vmatprep.mubr.msk.bf16.mxu0 %vm1123_vm0, %v1122_v1 }
  0x5d   : > { %1080 = vmatmul.mubr.msk.bf16.gmra.mrb[36].mxu1 %vm269_vm1, %v625_v15 }
  0x63   : > { %1056 = vmatmul.mubr.msk.bf16.gmra.mrb[36].mxu0 %vm269_vm1, %v503_v24 }
  0xe7   : > { %v415_v25 = vpop.f32.mrb[0].mxu1 }
  0xe8   : > { %v1017_v26 = vpop.f32.mrb[1].mxu1 }
  0xe9   : > { %v418_v27 = vpop.f32.mrb[2].mxu1 }
  0xea   : > { %v1018_v28 = vpop.f32.mrb[3].mxu1 }
  0xee   : > { %v319_v29 = vpop.f32.mrb[0].mxu0 }
  0xef   : > { %v416_v30 = vadd.f32 %v415_v25, %v319_v29  ;;  %v993_v31 = vpop.f32.mrb[1].mxu0 }
  0xf0   : > { %v322_v32 = vpop.f32.mrb[2].mxu0  ;;  %v423_v33 = vpop.f32.mrb[4].mxu1 }
  0xf1   : > { %v419_v34 = vadd.f32 %v418_v27, %v322_v32  ;;  %v994_v35 = vpop.f32.mrb[3].mxu0  ;;  %v1021_v36 = vpop.f32.mrb[5].mxu1 }
  0xf2   : > { %v426_v37 = vpop.f32.mrb[6].mxu1 }
  0xf3   : > { %v1022_v38 = vpop.f32.mrb[7].mxu1 }
  0xf6   : > { %v327_v1 = vpop.f32.mrb[4].mxu0 }
  0xf7   : > { %v424_v39 = vadd.f32 %v423_v33, %v327_v1  ;;  %v997_v40 = vpop.f32.mrb[5].mxu0 }
  0xf8   : > { %v330_v41 = vpop.f32.mrb[6].mxu0  ;;  %v431_v42 = vpop.f32.mrb[8].mxu1 }
  0xf9   : > { %v1283_v43 = vadd.f32 %v426_v37, %v330_v41  ;;  %v998_v44 = vpop.f32.mrb[7].mxu0  ;;  %v1025_v45 = vpop.f32.mrb[9].mxu1 }
  0xfa   : > { %v434_v46 = vpop.f32.mrb[10].mxu1 }
  0xfb   : > { %v1026_v47 = vpop.f32.mrb[11].mxu1 }
  0xfe   : > { %v335_v48 = vpop.f32.mrb[8].mxu0 }
  0xff   : > { %v1285_v49 = vadd.f32 %v431_v42, %v335_v48  ;;  %v1001_v50 = vpop.f32.mrb[9].mxu0 }
 0x100   : > { %v338_v51 = vpop.f32.mrb[10].mxu0  ;;  %v439_v52 = vpop.f32.mrb[12].mxu1 }
 0x101   : > { %v1287_v53 = vadd.f32 %v434_v46, %v338_v51  ;;  %v1002_v54 = vpop.f32.mrb[11].mxu0  ;;  %v1029_v55 = vpop.f32.mrb[13].mxu1 }
 0x102   : > { %v442_v56 = vpop.f32.mrb[14].mxu1 }
 0x103   : > { %v1030_v57 = vpop.f32.mrb[15].mxu1 }
 0x106   : > { %v343_v58 = vpop.f32.mrb[12].mxu0 }
 0x107   : > { %v1289_v59 = vadd.f32 %v439_v52, %v343_v58  ;;  %v1005_v60 = vpop.f32.mrb[13].mxu0 }
 0x108   : > { %v346_v61 = vpop.f32.mrb[14].mxu0  ;;  %v447_v62 = vpop.f32.mrb[16].mxu1 }
 0x109   : > { %v1291_v63 = vadd.f32 %v442_v56, %v346_v61  ;;  %v1006_v0 = vpop.f32.mrb[15].mxu0  ;;  %v1033_v2 = vpop.f32.mrb[17].mxu1 }
 0x10a   : > { %v450_v3 = vpop.f32.mrb[18].mxu1 }
 0x10b   : > { %v1034_v4 = vpop.f32.mrb[19].mxu1 }
 0x10e   : > { %v351_v5 = vpop.f32.mrb[16].mxu0 }
 0x10f   : > { %v1293_v6 = vadd.f32 %v447_v62, %v351_v5  ;;  %v1009_v7 = vpop.f32.mrb[17].mxu0 }
 0x110   : > { %v354_v8 = vpop.f32.mrb[18].mxu0  ;;  %v688_v9 = vpop.f32.mrb[20].mxu1 }
 0x111   : > { %v1010_v10 = vpop.f32.mrb[19].mxu0  ;;  %v1065_v11 = vpop.f32.mrb[21].mxu1 }
 0x112   : > { %v691_v12 = vpop.f32.mrb[22].mxu1 }
 0x113   : > { %v1066_v13 = vpop.f32.mrb[23].mxu1 }
 0x116   : > { %v565_v14 = vpop.f32.mrb[20].mxu0 }
 0x117   : > { %v603_v15 = vadd.f32 %v565_v14, %v416_v30  ;;  %v1041_v16 = vpop.f32.mrb[21].mxu0 }
 0x118   : > { %v568_v18 = vpop.f32.mrb[22].mxu0  ;;  %v696_v19 = vpop.f32.mrb[24].mxu1 }
 0x119   : > { %v726_v20 = vadd.f32 %v688_v9, %v603_v15  ;;  %v604_v21 = vadd.f32 %v568_v18, %v419_v34  ;;  %v1042_v22 = vpop.f32.mrb[23].mxu0  ;;  %v1069_v23 = vpop.f32.mrb[25].mxu1 }
 0x11a   : > { %v699_v24 = vpop.f32.mrb[26].mxu1 }
 0x11b   : > { %v742_v25 = vadd.f32 %v1298_v17, %v726_v20  ;;  %v727_v26 = vadd.f32 %v691_v12, %v604_v21  ;;  %v1070_v27 = vpop.f32.mrb[27].mxu1 }
 0x11d   : > { %vm751_vm4 = vcmp.gt.f32.partialorder %v742_v25, 0.0  ;;  %v760_v28 = vmul.f32 0.01, %v742_v25  ;;  %v743_v29 = vadd.f32 %v1298_v17, %v727_v26 }
 0x11e   : > { %v573_v30 = vpop.f32.mrb[24].mxu0 }
 0x11f   : > { %v769_v31 = vsel %vm751_vm4, %v742_v25, %v760_v28  ;;  %vm752_vm6 = vcmp.gt.f32.partialorder %v743_v29, 0.0  ;;  %v761_v32 = vmul.f32 0.01, %v743_v29  ;;  %v605_v33 = vadd.f32 %v573_v30, %v424_v39  ;;  %v1045_v34 = vpop.f32.mrb[25].mxu0 }
 0x120   : > { %v950_v35 = vpack.c.bf16 %v769_v31, %v769_v31  ;;  %v576_v36 = vpop.f32.mrb[26].mxu0  ;;  %v704_v37 = vpop.f32.mrb[28].mxu1 }
 0x121   : > { %v770_v38 = vsel %vm752_vm6, %v743_v29, %v761_v32  ;;  %v728_v1 = vadd.f32 %v696_v19, %v605_v33  ;;  %v606_v40 = vadd.f32 %v576_v36, %v1283_v43  ;;  %v1046_v41 = vpop.f32.mrb[27].mxu0  ;;  %v1073_v42 = vpop.f32.mrb[29].mxu1 }
 0x122   : > { %816 = vst.msk [vmem:[%s1306_s14] sm:$0xf] %vm815_vm5, %v950_v35  ;;  %v951_v44 = vpack.c.bf16 %v770_v38, %v770_v38  ;;  %v707_v45 = vpop.f32.mrb[30].mxu1 }
 0x123   : > { %v744_v46 = vadd.f32 %v1298_v17, %v728_v1  ;;  %v729_v47 = vadd.f32 %v699_v24, %v606_v40  ;;  %v1074_v48 = vpop.f32.mrb[31].mxu1 }
 0x124   : > { %817 = vst.msk [vmem:[%s1306_s14 + $0x4] sm:$0xf] %vm815_vm5, %v951_v44 }
 0x125   : > { %vm753_vm7 = vcmp.gt.f32.partialorder %v744_v46, 0.0  ;;  %v762_v39 = vmul.f32 0.01, %v744_v46  ;;  %v745_v50 = vadd.f32 %v1298_v17, %v729_v47 }
 0x126   : > { %v581_v51 = vpop.f32.mrb[28].mxu0 }
 0x127   : > { %v771_v52 = vsel %vm753_vm7, %v744_v46, %v762_v39  ;;  %vm754_vm8 = vcmp.gt.f32.partialorder %v745_v50, 0.0  ;;  %v763_v43 = vmul.f32 0.01, %v745_v50  ;;  %v607_v54 = vadd.f32 %v581_v51, %v1285_v49  ;;  %v1049_v55 = vpop.f32.mrb[29].mxu0 }
 0x128   : > { %v952_v56 = vpack.c.bf16 %v771_v52, %v771_v52  ;;  %v584_v57 = vpop.f32.mrb[30].mxu0  ;;  %v712_v58 = vpop.f32.mrb[32].mxu1 }
 0x129   : > { %v772_v60 = vsel %vm754_vm8, %v745_v50, %v763_v43  ;;  %v730_v61 = vadd.f32 %v704_v37, %v607_v54  ;;  %v608_v62 = vadd.f32 %v584_v57, %v1287_v53  ;;  %v1050_v0 = vpop.f32.mrb[31].mxu0  ;;  %v1077_v2 = vpop.f32.mrb[33].mxu1 }
 0x12a   : > { %818 = vst.msk [vmem:[%s1306_s14 + $0x8] sm:$0xf] %vm815_vm5, %v952_v56  ;;  %v953_v3 = vpack.c.bf16 %v772_v60, %v772_v60  ;;  %v715_v4 = vpop.f32.mrb[34].mxu1 }
 0x12b   : > { %v746_v5 = vadd.f32 %v1298_v17, %v730_v61  ;;  %v731_v7 = vadd.f32 %v707_v45, %v608_v62  ;;  %v1078_v8 = vpop.f32.mrb[35].mxu1 }
 0x12c   : > { %819 = vst.msk [vmem:[%s1306_s14 + $0xc] sm:$0xf] %vm815_vm5, %v953_v3 }
 0x12d   : > { %vm755_vm9 = vcmp.gt.f32.partialorder %v746_v5, 0.0  ;;  %v764_v49 = vmul.f32 0.01, %v746_v5  ;;  %v747_v9 = vadd.f32 %v1298_v17, %v731_v7 }
 0x12e   : > { %v589_v10 = vpop.f32.mrb[32].mxu0 }
 0x12f   : > { %v773_v11 = vsel %vm755_vm9, %v746_v5, %v764_v49  ;;  %vm756_vm10 = vcmp.gt.f32.partialorder %v747_v9, 0.0  ;;  %v765_v53 = vmul.f32 0.01, %v747_v9  ;;  %v609_v12 = vadd.f32 %v589_v10, %v1289_v59  ;;  %v1053_v13 = vpop.f32.mrb[33].mxu0 }
 0x130   : > { %v954_v14 = vpack.c.bf16 %v773_v11, %v773_v11  ;;  %v592_v15 = vpop.f32.mrb[34].mxu0  ;;  %v720_v16 = vpop.f32.mrb[36].mxu1 }
 0x131   : > { %v774_v18 = vsel %vm756_vm10, %v747_v9, %v765_v53  ;;  %v732_v19 = vadd.f32 %v712_v58, %v609_v12  ;;  %v610_v20 = vadd.f32 %v592_v15, %v1291_v63  ;;  %v1054_v21 = vpop.f32.mrb[35].mxu0  ;;  %v1081_v22 = vpop.f32.mrb[37].mxu1 }
 0x132   : > { %820 = vst.msk [vmem:[%s1306_s14 + $0x10] sm:$0xf] %vm815_vm5, %v954_v14  ;;  %v955_v23 = vpack.c.bf16 %v774_v18, %v774_v18  ;;  %v723_v24 = vpop.f32.mrb[38].mxu1 }
 0x133   : > { %v748_v25 = vadd.f32 %v1298_v17, %v732_v19  ;;  %v733_v26 = vadd.f32 %v715_v4, %v610_v20  ;;  %v1082_v27 = vpop.f32.mrb[39].mxu1 }
 0x134   : > { %821 = vst.msk [vmem:[%s1306_s14 + $0x14] sm:$0xf] %vm815_vm5, %v955_v23 }
 0x135   : > { %vm757_vm11 = vcmp.gt.f32.partialorder %v748_v25, 0.0  ;;  %v766_v59 = vmul.f32 0.01, %v748_v25  ;;  %v749_v28 = vadd.f32 %v1298_v17, %v733_v26 }
 0x136   : > { %v597_v29 = vpop.f32.mrb[36].mxu0 }
 0x137   : > { %v775_v63 = vsel %vm757_vm11, %v748_v25, %v766_v59  ;;  %vm758_vm12 = vcmp.gt.f32.partialorder %v749_v28, 0.0  ;;  %v767_v30 = vmul.f32 0.01, %v749_v28  ;;  %v611_v31 = vadd.f32 %v597_v29, %v1293_v6  ;;  %v1057_v32 = vpop.f32.mrb[37].mxu0 }
 0x138   : > { %v956_v33 = vpack.c.bf16 %v775_v63, %v775_v63  ;;  %v600_v34 = vpop.f32.mrb[38].mxu0 }
 0x139   : > { %v776_v35 = vsel %vm758_vm12, %v749_v28, %v767_v30  ;;  %v734_v36 = vadd.f32 %v720_v16, %v611_v31  ;;  %v1058_v37 = vpop.f32.mrb[39].mxu0 }
 0x13a   : > { %822 = vst.msk [vmem:[%s1306_s14 + $0x18] sm:$0xf] %vm815_vm5, %v956_v33  ;;  %v957_v38 = vpack.c.bf16 %v776_v35, %v776_v35 }
 0x13b   : > { %v750_v1 = vadd.f32 %v1298_v17, %v734_v36 }
 0x13c   : > { %823 = vst.msk [vmem:[%s1306_s14 + $0x1c] sm:$0xf] %vm815_vm5, %v957_v38 }
 0x13d   : > { %vm759_vm13 = vcmp.gt.f32.partialorder %v750_v1, 0.0  ;;  %v768_v40 = vmul.f32 0.01, %v750_v1 }
 0x13f   : > { %v777_v41 = vsel %vm759_vm13, %v750_v1, %v768_v40 }
 0x140   : > { %v958_v42 = vpack.c.bf16 %v777_v41, %v777_v41 }
 0x142   : > { %824 = vst.msk [vmem:[%s1306_s14 + $0x20] sm:$0xf] %vm815_vm5, %v958_v42 }
 0x143 PF: > { %s13_s12 = sadd.s32 1, %s1120_s12  }
 0x144   : > { %p10_p4 = scmp.ge.s32.totalorder %s13_s12, 4  }
 0x146   :  { %12 = sbr.rel (!%p10_p4) target bundleno = 1 (0x1), region = 65 }

// kernel: encoder_forward.9
= control target key start
LH: loop header
LB: loop body
LE: loop exit
PB: predicated region body
PF: predicated region fallthrough
CT: control target
= control target key end

     0   :  { %s2009_s12 = smov 0   ;;  %s2507_s0 = inlined_call_operand.vmem [shape: bf16[2,104,16], index: 0, kind: input, shape index: {}]   ;;  %s2508_s1 = inlined_call_operand.vmem [shape: bf16[9,16,16], index: 1, kind: input, shape index: {}]   ;;  %s2509_s2 = inlined_call_operand.vmem [shape: f32[1,16], index: 2, kind: input, shape index: {}]   ;;  %s2510_s3 = inlined_call_operand.vmem [shape: bf16[2,80,16], index: 3, kind: output, shape index: {}]  }
   0x1 LB: > { %s1571_s13 = sadd.s32 4294967295, %s1985_s12   ;;  %p1575_p0 = scmp.ge.s32.totalorder %s1985_s12, 1  ;;  %s1985_s12 = sphi %s2009_s12, %s13_s12  }
   0x2   : > { %p137_p1 = scmp.lt.s32.totalorder %s1985_s12, 3 }
   0x4   : > { %p138_p2 = pnand %p1575_p0, %p137_p1 }
   0x5   : > { %v1951_v0 = vld [vmem:[%s2508_s1 + $0x8] sm:$0xff] (!%p138_p2)   ;;  %v1987_v1 = vmov (!%p138_p2), 0.0   ;;  %p161_p3 = scmp.lt.s32.totalorder (!%p138_p2), %s1571_s13, 1  ;;  %vm1988_vm0 = vmmov (!%p138_p2), 0   ;;  %vm218_vm1 = vsmask.f32 (!%p138_p2), 7424 }
   0x6   : > { %141 = sbr.rel (%p138_p2) target bundleno = 429 (0x1ad), region = 32  ;;  %1739 = vmatprep.subr.bf16.mxu0 (!%p138_p2), %v1987_v1  ;;  %1937 = vmatprep.subr.bf16.mxu1 (!%p138_p2), %v1987_v1  ;;  %vm269_vm2 = vcmask (!%p138_p2), 130048   ;;  %v1956_v30 = vld [vmem:[%s2508_s1 + $0x10] sm:$0xff] (!%p138_p2)   ;;  %v1957_v34 = vld [vmem:[%s2508_s1] sm:$0xff] (!%p138_p2)   ;;  %v1960_v48 = vld [vmem:[%s2508_s1 + $0x18] sm:$0xff] (!%p138_p2)   ;;  %vm450_vm3 = vcmask (!%p138_p2), 1046528  }
   0x7   : > { %1740 = vmatpush3.bf16.msra.mxu0 (!%p138_p2), %v1951_v0  ;;  %1938 = vmatpush3.bf16.msra.mxu1 (!%p138_p2), %v1951_v0  ;;  %vm856_vm4 = vcmask (!%p138_p2), 1045504   ;;  %v1961_v62 = vld [vmem:[%s2508_s1 + $0x20] sm:$0xff] (!%p138_p2)   ;;  %vm1097_vm5 = vsmask.f32 (!%p138_p2), 5376  ;;  %vm1238_vm6 = vcmask (!%p138_p2), 1044480   ;;  %vm1505_vm10 = vcmask (!%p138_p2), 125952  }
   0x8   : > { %1741 = vmatprep.mubr.msk.bf16.mxu0 (!%p138_p2), %vm1988_vm0, %v1987_v1  ;;  %1753 = vmatprep.mubr.msk.bf16.mxu1 (!%p138_p2), %vm1988_vm0, %v1987_v1  ;;  %vm695_vm7 = vsmask.f32 (!%p138_p2), 6400 }
   0x9   : > { %1783 = vmatprep.subr.bf16.mxu0 (!%p138_p2), %v1987_v1  ;;  %1761 = vmatprep.subr.bf16.mxu1 (!%p138_p2), %v1987_v1 }
   0xd   : > { %s2512_s13 = smov (!%p161_p3, %s1571_s13), 1 }
   0xe   : > { %s1939_s16 = smul.u32 52, %s2512_s13 }
   0xf   : > { %s1940_s11 = smul.u32 40, %s2512_s13 }
  0x10   : > { %s2034_s19 = scalar_lea.vmem %s2507_s0, %s1939_s16 }
  0x11   : > { %v172_v2 = vld [vmem:[%s2034_s19] sm:$0xf]  ;;  %v2038_v3 = vld [vmem:[%s2034_s19 + $0x4] sm:$0xf]  ;;  %v2041_v4 = vld [vmem:[%s2034_s19 + $0x8] sm:$0xf]  ;;  %s2454_s13 = scalar_lea.vmem %s2510_s3, %s1940_s11 }
  0x12   : > { %v2044_v5 = vld [vmem:[%s2034_s19 + $0xc] sm:$0xf]  ;;  %v2047_v6 = vcombine.low %v172_v2, %v2038_v3  ;;  %v2050_v7 = vld [vmem:[%s2034_s19 + $0x18] sm:$0xf]  ;;  %v2053_v8 = vld [vmem:[%s2034_s19 + $0x1c] sm:$0xf] }
  0x13   : > { %v2057_v9 = vcombine.low %v2041_v4, %v2044_v5  ;;  %v2060_v10 = vld [vmem:[%s2034_s19 + $0x20] sm:$0xf]  ;;  %v2063_v11 = vld [vmem:[%s2034_s19 + $0x24] sm:$0xf]  ;;  %v2067_v12 = vcombine.low %v2050_v7, %v2053_v8  ;;  %v2070_v13 = vld [vmem:[%s2034_s19 + $0x10] sm:$0xf] }
  0x14   : > { %v220_v14 = vshrl.u32 %v2047_v6, 16  ;;  %v222_v15 = vshll.u32 %v2047_v6, 16  ;;  %v2076_v16 = vcombine.low %v2060_v10, %v2063_v11  ;;  %v2079_v17 = vld [vmem:[%s2034_s19 + $0x14] sm:$0xf]  ;;  %v2082_v18 = vld [vmem:[%s2034_s19 + $0x28] sm:$0xf] }
  0x15   : > { %v227_v19 = vshll.u32 %v2057_v9, 16  ;;  %v243_v20 = vshll.u32 %v2067_v12, 16  ;;  %v247_v21 = vshrl.u32 %v2067_v12, 16  ;;  %v2089_v22 = vcombine.low %v2070_v13, %v2079_v17 }
  0x16   : > { %v224_v23 = vrot.slane %v222_v15, 1  ;;  %v251_v24 = vshll.u32 %v2076_v16, 16  ;;  %v2094_v25 = vcombine.low %v2082_v18, %v2082_v18  ;;  %v231_v31 = vshrl.u32 %v2057_v9, 16 }
  0x17   : > { %v229_v26 = vrot.slane %v227_v19, 1  ;;  %v245_v27 = vrot.slane %v243_v20, 1  ;;  %v235_v32 = vshll.u32 %v2089_v22, 16  ;;  %v255_v35 = vshrl.u32 %v2076_v16, 16 }
  0x18   : > { %v225_v28 = vor.u32 %v224_v23, %v220_v14  ;;  %v253_v29 = vrot.slane %v251_v24, 1  ;;  %v259_v37 = vshll.u32 %v2094_v25, 16  ;;  %v239_v44 = vshrl.u32 %v2089_v22, 16 }
  0x19   : > { %v249_v33 = vor.u32 %v247_v21, %v245_v27  ;;  %v233_v39 = vor.u32 %v231_v31, %v229_v26  ;;  %v237_v40 = vrot.slane %v235_v32, 1  ;;  %v1099_v49 = vrot.slane %v227_v19, 3 }
  0x1a   : > { %v230_v36 = vsel %vm218_vm1, %v225_v28, %v229_v26  ;;  %v257_v41 = vor.u32 %v255_v35, %v253_v29  ;;  %v261_v42 = vrot.slane %v259_v37, 1  ;;  %v979_v50 = vrot.slane %v2057_v9, 2 }
  0x1b   : > { %1742 = vmatmul.mubr.msk.bf16.vlgmr.msra.gmra.mrb[0].mxu0 %vm269_vm2, %v230_v36  ;;  %v254_v38 = vsel %vm218_vm1, %v249_v33, %v253_v29  ;;  %v238_v43 = vsel %vm218_vm1, %v233_v39, %v237_v40  ;;  %v241_v46 = vor.u32 %v239_v44, %v237_v40  ;;  %v1098_v51 = vrot.slane %v231_v31, 2 }
  0x1c   : > { %1754 = vmatmul.mubr.msk.bf16.vlgmr.msra.gmra.mrb[0].mxu1 %vm269_vm2, %v254_v38  ;;  %1784 = vmatpush3.bf16.msra.mxu0 %v1956_v30  ;;  %v262_v45 = vsel %vm218_vm1, %v257_v41, %v261_v42  ;;  %v451_v52 = vrot.slane %v2047_v6, 1  ;;  %v452_v53 = vrot.slane %v2057_v9, 1  ;;  %v980_v54 = vrot.slane %v2089_v22, 2 }
  0x1d   : > { %1762 = vmatpush3.bf16.msra.mxu1 %v1957_v34  ;;  %1745 = vmatprep.mubr.msk.bf16.mxu0 %vm1988_vm0, %v1987_v1  ;;  %v246_v47 = vsel %vm218_vm1, %v241_v46, %v245_v27  ;;  %v1102_v55 = vrot.slane %v235_v32, 3  ;;  %v1101_v56 = vrot.slane %v239_v44, 2  ;;  %v982_v57 = vrot.slane %v2067_v12, 2 }
  0x1e   : > { %1757 = vmatprep.mubr.msk.bf16.mxu1 %vm1988_vm0, %v1987_v1  ;;  %1805 = vmatprep.subr.bf16.mxu1 %v1987_v1  ;;  %v2151_v58 = vsel %vm856_vm4, %v979_v50, %v980_v54  ;;  %v984_v60 = vrot.slane %v2076_v16, 2  ;;  %v453_v61 = vsel %vm450_vm3, %v451_v52, %v452_v53  ;;  %v1100_v63 = vor.u32 %v1099_v49, %v1098_v51  ;;  %v1964_v51 = vld [vmem:[%s2508_s1 + $0x28] sm:$0xff]  }
  0x1f   : > { %1827 = vmatprep.subr.bf16.mxu0 %v1987_v1  ;;  %v2154_v59 = vsel %vm856_vm4, %v980_v54, %v982_v57  ;;  %v1103_v2 = vor.u32 %v1102_v55, %v1101_v56  ;;  %v1106_v14 = vrot.slane %v243_v20, 3  ;;  %v1239_v15 = vrot.slane %v2057_v9, 3 }
  0x20   : > { %v2164_v0 = vsel %vm856_vm4, %v982_v57, %v984_v60  ;;  %v454_v19 = vrot.slane %v2089_v22, 1  ;;  %v1240_v26 = vrot.slane %v2089_v22, 3  ;;  %v1109_v20 = vrot.slane %v255_v35, 2 }
  0x21   : > { %v2174_v23 = vsel %vm1097_vm5, %v1100_v63, %v1103_v2  ;;  %v1110_v27 = vrot.slane %v251_v24, 3  ;;  %v1242_v28 = vrot.slane %v2067_v12, 3  ;;  %v1244_v33 = vrot.slane %v2076_v16, 3 }
  0x22   : > { %v2189_v29 = vsel %vm1238_vm6, %v1239_v15, %v1240_v26  ;;  %v455_v31 = vsel %vm450_vm3, %v452_v53, %v454_v19  ;;  %v456_v35 = vrot.slane %v2067_v12, 1  ;;  %v2231_v38 = vcombine.low %v2038_v3, %v2041_v4 }
  0x23   : > { %1746 = vmatmul.mubr.msk.bf16.gmra.mrb[4].mxu0 %vm269_vm2, %v238_v43  ;;  %v2195_v30 = vor.u32 %v1110_v27, %v1109_v20  ;;  %v2198_v24 = vsel %vm1238_vm6, %v1240_v26, %v1242_v28  ;;  %v2210_v34 = vsel %vm1238_vm6, %v1242_v28, %v1244_v33  ;;  %v2235_v39 = vcombine.low %v2044_v5, %v2070_v13 }
  0x24   : > { %1758 = vmatmul.mubr.msk.bf16.gmra.mrb[4].mxu1 %vm269_vm2, %v262_v45  ;;  %1749 = vmatprep.mubr.msk.bf16.mxu0 %vm1988_vm0, %v1987_v1  ;;  %v457_v36 = vsel %vm450_vm3, %v454_v19, %v456_v35  ;;  %v697_v40 = vshrl.u32 %v2231_v38, 16  ;;  %v700_v41 = vshll.u32 %v2231_v38, 16  ;;  %v577_v44 = vrot.slane %v2231_v38, 1 }
  0x25   : > { %1763 = vmatprep.mubr.msk.bf16.mxu1 %vm1988_vm0, %v1987_v1  ;;  %v705_v42 = vshrl.u32 %v2235_v39, 16  ;;  %v708_v43 = vshll.u32 %v2235_v39, 16  ;;  %v2258_v52 = vcombine.low %v2079_v17, %v2050_v7  ;;  %v2293_v27 = vcombine.low %v2063_v11, %v2082_v18 }
  0x26   : > { %v699_v46 = vrot.slane %v697_v40, 1 }
  0x27   : > { %v710_v49 = vrot.slane %v708_v43, 2  ;;  %v714_v55 = vshrl.u32 %v2258_v52, 16  ;;  %v717_v56 = vshll.u32 %v2258_v52, 16  ;;  %v580_v7 = vrot.slane %v2258_v52, 1 }
  0x29   : > { %v719_v63 = vrot.slane %v717_v56, 2 }
  0x2b   : > { %1750 = vmatmul.mubr.msk.bf16.gmra.mrb[8].mxu0 %vm269_vm2, %v246_v47  ;;  %v702_v47 = vrot.slane %v700_v41, 2 }
  0x2c   : > { %1764 = vmatmul.mubr.msk.bf16.vlgmr.msra.gmra.mrb[8].mxu1 %vm269_vm2, %v2047_v6  ;;  %1785 = vmatprep.mubr.msk.bf16.mxu0 %vm1988_vm0, %v1987_v1  ;;  %v1105_v6 = vrot.slane %v247_v21, 2 }
  0x2d   : > { %1806 = vmatpush3.bf16.msra.mxu1 %v1960_v48  ;;  %1767 = vmatprep.mubr.msk.bf16.mxu1 %vm1988_vm0, %v1987_v1  ;;  %v707_v48 = vrot.slane %v705_v42, 1  ;;  %v703_v53 = vor.u32 %v702_v47, %v699_v46 }
  0x2e   : > { %1849 = vmatprep.subr.bf16.mxu1 %v1987_v1  ;;  %v1107_v21 = vor.u32 %v1106_v14, %v1105_v6  ;;  %v2277_v6 = vcombine.low %v2053_v8, %v2060_v10 }
  0x2f   : > { %v711_v54 = vor.u32 %v710_v49, %v707_v48 }
  0x30   : > { %v2203_v32 = vsel %vm1097_vm5, %v1107_v21, %v2195_v30  ;;  %v723_v15 = vshrl.u32 %v2277_v6, 16  ;;  %v726_v19 = vshll.u32 %v2277_v6, 16  ;;  %v582_v8 = vrot.slane %v2277_v6, 1 }
  0x31   : > { %v712_v57 = vsel %vm695_vm7, %v703_v53, %v711_v54 }
  0x32   : > { %v725_v26 = vrot.slane %v723_v15, 1  ;;  %v583_v20 = vsel %vm450_vm3, %v580_v7, %v582_v8 }
  0x33   : > { %1786 = vmatmul.mubr.msk.bf16.vlgmr.msra.gmra.mrb[12].mxu0 %vm269_vm2, %v453_v61  ;;  %v1966_v61 = vld [vmem:[%s2508_s1 + $0x30] sm:$0xff]  }
  0x34   : > { %1768 = vmatmul.mubr.msk.bf16.gmra.mrb[12].mxu1 %vm269_vm2, %v2057_v9  ;;  %1828 = vmatpush3.bf16.msra.mxu0 %v1961_v62  ;;  %v2193_v9 = vsel %vm1097_vm5, %v1103_v2, %v1107_v21  ;;  %v716_v62 = vrot.slane %v714_v55, 1  ;;  %v728_v21 = vrot.slane %v726_v19, 2  ;;  %v1970_v55 = vld [vmem:[%s2508_s1 + $0x38] sm:$0xff]  }
  0x35   : > { %1771 = vmatprep.mubr.msk.bf16.mxu1 %vm1988_vm0, %v1987_v1  ;;  %1789 = vmatprep.mubr.msk.bf16.mxu0 %vm1988_vm0, %v1987_v1 }
  0x36   : > { %1871 = vmatprep.subr.bf16.mxu0 %v1987_v1  ;;  %v720_v14 = vor.u32 %v719_v63, %v716_v62  ;;  %v729_v28 = vor.u32 %v728_v21, %v725_v26 }
  0x38   : > { %v721_v10 = vsel %vm695_vm7, %v711_v54, %v720_v14  ;;  %v730_v11 = vsel %vm695_vm7, %v720_v14, %v729_v28 }
  0x3b   : > { %1790 = vmatmul.mubr.msk.bf16.gmra.mrb[16].mxu0 %vm269_vm2, %v455_v31  ;;  %v732_v31 = vshrl.u32 %v2293_v27, 16 }
  0x3c   : > { %1772 = vmatmul.mubr.msk.bf16.gmra.mrb[16].mxu1 %vm269_vm2, %v2089_v22  ;;  %1793 = vmatprep.mubr.msk.bf16.mxu0 %vm1988_vm0, %v1987_v1  ;;  %v458_v22 = vrot.slane %v2076_v16, 1 }
  0x3d   : > { %1775 = vmatprep.mubr.msk.bf16.mxu1 %vm1988_vm0, %v1987_v1 }
  0x3e   : > { %v459_v37 = vsel %vm450_vm3, %v456_v35, %v458_v22  ;;  %v735_v35 = vshll.u32 %v2293_v27, 16 }
  0x43   : > { %1794 = vmatmul.mubr.msk.bf16.gmra.mrb[20].mxu0 %vm269_vm2, %v457_v36  ;;  %v584_v36 = vrot.slane %v2293_v27, 1 }
  0x44   : > { %1776 = vmatmul.mubr.msk.bf16.gmra.mrb[20].mxu1 %vm269_vm2, %v2067_v12  ;;  %1797 = vmatprep.mubr.msk.bf16.mxu0 %vm1988_vm0, %v1987_v1  ;;  %v460_v12 = vrot.slane %v2094_v25, 1  ;;  %v578_v25 = vrot.slane %v2235_v39, 1 }
  0x45   : > { %1779 = vmatprep.mubr.msk.bf16.mxu1 %vm1988_vm0, %v1987_v1  ;;  %v585_v40 = vsel %vm450_vm3, %v582_v8, %v584_v36 }
  0x46   : > { %v461_v45 = vsel %vm450_vm3, %v458_v22, %v460_v12  ;;  %v579_v50 = vsel %vm450_vm3, %v577_v44, %v578_v25  ;;  %v581_v2 = vsel %vm450_vm3, %v578_v25, %v580_v7  ;;  %v2305_v22 = vld [vmem:[%s2034_s19 + $0x2c] sm:$0xf]  ;;  %v737_v12 = vrot.slane %v735_v35, 2 }
  0x47   : > { %v1613_v41 = vcombine.low %v2305_v22, %v2305_v22 }
  0x49   : > { %v741_v43 = vshrl.u32 %v1613_v41, 16  ;;  %v744_v44 = vshll.u32 %v1613_v41, 16  ;;  %v586_v25 = vrot.slane %v1613_v41, 1  ;;  %v866_v62 = vrot.slane %v1613_v41, 2 }
  0x4b   : > { %1798 = vmatmul.mubr.msk.bf16.gmra.mrb[24].mxu0 %vm269_vm2, %v459_v37  ;;  %v734_v37 = vrot.slane %v732_v31, 1  ;;  %v743_v46 = vrot.slane %v741_v43, 1  ;;  %v746_v47 = vrot.slane %v744_v44, 2  ;;  %v587_v48 = vsel %vm450_vm3, %v584_v36, %v586_v25 }
  0x4c   : > { %1780 = vmatmul.mubr.msk.bf16.gmra.mrb[24].mxu1 %vm269_vm2, %v2076_v16  ;;  %1801 = vmatprep.mubr.msk.bf16.mxu0 %vm1988_vm0, %v1987_v1 }
  0x4d   : > { %1807 = vmatprep.mubr.msk.bf16.mxu1 %vm1988_vm0, %v1987_v1  ;;  %v738_v42 = vor.u32 %v737_v12, %v734_v37  ;;  %v747_v49 = vor.u32 %v746_v47, %v743_v46 }
  0x4f   : > { %v748_v53 = vsel %vm695_vm7, %v738_v42, %v747_v49 }
  0x53   : > { %1802 = vmatmul.mubr.msk.bf16.gmra.mrb[28].mxu0 %vm269_vm2, %v461_v45  ;;  %v739_v45 = vsel %vm695_vm7, %v729_v28, %v738_v42 }
  0x54   : > { %1808 = vmatmul.mubr.msk.bf16.vlgmr.msra.gmra.mrb[28].mxu1 %vm269_vm2, %v579_v50  ;;  %1829 = vmatprep.mubr.msk.bf16.mxu0 %vm1988_vm0, %v1987_v1  ;;  %v857_v50 = vrot.slane %v2231_v38, 2  ;;  %v860_v38 = vrot.slane %v2258_v52, 2  ;;  %v862_v52 = vrot.slane %v2277_v6, 2 }
  0x55   : > { %1850 = vmatpush3.bf16.msra.mxu1 %v1964_v51  ;;  %1811 = vmatprep.mubr.msk.bf16.mxu1 %vm1988_vm0, %v1987_v1  ;;  %v858_v51 = vrot.slane %v2235_v39, 2  ;;  %v1971_v39 = vld [vmem:[%s2508_s1 + $0x40] sm:$0xff]  }
  0x56   : > { %1893 = vmatprep.subr.bf16.mxu1 %v1987_v1  ;;  %v863_v7 = vsel %vm856_vm4, %v860_v38, %v862_v52 }
  0x57   : > { %v859_v54 = vsel %vm856_vm4, %v857_v50, %v858_v51  ;;  %v861_v56 = vsel %vm856_vm4, %v858_v51, %v860_v38 }
  0x5b   : > { %1830 = vmatmul.mubr.msk.bf16.vlgmr.msra.gmra.mrb[32].mxu0 %vm269_vm2, %v712_v57  ;;  %v1638_v57 = vcombine.low %v2082_v18, %v2305_v22  ;;  %v1973_v18 = vld [vmem:[%s2034_s19 + $0x30] ss:$0 sps:$4 sm:$0xff]  }
  0x5c   : > { %1812 = vmatmul.mubr.msk.bf16.gmra.mrb[32].mxu1 %vm269_vm2, %v581_v2  ;;  %1872 = vmatpush3.bf16.msra.mxu0 %v1966_v61  ;;  %v1126_v19 = vshll.u32 %v1973_v18, 16 }
  0x5d   : > { %1815 = vmatprep.mubr.msk.bf16.mxu1 %vm1988_vm0, %v1987_v1  ;;  %1833 = vmatprep.mubr.msk.bf16.mxu0 %vm1988_vm0, %v1987_v1 }
  0x5e   : > { %1915 = vmatprep.subr.bf16.mxu0 %v1987_v1  ;;  %v1128_v26 = vrot.slane %v1126_v19, 3 }
  0x63   : > { %1834 = vmatmul.mubr.msk.bf16.gmra.mrb[36].mxu0 %vm269_vm2, %v721_v10 }
  0x64   : > { %1816 = vmatmul.mubr.msk.bf16.gmra.mrb[36].mxu1 %vm269_vm2, %v583_v20  ;;  %1837 = vmatprep.mubr.msk.bf16.mxu0 %vm1988_vm0, %v1987_v1 }
  0x65   : > { %1819 = vmatprep.mubr.msk.bf16.mxu1 %vm1988_vm0, %v1987_v1 }
  0x6b   : > { %1838 = vmatmul.mubr.msk.bf16.gmra.mrb[40].mxu0 %vm269_vm2, %v730_v11 }
  0x6c   : > { %1820 = vmatmul.mubr.msk.bf16.gmra.mrb[40].mxu1 %vm269_vm2, %v585_v40  ;;  %1841 = vmatprep.mubr.msk.bf16.mxu0 %vm1988_vm0, %v1987_v1 }
  0x6d   : > { %1823 = vmatprep.mubr.msk.bf16.mxu1 %vm1988_vm0, %v1987_v1 }
  0x73   : > { %1842 = vmatmul.mubr.msk.bf16.gmra.mrb[44].mxu0 %vm269_vm2, %v739_v45 }
  0x74   : > { %1824 = vmatmul.mubr.msk.bf16.gmra.mrb[44].mxu1 %vm269_vm2, %v587_v48  ;;  %1845 = vmatprep.mubr.msk.bf16.mxu0 %vm1988_vm0, %v1987_v1 }
  0x75   : > { %1851 = vmatprep.mubr.msk.bf16.mxu1 %vm1988_vm0, %v1987_v1 }
  0x7b   : > { %1846 = vmatmul.mubr.msk.bf16.gmra.mrb[48].mxu0 %vm269_vm2, %v748_v53 }
  0x7c   : > { %1852 = vmatmul.mubr.msk.bf16.vlgmr.msra.gmra.mrb[48].mxu1 %vm269_vm2, %v859_v54  ;;  %1873 = vmatprep.mubr.msk.bf16.mxu0 %vm1988_vm0, %v1987_v1 }
  0x7d   : > { %1894 = vmatpush3.bf16.msra.mxu1 %v1970_v55  ;;  %1855 = vmatprep.mubr.msk.bf16.mxu1 %vm1988_vm0, %v1987_v1 }
  0x83   : > { %1874 = vmatmul.mubr.msk.bf16.vlgmr.msra.gmra.mrb[52].mxu0 %vm269_vm2, %v2151_v58  ;;  %v864_v58 = vrot.slane %v2293_v27, 2 }
  0x84   : > { %1856 = vmatmul.mubr.msk.bf16.gmra.mrb[52].mxu1 %vm269_vm2, %v861_v56  ;;  %1916 = vmatpush3.bf16.msra.mxu0 %v1971_v39 }
  0x85   : > { %1859 = vmatprep.mubr.msk.bf16.mxu1 %vm1988_vm0, %v1987_v1  ;;  %1877 = vmatprep.mubr.msk.bf16.mxu0 %vm1988_vm0, %v1987_v1  ;;  %v865_v61 = vsel %vm856_vm4, %v862_v52, %v864_v58  ;;  %v867_v2 = vsel %vm856_vm4, %v864_v58, %v866_v62 }
  0x8b   : > { %1878 = vmatmul.mubr.msk.bf16.gmra.mrb[56].mxu0 %vm269_vm2, %v2154_v59  ;;  %v986_v59 = vrot.slane %v1638_v57, 2 }
  0x8c   : > { %1860 = vmatmul.mubr.msk.bf16.gmra.mrb[56].mxu1 %vm269_vm2, %v863_v7  ;;  %1881 = vmatprep.mubr.msk.bf16.mxu0 %vm1988_vm0, %v1987_v1 }
  0x8d   : > { %1863 = vmatprep.mubr.msk.bf16.mxu1 %vm1988_vm0, %v1987_v1  ;;  %v987_v63 = vsel %vm856_vm4, %v984_v60, %v986_v59  ;;  %v1114_v60 = vshrl.u32 %v1638_v57, 16 }
  0x8f   : > { %v1116_v14 = vrot.slane %v1114_v60, 2 }
  0x93   : > { %1882 = vmatmul.mubr.msk.bf16.gmra.mrb[60].mxu0 %vm269_vm2, %v2164_v0  ;;  %v988_v0 = vrot.slane %v1973_v18, 2 }
  0x94   : > { %1864 = vmatmul.mubr.msk.bf16.gmra.mrb[60].mxu1 %vm269_vm2, %v865_v61  ;;  %1885 = vmatprep.mubr.msk.bf16.mxu0 %vm1988_vm0, %v1987_v1 }
  0x95   : > { %1867 = vmatprep.mubr.msk.bf16.mxu1 %vm1988_vm0, %v1987_v1  ;;  %v989_v6 = vsel %vm856_vm4, %v986_v59, %v988_v0 }
  0x9b   : > { %1886 = vmatmul.mubr.msk.bf16.gmra.mrb[64].mxu0 %vm269_vm2, %v987_v63 }
  0x9c   : > { %1868 = vmatmul.mubr.msk.bf16.gmra.mrb[64].mxu1 %vm269_vm2, %v867_v2  ;;  %1889 = vmatprep.mubr.msk.bf16.mxu0 %vm1988_vm0, %v1987_v1 }
  0x9d   : > { %1895 = vmatprep.mubr.msk.bf16.mxu1 %vm1988_vm0, %v1987_v1 }
  0xa3   : > { %1890 = vmatmul.mubr.msk.bf16.gmra.mrb[68].mxu0 %vm269_vm2, %v989_v6 }
  0xa4   : > { %1896 = vmatmul.mubr.msk.bf16.vlgmr.msra.gmra.mrb[68].mxu1 %vm269_vm2, %v2174_v23  ;;  %1917 = vmatprep.mubr.msk.bf16.mxu0 %vm1988_vm0, %v1987_v1  ;;  %v1117_v23 = vshll.u32 %v1638_v57, 16 }
  0xa5   : > { %1899 = vmatprep.mubr.msk.bf16.mxu1 %vm1988_vm0, %v1987_v1 }
  0xa6   : > { %v1119_v15 = vrot.slane %v1117_v23, 3 }
  0xab   : > { %1918 = vmatmul.mubr.msk.bf16.vlgmr.msra.gmra.mrb[72].mxu0 %vm269_vm2, %v2189_v29  ;;  %v1120_v29 = vor.u32 %v1119_v15, %v1116_v14 }
  0xac   : > { %1900 = vmatmul.mubr.msk.bf16.gmra.mrb[72].mxu1 %vm269_vm2, %v2193_v9  ;;  %1921 = vmatprep.mubr.msk.bf16.mxu0 %vm1988_vm0, %v1987_v1  ;;  %v1123_v9 = vshrl.u32 %v1973_v18, 16 }
  0xad   : > { %1903 = vmatprep.mubr.msk.bf16.mxu1 %vm1988_vm0, %v1987_v1  ;;  %v1121_v8 = vsel %vm1097_vm5, %v2195_v30, %v1120_v29 }
  0xae   : > { %v1125_v10 = vrot.slane %v1123_v9, 2 }
  0xb3   : > { %1922 = vmatmul.mubr.msk.bf16.gmra.mrb[76].mxu0 %vm269_vm2, %v2198_v24  ;;  %v1246_v24 = vrot.slane %v1638_v57, 3 }
  0xb4   : > { %1904 = vmatmul.mubr.msk.bf16.gmra.mrb[76].mxu1 %vm269_vm2, %v2203_v32  ;;  %1925 = vmatprep.mubr.msk.bf16.mxu0 %vm1988_vm0, %v1987_v1  ;;  %v1129_v32 = vor.u32 %v1128_v26, %v1125_v10 }
  0xb5   : > { %1907 = vmatprep.mubr.msk.bf16.mxu1 %vm1988_vm0, %v1987_v1  ;;  %v1247_v21 = vsel %vm1238_vm6, %v1244_v33, %v1246_v24 }
  0xb6   : > { %v1130_v30 = vsel %vm1097_vm5, %v1120_v29, %v1129_v32 }
  0xbb   : > { %1926 = vmatmul.mubr.msk.bf16.gmra.mrb[80].mxu0 %vm269_vm2, %v2210_v34  ;;  %v1248_v34 = vrot.slane %v1973_v18, 3 }
  0xbc   : > { %1908 = vmatmul.mubr.msk.bf16.gmra.mrb[80].mxu1 %vm269_vm2, %v1121_v8  ;;  %1929 = vmatprep.mubr.msk.bf16.mxu0 %vm1988_vm0, %v1987_v1 }
  0xbd   : > { %1911 = vmatprep.mubr.msk.bf16.mxu1 %vm1988_vm0, %v1987_v1  ;;  %v1249_v20 = vsel %vm1238_vm6, %v1246_v24, %v1248_v34 }
  0xc3   : > { %1930 = vmatmul.mubr.msk.bf16.gmra.mrb[84].mxu0 %vm269_vm2, %v1247_v21 }
  0xc4   : > { %1912 = vmatmul.mubr.msk.bf16.gmra.mrb[84].mxu1 %vm269_vm2, %v1130_v30  ;;  %1933 = vmatprep.mubr.msk.bf16.mxu0 %vm1988_vm0, %v1987_v1 }
  0xcb   : > { %1934 = vmatmul.mubr.msk.bf16.gmra.mrb[88].mxu0 %vm269_vm2, %v1249_v20 }
  0xee   : > { %v319_v27 = vpop.f32.mrb[0].mxu0 }
  0xef   : > { %v1743_v28 = vpop.f32.mrb[1].mxu0  ;;  %v343_v31 = vpop.f32.mrb[0].mxu1 }
  0xf0   : > { %v322_v16 = vpop.f32.mrb[2].mxu0  ;;  %v1755_v35 = vpop.f32.mrb[1].mxu1 }
  0xf1   : > { %v1744_v33 = vpop.f32.mrb[3].mxu0  ;;  %v346_v36 = vpop.f32.mrb[2].mxu1 }
  0xf2   : > { %v1756_v11 = vpop.f32.mrb[3].mxu1 }
  0xf6   : > { %v327_v37 = vpop.f32.mrb[4].mxu0 }
  0xf7   : > { %v1747_v12 = vpop.f32.mrb[5].mxu0  ;;  %v351_v40 = vpop.f32.mrb[4].mxu1 }
  0xf8   : > { %v330_v41 = vpop.f32.mrb[6].mxu0  ;;  %v1759_v42 = vpop.f32.mrb[5].mxu1 }
  0xf9   : > { %v1748_v43 = vpop.f32.mrb[7].mxu0  ;;  %v354_v1 = vpop.f32.mrb[6].mxu1 }
  0xfa   : > { %v1760_v44 = vpop.f32.mrb[7].mxu1 }
  0xfe   : > { %v335_v25 = vpop.f32.mrb[8].mxu0 }
  0xff   : > { %v408_v45 = vpop.f32.mrb[8].mxu1  ;;  %v1751_v46 = vpop.f32.mrb[9].mxu0 }
 0x100   : > { %v409_v47 = vadd.f32 %v408_v45, %v319_v27  ;;  %v1765_v48 = vpop.f32.mrb[9].mxu1  ;;  %v338_v49 = vpop.f32.mrb[10].mxu0 }
 0x101   : > { %v411_v50 = vpop.f32.mrb[10].mxu1  ;;  %v1752_v51 = vpop.f32.mrb[11].mxu0 }
 0x102   : > { %v412_v53 = vadd.f32 %v411_v50, %v322_v16  ;;  %v1766_v54 = vpop.f32.mrb[11].mxu1 }
 0x106   : > { %v517_v55 = vpop.f32.mrb[12].mxu0 }
 0x107   : > { %v416_v38 = vpop.f32.mrb[12].mxu1  ;;  %v556_v39 = vadd.f32 %v517_v55, %v409_v47  ;;  %v1787_v56 = vpop.f32.mrb[13].mxu0 }
 0x108   : > { %v417_v52 = vadd.f32 %v416_v38, %v327_v37  ;;  %v1769_v7 = vpop.f32.mrb[13].mxu1  ;;  %v520_v58 = vpop.f32.mrb[14].mxu0 }
 0x109   : > { %v419_v57 = vpop.f32.mrb[14].mxu1  ;;  %v557_v61 = vadd.f32 %v520_v58, %v412_v53  ;;  %v1788_v59 = vpop.f32.mrb[15].mxu0 }
 0x10a   : > { %v420_v62 = vadd.f32 %v419_v57, %v330_v41  ;;  %v1770_v63 = vpop.f32.mrb[15].mxu1 }
 0x10e   : > { %v525_v18 = vpop.f32.mrb[16].mxu0 }
 0x10f   : > { %v424_v2 = vpop.f32.mrb[16].mxu1  ;;  %v558_v0 = vadd.f32 %v525_v18, %v417_v52  ;;  %v1791_v6 = vpop.f32.mrb[17].mxu0 }
 0x110   : > { %v425_v60 = vadd.f32 %v424_v2, %v335_v25  ;;  %v1773_v23 = vpop.f32.mrb[17].mxu1  ;;  %v528_v14 = vpop.f32.mrb[18].mxu0 }
 0x111   : > { %v427_v15 = vpop.f32.mrb[18].mxu1  ;;  %v559_v29 = vadd.f32 %v528_v14, %v420_v62  ;;  %v1792_v9 = vpop.f32.mrb[19].mxu0 }
 0x112   : > { %v428_v19 = vadd.f32 %v427_v15, %v338_v49  ;;  %v1774_v8 = vpop.f32.mrb[19].mxu1 }
 0x116   : > { %v533_v10 = vpop.f32.mrb[20].mxu0 }
 0x117   : > { %v432_v26 = vpop.f32.mrb[20].mxu1  ;;  %v560_v24 = vadd.f32 %v533_v10, %v425_v60  ;;  %v1795_v32 = vpop.f32.mrb[21].mxu0 }
 0x118   : > { %v433_v21 = vadd.f32 %v432_v26, %v343_v31  ;;  %v1777_v30 = vpop.f32.mrb[21].mxu1  ;;  %v536_v34 = vpop.f32.mrb[22].mxu0 }
 0x119   : > { %v435_v20 = vpop.f32.mrb[22].mxu1  ;;  %v561_v27 = vadd.f32 %v536_v34, %v428_v19  ;;  %v1796_v28 = vpop.f32.mrb[23].mxu0 }
 0x11a   : > { %v436_v16 = vadd.f32 %v435_v20, %v346_v36  ;;  %v1778_v35 = vpop.f32.mrb[23].mxu1 }
 0x11e   : > { %v541_v33 = vpop.f32.mrb[24].mxu0 }
 0x11f   : > { %v440_v11 = vpop.f32.mrb[24].mxu1  ;;  %v562_v37 = vadd.f32 %v541_v33, %v433_v21  ;;  %v1799_v12 = vpop.f32.mrb[25].mxu0 }
 0x120   : > { %v441_v41 = vadd.f32 %v440_v11, %v351_v40  ;;  %v1781_v42 = vpop.f32.mrb[25].mxu1  ;;  %v544_v43 = vpop.f32.mrb[26].mxu0 }
 0x121   : > { %v443_v44 = vpop.f32.mrb[26].mxu1  ;;  %v563_v25 = vadd.f32 %v544_v43, %v436_v16  ;;  %v1800_v45 = vpop.f32.mrb[27].mxu0 }
 0x122   : > { %v444_v46 = vadd.f32 %v443_v44, %v354_v1  ;;  %v1782_v47 = vpop.f32.mrb[27].mxu1 }
 0x126   : > { %v549_v31 = vpop.f32.mrb[28].mxu0 }
 0x127   : > { %v564_v48 = vadd.f32 %v549_v31, %v441_v41  ;;  %v643_v49 = vpop.f32.mrb[28].mxu1  ;;  %v1803_v50 = vpop.f32.mrb[29].mxu0 }
 0x128   : > { %v682_v51 = vadd.f32 %v643_v49, %v556_v39  ;;  %v1809_v53 = vpop.f32.mrb[29].mxu1  ;;  %v552_v36 = vpop.f32.mrb[30].mxu0 }
 0x129   : > { %v565_v54 = vadd.f32 %v552_v36, %v444_v46  ;;  %v646_v55 = vpop.f32.mrb[30].mxu1  ;;  %v1804_v38 = vpop.f32.mrb[31].mxu0 }
 0x12a   : > { %v683_v56 = vadd.f32 %v646_v55, %v557_v61  ;;  %v1810_v52 = vpop.f32.mrb[31].mxu1 }
 0x12e   : > { %v804_v40 = vpop.f32.mrb[32].mxu0 }
 0x12f   : > { %v651_v7 = vpop.f32.mrb[32].mxu1  ;;  %v843_v58 = vadd.f32 %v804_v40, %v682_v51  ;;  %v1831_v57 = vpop.f32.mrb[33].mxu0 }
 0x130   : > { %v684_v59 = vadd.f32 %v651_v7, %v558_v0  ;;  %v1813_v62 = vpop.f32.mrb[33].mxu1  ;;  %v807_v1 = vpop.f32.mrb[34].mxu0 }
 0x131   : > { %v654_v63 = vpop.f32.mrb[34].mxu1  ;;  %v844_v18 = vadd.f32 %v807_v1, %v683_v56  ;;  %v1832_v2 = vpop.f32.mrb[35].mxu0 }
 0x132   : > { %v685_v6 = vadd.f32 %v654_v63, %v559_v29  ;;  %v1814_v60 = vpop.f32.mrb[35].mxu1 }
 0x136   : > { %v812_v39 = vpop.f32.mrb[36].mxu0 }
 0x137   : > { %v659_v23 = vpop.f32.mrb[36].mxu1  ;;  %v845_v14 = vadd.f32 %v812_v39, %v684_v59  ;;  %v1835_v15 = vpop.f32.mrb[37].mxu0 }
 0x138   : > { %v686_v9 = vadd.f32 %v659_v23, %v560_v24  ;;  %v1817_v19 = vpop.f32.mrb[37].mxu1  ;;  %v815_v61 = vpop.f32.mrb[38].mxu0 }
 0x139   : > { %v662_v8 = vpop.f32.mrb[38].mxu1  ;;  %v846_v10 = vadd.f32 %v815_v61, %v685_v6  ;;  %v1836_v26 = vpop.f32.mrb[39].mxu0 }
 0x13a   : > { %v687_v32 = vadd.f32 %v662_v8, %v561_v27  ;;  %v1818_v21 = vpop.f32.mrb[39].mxu1 }
 0x13e   : > { %v820_v0 = vpop.f32.mrb[40].mxu0 }
 0x13f   : > { %v667_v30 = vpop.f32.mrb[40].mxu1  ;;  %v847_v34 = vadd.f32 %v820_v0, %v686_v9  ;;  %v1839_v20 = vpop.f32.mrb[41].mxu0 }
 0x140   : > { %v688_v28 = vadd.f32 %v667_v30, %v562_v37  ;;  %v1821_v16 = vpop.f32.mrb[41].mxu1  ;;  %v823_v29 = vpop.f32.mrb[42].mxu0 }
 0x141   : > { %v670_v35 = vpop.f32.mrb[42].mxu1  ;;  %v848_v33 = vadd.f32 %v823_v29, %v687_v32  ;;  %v1840_v11 = vpop.f32.mrb[43].mxu0 }
 0x142   : > { %v689_v12 = vadd.f32 %v670_v35, %v563_v25  ;;  %v1822_v41 = vpop.f32.mrb[43].mxu1 }
 0x146   : > { %v828_v24 = vpop.f32.mrb[44].mxu0 }
 0x147   : > { %v675_v42 = vpop.f32.mrb[44].mxu1  ;;  %v849_v43 = vadd.f32 %v828_v24, %v688_v28  ;;  %v1843_v44 = vpop.f32.mrb[45].mxu0 }
 0x148   : > { %v690_v45 = vadd.f32 %v675_v42, %v564_v48  ;;  %v1825_v46 = vpop.f32.mrb[45].mxu1  ;;  %v831_v27 = vpop.f32.mrb[46].mxu0 }
 0x149   : > { %v678_v47 = vpop.f32.mrb[46].mxu1  ;;  %v850_v31 = vadd.f32 %v831_v27, %v689_v12  ;;  %v1844_v49 = vpop.f32.mrb[47].mxu0 }
 0x14a   : > { %v691_v50 = vadd.f32 %v678_v47, %v565_v54  ;;  %v1826_v51 = vpop.f32.mrb[47].mxu1 }
 0x14e   : > { %v836_v37 = vpop.f32.mrb[48].mxu0 }
 0x14f   : > { %v851_v53 = vadd.f32 %v836_v37, %v690_v45  ;;  %v923_v36 = vpop.f32.mrb[48].mxu1  ;;  %v1847_v55 = vpop.f32.mrb[49].mxu0 }
 0x150   : > { %v962_v38 = vadd.f32 %v923_v36, %v843_v58  ;;  %v1853_v56 = vpop.f32.mrb[49].mxu1  ;;  %v839_v25 = vpop.f32.mrb[50].mxu0 }
 0x151   : > { %v852_v52 = vadd.f32 %v839_v25, %v691_v50  ;;  %v926_v40 = vpop.f32.mrb[50].mxu1  ;;  %v1848_v7 = vpop.f32.mrb[51].mxu0 }
 0x152   : > { %v963_v57 = vadd.f32 %v926_v40, %v844_v18  ;;  %v1854_v59 = vpop.f32.mrb[51].mxu1 }
 0x156   : > { %v1045_v48 = vpop.f32.mrb[52].mxu0 }
 0x157   : > { %v931_v62 = vpop.f32.mrb[52].mxu1  ;;  %v1084_v1 = vadd.f32 %v1045_v48, %v962_v38  ;;  %v1875_v63 = vpop.f32.mrb[53].mxu0 }
 0x158   : > { %v964_v2 = vadd.f32 %v931_v62, %v845_v14  ;;  %v1857_v6 = vpop.f32.mrb[53].mxu1  ;;  %v1048_v54 = vpop.f32.mrb[54].mxu0 }
 0x159   : > { %v934_v60 = vpop.f32.mrb[54].mxu1  ;;  %v1085_v39 = vadd.f32 %v1048_v54, %v963_v57  ;;  %v1876_v23 = vpop.f32.mrb[55].mxu0  ;;  %v1402_v6 = vunpack.c.l.bf16 %v2041_v4 }
 0x15a   : > { %v965_v15 = vadd.f32 %v934_v60, %v846_v10  ;;  %v1858_v9 = vpop.f32.mrb[55].mxu1  ;;  %v2442_v60 = vld [vmem:[%s2509_s2] ss:$0 sm:$0xff] }
 0x15b   : > { %v1425_v9 = vrot.slane %v1402_v6, 3 }
 0x15e   : > { %v1053_v58 = vpop.f32.mrb[56].mxu0 }
 0x15f   : > { %v939_v19 = vpop.f32.mrb[56].mxu1  ;;  %v1086_v61 = vadd.f32 %v1053_v58, %v964_v2  ;;  %v1879_v8 = vpop.f32.mrb[57].mxu0  ;;  %v1401_v2 = vunpack.c.l.bf16 %v2038_v3 }
 0x160   : > { %v966_v26 = vadd.f32 %v939_v19, %v847_v34  ;;  %v1861_v32 = vpop.f32.mrb[57].mxu1  ;;  %v1056_v18 = vpop.f32.mrb[58].mxu0 }
 0x161   : > { %v942_v21 = vpop.f32.mrb[58].mxu1  ;;  %v1087_v0 = vadd.f32 %v1056_v18, %v965_v15  ;;  %v1880_v30 = vpop.f32.mrb[59].mxu0  ;;  %v1424_v15 = vrot.slane %v1401_v2, 3 }
 0x162   : > { %v967_v20 = vadd.f32 %v942_v21, %v848_v33  ;;  %v1862_v28 = vpop.f32.mrb[59].mxu1  ;;  %v1404_v30 = vunpack.c.l.bf16 %v2070_v13 }
 0x163   : > { %v1426_v28 = vsel %vm1238_vm6, %v1424_v15, %v1425_v9 }
 0x166   : > { %v1061_v14 = vpop.f32.mrb[60].mxu0 }
 0x167   : > { %v947_v16 = vpop.f32.mrb[60].mxu1  ;;  %v2424_v29 = vadd.f32 %v1061_v14, %v966_v26  ;;  %v1883_v35 = vpop.f32.mrb[61].mxu0 }
 0x168   : > { %v968_v11 = vadd.f32 %v947_v16, %v849_v43  ;;  %v1865_v10 = vpop.f32.mrb[61].mxu1  ;;  %v1064_v12 = vpop.f32.mrb[62].mxu0 }
 0x169   : > { %v950_v41 = vpop.f32.mrb[62].mxu1  ;;  %v2426_v24 = vadd.f32 %v1064_v12, %v967_v20  ;;  %v1884_v42 = vpop.f32.mrb[63].mxu0 }
 0x16a   : > { %v969_v34 = vadd.f32 %v950_v41, %v850_v31  ;;  %v1866_v44 = vpop.f32.mrb[63].mxu1 }
 0x16e   : > { %v1069_v45 = vpop.f32.mrb[64].mxu0 }
 0x16f   : > { %v955_v46 = vpop.f32.mrb[64].mxu1  ;;  %v2428_v27 = vadd.f32 %v1069_v45, %v968_v11  ;;  %v1887_v33 = vpop.f32.mrb[65].mxu0 }
 0x170   : > { %v970_v47 = vadd.f32 %v955_v46, %v851_v53  ;;  %v1869_v49 = vpop.f32.mrb[65].mxu1  ;;  %v1072_v50 = vpop.f32.mrb[66].mxu0 }
 0x171   : > { %v958_v51 = vpop.f32.mrb[66].mxu1  ;;  %v2430_v37 = vadd.f32 %v1072_v50, %v969_v34  ;;  %v1888_v43 = vpop.f32.mrb[67].mxu0 }
 0x172   : > { %v971_v36 = vadd.f32 %v958_v51, %v852_v52  ;;  %v1870_v55 = vpop.f32.mrb[67].mxu1  ;;  %v1403_v52 = vunpack.c.l.bf16 %v2044_v5 }
 0x174   : > { %v1427_v5 = vrot.slane %v1403_v52, 3 }
 0x176   : > { %v1077_v38 = vpop.f32.mrb[68].mxu0  ;;  %v1428_v11 = vsel %vm1238_vm6, %v1425_v9, %v1427_v5 }
 0x177   : > { %v2432_v56 = vadd.f32 %v1077_v38, %v970_v47  ;;  %v1186_v25 = vpop.f32.mrb[68].mxu1  ;;  %v1891_v31 = vpop.f32.mrb[69].mxu0 }
 0x178   : > { %v1225_v40 = vadd.f32 %v1186_v25, %v1084_v1  ;;  %v1897_v7 = vpop.f32.mrb[69].mxu1  ;;  %v1080_v57 = vpop.f32.mrb[70].mxu0 }
 0x179   : > { %v2434_v59 = vadd.f32 %v1080_v57, %v971_v36  ;;  %v1189_v48 = vpop.f32.mrb[70].mxu1  ;;  %v1892_v53 = vpop.f32.mrb[71].mxu0 }
 0x17a   : > { %v1226_v62 = vadd.f32 %v1189_v48, %v1085_v39  ;;  %v1898_v63 = vpop.f32.mrb[71].mxu1 }
 0x17e   : > { %v1305_v54 = vpop.f32.mrb[72].mxu0 }
 0x17f   : > { %v1194_v1 = vpop.f32.mrb[72].mxu1  ;;  %v1344_v23 = vadd.f32 %v1305_v54, %v1225_v40  ;;  %v1919_v58 = vpop.f32.mrb[73].mxu0  ;;  %v1974_v40 = vld [vmem:[%s2034_s19 + $0x18] sm:$0xf] }
 0x180   : > { %v1227_v39 = vadd.f32 %v1194_v1, %v1086_v61  ;;  %v1901_v19 = vpop.f32.mrb[73].mxu1  ;;  %v1308_v8 = vpop.f32.mrb[74].mxu0  ;;  %v1405_v61 = vunpack.c.l.bf16 %v2079_v17  ;;  %v1406_v7 = vunpack.c.l.bf16 %v1974_v40 }
 0x181   : > { %v1361_v3 = vadd.f32 %v2442_v60, %v1344_v23  ;;  %v1197_v4 = vpop.f32.mrb[74].mxu1  ;;  %v1345_v26 = vadd.f32 %v1308_v8, %v1226_v62  ;;  %v1920_v32 = vpop.f32.mrb[75].mxu0  ;;  %v1975_v62 = vld [vmem:[%s2034_s19 + $0x1c] sm:$0xf] }
 0x182   : > { %v1228_v18 = vadd.f32 %v1197_v4, %v1087_v0  ;;  %v1902_v21 = vpop.f32.mrb[75].mxu1  ;;  %v1429_v0 = vrot.slane %v1404_v30, 3  ;;  %v1431_v47 = vrot.slane %v1405_v61, 3  ;;  %v1407_v63 = vunpack.c.l.bf16 %v1975_v62  ;;  %v1976_v30 = vld [vmem:[%s2034_s19 + $0x20] sm:$0xf] }
 0x183   : > { %vm1371_vm8 = vcmp.gt.f32.partialorder %v1361_v3, 0.0  ;;  %v1381_v20 = vmul.f32 0.01, %v1361_v3  ;;  %v1362_v14 = vadd.f32 %v2442_v60, %v1345_v26  ;;  %v1433_v1 = vrot.slane %v1406_v7, 3  ;;  %v1977_v61 = vld [vmem:[%s2034_s19 + $0x24] sm:$0xf] }
 0x184   : > { %v1430_v55 = vsel %vm1238_vm6, %v1427_v5, %v1429_v0  ;;  %v1432_v57 = vsel %vm1238_vm6, %v1429_v0, %v1431_v47  ;;  %v1435_v26 = vrot.slane %v1407_v63, 3 }
 0x185   : > { %v1391_v16 = vsel %vm1371_vm8, %v1361_v3, %v1381_v20  ;;  %vm1372_vm9 = vcmp.gt.f32.partialorder %v1362_v14, 0.0  ;;  %v1382_v35 = vmul.f32 0.01, %v1362_v14  ;;  %v1408_v20 = vunpack.c.l.bf16 %v1976_v30 }
 0x186   : > { %v1455_v10 = vadd.f32 %v1426_v28, %v1391_v16  ;;  %v1313_v12 = vpop.f32.mrb[76].mxu0  ;;  %v1434_v28 = vsel %vm1238_vm6, %v1431_v47, %v1433_v1  ;;  %v1409_v16 = vunpack.c.l.bf16 %v1977_v61 }
 0x187   : > { %v1392_v13 = vsel %vm1372_vm9, %v1362_v14, %v1382_v35  ;;  %v1202_v41 = vpop.f32.mrb[76].mxu1  ;;  %v1346_v42 = vadd.f32 %v1313_v12, %v1227_v39  ;;  %v1923_v34 = vpop.f32.mrb[77].mxu0  ;;  %v1437_v0 = vrot.slane %v1408_v20, 3 }
 0x188   : > { %v1675_v17 = vpack.c.bf16 %v1455_v10, %v1455_v10  ;;  %v1456_v44 = vadd.f32 %v1428_v11, %v1392_v13  ;;  %v1229_v45 = vadd.f32 %v1202_v41, %v2424_v29  ;;  %v1905_v46 = vpop.f32.mrb[77].mxu1  ;;  %v1316_v33 = vpop.f32.mrb[78].mxu0  ;;  %v1436_v10 = vsel %vm1238_vm6, %v1433_v1, %v1435_v26 }
 0x189   : > { %v1363_v49 = vadd.f32 %v2442_v60, %v1346_v42  ;;  %v1205_v50 = vpop.f32.mrb[78].mxu1  ;;  %v1347_v51 = vadd.f32 %v1316_v33, %v1228_v18  ;;  %v1924_v43 = vpop.f32.mrb[79].mxu0  ;;  %v1439_v47 = vrot.slane %v1409_v16, 3 }
 0x18a   : > { %1506 = vst.msk [vmem:[%s2454_s13] sm:$0xf] %vm1505_vm10, %v1675_v17  ;;  %v1676_v36 = vpack.c.bf16 %v1456_v44, %v1456_v44  ;;  %v1230_v38 = vadd.f32 %v1205_v50, %v2426_v24  ;;  %v1906_v25 = vpop.f32.mrb[79].mxu1 }
 0x18b   : > { %vm1373_vm11 = vcmp.gt.f32.partialorder %v1363_v49, 0.0  ;;  %v1383_v29 = vmul.f32 0.01, %v1363_v49  ;;  %v1364_v31 = vadd.f32 %v2442_v60, %v1347_v51  ;;  %v1440_v7 = vsel %vm1238_vm6, %v1437_v0, %v1439_v47 }
 0x18c   : > { %1507 = vst.msk [vmem:[%s2454_s13 + $0x4] sm:$0xf] %vm1505_vm10, %v1676_v36 }
 0x18d   : > { %v1393_v48 = vsel %vm1373_vm11, %v1363_v49, %v1383_v29  ;;  %vm1374_vm12 = vcmp.gt.f32.partialorder %v1364_v31, 0.0  ;;  %v1384_v53 = vmul.f32 0.01, %v1364_v31 }
 0x18e   : > { %v1457_v2 = vadd.f32 %v1430_v55, %v1393_v48  ;;  %v1321_v6 = vpop.f32.mrb[80].mxu0  ;;  %v1438_v55 = vsel %vm1238_vm6, %v1435_v26, %v1437_v0 }
 0x18f   : > { %v1394_v24 = vsel %vm1374_vm12, %v1364_v31, %v1384_v53  ;;  %v1210_v52 = vpop.f32.mrb[80].mxu1  ;;  %v1348_v54 = vadd.f32 %v1321_v6, %v1229_v45  ;;  %v1927_v23 = vpop.f32.mrb[81].mxu0  ;;  %v1978_v31 = vld [vmem:[%s2034_s19 + $0x28] sm:$0xf]  ;;  %v1411_v53 = vunpack.c.l.bf16 %v2305_v22 }
 0x190   : > { %v1677_v15 = vpack.c.bf16 %v1457_v2, %v1457_v2  ;;  %v1458_v9 = vadd.f32 %v1432_v57, %v1394_v24  ;;  %v1231_v58 = vadd.f32 %v1210_v52, %v2428_v27  ;;  %v1909_v39 = vpop.f32.mrb[81].mxu1  ;;  %v1324_v19 = vpop.f32.mrb[82].mxu0  ;;  %v1410_v40 = vunpack.c.l.bf16 %v1978_v31 }
 0x191   : > { %v1365_v8 = vadd.f32 %v2442_v60, %v1348_v54  ;;  %v1213_v3 = vpop.f32.mrb[82].mxu1  ;;  %v1349_v4 = vadd.f32 %v1324_v19, %v1230_v38  ;;  %v1928_v5 = vpop.f32.mrb[83].mxu0 }
 0x192   : > { %1508 = vst.msk [vmem:[%s2454_s13 + $0x8] sm:$0xf] %vm1505_vm10, %v1677_v15  ;;  %v1678_v32 = vpack.c.bf16 %v1458_v9, %v1458_v9  ;;  %v1232_v18 = vadd.f32 %v1213_v3, %v2430_v37  ;;  %v1910_v21 = vpop.f32.mrb[83].mxu1  ;;  %v1441_v6 = vrot.slane %v1410_v40, 3  ;;  %v1443_v9 = vrot.slane %v1411_v53, 3 }
 0x193   : > { %vm1375_vm13 = vcmp.gt.f32.partialorder %v1365_v8, 0.0  ;;  %v1385_v27 = vmul.f32 0.01, %v1365_v8  ;;  %v1366_v14 = vadd.f32 %v2442_v60, %v1349_v4 }
 0x194   : > { %1509 = vst.msk [vmem:[%s2454_s13 + $0xc] sm:$0xf] %vm1505_vm10, %v1678_v32  ;;  %v1442_v19 = vsel %vm1238_vm6, %v1439_v47, %v1441_v6  ;;  %v1444_v26 = vsel %vm1238_vm6, %v1441_v6, %v1443_v9 }
 0x195   : > { %v1395_v35 = vsel %vm1375_vm13, %v1365_v8, %v1385_v27  ;;  %vm1376_vm14 = vcmp.gt.f32.partialorder %v1366_v14, 0.0  ;;  %v1386_v11 = vmul.f32 0.01, %v1366_v14 }
 0x196   : > { %v1459_v12 = vadd.f32 %v1434_v28, %v1395_v35  ;;  %v1329_v37 = vpop.f32.mrb[84].mxu0 }
 0x197   : > { %v1396_v13 = vsel %vm1376_vm14, %v1366_v14, %v1386_v11  ;;  %v1218_v41 = vpop.f32.mrb[84].mxu1  ;;  %v1350_v42 = vadd.f32 %v1329_v37, %v1231_v58  ;;  %v1931_v34 = vpop.f32.mrb[85].mxu0 }
 0x198   : > { %v1679_v17 = vpack.c.bf16 %v1459_v12, %v1459_v12  ;;  %v1460_v44 = vadd.f32 %v1436_v10, %v1396_v13  ;;  %v1233_v45 = vadd.f32 %v1218_v41, %v2432_v56  ;;  %v1913_v46 = vpop.f32.mrb[85].mxu1  ;;  %v1332_v33 = vpop.f32.mrb[86].mxu0 }
 0x199   : > { %v1367_v49 = vadd.f32 %v2442_v60, %v1350_v42  ;;  %v1221_v50 = vpop.f32.mrb[86].mxu1  ;;  %v1351_v51 = vadd.f32 %v1332_v33, %v1232_v18  ;;  %v1932_v43 = vpop.f32.mrb[87].mxu0 }
 0x19a   : > { %1510 = vst.msk [vmem:[%s2454_s13 + $0x10] sm:$0xf] %vm1505_vm10, %v1679_v17  ;;  %v1680_v36 = vpack.c.bf16 %v1460_v44, %v1460_v44  ;;  %v1234_v38 = vadd.f32 %v1221_v50, %v2434_v59  ;;  %v1914_v25 = vpop.f32.mrb[87].mxu1 }
 0x19b   : > { %vm1377_vm15 = vcmp.gt.f32.partialorder %v1367_v49, 0.0  ;;  %v1387_v56 = vmul.f32 0.01, %v1367_v49  ;;  %v1368_v29 = vadd.f32 %v2442_v60, %v1351_v51 }
 0x19c   : > { %1511 = vst.msk [vmem:[%s2454_s13 + $0x14] sm:$0xf] %vm1505_vm10, %v1680_v36 }
 0x19d   : > { %v1397_v57 = vsel %vm1377_vm15, %v1367_v49, %v1387_v56  ;;  %vm1378_vm0 = vcmp.gt.f32.partialorder %v1368_v29, 0.0  ;;  %v1388_v48 = vmul.f32 0.01, %v1368_v29 }
 0x19e   : > { %v1461_v62 = vadd.f32 %v1438_v55, %v1397_v57  ;;  %v1337_v63 = vpop.f32.mrb[88].mxu0 }
 0x19f   : > { %v1398_v59 = vsel %vm1378_vm0, %v1368_v29, %v1388_v48  ;;  %v1352_v2 = vadd.f32 %v1337_v63, %v1233_v45  ;;  %v1935_v24 = vpop.f32.mrb[89].mxu0 }
 0x1a0   : > { %v1681_v52 = vpack.c.bf16 %v1461_v62, %v1461_v62  ;;  %v1462_v54 = vadd.f32 %v1440_v7, %v1398_v59  ;;  %v1340_v1 = vpop.f32.mrb[90].mxu0 }
 0x1a1   : > { %v1369_v23 = vadd.f32 %v2442_v60, %v1352_v2  ;;  %v1353_v15 = vadd.f32 %v1340_v1, %v1234_v38  ;;  %v1936_v58 = vpop.f32.mrb[91].mxu0 }
 0x1a2   : > { %1512 = vst.msk [vmem:[%s2454_s13 + $0x18] sm:$0xf] %vm1505_vm10, %v1681_v52  ;;  %v1682_v39 = vpack.c.bf16 %v1462_v54, %v1462_v54 }
 0x1a3   : > { %vm1379_vm1 = vcmp.gt.f32.partialorder %v1369_v23, 0.0  ;;  %v1389_v22 = vmul.f32 0.01, %v1369_v23  ;;  %v1370_v8 = vadd.f32 %v2442_v60, %v1353_v15 }
 0x1a4   : > { %1513 = vst.msk [vmem:[%s2454_s13 + $0x1c] sm:$0xf] %vm1505_vm10, %v1682_v39 }
 0x1a5   : > { %v1399_v3 = vsel %vm1379_vm1, %v1369_v23, %v1389_v22  ;;  %vm1380_vm2 = vcmp.gt.f32.partialorder %v1370_v8, 0.0  ;;  %v1390_v4 = vmul.f32 0.01, %v1370_v8 }
 0x1a6   : > { %v1463_v5 = vadd.f32 %v1442_v19, %v1399_v3 }
 0x1a7   : > { %v1400_v32 = vsel %vm1380_vm2, %v1370_v8, %v1390_v4 }
 0x1a8   : > { %v1683_v18 = vpack.c.bf16 %v1463_v5, %v1463_v5  ;;  %v1464_v21 = vadd.f32 %v1444_v26, %v1400_v32 }
 0x1aa   : > { %1514 = vst.msk [vmem:[%s2454_s13 + $0x20] sm:$0xf] %vm1505_vm10, %v1683_v18  ;;  %v1684_v30 = vpack.c.bf16 %v1464_v21, %v1464_v21 }
 0x1ac   : > { %1515 = vst.msk [vmem:[%s2454_s13 + $0x24] sm:$0xf] %vm1505_vm10, %v1684_v30 }
 0x1ad PF: > { %s13_s12 = sadd.s32 1, %s1985_s12  }
 0x1ae   : > { %p10_p4 = scmp.ge.s32.totalorder %s13_s12, 4  }
 0x1b0   :  { %12 = sbr.rel (!%p10_p4) target bundleno = 1 (0x1), region = 70 }

// kernel: encoder_forward.10
= control target key start
LH: loop header
LB: loop body
LE: loop exit
PB: predicated region body
PF: predicated region fallthrough
CT: control target
= control target key end

     0   :  { %s861_s12 = smov 0   ;;  %s942_s0 = inlined_call_operand.vmem [shape: bf16[2,32,64], index: 0, kind: input, shape index: {}]   ;;  %s943_s1 = inlined_call_operand.vmem [shape: bf16[4,64,32], index: 1, kind: input, shape index: {}]   ;;  %s944_s2 = inlined_call_operand.vmem [shape: f32[1,32], index: 2, kind: input, shape index: {}]   ;;  %s945_s3 = inlined_call_operand.vmem [shape: bf16[2,20,32], index: 3, kind: output, shape index: {}]  }
   0x1 LB: > { %s664_s13 = sadd.s32 4294967295, %s839_s12   ;;  %p668_p0 = scmp.ge.s32.totalorder %s839_s12, 1  ;;  %s839_s12 = sphi %s861_s12, %s13_s12  }
   0x2   : > { %p137_p1 = scmp.lt.s32.totalorder %s839_s12, 3 }
   0x4   : > { %p138_p2 = pnand %p668_p0, %p137_p1 }
   0x5   : > { %v814_v0 = vld [vmem:[%s943_s1 + $0x20] sm:$0xff] (!%p138_p2)   ;;  %p161_p3 = scmp.lt.s32.totalorder (!%p138_p2), %s664_s13, 1  ;;  %v816_v2 = vld [vmem:[%s943_s1 + $0x28] sm:$0xff] (!%p138_p2)   ;;  %v818_v4 = vld [vmem:[%s943_s1 + $0x30] sm:$0xff] (!%p138_p2)   ;;  %vm241_vm0 = vcmask (!%p138_p2), 523264   ;;  %vm487_vm2 = vcmask (!%p138_p2), 1044480  }
   0x6   : > { %141 = sbr.rel (%p138_p2) target bundleno = 268 (0x10c), region = 32  ;;  %v815_v1 = vld [vmem:[%s943_s1] sm:$0xff] (!%p138_p2)   ;;  %757 = vmatprep.subr.bf16.mxu0 (!%p138_p2), %v814_v0  ;;  %v817_v3 = vld [vmem:[%s943_s1 + $0x8] sm:$0xff] (!%p138_p2)   ;;  %v819_v5 = vld [vmem:[%s943_s1 + $0x10] sm:$0xff] (!%p138_p2)   ;;  %vm201_vm1 = vsmask.f32 (!%p138_p2), 7424 }
   0x7   : > { %769 = vmatprep.subr.bf16.mxu1 (!%p138_p2), %v815_v1  ;;  %758 = vmatpush3.bf16.msra.mxu0 (!%p138_p2), %v814_v0  ;;  %v820_v6 = vld [vmem:[%s943_s1 + $0x38] sm:$0xff] (!%p138_p2)   ;;  %v825_v17 = vld [vmem:[%s943_s1 + $0x40] sm:$0xff] (!%p138_p2)   ;;  %v827_v26 = vld [vmem:[%s943_s1 + $0x48] sm:$0xff] (!%p138_p2)   ;;  %vm384_vm3 = vsmask.f32 (!%p138_p2), 5376  ;;  %vm607_vm6 = vcmask (!%p138_p2), 254976  }
   0x8   : > { %770 = vmatpush3.bf16.msra.mxu1 (!%p138_p2), %v815_v1  ;;  %759 = vmatprep.subr.bf16.mxu0 (!%p138_p2), %v816_v2  ;;  %v821_v8 = vld [vmem:[%s943_s1 + $0x18] sm:$0xff] (!%p138_p2)   ;;  %v826_v21 = vld [vmem:[%s943_s1 + $0x60] sm:$0xff] (!%p138_p2)   ;;  %v828_v30 = vld [vmem:[%s943_s1 + $0x68] sm:$0xff] (!%p138_p2)   ;;  %vm604_vm7 = vcmask (!%p138_p2), 257024  }
   0x9   : > { %771 = vmatprep.subr.bf16.mxu1 (!%p138_p2), %v817_v3  ;;  %v829_v36 = vld [vmem:[%s943_s1 + $0x50] sm:$0xff] (!%p138_p2)   ;;  %v831_v40 = vld [vmem:[%s943_s1 + $0x58] sm:$0xff] (!%p138_p2)   ;;  %v723_v58 = vld [vmem:[%s944_s2] ss:$0 sm:$0xff] (!%p138_p2) }
   0xa   : > { %v830_v37 = vld [vmem:[%s943_s1 + $0x70] sm:$0xff] (!%p138_p2)   ;;  %v832_v41 = vld [vmem:[%s943_s1 + $0x78] sm:$0xff] (!%p138_p2)  }
   0xb   : > { %760 = vmatpush3.bf16.msra.mxu0 (!%p138_p2), %v816_v2 }
   0xc   : > { %772 = vmatpush3.bf16.msra.mxu1 (!%p138_p2), %v817_v3  ;;  %761 = vmatprep.subr.bf16.mxu0 (!%p138_p2), %v818_v4 }
   0xd   : > { %s947_s13 = smov (!%p161_p3, %s664_s13), 1  ;;  %773 = vmatprep.subr.bf16.mxu1 %v819_v5 }
   0xe   : > { %s729_s24 = sshll.u32 %s947_s13, 4  ;;  %s805_s27 = smul.u32 12, %s947_s13 }
   0xf   : > { %s165_s29 = scalar_lea.vmem %s942_s0, %s729_s24  ;;  %762 = vmatpush3.bf16.msra.mxu0 %v818_v4 }
  0x10   : > { %v174_v7 = vld [vmem:[%s165_s29 + $0x8] sm:$0xf]  ;;  %v175_v9 = vld [vmem:[%s165_s29 + $0xc] sm:$0xf]  ;;  %v822_v10 = vld [vmem:[%s165_s29] sm:$0xff]   ;;  %774 = vmatpush3.bf16.msra.mxu1 %v819_v5  ;;  %763 = vmatprep.subr.bf16.mxu0 %v820_v6  ;;  %s170_s30 = scalar_lea.vmem %s945_s3, %s805_s27 }
  0x11   : > { %v681_v11 = vcombine.low %v174_v7, %v174_v7  ;;  %v702_v12 = vcombine.low %v174_v7, %v175_v9  ;;  %v203_v13 = vshrl.u32 %v822_v10, 16  ;;  %v205_v14 = vshll.u32 %v822_v10, 16  ;;  %777 = vmatprep.mubr.msk.bf16.mxu1 %vm241_vm0, %v822_v10  ;;  %775 = vmatprep.subr.bf16.mxu1 %v821_v8 }
  0x12   : > { %v488_v31 = vrot.slane %v822_v10, 3 }
  0x13   : > { %v210_v15 = vshll.u32 %v681_v11, 16  ;;  %v214_v16 = vshrl.u32 %v681_v11, 16  ;;  %v389_v18 = vshrl.u32 %v702_v12, 16  ;;  %v207_v19 = vrot.slane %v205_v14, 1  ;;  %764 = vmatpush3.bf16.msra.mxu0 %v820_v6 }
  0x14   : > { %v385_v22 = vrot.slane %v203_v13, 2  ;;  %v386_v23 = vrot.slane %v205_v14, 3  ;;  %776 = vmatpush3.bf16.msra.mxu1 %v821_v8  ;;  %781 = vmatprep.subr.bf16.mxu0 %v825_v17  ;;  %v392_v28 = vshll.u32 %v702_v12, 16  ;;  %v489_v34 = vrot.slane %v702_v12, 3 }
  0x15   : > { %v212_v20 = vrot.slane %v210_v15, 1  ;;  %v208_v24 = vor.u32 %v207_v19, %v203_v13  ;;  %v391_v27 = vrot.slane %v389_v18, 2  ;;  %793 = vmatprep.subr.bf16.mxu1 %v826_v21 }
  0x16   : > { %v387_v32 = vor.u32 %v386_v23, %v385_v22  ;;  %v394_v33 = vrot.slane %v392_v28, 3  ;;  %v490_v38 = vsel %vm487_vm2, %v488_v31, %v489_v34 }
  0x17   : > { %v216_v25 = vor.u32 %v214_v16, %v212_v20  ;;  %v213_v29 = vsel %vm201_vm1, %v208_v24, %v212_v20  ;;  %778 = vmatmul.mubr.msk.bf16.vlgmr.msra.gmra.mrb[0].mxu1 %vm241_vm0, %v681_v11 }
  0x18   : > { %765 = vmatprep.mubr.msk.bf16.mxu0 %vm241_vm0, %v213_v29  ;;  %794 = vmatpush3.bf16.msra.mxu1 %v826_v21  ;;  %v395_v35 = vor.u32 %v394_v33, %v391_v27 }
  0x19   : > { %766 = vmatmul.mubr.msk.bf16.vlgmr.msra.gmra.mrb[0].mxu0 %vm241_vm0, %v216_v25  ;;  %795 = vmatprep.subr.bf16.mxu1 %v828_v30 }
  0x1a   : > { %782 = vmatpush3.bf16.msra.mxu0 %v825_v17  ;;  %v396_v39 = vsel %vm384_vm3, %v387_v32, %v395_v35  ;;  %801 = vmatprep.mubr.msk.bf16.mxu1 %vm241_vm0, %v490_v38 }
  0x1b   : > { %783 = vmatprep.subr.bf16.mxu0 %v827_v26  ;;  %789 = vmatprep.mubr.msk.bf16.mxu0 %vm241_vm0, %v396_v39 }
  0x1c   : > { %796 = vmatpush3.bf16.msra.mxu1 %v828_v30 }
  0x1d   : > { %797 = vmatprep.subr.bf16.mxu1 %v830_v37 }
  0x1e   : > { %784 = vmatpush3.bf16.msra.mxu0 %v827_v26 }
  0x1f   : > { %785 = vmatprep.subr.bf16.mxu0 %v829_v36 }
  0x20   : > { %798 = vmatpush3.bf16.msra.mxu1 %v830_v37 }
  0x21   : > { %799 = vmatprep.subr.bf16.mxu1 %v832_v41 }
  0x22   : > { %786 = vmatpush3.bf16.msra.mxu0 %v829_v36 }
  0x23   : > { %787 = vmatprep.subr.bf16.mxu0 %v831_v40 }
  0x24   : > { %800 = vmatpush3.bf16.msra.mxu1 %v832_v41 }
  0x26   : > { %788 = vmatpush3.bf16.msra.mxu0 %v831_v40 }
  0x27   : > { %802 = vmatmul.mubr.msk.bf16.vlgmr.msra.gmra.mrb[4].mxu1 %vm241_vm0, %v489_v34 }
  0x29   : > { %790 = vmatmul.mubr.msk.bf16.vlgmr.msra.gmra.mrb[4].mxu0 %vm241_vm0, %v395_v35 }
  0xea   : > { %v779_v43 = vpop.f32.mrb[0].mxu1 }
  0xeb   : > { %v358_v46 = vpop.f32.mrb[1].mxu1 }
  0xec   : > { %v767_v42 = vpop.f32.mrb[0].mxu0  ;;  %v780_v49 = vpop.f32.mrb[2].mxu1 }
  0xed   : > { %v367_v44 = vadd.f32 %v779_v43, %v767_v42  ;;  %v282_v45 = vpop.f32.mrb[1].mxu0  ;;  %v361_v51 = vpop.f32.mrb[3].mxu1 }
  0xee   : > { %v359_v47 = vadd.f32 %v358_v46, %v282_v45  ;;  %v768_v48 = vpop.f32.mrb[2].mxu0 }
  0xef   : > { %v285_v50 = vpop.f32.mrb[3].mxu0 }
  0xf0   : > { %v362_v52 = vadd.f32 %v361_v51, %v285_v50 }
  0xfa   : > { %v803_v54 = vpop.f32.mrb[4].mxu1 }
  0xfb   : > { %v555_v57 = vpop.f32.mrb[5].mxu1 }
  0xfc   : > { %v791_v53 = vpop.f32.mrb[4].mxu0  ;;  %v804_v61 = vpop.f32.mrb[6].mxu1 }
  0xfd   : > { %v477_v55 = vadd.f32 %v791_v53, %v367_v44  ;;  %v461_v56 = vpop.f32.mrb[5].mxu0  ;;  %v558_v0 = vpop.f32.mrb[7].mxu1 }
  0xfe   : > { %v475_v59 = vadd.f32 %v461_v56, %v359_v47  ;;  %v792_v60 = vpop.f32.mrb[6].mxu0 }
  0xff   : > { %v571_v62 = vadd.f32 %v803_v54, %v477_v55  ;;  %v464_v63 = vpop.f32.mrb[7].mxu0 }
 0x100   : > { %v569_v1 = vadd.f32 %v555_v57, %v475_v59  ;;  %v476_v2 = vadd.f32 %v464_v63, %v362_v52 }
 0x101   : > { %v581_v3 = vadd.f32 %v723_v58, %v571_v62 }
 0x102   : > { %v579_v4 = vadd.f32 %v723_v58, %v569_v1  ;;  %v570_v5 = vadd.f32 %v558_v0, %v476_v2 }
 0x103   : > { %vm584_vm4 = vcmp.gt.f32.partialorder %v581_v3, 0.0  ;;  %v587_v6 = vmul.f32 0.01, %v581_v3 }
 0x104   : > { %vm582_vm5 = vcmp.gt.f32.partialorder %v579_v4, 0.0  ;;  %v585_v7 = vmul.f32 0.01, %v579_v4  ;;  %v580_v8 = vadd.f32 %v723_v58, %v570_v5 }
 0x105   : > { %v590_v9 = vsel %vm584_vm4, %v581_v3, %v587_v6 }
 0x106   : > { %v732_v10 = vpack.c.bf16 %v590_v9, %v590_v9  ;;  %v588_v11 = vsel %vm582_vm5, %v579_v4, %v585_v7  ;;  %vm583_vm8 = vcmp.gt.f32.partialorder %v580_v8, 0.0  ;;  %v586_v12 = vmul.f32 0.01, %v580_v8 }
 0x107   : > { %v730_v13 = vpack.c.bf16 %v588_v11, %v588_v11 }
 0x108   : > { %608 = vst.msk [vmem:[%s170_s30 + $0x8] sm:$0x3] %vm607_vm6, %v732_v10  ;;  %v589_v14 = vsel %vm583_vm8, %v580_v8, %v586_v12 }
 0x109   : > { %605 = vst.msk [vmem:[%s170_s30] sm:$0xf] %vm604_vm7, %v730_v13  ;;  %v731_v15 = vpack.c.bf16 %v589_v14, %v589_v14 }
 0x10b   : > { %606 = vst.msk [vmem:[%s170_s30 + $0x4] sm:$0xf] %vm604_vm7, %v731_v15 }
 0x10c PF: > { %s13_s12 = sadd.s32 1, %s839_s12  }
 0x10d   : > { %p10_p4 = scmp.ge.s32.totalorder %s13_s12, 4  }
 0x10f   :  { %12 = sbr.rel (!%p10_p4) target bundleno = 1 (0x1), region = 65 }

// kernel: encoder_forward.11
= control target key start
LH: loop header
LB: loop body
LE: loop exit
PB: predicated region body
PF: predicated region fallthrough
CT: control target
= control target key end

     0   :  { %v548_v22 = vmov 1966171168   ;;  %v102_v24 = vlaneseq  ;;  %vm22_vm0 = vcmask 123904   ;;  %v549_v44 = vmov 0.0   ;;  %s688_s1 = inlined_call_operand.vmem [shape: bf16[512,16], index: 1, kind: input, shape index: {}]   ;;  %s689_s0 = inlined_call_operand.vmem [shape: bf16[2,512], index: 0, kind: input, shape index: {}]   ;;  %s690_s2 = inlined_call_operand.vmem [shape: f32[1,16], index: 2, kind: input, shape index: {}]   ;;  %s691_s3 = inlined_call_operand.vmem [shape: f32[1,16], index: 3, kind: input, shape index: {}]   ;;  %s692_s4 = inlined_call_operand.vmem [shape: f32[2,16], index: 4, kind: output, shape index: {}]  }
   0x1   :  { %v514_v0 = vld [vmem:[%s688_s1 + $0x40] sm:$0xff]   ;;  %v518_v4 = vld [vmem:[%s688_s1 + $0x48] sm:$0xff]   ;;  %v522_v8 = vld [vmem:[%s688_s1 + $0x50] sm:$0xff]   ;;  %v100_v23 = vunpack.c.l.s4 %v548_v22  ;;  %23 = vst.msk [vmem:[#allocation2] sm:$0x3] %vm22_vm0, %v549_v44 }
   0x2   :  { %v515_v1 = vld [vmem:[%s688_s1 + $0xc0] sm:$0xff]   ;;  %468 = vmatprep.subr.bf16.mxu0 %v514_v0  ;;  %v519_v5 = vld [vmem:[%s688_s1 + $0xc8] sm:$0xff]   ;;  %v523_v9 = vld [vmem:[%s688_s1 + $0xd0] sm:$0xff]   ;;  %v103_v30 = vshrl.u32 %v102_v24, 7 }
   0x3   :  { %v516_v2 = vld [vmem:[%s688_s1] sm:$0xff]   ;;  %490 = vmatprep.subr.bf16.mxu1 %v515_v1  ;;  %v520_v6 = vld [vmem:[%s688_s1 + $0x8] sm:$0xff]   ;;  %v524_v10 = vld [vmem:[%s688_s1 + $0x10] sm:$0xff]   ;;  %v101_v29 = vunpack.c.0.s8 %v100_v23 }
   0x4   :  { %v517_v3 = vld [vmem:[%s688_s1 + $0x80] sm:$0xff]   ;;  %469 = vmatpush3.bf16.msra.mxu0 %v516_v2  ;;  %v521_v7 = vld [vmem:[%s688_s1 + $0x88] sm:$0xff]   ;;  %v525_v11 = vld [vmem:[%s688_s1 + $0x90] sm:$0xff]  }
   0x5   :  { %491 = vmatpush3.bf16.msra.mxu1 %v517_v3  ;;  %470 = vmatprep.subr.bf16.mxu0 %v518_v4  ;;  %v526_v12 = vld [vmem:[%s688_s1 + $0x58] sm:$0xff]   ;;  %v530_v16 = vld [vmem:[%s688_s1 + $0x60] sm:$0xff]   ;;  %v534_v20 = vld [vmem:[%s688_s1 + $0x68] sm:$0xff]   ;;  %v104_v35 = vsub.s32 %v101_v29, %v103_v30 }
   0x6   :  { %492 = vmatprep.subr.bf16.mxu1 %v519_v5  ;;  %v527_v13 = vld [vmem:[%s688_s1 + $0xd8] sm:$0xff]   ;;  %v531_v17 = vld [vmem:[%s688_s1 + $0xe0] sm:$0xff]   ;;  %v535_v21 = vld [vmem:[%s688_s1 + $0xe8] sm:$0xff]  }
   0x7   :  { %v528_v14 = vld [vmem:[%s688_s1 + $0x18] sm:$0xff]   ;;  %v532_v18 = vld [vmem:[%s688_s1 + $0x20] sm:$0xff]   ;;  %v536_v25 = vld [vmem:[%s688_s1 + $0x28] sm:$0xff]  }
   0x8   :  { %471 = vmatpush3.bf16.msra.mxu0 %v520_v6  ;;  %v529_v15 = vld [vmem:[%s688_s1 + $0x98] sm:$0xff]   ;;  %v533_v19 = vld [vmem:[%s688_s1 + $0xa0] sm:$0xff]   ;;  %v537_v26 = vld [vmem:[%s688_s1 + $0xa8] sm:$0xff]  }
   0x9   :  { %493 = vmatpush3.bf16.msra.mxu1 %v521_v7  ;;  %472 = vmatprep.subr.bf16.mxu0 %v522_v8  ;;  %v538_v27 = vld [vmem:[%s688_s1 + $0x70] sm:$0xff]   ;;  %v542_v33 = vld [vmem:[%s688_s1 + $0x78] sm:$0xff]   ;;  %v433_v38 = vld.sshfl [vmem:[%s689_s0] sm:$0x33 pattern:$0x75316420] }
   0xa   :  { %494 = vmatprep.subr.bf16.mxu1 %v523_v9  ;;  %v539_v28 = vld [vmem:[%s688_s1 + $0xf0] sm:$0xff]   ;;  %v543_v34 = vld [vmem:[%s688_s1 + $0xf8] sm:$0xff]   ;;  %v98_v39 = vcombine.high %v433_v38, %v433_v38  ;;  %v105_v40 = vrot.slane %v433_v38, %v104_v35  ;;  %v24_v54 = vld [vmem:[#allocation2] sm:$0x3] }
   0xb   :  { %v540_v31 = vld [vmem:[%s688_s1 + $0x30] sm:$0xff]   ;;  %v544_v36 = vld [vmem:[%s688_s1 + $0x38] sm:$0xff]   ;;  %v466_v5 = vld [vmem:[%s690_s2] ss:$0 sm:$0xff] }
   0xc   :  { %473 = vmatpush3.bf16.msra.mxu0 %v524_v10  ;;  %v541_v32 = vld [vmem:[%s688_s1 + $0xb0] sm:$0xff]   ;;  %v545_v37 = vld [vmem:[%s688_s1 + $0xb8] sm:$0xff]   ;;  %v112_v41 = vrot.slane %v98_v39, %v104_v35  ;;  %v113_v42 = vcombine.high %v105_v40, %v105_v40  ;;  %v467_v7 = vld [vmem:[%s691_s3] ss:$0 sm:$0xff] }
   0xd   :  { %495 = vmatpush3.bf16.msra.mxu1 %v525_v11  ;;  %474 = vmatprep.subr.bf16.mxu0 %v526_v12 }
   0xe   :  { %496 = vmatprep.subr.bf16.mxu1 %v527_v13  ;;  %343 = vmatprep.mubr.bf16.mxu0 %v112_v41  ;;  %v114_v43 = vcombine.high %v112_v41, %v112_v41 }
  0x10   :  { %475 = vmatpush3.bf16.msra.mxu0 %v528_v14  ;;  %383 = vmatprep.mubr.bf16.mxu1 %v114_v43 }
  0x11   :  { %497 = vmatpush3.bf16.msra.mxu1 %v529_v15  ;;  %476 = vmatprep.subr.bf16.mxu0 %v530_v16 }
  0x12   :  { %498 = vmatprep.subr.bf16.mxu1 %v531_v17 }
  0x14   :  { %477 = vmatpush3.bf16.msra.mxu0 %v532_v18 }
  0x15   :  { %499 = vmatpush3.bf16.msra.mxu1 %v533_v19  ;;  %478 = vmatprep.subr.bf16.mxu0 %v534_v20 }
  0x16   :  { %500 = vmatprep.subr.bf16.mxu1 %v535_v21 }
  0x18   :  { %479 = vmatpush3.bf16.msra.mxu0 %v536_v25 }
  0x19   :  { %501 = vmatpush3.bf16.msra.mxu1 %v537_v26  ;;  %480 = vmatprep.subr.bf16.mxu0 %v538_v27 }
  0x1a   :  { %502 = vmatprep.subr.bf16.mxu1 %v539_v28 }
  0x1c   :  { %481 = vmatpush3.bf16.msra.mxu0 %v540_v31 }
  0x1d   :  { %503 = vmatpush3.bf16.msra.mxu1 %v541_v32  ;;  %482 = vmatprep.subr.bf16.mxu0 %v542_v33 }
  0x1e   :  { %504 = vmatprep.subr.bf16.mxu1 %v543_v34 }
  0x20   :  { %483 = vmatpush3.bf16.msra.mxu0 %v544_v36 }
  0x21   :  { %505 = vmatpush3.bf16.msra.mxu1 %v545_v37 }
  0x23   :  { %344 = vmatmul.mubr.bf16.vlgmr.msra.gmra.mrb[0].mxu0 %v105_v40 }
  0x24   :  { %384 = vmatmul.mubr.bf16.vlgmr.msra.gmra.mrb[0].mxu1 %v113_v42 }
  0xf6   :  { %v484_v45 = vpop.f32.mrb[0].mxu0 }
  0xf7   :  { %v485_v46 = vpop.f32.mrb[1].mxu0  ;;  %v506_v47 = vpop.f32.mrb[0].mxu1 }
  0xf8   :  { %v486_v48 = vadd.f32 %v485_v46, %v484_v45  ;;  %v487_v49 = vpop.f32.mrb[2].mxu0  ;;  %v507_v50 = vpop.f32.mrb[1].mxu1 }
  0xf9   :  { %v488_v51 = vpop.f32.mrb[3].mxu0  ;;  %v508_v52 = vadd.f32 %v507_v50, %v506_v47  ;;  %v509_v53 = vpop.f32.mrb[2].mxu1 }
  0xfa   :  { %v510_v55 = vpop.f32.mrb[3].mxu1 }
  0xfb   :  { %v386_v56 = vadd.f32 %v508_v52, %v486_v48 }
  0xfd   :  { %v391_v57 = vadd.f32 %v386_v56, %v24_v54 }
  0xff   :  { %393 = vst.msk [vmem:[#allocation2] sm:$0x3] %vm22_vm0, %v391_v57 }
 0x106   :  { %v397_v58 = vld [vmem:[#allocation2] sm:$0x3] }
 0x107   :  { %v398_v59 = vsel %vm22_vm0, %v397_v58, 0.0 }
 0x108   :  { %399 = vadd.xlane.f32.xlu0 %v398_v59 }
 0x195   :  { %v400_v60 = vpop.xlane.xlu0 %399 }
 0x196   :  { %v402_v61 = vmul.f32 0.0625, %v400_v60 }
 0x198   :  { %v403_v62 = vsub.f32 %v397_v58, %v402_v61 }
 0x19a   :  { %v404_v63 = vmul.f32 %v403_v62, %v403_v62 }
 0x19c   :  { %v405_v0 = vsel %vm22_vm0, %v404_v63, 0.0 }
 0x19d   :  { %406 = vadd.xlane.f32.xlu0 %v405_v0 }
 0x22a   :  { %v407_v1 = vpop.xlane.xlu0 %406 }
 0x22b   :  { %v408_v2 = vmul.f32 0.0625, %v407_v1 }
 0x22d   :  { %v409_v3 = vadd.f32 1e-05, %v408_v2 }
 0x22f   :  { %546 = vrsqrt.f32 %v409_v3 }
 0x239   :  { %v547_v4 = vpop.eup %546 }
 0x23a   :  { %v411_v6 = vmul.f32 %v547_v4, %v403_v62 }
 0x23c   :  { %v419_v8 = vmul.f32 %v466_v5, %v411_v6 }
 0x23e   :  { %v427_v9 = vadd.f32 %v467_v7, %v419_v8 }
 0x240   :  { %428 = vst.msk [vmem:[%s692_s4] sm:$0x3] %vm22_vm0, %v427_v9 }

</bundles_post_ra>
